<compile_context>
chip_gen: v7x
topology: tpu7x:2x2x1
jax: 0.10.0
libtpu: 0.0.40
codegen_flags: <defaults>
</compile_context>

<pallas_src>
import functools
import numpy as np
import jax
import jax.numpy as jnp
from jax.experimental import pallas as pl
from jax.experimental.pallas import tpu as pltpu


def _round_up(v, m):
    return ((v + m - 1) // m) * m


def _gelu_tanh(x):
    # tanh-approx GELU (maps to the EUP); tiny deviation from PyTorch erf-GELU.
    c = 0.7978845608028654  # sqrt(2/pi)
    return 0.5 * x * (1.0 + jnp.tanh(c * (x + 0.044715 * x * x * x)))


# ---------------------------------------------------------------------------
# Pallas kernels
# ---------------------------------------------------------------------------

@functools.lru_cache(maxsize=None)
def _matmul_fn(M, K, N, tm, tn, tk, out_dtype, activation):
    """Tiled GEMM: grid=(M/tm, N/tn, K/tk), fp32 accumulator, bias (+GELU) on store."""

    def kernel(x_ref, w_ref, b_ref, o_ref, acc_ref):
        @pl.when(pl.program_id(2) == 0)
        def _():
            acc_ref[...] = jnp.zeros_like(acc_ref)

        acc_ref[...] += jnp.dot(x_ref[...], w_ref[...],
                                preferred_element_type=jnp.float32)

        @pl.when(pl.program_id(2) == pl.num_programs(2) - 1)
        def _():
            r = acc_ref[...] + b_ref[...]
            if activation == "gelu_tanh":
                r = _gelu_tanh(r)
            o_ref[...] = r.astype(o_ref.dtype)

    return pl.pallas_call(
        kernel,
        out_shape=jax.ShapeDtypeStruct((M, N), out_dtype),
        grid_spec=pltpu.PrefetchScalarGridSpec(
            num_scalar_prefetch=0,
            grid=(M // tm, N // tn, K // tk),
            in_specs=[pl.BlockSpec((tm, tk), lambda i, j, k: (i, k)),
                      pl.BlockSpec((tk, tn), lambda i, j, k: (k, j)),
                      pl.BlockSpec((1, tn), lambda i, j, k: (0, j))],
            out_specs=pl.BlockSpec((tm, tn), lambda i, j, k: (i, j)),
            scratch_shapes=[pltpu.VMEM((tm, tn), jnp.float32)]),
        compiler_params=pltpu.CompilerParams(
            dimension_semantics=("parallel", "parallel", "arbitrary"),
            vmem_limit_bytes=32 * 1024 * 1024),
    )


def linear(x, w, b=None, activation=None, out_dtype=jnp.bfloat16):
    """x: (..., K) @ w: (K, N) + b. bf16 MXU inputs, fp32 accumulation, bf16 out."""
    *lead, K = x.shape
    N = w.shape[1]
    M = int(np.prod(lead)) if lead else 1
    x2 = x.reshape(M, K).astype(jnp.bfloat16)
    w2 = w.astype(jnp.bfloat16)
    b2 = jnp.zeros((N,), jnp.float32) if b is None else b.astype(jnp.float32)

    Mp = _round_up(M, 8)
    Kp = _round_up(K, 128)
    Np = _round_up(N, 128)
    # tm=512 halves M-steps / weight re-reads; footprint (~5 MiB double-buffered
    # with bf16 out + fp32 acc) fits all generations' scoped VMEM.
    tm = Mp if Mp <= 512 else 512
    tk = Kp if Kp <= 512 else 512
    tn = Np if Np <= 512 else 512
    Mp = _round_up(Mp, tm)
    Kp = _round_up(Kp, tk)
    Np = _round_up(Np, tn)

    if (Mp, Kp) != (M, K):
        x2 = jnp.pad(x2, ((0, Mp - M), (0, Kp - K)))
    if (Kp, Np) != (K, N):
        w2 = jnp.pad(w2, ((0, Kp - K), (0, Np - N)))
    if Np != N:
        b2 = jnp.pad(b2, (0, Np - N))

    out = _matmul_fn(Mp, Kp, Np, tm, tn, tk, out_dtype, activation)(
        x2, w2, b2.reshape(1, Np))
    return out[:M, :N].reshape(*lead, N)


@functools.lru_cache(maxsize=None)
def _layernorm_fn(M, C, tm, out_dtype):
    """Row-tiled LayerNorm: bf16 in/out, fp32 compute, channels kept whole."""

    def kernel(x_ref, g_ref, b_ref, o_ref):
        x = x_ref[...].astype(jnp.float32)
        mean = jnp.mean(x, axis=-1, keepdims=True)
        xc = x - mean
        var = jnp.mean(xc * xc, axis=-1, keepdims=True)
        inv = jax.lax.rsqrt(var + 1e-5)          # PyTorch LayerNorm eps default
        o_ref[...] = (xc * inv * g_ref[...] + b_ref[...]).astype(o_ref.dtype)

    return pl.pallas_call(
        kernel,
        out_shape=jax.ShapeDtypeStruct((M, C), out_dtype),
        grid=(M // tm,),
        in_specs=[pl.BlockSpec((tm, C), lambda i: (i, 0)),
                  pl.BlockSpec((1, C), lambda i: (0, 0)),
                  pl.BlockSpec((1, C), lambda i: (0, 0))],
        out_specs=pl.BlockSpec((tm, C), lambda i: (i, 0)),
        compiler_params=pltpu.CompilerParams(
            dimension_semantics=("parallel",),
            vmem_limit_bytes=32 * 1024 * 1024),
    )


def layer_norm(x, g, b, out_dtype=jnp.bfloat16):
    # TODO(synk): LN could be fused as a prologue of the consuming GEMM.
    *lead, C = x.shape
    M = int(np.prod(lead)) if lead else 1
    Mp = _round_up(M, 8)
    # Size row tile from a ~2 MiB fp32 working-set budget (v5e-safe).
    tm_cap = max(8, ((2 * 1024 * 1024) // (C * 4)) // 8 * 8)
    tm = min(Mp, tm_cap, 1024)
    Mp = _round_up(Mp, tm)
    x2 = x.reshape(M, C).astype(jnp.bfloat16)
    if Mp != M:
        x2 = jnp.pad(x2, ((0, Mp - M), (0, 0)))
    out = _layernorm_fn(Mp, C, tm, out_dtype)(
        x2, g.reshape(1, C).astype(jnp.float32), b.reshape(1, C).astype(jnp.float32))
    return out[:M].reshape(*lead, C)


@functools.lru_cache(maxsize=None)
def _attn_fn(B_, N, nH, Dh, nW, has_mask):
    """Window attention, grid=(window, head): one (N,N) bf16 bias block per step,
    mask resident per window, scale pre-folded into q, bf16 output."""

    def kernel(*refs):
        if has_mask:
            q_ref, k_ref, v_ref, bias_ref, mask_ref, o_ref = refs
        else:
            q_ref, k_ref, v_ref, bias_ref, o_ref = refs
            mask_ref = None
        q = q_ref[0, 0]                               # (N, Dh) bf16, pre-scaled
        k = k_ref[0, 0]
        v = v_ref[0, 0]
        s = jax.lax.dot_general(q, k, (((1,), (1,)), ((), ())),
                                preferred_element_type=jnp.float32)   # (N, N)
        s = s + bias_ref[0].astype(jnp.float32)
        if has_mask:
            s = s + mask_ref[0].astype(jnp.float32)
        s = s - jnp.max(s, axis=-1, keepdims=True)
        p = jnp.exp(s)
        p = p * pl.reciprocal(jnp.sum(p, axis=-1, keepdims=True), approx=True)
        o = jnp.dot(p.astype(jnp.bfloat16), v, preferred_element_type=jnp.float32)
        o_ref[0, 0] = o.astype(jnp.bfloat16)

    qkv_spec = pl.BlockSpec((1, 1, N, Dh), lambda i, h: (i, h, 0, 0))
    in_specs = [qkv_spec, qkv_spec, qkv_spec,
                pl.BlockSpec((1, N, N), lambda i, h: (h, 0, 0))]       # per-head bias
    if has_mask:
        in_specs.append(pl.BlockSpec((1, N, N), lambda i, h: (i % nW, 0, 0)))

    # TODO(synk): flash-style key tiling (online softmax) for production N=784.
    return pl.pallas_call(
        kernel,
        out_shape=jax.ShapeDtypeStruct((B_, nH, N, Dh), jnp.bfloat16),
        grid=(B_, nH),
        in_specs=in_specs,
        out_specs=pl.BlockSpec((1, 1, N, Dh), lambda i, h: (i, h, 0, 0)),
        compiler_params=pltpu.CompilerParams(
            dimension_semantics=("parallel", "arbitrary"),
            vmem_limit_bytes=32 * 1024 * 1024),
    )


# ---------------------------------------------------------------------------
# Video-Swin helpers (glue, matches the reference swin_transformer utilities)
# ---------------------------------------------------------------------------

def get_window_size(x_size, window_size, shift_size=None):
    use_w = list(window_size)
    use_s = list(shift_size) if shift_size is not None else None
    for i in range(len(x_size)):
        if x_size[i] <= window_size[i]:
            use_w[i] = x_size[i]
            if shift_size is not None:
                use_s[i] = 0
    if shift_size is None:
        return tuple(use_w)
    return tuple(use_w), tuple(use_s)


def window_partition(x, ws):
    B, D, H, W, C = x.shape
    x = x.reshape(B, D // ws[0], ws[0], H // ws[1], ws[1], W // ws[2], ws[2], C)
    x = jnp.transpose(x, (0, 1, 3, 5, 2, 4, 6, 7))
    return x.reshape(-1, ws[0] * ws[1] * ws[2], C)


def window_reverse(windows, ws, B, D, H, W):
    x = windows.reshape(B, D // ws[0], H // ws[1], W // ws[2], ws[0], ws[1], ws[2], -1)
    x = jnp.transpose(x, (0, 1, 4, 2, 5, 3, 6, 7))
    return x.reshape(B, D, H, W, -1)


@functools.lru_cache(maxsize=None)
def compute_mask(Dp, Hp, Wp, window_size, shift_size):
    img_mask = np.zeros((1, Dp, Hp, Wp, 1), np.float32)
    cnt = 0
    for d in (slice(-window_size[0]), slice(-window_size[0], -shift_size[0]),
              slice(-shift_size[0], None)):
        for h in (slice(-window_size[1]), slice(-window_size[1], -shift_size[1]),
                  slice(-shift_size[1], None)):
            for w in (slice(-window_size[2]), slice(-window_size[2], -shift_size[2]),
                      slice(-shift_size[2], None)):
                img_mask[:, d, h, w, :] = cnt
                cnt += 1
    mw = jnp.squeeze(window_partition(jnp.asarray(img_mask), window_size), axis=-1)
    attn_mask = mw[:, None, :] - mw[:, :, None]
    return jnp.where(attn_mask != 0, -100.0, 0.0).astype(jnp.float32)


@functools.lru_cache(maxsize=None)
def _relative_position_index(window_size):
    Wd, Wh, Ww = window_size
    coords = np.stack(np.meshgrid(np.arange(Wd), np.arange(Wh), np.arange(Ww),
                                  indexing="ij"))
    coords_flat = coords.reshape(3, -1)
    rel = coords_flat[:, :, None] - coords_flat[:, None, :]
    rel = rel.transpose(1, 2, 0).copy()
    rel[:, :, 0] += Wd - 1
    rel[:, :, 1] += Wh - 1
    rel[:, :, 2] += Ww - 1
    rel[:, :, 0] *= (2 * Wh - 1) * (2 * Ww - 1)
    rel[:, :, 1] *= (2 * Ww - 1)
    return rel.sum(-1).astype(np.int32)       # (Wd*Wh*Ww, Wd*Wh*Ww)


# ---------------------------------------------------------------------------
# Model pieces
# ---------------------------------------------------------------------------

def patch_embed_3d(x, p, patch_size, embed_dim):
    # x: (B, 3, T, H, W) bf16 -- Conv3d with kernel==stride == patch GEMM.
    B, Cin, T, H, W = x.shape
    pt, ph, pw = patch_size
    x = jnp.pad(x, ((0, 0), (0, 0),
                    (0, (pt - T % pt) % pt),
                    (0, (ph - H % ph) % ph),
                    (0, (pw - W % pw) % pw)))
    T2, H2, W2 = x.shape[2:]
    D, Hp, Wp = T2 // pt, H2 // ph, W2 // pw
    xp = x.reshape(B, Cin, D, pt, Hp, ph, Wp, pw)
    xp = jnp.transpose(xp, (0, 2, 4, 6, 1, 3, 5, 7)).reshape(
        B * D * Hp * Wp, Cin * pt * ph * pw)
    out = linear(xp, p["proj_w"], p["proj_b"])        # conv as GEMM (Pallas)
    out = layer_norm(out, p["norm_g"], p["norm_b"])   # PatchEmbed3D norm (Pallas)
    out = out.reshape(B, D, Hp, Wp, embed_dim)
    return jnp.transpose(out, (0, 4, 1, 2, 3))        # (B, C, D, H, W)


def window_attention(xw, p, num_heads, mask):
    B_, N, C = xw.shape
    Dh = C // num_heads
    # qkv (scale already folded into q weights/bias at prepare time)
    qkv = linear(xw, p["qkv_w"], p["qkv_b"])          # (B_, N, 3C) bf16
    qkv = qkv.reshape(B_, N, 3, num_heads, Dh)
    qkv = jnp.transpose(qkv, (2, 0, 3, 1, 4))         # (3, B_, nH, N, Dh) bf16
    q, k, v = qkv[0], qkv[1], qkv[2]

    bias = p["rel_bias"][:, :N, :N]                   # precomputed (nH, Nf, Nf) bf16

    if mask is not None:
        nW = mask.shape[0]
        out = _attn_fn(B_, N, num_heads, Dh, int(nW), True)(
            q, k, v, bias, mask.astype(jnp.bfloat16))
    else:
        out = _attn_fn(B_, N, num_heads, Dh, 1, False)(q, k, v, bias)

    out = jnp.transpose(out, (0, 2, 1, 3)).reshape(B_, N, C)   # (B_, N, C) bf16
    return linear(out, p["proj_w"], p["proj_b"])


def swin_block(x, p, num_heads, window_size, shift_size):
    # x: (B, D, H, W, C) bf16; dropout / drop_path are identity in eval.
    B, D, H, W, C = x.shape
    ws, ss = get_window_size((D, H, W), window_size, shift_size)

    shortcut = x
    h = layer_norm(x, p["norm1_g"], p["norm1_b"])
    pad_d = (ws[0] - D % ws[0]) % ws[0]
    pad_h = (ws[1] - H % ws[1]) % ws[1]
    pad_w = (ws[2] - W % ws[2]) % ws[2]
    h = jnp.pad(h, ((0, 0), (0, pad_d), (0, pad_h), (0, pad_w), (0, 0)))
    _, Dp, Hp, Wp, _ = h.shape

    if any(s > 0 for s in ss):
        h = jnp.roll(h, shift=(-ss[0], -ss[1], -ss[2]), axis=(1, 2, 3))
        mask = compute_mask(Dp, Hp, Wp, ws, ss)
    else:
        mask = None

    # TODO(synk): window partition/reverse could be expressed as BlockSpec tiling
    # to avoid two XLA relayout passes; kept as plain-JAX glue here.
    xw = window_partition(h, ws)
    aw = window_attention(xw, p, num_heads, mask)
    h = window_reverse(aw, ws, B, Dp, Hp, Wp)

    if any(s > 0 for s in ss):
        h = jnp.roll(h, shift=(ss[0], ss[1], ss[2]), axis=(1, 2, 3))
    h = h[:, :D, :H, :W, :]
    x = shortcut + h

    # MLP branch: GELU fused into the fc1 GEMM epilogue.
    h2 = layer_norm(x, p["norm2_g"], p["norm2_b"])
    h2 = linear(h2, p["fc1_w"], p["fc1_b"], activation="gelu_tanh")
    h2 = linear(h2, p["fc2_w"], p["fc2_b"])
    return x + h2


def patch_merging(x, p):
    B, D, H, W, C = x.shape
    x = jnp.pad(x, ((0, 0), (0, 0), (0, H % 2), (0, W % 2), (0, 0)))
    x0 = x[:, :, 0::2, 0::2, :]
    x1 = x[:, :, 1::2, 0::2, :]
    x2 = x[:, :, 0::2, 1::2, :]
    x3 = x[:, :, 1::2, 1::2, :]
    x = jnp.concatenate([x0, x1, x2, x3], axis=-1)
    x = layer_norm(x, p["norm_g"], p["norm_b"])
    return linear(x, p["red_w"], None)                 # Linear(4C, 2C, bias=False)


def basic_layer(x, lp, num_heads, window_size, has_downsample):
    # x: (B, C, D, H, W); returns (downsampled, before-downsample) in NCDHW.
    # TODO(synk): custom swin_transformer.BasicLayer source unavailable — the
    # second return value is assumed to be the pre-downsample feature (NCDHW).
    B, C, D, H, W = x.shape
    x = jnp.transpose(x, (0, 2, 3, 4, 1))              # b d h w c
    for i, bp in enumerate(lp["blocks"]):
        shift = (0, 0, 0) if i % 2 == 0 else tuple(w // 2 for w in window_size)
        x = swin_block(x, bp, num_heads, window_size, shift)
    x = x.reshape(B, D, H, W, -1)
    xbfd = jnp.transpose(x, (0, 4, 1, 2, 3))
    if has_downsample:
        x = patch_merging(x, lp["ds"])
    x = jnp.transpose(x, (0, 4, 1, 2, 3))
    return x, xbfd


def viedoswin_forward(x, params, *, patch_size, embed_dim, num_heads, window_size):
    x = x.astype(jnp.bfloat16)                         # bf16 activations throughout
    x = patch_embed_3d(x, params["patch_embed"], patch_size, embed_dim)
    feats = []
    for li in range(4):
        x, xbfd = basic_layer(x, params["layers"][li], num_heads[li], window_size,
                              has_downsample=(li < 3))
        feats.append(xbfd)
    x = jnp.transpose(x, (0, 2, 3, 4, 1))              # n c d h w -> n d h w c
    x = layer_norm(x, params["norm3_g"], params["norm3_b"], out_dtype=jnp.float32)
    x = jnp.transpose(x, (0, 4, 1, 2, 3))              # n d h w c -> n c d h w
    return [feats[1].astype(jnp.float32), feats[2].astype(jnp.float32), x]


# ---------------------------------------------------------------------------
# Parameter init (synthetic, PyTorch-shaped) + one-time preprocessing
# ---------------------------------------------------------------------------

def init_params(embed_dim, depths, num_heads, window_size, patch_size,
                mlp_ratio=4.0, seed=42):
    key = jax.random.PRNGKey(seed)

    def nxt():
        nonlocal key
        key, sub = jax.random.split(key)
        return sub

    def randn(shape, std=0.02):
        return std * jax.random.normal(nxt(), shape, dtype=jnp.float32)

    def ones(n):
        return jnp.ones((n,), jnp.float32)

    def zeros(n):
        return jnp.zeros((n,), jnp.float32)

    params = {
        "patch_embed": dict(
            proj_w=randn((embed_dim, 3, patch_size[0], patch_size[1], patch_size[2])),
            proj_b=zeros(embed_dim),
            norm_g=ones(embed_dim), norm_b=zeros(embed_dim)),
    }
    table_rows = ((2 * window_size[0] - 1) * (2 * window_size[1] - 1)
                  * (2 * window_size[2] - 1))
    layers = []
    for li in range(4):
        dim = embed_dim * (2 ** li)
        hidden = int(dim * mlp_ratio)
        blocks = []
        for _ in range(depths[li]):
            blocks.append(dict(
                norm1_g=ones(dim), norm1_b=zeros(dim),
                qkv_w=randn((dim, 3 * dim)), qkv_b=zeros(3 * dim),
                rel_table=randn((table_rows, num_heads[li])),
                proj_w=randn((dim, dim)), proj_b=zeros(dim),
                norm2_g=ones(dim), norm2_b=zeros(dim),
                fc1_w=randn((dim, hidden)), fc1_b=zeros(hidden),
                fc2_w=randn((hidden, dim)), fc2_b=zeros(dim)))
        layer = {"blocks": blocks}
        if li < 3:
            layer["ds"] = dict(norm_g=ones(4 * dim), norm_b=zeros(4 * dim),
                               red_w=randn((4 * dim, 2 * dim)))
        layers.append(layer)
    params["layers"] = layers
    params["norm3_g"] = ones(embed_dim * 8)
    params["norm3_b"] = zeros(embed_dim * 8)
    return params


def prepare_params(params, num_heads, window_size):
    """One-time prep (outside jit): fold attn scale into q weights, pre-gather the
    (nH, Nfull, Nfull) bf16 relative-position bias per block, cast weights to bf16."""
    Nf = int(np.prod(window_size))
    rel_idx = jnp.asarray(
        _relative_position_index(window_size).reshape(-1), jnp.int32)

    pe = params["patch_embed"]
    out = {
        "patch_embed": dict(
            proj_w=pe["proj_w"].reshape(pe["proj_w"].shape[0], -1).T.astype(jnp.bfloat16),
            proj_b=pe["proj_b"],
            norm_g=pe["norm_g"], norm_b=pe["norm_b"]),
        "norm3_g": params["norm3_g"], "norm3_b": params["norm3_b"],
        "layers": []}

    for li, lp in enumerate(params["layers"]):
        nh = num_heads[li]
        blocks = []
        for bp in lp["blocks"]:
            dim = bp["qkv_w"].shape[0]
            scale = (dim // nh) ** -0.5
            qkv_w = bp["qkv_w"].at[:, :dim].multiply(scale)
            qkv_b = bp["qkv_b"].at[:dim].multiply(scale)
            bias = jnp.take(bp["rel_table"], rel_idx, axis=0)          # (Nf*Nf, nh)
            bias = jnp.transpose(bias.reshape(Nf, Nf, nh), (2, 0, 1))  # (nh, Nf, Nf)
            blocks.append(dict(
                norm1_g=bp["norm1_g"], norm1_b=bp["norm1_b"],
                qkv_w=qkv_w.astype(jnp.bfloat16), qkv_b=qkv_b,
                rel_bias=bias.astype(jnp.bfloat16),
                proj_w=bp["proj_w"].astype(jnp.bfloat16), proj_b=bp["proj_b"],
                norm2_g=bp["norm2_g"], norm2_b=bp["norm2_b"],
                fc1_w=bp["fc1_w"].astype(jnp.bfloat16), fc1_b=bp["fc1_b"],
                fc2_w=bp["fc2_w"].astype(jnp.bfloat16), fc2_b=bp["fc2_b"]))
        layer = {"blocks": blocks}
        if "ds" in lp:
            layer["ds"] = dict(norm_g=lp["ds"]["norm_g"], norm_b=lp["ds"]["norm_b"],
                               red_w=lp["ds"]["red_w"].astype(jnp.bfloat16))
        out["layers"].append(layer)
    return out


# ---------------------------------------------------------------------------
# Main
# ---------------------------------------------------------------------------

if __name__ == "__main__":
    # Small synthetic configuration, structurally identical to viedoswinRGB
    # (same constructor layout, reduced embed_dim / depths / heads for speed).
    embed_dim = 32
    depths = [2, 2, 2, 2]
    num_heads = [2, 4, 8, 16]
    window_size = (16, 7, 7)
    patch_size = (2, 4, 4)

    raw_params = init_params(embed_dim, depths, num_heads, window_size, patch_size)
    params = prepare_params(raw_params, num_heads, window_size)

    key = jax.random.PRNGKey(0)
    x = jax.random.normal(key, (2, 3, 4, 16, 16), dtype=jnp.float32)  # NCDHW video

    fwd = jax.jit(functools.partial(
        viedoswin_forward, patch_size=patch_size, embed_dim=embed_dim,
        num_heads=tuple(num_heads), window_size=window_size))

    outs = fwd(x, params)
    outs = jax.block_until_ready(outs)

    # Sanity: [xbfd2, xbfd3, x] with channels 2C, 4C, 8C respectively.
    assert outs[0].shape == (2, embed_dim * 2, 2, 2, 2)
    assert outs[1].shape == (2, embed_dim * 4, 2, 1, 1)
    assert outs[2].shape == (2, embed_dim * 8, 2, 1, 1)
    assert all(bool(jnp.isfinite(o).all()) for o in outs)
    print("KERNEL_OK")
</pallas_src>

<mosaic_0001>
module attributes {stable_mosaic.version = 11 : i64} {
  func.func @kernel(%arg0: i32, %arg1: i32, %arg2: i32, %arg3: memref<64x128xbf16, #tpu.memory_space<vmem>>, %arg4: memref<128x128xbf16, #tpu.memory_space<vmem>>, %arg5: memref<1x128xf32, #tpu.memory_space<vmem>>, %arg6: memref<64x128xbf16, #tpu.memory_space<vmem>>, %arg7: memref<64x128xf32, #tpu.memory_space<vmem>>) attributes {dimension_semantics = [#tpu.dimension_semantics<parallel>, #tpu.dimension_semantics<parallel>, #tpu.dimension_semantics<arbitrary>], iteration_bounds = array<i64: 1, 1, 1>, scalar_prefetch = 0 : i64, scratch_operands = 1 : i64, tpu.core_type = #tpu.core_type<tc>, window_params = [{transform_indices = @transform_0, window_bounds = array<i64: 64, 128>}, {transform_indices = @transform_1, window_bounds = array<i64: 128, 128>}, {transform_indices = @transform_2, window_bounds = array<i64: 1, 128>}, {transform_indices = @transform_3, window_bounds = array<i64: 64, 128>}]} {
    %c0_i32 = arith.constant 0 : i32
    %0 = arith.cmpi eq, %arg2, %c0_i32 : i32
    %1 = arith.extui %0 : i1 to i32
    %c0_i32_0 = arith.constant 0 : i32
    %2 = arith.cmpi ne, %1, %c0_i32_0 : i32
    scf.if %2 {
      %cst_10 = arith.constant 0.000000e+00 : f32
      %12 = vector.broadcast %cst_10 : f32 to vector<64x128xf32>
      %c0_11 = arith.constant 0 : index
      %c0_12 = arith.constant 0 : index
      %13 = vector.load %arg7[%c0_11, %c0_12] : memref<64x128xf32, #tpu.memory_space<vmem>>, vector<64x128xf32>
      tpu.vector_store %arg7[%c0_11, %c0_12], %12 {strides = array<i32>} : memref<64x128xf32, #tpu.memory_space<vmem>>, vector<64x128xf32>,
    } else {
    }
    %c0 = arith.constant 0 : index
    %c0_1 = arith.constant 0 : index
    %3 = vector.load %arg7[%c0, %c0_1] : memref<64x128xf32, #tpu.memory_space<vmem>>, vector<64x128xf32>
    %c0_2 = arith.constant 0 : index
    %c0_3 = arith.constant 0 : index
    %4 = vector.load %arg3[%c0_2, %c0_3] : memref<64x128xbf16, #tpu.memory_space<vmem>>, vector<64x128xbf16>
    %c0_4 = arith.constant 0 : index
    %c0_5 = arith.constant 0 : index
    %5 = vector.load %arg4[%c0_4, %c0_5] : memref<128x128xbf16, #tpu.memory_space<vmem>>, vector<128x128xbf16>
    %cst = arith.constant dense<0.000000e+00> : vector<64x128xf32>
    %6 = tpu.matmul %4, %5, %cst {dimension_numbers = #tpu.dot_dimension_numbers<[1], [0], [0], [1], [0, 0, 1, 1], [], []>} : vector<64x128xbf16>, vector<128x128xbf16>, vector<64x128xf32> -> vector<64x128xf32>
    %7 = arith.addf %3, %6 : vector<64x128xf32>
    %c0_6 = arith.constant 0 : index
    %c0_7 = arith.constant 0 : index
    %8 = vector.load %arg7[%c0_6, %c0_7] : memref<64x128xf32, #tpu.memory_space<vmem>>, vector<64x128xf32>
    tpu.vector_store %arg7[%c0_6, %c0_7], %7 {strides = array<i32>} : memref<64x128xf32, #tpu.memory_space<vmem>>, vector<64x128xf32>,
    %c0_i32_8 = arith.constant 0 : i32
    %9 = arith.cmpi eq, %arg2, %c0_i32_8 : i32
    %10 = arith.extui %9 : i1 to i32
    %c0_i32_9 = arith.constant 0 : i32
    %11 = arith.cmpi ne, %10, %c0_i32_9 : i32
    scf.if %11 {
      %c0_10 = arith.constant 0 : index
      %c0_11 = arith.constant 0 : index
      %12 = vector.load %arg7[%c0_10, %c0_11] : memref<64x128xf32, #tpu.memory_space<vmem>>, vector<64x128xf32>
      %c0_12 = arith.constant 0 : index
      %c0_13 = arith.constant 0 : index
      %13 = vector.load %arg5[%c0_12, %c0_13] : memref<1x128xf32, #tpu.memory_space<vmem>>, vector<1x128xf32>
      %14 = vector.broadcast %13 : vector<1x128xf32> to vector<64x128xf32>
      %15 = arith.addf %12, %14 : vector<64x128xf32>
      %16 = arith.truncf %15 : vector<64x128xf32> to vector<64x128xbf16>
      %c0_14 = arith.constant 0 : index
      %c0_15 = arith.constant 0 : index
      %17 = vector.load %arg6[%c0_14, %c0_15] : memref<64x128xbf16, #tpu.memory_space<vmem>>, vector<64x128xbf16>
      tpu.vector_store %arg6[%c0_14, %c0_15], %16 {strides = array<i32>} : memref<64x128xbf16, #tpu.memory_space<vmem>>, vector<64x128xbf16>,
    } else {
    }
    return
  }
  func.func @transform_0(%arg0: i32, %arg1: i32, %arg2: i32) -> (i32, i32) {
    %c0_i32 = arith.constant 0 : i32
    return %arg0, %arg2 : i32, i32
  }
  func.func @transform_1(%arg0: i32, %arg1: i32, %arg2: i32) -> (i32, i32) {
    %c0_i32 = arith.constant 0 : i32
    return %arg2, %arg1 : i32, i32
  }
  func.func @transform_2(%arg0: i32, %arg1: i32, %arg2: i32) -> (i32, i32) {
    %c0_i32 = arith.constant 0 : i32
    %c0_i32_0 = arith.constant 0 : i32
    return %c0_i32, %arg1 : i32, i32
  }
  func.func @transform_3(%arg0: i32, %arg1: i32, %arg2: i32) -> (i32, i32) {
    %c0_i32 = arith.constant 0 : i32
    return %arg0, %arg1 : i32, i32
  }
}

module attributes {stable_mosaic.version = 11 : i64} {
  func.func @kernel(%arg0: i32, %arg1: memref<64x32xbf16, #tpu.memory_space<vmem>>, %arg2: memref<1x32xf32, #tpu.memory_space<vmem>>, %arg3: memref<1x32xf32, #tpu.memory_space<vmem>>, %arg4: memref<64x32xbf16, #tpu.memory_space<vmem>>) attributes {dimension_semantics = [#tpu.dimension_semantics<parallel>], iteration_bounds = array<i64: 1>, scalar_prefetch = 0 : i64, scratch_operands = 0 : i64, tpu.core_type = #tpu.core_type<tc>, window_params = [{transform_indices = @transform_0, window_bounds = array<i64: 64, 32>}, {pipeline_mode = #tpu.pipeline_mode<synchronous>, transform_indices = @transform_1, window_bounds = array<i64: 1, 32>}, {pipeline_mode = #tpu.pipeline_mode<synchronous>, transform_indices = @transform_2, window_bounds = array<i64: 1, 32>}, {transform_indices = @transform_3, window_bounds = array<i64: 64, 32>}]} {
    %c0 = arith.constant 0 : index
    %c0_0 = arith.constant 0 : index
    %0 = vector.load %arg1[%c0, %c0_0] : memref<64x32xbf16, #tpu.memory_space<vmem>>, vector<64x32xbf16>
    %1 = arith.extf %0 : vector<64x32xbf16> to vector<64x32xf32>
    %cst = arith.constant dense<0.000000e+00> : vector<64xf32>
    %2 = vector.multi_reduction <add>, %1, %cst [1] : vector<64x32xf32> to vector<64xf32>
    %3 = vector.shape_cast %2 : vector<64xf32> to vector<64x1xf32>
    %cst_1 = arith.constant 3.200000e+01 : f32
    %4 = vector.broadcast %cst_1 : f32 to vector<64x1xf32>
    %5 = arith.divf %3, %4 : vector<64x1xf32>
    %6 = vector.broadcast %5 : vector<64x1xf32> to vector<64x32xf32>
    %7 = arith.subf %1, %6 : vector<64x32xf32>
    %8 = arith.mulf %7, %7 : vector<64x32xf32>
    %cst_2 = arith.constant dense<0.000000e+00> : vector<64xf32>
    %9 = vector.multi_reduction <add>, %8, %cst_2 [1] : vector<64x32xf32> to vector<64xf32>
    %10 = vector.shape_cast %9 : vector<64xf32> to vector<64x1xf32>
    %cst_3 = arith.constant 3.200000e+01 : f32
    %11 = vector.broadcast %cst_3 : f32 to vector<64x1xf32>
    %12 = arith.divf %10, %11 : vector<64x1xf32>
    %cst_4 = arith.constant 9.99999974E-6 : f32
    %13 = vector.broadcast %cst_4 : f32 to vector<64x1xf32>
    %14 = arith.addf %12, %13 : vector<64x1xf32>
    %15 = math.rsqrt %14 : vector<64x1xf32>
    %16 = vector.broadcast %15 : vector<64x1xf32> to vector<64x32xf32>
    %17 = arith.mulf %7, %16 : vector<64x32xf32>
    %c0_5 = arith.constant 0 : index
    %c0_6 = arith.constant 0 : index
    %18 = vector.load %arg2[%c0_5, %c0_6] : memref<1x32xf32, #tpu.memory_space<vmem>>, vector<1x32xf32>
    %19 = vector.broadcast %18 : vector<1x32xf32> to vector<64x32xf32>
    %20 = arith.mulf %17, %19 : vector<64x32xf32>
    %c0_7 = arith.constant 0 : index
    %c0_8 = arith.constant 0 : index
    %21 = vector.load %arg3[%c0_7, %c0_8] : memref<1x32xf32, #tpu.memory_space<vmem>>, vector<1x32xf32>
    %22 = vector.broadcast %21 : vector<1x32xf32> to vector<64x32xf32>
    %23 = arith.addf %20, %22 : vector<64x32xf32>
    %24 = arith.truncf %23 : vector<64x32xf32> to vector<64x32xbf16>
    %c0_9 = arith.constant 0 : index
    %c0_10 = arith.constant 0 : index
    %25 = vector.load %arg4[%c0_9, %c0_10] : memref<64x32xbf16, #tpu.memory_space<vmem>>, vector<64x32xbf16>
    tpu.vector_store %arg4[%c0_9, %c0_10], %24 {strides = array<i32>} : memref<64x32xbf16, #tpu.memory_space<vmem>>, vector<64x32xbf16>,
    return
  }
  func.func @transform_0(%arg0: i32) -> (i32, i32) {
    %c0_i32 = arith.constant 0 : i32
    %c0_i32_0 = arith.constant 0 : i32
    return %arg0, %c0_i32 : i32, i32
  }
  func.func @transform_1(%arg0: i32) -> (i32, i32) {
    %c0_i32 = arith.constant 0 : i32
    %c0_i32_0 = arith.constant 0 : i32
    %c0_i32_1 = arith.constant 0 : i32
    return %c0_i32, %c0_i32_0 : i32, i32
  }
  func.func @transform_2(%arg0: i32) -> (i32, i32) {
    %c0_i32 = arith.constant 0 : i32
    %c0_i32_0 = arith.constant 0 : i32
    %c0_i32_1 = arith.constant 0 : i32
    return %c0_i32, %c0_i32_0 : i32, i32
  }
  func.func @transform_3(%arg0: i32) -> (i32, i32) {
    %c0_i32 = arith.constant 0 : i32
    %c0_i32_0 = arith.constant 0 : i32
    return %arg0, %c0_i32 : i32, i32
  }
}

module attributes {stable_mosaic.version = 11 : i64} {
  func.func @kernel(%arg0: i32, %arg1: i32, %arg2: memref<1x1x32x16xbf16, #tpu.memory_space<vmem>>, %arg3: memref<1x1x32x16xbf16, #tpu.memory_space<vmem>>, %arg4: memref<1x1x32x16xbf16, #tpu.memory_space<vmem>>, %arg5: memref<1x32x32xbf16, #tpu.memory_space<vmem>>, %arg6: memref<1x1x32x16xbf16, #tpu.memory_space<vmem>>) attributes {dimension_semantics = [#tpu.dimension_semantics<parallel>, #tpu.dimension_semantics<arbitrary>], iteration_bounds = array<i64: 2, 2>, scalar_prefetch = 0 : i64, scratch_operands = 0 : i64, tpu.core_type = #tpu.core_type<tc>, window_params = [{transform_indices = @transform_0, window_bounds = array<i64: 1, 1, 32, 16>}, {transform_indices = @transform_1, window_bounds = array<i64: 1, 1, 32, 16>}, {transform_indices = @transform_2, window_bounds = array<i64: 1, 1, 32, 16>}, {transform_indices = @transform_3, window_bounds = array<i64: 1, 32, 32>}, {transform_indices = @transform_4, window_bounds = array<i64: 1, 1, 32, 16>}]} {
    %c0 = arith.constant 0 : index
    %c0_0 = arith.constant 0 : index
    %c0_1 = arith.constant 0 : index
    %c0_2 = arith.constant 0 : index
    %0 = vector.load %arg2[%c0, %c0_0, %c0_1, %c0_2] : memref<1x1x32x16xbf16, #tpu.memory_space<vmem>>, vector<1x1x32x16xbf16>
    %1 = vector.shape_cast %0 : vector<1x1x32x16xbf16> to vector<32x16xbf16>
    %c0_3 = arith.constant 0 : index
    %c0_4 = arith.constant 0 : index
    %c0_5 = arith.constant 0 : index
    %c0_6 = arith.constant 0 : index
    %2 = vector.load %arg3[%c0_3, %c0_4, %c0_5, %c0_6] : memref<1x1x32x16xbf16, #tpu.memory_space<vmem>>, vector<1x1x32x16xbf16>
    %3 = vector.shape_cast %2 : vector<1x1x32x16xbf16> to vector<32x16xbf16>
    %c0_7 = arith.constant 0 : index
    %c0_8 = arith.constant 0 : index
    %c0_9 = arith.constant 0 : index
    %c0_10 = arith.constant 0 : index
    %4 = vector.load %arg4[%c0_7, %c0_8, %c0_9, %c0_10] : memref<1x1x32x16xbf16, #tpu.memory_space<vmem>>, vector<1x1x32x16xbf16>
    %5 = vector.shape_cast %4 : vector<1x1x32x16xbf16> to vector<32x16xbf16>
    %cst = arith.constant dense<0.000000e+00> : vector<32x32xf32>
    %6 = tpu.matmul %1, %3, %cst {dimension_numbers = #tpu.dot_dimension_numbers<[1], [1], [0], [0], [0, 0, 1, 0], [], []>} : vector<32x16xbf16>, vector<32x16xbf16>, vector<32x32xf32> -> vector<32x32xf32>
    %c0_11 = arith.constant 0 : index
    %c0_12 = arith.constant 0 : index
    %c0_13 = arith.constant 0 : index
    %7 = vector.load %arg5[%c0_11, %c0_12, %c0_13] : memref<1x32x32xbf16, #tpu.memory_space<vmem>>, vector<1x32x32xbf16>
    %8 = vector.shape_cast %7 : vector<1x32x32xbf16> to vector<32x32xbf16>
    %9 = arith.extf %8 : vector<32x32xbf16> to vector<32x32xf32>
    %10 = arith.addf %6, %9 : vector<32x32xf32>
    %cst_14 = arith.constant dense<0xFF800000> : vector<32xf32>
    %11 = vector.multi_reduction <maximumf>, %10, %cst_14 [1] : vector<32x32xf32> to vector<32xf32>
    %12 = vector.shape_cast %11 : vector<32xf32> to vector<32x1xf32>
    %13 = vector.broadcast %12 : vector<32x1xf32> to vector<32x32xf32>
    %14 = arith.subf %10, %13 : vector<32x32xf32>
    %15 = math.exp %14 : vector<32x32xf32>
    %cst_15 = arith.constant dense<0.000000e+00> : vector<32xf32>
    %16 = vector.multi_reduction <add>, %15, %cst_15 [1] : vector<32x32xf32> to vector<32xf32>
    %17 = vector.shape_cast %16 : vector<32xf32> to vector<32x1xf32>
    %18 = tpu.reciprocal %17 {approx = true} : vector<32x1xf32> -> vector<32x1xf32>
    %19 = vector.broadcast %18 : vector<32x1xf32> to vector<32x32xf32>
    %20 = arith.mulf %15, %19 : vector<32x32xf32>
    %21 = arith.truncf %20 : vector<32x32xf32> to vector<32x32xbf16>
    %cst_16 = arith.constant dense<0.000000e+00> : vector<32x16xf32>
    %22 = tpu.matmul %21, %5, %cst_16 {dimension_numbers = #tpu.dot_dimension_numbers<[1], [0], [0], [1], [0, 0, 1, 1], [], []>} : vector<32x32xbf16>, vector<32x16xbf16>, vector<32x16xf32> -> vector<32x16xf32>
    %23 = arith.truncf %22 : vector<32x16xf32> to vector<32x16xbf16>
    %c0_17 = arith.constant 0 : index
    %c0_18 = arith.constant 0 : index
    %c0_19 = arith.constant 0 : index
    %c0_20 = arith.constant 0 : index
    %24 = vector.load %arg6[%c0_17, %c0_18, %c0_19, %c0_20] : memref<1x1x32x16xbf16, #tpu.memory_space<vmem>>, vector<1x1x32x16xbf16>
    %25 = vector.shape_cast %24 : vector<1x1x32x16xbf16> to vector<32x16xbf16>
    %26 = vector.shape_cast %23 : vector<32x16xbf16> to vector<1x1x32x16xbf16>
    tpu.vector_store %arg6[%c0_17, %c0_18, %c0_19, %c0_20], %26 {strides = array<i32>} : memref<1x1x32x16xbf16, #tpu.memory_space<vmem>>, vector<1x1x32x16xbf16>,
    return
  }
  func.func @transform_0(%arg0: i32, %arg1: i32) -> (i32, i32, i32, i32) {
    %c0_i32 = arith.constant 0 : i32
    %c0_i32_0 = arith.constant 0 : i32
    %c0_i32_1 = arith.constant 0 : i32
    return %arg0, %arg1, %c0_i32, %c0_i32_0 : i32, i32, i32, i32
  }
  func.func @transform_1(%arg0: i32, %arg1: i32) -> (i32, i32, i32, i32) {
    %c0_i32 = arith.constant 0 : i32
    %c0_i32_0 = arith.constant 0 : i32
    %c0_i32_1 = arith.constant 0 : i32
    return %arg0, %arg1, %c0_i32, %c0_i32_0 : i32, i32, i32, i32
  }
  func.func @transform_2(%arg0: i32, %arg1: i32) -> (i32, i32, i32, i32) {
    %c0_i32 = arith.constant 0 : i32
    %c0_i32_0 = arith.constant 0 : i32
    %c0_i32_1 = arith.constant 0 : i32
    return %arg0, %arg1, %c0_i32, %c0_i32_0 : i32, i32, i32, i32
  }
  func.func @transform_3(%arg0: i32, %arg1: i32) -> (i32, i32, i32) {
    %c0_i32 = arith.constant 0 : i32
    %c0_i32_0 = arith.constant 0 : i32
    %c0_i32_1 = arith.constant 0 : i32
    return %arg1, %c0_i32, %c0_i32_0 : i32, i32, i32
  }
  func.func @transform_4(%arg0: i32, %arg1: i32) -> (i32, i32, i32, i32) {
    %c0_i32 = arith.constant 0 : i32
    %c0_i32_0 = arith.constant 0 : i32
    %c0_i32_1 = arith.constant 0 : i32
    return %arg0, %arg1, %c0_i32, %c0_i32_0 : i32, i32, i32, i32
  }
}

module attributes {stable_mosaic.version = 11 : i64} {
  func.func @kernel(%arg0: i32, %arg1: i32, %arg2: i32, %arg3: memref<64x128xbf16, #tpu.memory_space<vmem>>, %arg4: memref<128x128xbf16, #tpu.memory_space<vmem>>, %arg5: memref<1x128xf32, #tpu.memory_space<vmem>>, %arg6: memref<64x128xbf16, #tpu.memory_space<vmem>>, %arg7: memref<64x128xf32, #tpu.memory_space<vmem>>) attributes {dimension_semantics = [#tpu.dimension_semantics<parallel>, #tpu.dimension_semantics<parallel>, #tpu.dimension_semantics<arbitrary>], iteration_bounds = array<i64: 1, 1, 1>, scalar_prefetch = 0 : i64, scratch_operands = 1 : i64, tpu.core_type = #tpu.core_type<tc>, window_params = [{transform_indices = @transform_0, window_bounds = array<i64: 64, 128>}, {transform_indices = @transform_1, window_bounds = array<i64: 128, 128>}, {transform_indices = @transform_2, window_bounds = array<i64: 1, 128>}, {transform_indices = @transform_3, window_bounds = array<i64: 64, 128>}]} {
    %c0_i32 = arith.constant 0 : i32
    %0 = arith.cmpi eq, %arg2, %c0_i32 : i32
    %1 = arith.extui %0 : i1 to i32
    %c0_i32_0 = arith.constant 0 : i32
    %2 = arith.cmpi ne, %1, %c0_i32_0 : i32
    scf.if %2 {
      %cst_10 = arith.constant 0.000000e+00 : f32
      %12 = vector.broadcast %cst_10 : f32 to vector<64x128xf32>
      %c0_11 = arith.constant 0 : index
      %c0_12 = arith.constant 0 : index
      %13 = vector.load %arg7[%c0_11, %c0_12] : memref<64x128xf32, #tpu.memory_space<vmem>>, vector<64x128xf32>
      tpu.vector_store %arg7[%c0_11, %c0_12], %12 {strides = array<i32>} : memref<64x128xf32, #tpu.memory_space<vmem>>, vector<64x128xf32>,
    } else {
    }
    %c0 = arith.constant 0 : index
    %c0_1 = arith.constant 0 : index
    %3 = vector.load %arg7[%c0, %c0_1] : memref<64x128xf32, #tpu.memory_space<vmem>>, vector<64x128xf32>
    %c0_2 = arith.constant 0 : index
    %c0_3 = arith.constant 0 : index
    %4 = vector.load %arg3[%c0_2, %c0_3] : memref<64x128xbf16, #tpu.memory_space<vmem>>, vector<64x128xbf16>
    %c0_4 = arith.constant 0 : index
    %c0_5 = arith.constant 0 : index
    %5 = vector.load %arg4[%c0_4, %c0_5] : memref<128x128xbf16, #tpu.memory_space<vmem>>, vector<128x128xbf16>
    %cst = arith.constant dense<0.000000e+00> : vector<64x128xf32>
    %6 = tpu.matmul %4, %5, %cst {dimension_numbers = #tpu.dot_dimension_numbers<[1], [0], [0], [1], [0, 0, 1, 1], [], []>} : vector<64x128xbf16>, vector<128x128xbf16>, vector<64x128xf32> -> vector<64x128xf32>
    %7 = arith.addf %3, %6 : vector<64x128xf32>
    %c0_6 = arith.constant 0 : index
    %c0_7 = arith.constant 0 : index
    %8 = vector.load %arg7[%c0_6, %c0_7] : memref<64x128xf32, #tpu.memory_space<vmem>>, vector<64x128xf32>
    tpu.vector_store %arg7[%c0_6, %c0_7], %7 {strides = array<i32>} : memref<64x128xf32, #tpu.memory_space<vmem>>, vector<64x128xf32>,
    %c0_i32_8 = arith.constant 0 : i32
    %9 = arith.cmpi eq, %arg2, %c0_i32_8 : i32
    %10 = arith.extui %9 : i1 to i32
    %c0_i32_9 = arith.constant 0 : i32
    %11 = arith.cmpi ne, %10, %c0_i32_9 : i32
    scf.if %11 {
      %c0_10 = arith.constant 0 : index
      %c0_11 = arith.constant 0 : index
      %12 = vector.load %arg7[%c0_10, %c0_11] : memref<64x128xf32, #tpu.memory_space<vmem>>, vector<64x128xf32>
      %c0_12 = arith.constant 0 : index
      %c0_13 = arith.constant 0 : index
      %13 = vector.load %arg5[%c0_12, %c0_13] : memref<1x128xf32, #tpu.memory_space<vmem>>, vector<1x128xf32>
      %14 = vector.broadcast %13 : vector<1x128xf32> to vector<64x128xf32>
      %15 = arith.addf %12, %14 : vector<64x128xf32>
      %cst_14 = arith.constant 5.000000e-01 : f32
      %16 = vector.broadcast %cst_14 : f32 to vector<64x128xf32>
      %17 = arith.mulf %16, %15 : vector<64x128xf32>
      %cst_15 = arith.constant 4.471500e-02 : f32
      %18 = vector.broadcast %cst_15 : f32 to vector<64x128xf32>
      %19 = arith.mulf %18, %15 : vector<64x128xf32>
      %20 = arith.mulf %19, %15 : vector<64x128xf32>
      %21 = arith.mulf %20, %15 : vector<64x128xf32>
      %22 = arith.addf %15, %21 : vector<64x128xf32>
      %cst_16 = arith.constant 0.797884583 : f32
      %23 = vector.broadcast %cst_16 : f32 to vector<64x128xf32>
      %24 = arith.mulf %23, %22 : vector<64x128xf32>
      %25 = math.tanh %24 : vector<64x128xf32>
      %cst_17 = arith.constant 1.000000e+00 : f32
      %26 = vector.broadcast %cst_17 : f32 to vector<64x128xf32>
      %27 = arith.addf %26, %25 : vector<64x128xf32>
      %28 = arith.mulf %17, %27 : vector<64x128xf32>
      %29 = arith.truncf %28 : vector<64x128xf32> to vector<64x128xbf16>
      %c0_18 = arith.constant 0 : index
      %c0_19 = arith.constant 0 : index
      %30 = vector.load %arg6[%c0_18, %c0_19] : memref<64x128xbf16, #tpu.memory_space<vmem>>, vector<64x128xbf16>
      tpu.vector_store %arg6[%c0_18, %c0_19], %29 {strides = array<i32>} : memref<64x128xbf16, #tpu.memory_space<vmem>>, vector<64x128xbf16>,
    } else {
    }
    return
  }
  func.func @transform_0(%arg0: i32, %arg1: i32, %arg2: i32) -> (i32, i32) {
    %c0_i32 = arith.constant 0 : i32
    return %arg0, %arg2 : i32, i32
  }
  func.func @transform_1(%arg0: i32, %arg1: i32, %arg2: i32) -> (i32, i32) {
    %c0_i32 = arith.constant 0 : i32
    return %arg2, %arg1 : i32, i32
  }
  func.func @transform_2(%arg0: i32, %arg1: i32, %arg2: i32) -> (i32, i32) {
    %c0_i32 = arith.constant 0 : i32
    %c0_i32_0 = arith.constant 0 : i32
    return %c0_i32, %arg1 : i32, i32
  }
  func.func @transform_3(%arg0: i32, %arg1: i32, %arg2: i32) -> (i32, i32) {
    %c0_i32 = arith.constant 0 : i32
    return %arg0, %arg1 : i32, i32
  }
}

module attributes {stable_mosaic.version = 11 : i64} {
  func.func @kernel(%arg0: i32, %arg1: memref<16x128xbf16, #tpu.memory_space<vmem>>, %arg2: memref<1x128xf32, #tpu.memory_space<vmem>>, %arg3: memref<1x128xf32, #tpu.memory_space<vmem>>, %arg4: memref<16x128xbf16, #tpu.memory_space<vmem>>) attributes {dimension_semantics = [#tpu.dimension_semantics<parallel>], iteration_bounds = array<i64: 1>, scalar_prefetch = 0 : i64, scratch_operands = 0 : i64, tpu.core_type = #tpu.core_type<tc>, window_params = [{transform_indices = @transform_0, window_bounds = array<i64: 16, 128>}, {pipeline_mode = #tpu.pipeline_mode<synchronous>, transform_indices = @transform_1, window_bounds = array<i64: 1, 128>}, {pipeline_mode = #tpu.pipeline_mode<synchronous>, transform_indices = @transform_2, window_bounds = array<i64: 1, 128>}, {transform_indices = @transform_3, window_bounds = array<i64: 16, 128>}]} {
    %c0 = arith.constant 0 : index
    %c0_0 = arith.constant 0 : index
    %0 = vector.load %arg1[%c0, %c0_0] : memref<16x128xbf16, #tpu.memory_space<vmem>>, vector<16x128xbf16>
    %1 = arith.extf %0 : vector<16x128xbf16> to vector<16x128xf32>
    %cst = arith.constant dense<0.000000e+00> : vector<16xf32>
    %2 = vector.multi_reduction <add>, %1, %cst [1] : vector<16x128xf32> to vector<16xf32>
    %3 = vector.shape_cast %2 : vector<16xf32> to vector<16x1xf32>
    %cst_1 = arith.constant 1.280000e+02 : f32
    %4 = vector.broadcast %cst_1 : f32 to vector<16x1xf32>
    %5 = arith.divf %3, %4 : vector<16x1xf32>
    %6 = vector.broadcast %5 : vector<16x1xf32> to vector<16x128xf32>
    %7 = arith.subf %1, %6 : vector<16x128xf32>
    %8 = arith.mulf %7, %7 : vector<16x128xf32>
    %cst_2 = arith.constant dense<0.000000e+00> : vector<16xf32>
    %9 = vector.multi_reduction <add>, %8, %cst_2 [1] : vector<16x128xf32> to vector<16xf32>
    %10 = vector.shape_cast %9 : vector<16xf32> to vector<16x1xf32>
    %cst_3 = arith.constant 1.280000e+02 : f32
    %11 = vector.broadcast %cst_3 : f32 to vector<16x1xf32>
    %12 = arith.divf %10, %11 : vector<16x1xf32>
    %cst_4 = arith.constant 9.99999974E-6 : f32
    %13 = vector.broadcast %cst_4 : f32 to vector<16x1xf32>
    %14 = arith.addf %12, %13 : vector<16x1xf32>
    %15 = math.rsqrt %14 : vector<16x1xf32>
    %16 = vector.broadcast %15 : vector<16x1xf32> to vector<16x128xf32>
    %17 = arith.mulf %7, %16 : vector<16x128xf32>
    %c0_5 = arith.constant 0 : index
    %c0_6 = arith.constant 0 : index
    %18 = vector.load %arg2[%c0_5, %c0_6] : memref<1x128xf32, #tpu.memory_space<vmem>>, vector<1x128xf32>
    %19 = vector.broadcast %18 : vector<1x128xf32> to vector<16x128xf32>
    %20 = arith.mulf %17, %19 : vector<16x128xf32>
    %c0_7 = arith.constant 0 : index
    %c0_8 = arith.constant 0 : index
    %21 = vector.load %arg3[%c0_7, %c0_8] : memref<1x128xf32, #tpu.memory_space<vmem>>, vector<1x128xf32>
    %22 = vector.broadcast %21 : vector<1x128xf32> to vector<16x128xf32>
    %23 = arith.addf %20, %22 : vector<16x128xf32>
    %24 = arith.truncf %23 : vector<16x128xf32> to vector<16x128xbf16>
    %c0_9 = arith.constant 0 : index
    %c0_10 = arith.constant 0 : index
    %25 = vector.load %arg4[%c0_9, %c0_10] : memref<16x128xbf16, #tpu.memory_space<vmem>>, vector<16x128xbf16>
    tpu.vector_store %arg4[%c0_9, %c0_10], %24 {strides = array<i32>} : memref<16x128xbf16, #tpu.memory_space<vmem>>, vector<16x128xbf16>,
    return
  }
  func.func @transform_0(%arg0: i32) -> (i32, i32) {
    %c0_i32 = arith.constant 0 : i32
    %c0_i32_0 = arith.constant 0 : i32
    return %arg0, %c0_i32 : i32, i32
  }
  func.func @transform_1(%arg0: i32) -> (i32, i32) {
    %c0_i32 = arith.constant 0 : i32
    %c0_i32_0 = arith.constant 0 : i32
    %c0_i32_1 = arith.constant 0 : i32
    return %c0_i32, %c0_i32_0 : i32, i32
  }
  func.func @transform_2(%arg0: i32) -> (i32, i32) {
    %c0_i32 = arith.constant 0 : i32
    %c0_i32_0 = arith.constant 0 : i32
    %c0_i32_1 = arith.constant 0 : i32
    return %c0_i32, %c0_i32_0 : i32, i32
  }
  func.func @transform_3(%arg0: i32) -> (i32, i32) {
    %c0_i32 = arith.constant 0 : i32
    %c0_i32_0 = arith.constant 0 : i32
    return %arg0, %c0_i32 : i32, i32
  }
}

module attributes {stable_mosaic.version = 11 : i64} {
  func.func @kernel(%arg0: i32, %arg1: i32, %arg2: i32, %arg3: memref<16x128xbf16, #tpu.memory_space<vmem>>, %arg4: memref<128x128xbf16, #tpu.memory_space<vmem>>, %arg5: memref<1x128xf32, #tpu.memory_space<vmem>>, %arg6: memref<16x128xbf16, #tpu.memory_space<vmem>>, %arg7: memref<16x128xf32, #tpu.memory_space<vmem>>) attributes {dimension_semantics = [#tpu.dimension_semantics<parallel>, #tpu.dimension_semantics<parallel>, #tpu.dimension_semantics<arbitrary>], iteration_bounds = array<i64: 1, 1, 1>, scalar_prefetch = 0 : i64, scratch_operands = 1 : i64, tpu.core_type = #tpu.core_type<tc>, window_params = [{transform_indices = @transform_0, window_bounds = array<i64: 16, 128>}, {transform_indices = @transform_1, window_bounds = array<i64: 128, 128>}, {transform_indices = @transform_2, window_bounds = array<i64: 1, 128>}, {transform_indices = @transform_3, window_bounds = array<i64: 16, 128>}]} {
    %c0_i32 = arith.constant 0 : i32
    %0 = arith.cmpi eq, %arg2, %c0_i32 : i32
    %1 = arith.extui %0 : i1 to i32
    %c0_i32_0 = arith.constant 0 : i32
    %2 = arith.cmpi ne, %1, %c0_i32_0 : i32
    scf.if %2 {
      %cst_10 = arith.constant 0.000000e+00 : f32
      %12 = vector.broadcast %cst_10 : f32 to vector<16x128xf32>
      %c0_11 = arith.constant 0 : index
      %c0_12 = arith.constant 0 : index
      %13 = vector.load %arg7[%c0_11, %c0_12] : memref<16x128xf32, #tpu.memory_space<vmem>>, vector<16x128xf32>
      tpu.vector_store %arg7[%c0_11, %c0_12], %12 {strides = array<i32>} : memref<16x128xf32, #tpu.memory_space<vmem>>, vector<16x128xf32>,
    } else {
    }
    %c0 = arith.constant 0 : index
    %c0_1 = arith.constant 0 : index
    %3 = vector.load %arg7[%c0, %c0_1] : memref<16x128xf32, #tpu.memory_space<vmem>>, vector<16x128xf32>
    %c0_2 = arith.constant 0 : index
    %c0_3 = arith.constant 0 : index
    %4 = vector.load %arg3[%c0_2, %c0_3] : memref<16x128xbf16, #tpu.memory_space<vmem>>, vector<16x128xbf16>
    %c0_4 = arith.constant 0 : index
    %c0_5 = arith.constant 0 : index
    %5 = vector.load %arg4[%c0_4, %c0_5] : memref<128x128xbf16, #tpu.memory_space<vmem>>, vector<128x128xbf16>
    %cst = arith.constant dense<0.000000e+00> : vector<16x128xf32>
    %6 = tpu.matmul %4, %5, %cst {dimension_numbers = #tpu.dot_dimension_numbers<[1], [0], [0], [1], [0, 0, 1, 1], [], []>} : vector<16x128xbf16>, vector<128x128xbf16>, vector<16x128xf32> -> vector<16x128xf32>
    %7 = arith.addf %3, %6 : vector<16x128xf32>
    %c0_6 = arith.constant 0 : index
    %c0_7 = arith.constant 0 : index
    %8 = vector.load %arg7[%c0_6, %c0_7] : memref<16x128xf32, #tpu.memory_space<vmem>>, vector<16x128xf32>
    tpu.vector_store %arg7[%c0_6, %c0_7], %7 {strides = array<i32>} : memref<16x128xf32, #tpu.memory_space<vmem>>, vector<16x128xf32>,
    %c0_i32_8 = arith.constant 0 : i32
    %9 = arith.cmpi eq, %arg2, %c0_i32_8 : i32
    %10 = arith.extui %9 : i1 to i32
    %c0_i32_9 = arith.constant 0 : i32
    %11 = arith.cmpi ne, %10, %c0_i32_9 : i32
    scf.if %11 {
      %c0_10 = arith.constant 0 : index
      %c0_11 = arith.constant 0 : index
      %12 = vector.load %arg7[%c0_10, %c0_11] : memref<16x128xf32, #tpu.memory_space<vmem>>, vector<16x128xf32>
      %c0_12 = arith.constant 0 : index
      %c0_13 = arith.constant 0 : index
      %13 = vector.load %arg5[%c0_12, %c0_13] : memref<1x128xf32, #tpu.memory_space<vmem>>, vector<1x128xf32>
      %14 = vector.broadcast %13 : vector<1x128xf32> to vector<16x128xf32>
      %15 = arith.addf %12, %14 : vector<16x128xf32>
      %16 = arith.truncf %15 : vector<16x128xf32> to vector<16x128xbf16>
      %c0_14 = arith.constant 0 : index
      %c0_15 = arith.constant 0 : index
      %17 = vector.load %arg6[%c0_14, %c0_15] : memref<16x128xbf16, #tpu.memory_space<vmem>>, vector<16x128xbf16>
      tpu.vector_store %arg6[%c0_14, %c0_15], %16 {strides = array<i32>} : memref<16x128xbf16, #tpu.memory_space<vmem>>, vector<16x128xbf16>,
    } else {
    }
    return
  }
  func.func @transform_0(%arg0: i32, %arg1: i32, %arg2: i32) -> (i32, i32) {
    %c0_i32 = arith.constant 0 : i32
    return %arg0, %arg2 : i32, i32
  }
  func.func @transform_1(%arg0: i32, %arg1: i32, %arg2: i32) -> (i32, i32) {
    %c0_i32 = arith.constant 0 : i32
    return %arg2, %arg1 : i32, i32
  }
  func.func @transform_2(%arg0: i32, %arg1: i32, %arg2: i32) -> (i32, i32) {
    %c0_i32 = arith.constant 0 : i32
    %c0_i32_0 = arith.constant 0 : i32
    return %c0_i32, %arg1 : i32, i32
  }
  func.func @transform_3(%arg0: i32, %arg1: i32, %arg2: i32) -> (i32, i32) {
    %c0_i32 = arith.constant 0 : i32
    return %arg0, %arg1 : i32, i32
  }
}

module attributes {stable_mosaic.version = 11 : i64} {
  func.func @kernel(%arg0: i32, %arg1: i32, %arg2: i32, %arg3: memref<16x128xbf16, #tpu.memory_space<vmem>>, %arg4: memref<128x256xbf16, #tpu.memory_space<vmem>>, %arg5: memref<1x256xf32, #tpu.memory_space<vmem>>, %arg6: memref<16x256xbf16, #tpu.memory_space<vmem>>, %arg7: memref<16x256xf32, #tpu.memory_space<vmem>>) attributes {dimension_semantics = [#tpu.dimension_semantics<parallel>, #tpu.dimension_semantics<parallel>, #tpu.dimension_semantics<arbitrary>], iteration_bounds = array<i64: 1, 1, 1>, scalar_prefetch = 0 : i64, scratch_operands = 1 : i64, tpu.core_type = #tpu.core_type<tc>, window_params = [{transform_indices = @transform_0, window_bounds = array<i64: 16, 128>}, {transform_indices = @transform_1, window_bounds = array<i64: 128, 256>}, {transform_indices = @transform_2, window_bounds = array<i64: 1, 256>}, {transform_indices = @transform_3, window_bounds = array<i64: 16, 256>}]} {
    %c0_i32 = arith.constant 0 : i32
    %0 = arith.cmpi eq, %arg2, %c0_i32 : i32
    %1 = arith.extui %0 : i1 to i32
    %c0_i32_0 = arith.constant 0 : i32
    %2 = arith.cmpi ne, %1, %c0_i32_0 : i32
    scf.if %2 {
      %cst_10 = arith.constant 0.000000e+00 : f32
      %12 = vector.broadcast %cst_10 : f32 to vector<16x256xf32>
      %c0_11 = arith.constant 0 : index
      %c0_12 = arith.constant 0 : index
      %13 = vector.load %arg7[%c0_11, %c0_12] : memref<16x256xf32, #tpu.memory_space<vmem>>, vector<16x256xf32>
      tpu.vector_store %arg7[%c0_11, %c0_12], %12 {strides = array<i32>} : memref<16x256xf32, #tpu.memory_space<vmem>>, vector<16x256xf32>,
    } else {
    }
    %c0 = arith.constant 0 : index
    %c0_1 = arith.constant 0 : index
    %3 = vector.load %arg7[%c0, %c0_1] : memref<16x256xf32, #tpu.memory_space<vmem>>, vector<16x256xf32>
    %c0_2 = arith.constant 0 : index
    %c0_3 = arith.constant 0 : index
    %4 = vector.load %arg3[%c0_2, %c0_3] : memref<16x128xbf16, #tpu.memory_space<vmem>>, vector<16x128xbf16>
    %c0_4 = arith.constant 0 : index
    %c0_5 = arith.constant 0 : index
    %5 = vector.load %arg4[%c0_4, %c0_5] : memref<128x256xbf16, #tpu.memory_space<vmem>>, vector<128x256xbf16>
    %cst = arith.constant dense<0.000000e+00> : vector<16x256xf32>
    %6 = tpu.matmul %4, %5, %cst {dimension_numbers = #tpu.dot_dimension_numbers<[1], [0], [0], [1], [0, 0, 1, 1], [], []>} : vector<16x128xbf16>, vector<128x256xbf16>, vector<16x256xf32> -> vector<16x256xf32>
    %7 = arith.addf %3, %6 : vector<16x256xf32>
    %c0_6 = arith.constant 0 : index
    %c0_7 = arith.constant 0 : index
    %8 = vector.load %arg7[%c0_6, %c0_7] : memref<16x256xf32, #tpu.memory_space<vmem>>, vector<16x256xf32>
    tpu.vector_store %arg7[%c0_6, %c0_7], %7 {strides = array<i32>} : memref<16x256xf32, #tpu.memory_space<vmem>>, vector<16x256xf32>,
    %c0_i32_8 = arith.constant 0 : i32
    %9 = arith.cmpi eq, %arg2, %c0_i32_8 : i32
    %10 = arith.extui %9 : i1 to i32
    %c0_i32_9 = arith.constant 0 : i32
    %11 = arith.cmpi ne, %10, %c0_i32_9 : i32
    scf.if %11 {
      %c0_10 = arith.constant 0 : index
      %c0_11 = arith.constant 0 : index
      %12 = vector.load %arg7[%c0_10, %c0_11] : memref<16x256xf32, #tpu.memory_space<vmem>>, vector<16x256xf32>
      %c0_12 = arith.constant 0 : index
      %c0_13 = arith.constant 0 : index
      %13 = vector.load %arg5[%c0_12, %c0_13] : memref<1x256xf32, #tpu.memory_space<vmem>>, vector<1x256xf32>
      %14 = vector.broadcast %13 : vector<1x256xf32> to vector<16x256xf32>
      %15 = arith.addf %12, %14 : vector<16x256xf32>
      %16 = arith.truncf %15 : vector<16x256xf32> to vector<16x256xbf16>
      %c0_14 = arith.constant 0 : index
      %c0_15 = arith.constant 0 : index
      %17 = vector.load %arg6[%c0_14, %c0_15] : memref<16x256xbf16, #tpu.memory_space<vmem>>, vector<16x256xbf16>
      tpu.vector_store %arg6[%c0_14, %c0_15], %16 {strides = array<i32>} : memref<16x256xbf16, #tpu.memory_space<vmem>>, vector<16x256xbf16>,
    } else {
    }
    return
  }
  func.func @transform_0(%arg0: i32, %arg1: i32, %arg2: i32) -> (i32, i32) {
    %c0_i32 = arith.constant 0 : i32
    return %arg0, %arg2 : i32, i32
  }
  func.func @transform_1(%arg0: i32, %arg1: i32, %arg2: i32) -> (i32, i32) {
    %c0_i32 = arith.constant 0 : i32
    return %arg2, %arg1 : i32, i32
  }
  func.func @transform_2(%arg0: i32, %arg1: i32, %arg2: i32) -> (i32, i32) {
    %c0_i32 = arith.constant 0 : i32
    %c0_i32_0 = arith.constant 0 : i32
    return %c0_i32, %arg1 : i32, i32
  }
  func.func @transform_3(%arg0: i32, %arg1: i32, %arg2: i32) -> (i32, i32) {
    %c0_i32 = arith.constant 0 : i32
    return %arg0, %arg1 : i32, i32
  }
}

module attributes {stable_mosaic.version = 11 : i64} {
  func.func @kernel(%arg0: i32, %arg1: memref<16x64xbf16, #tpu.memory_space<vmem>>, %arg2: memref<1x64xf32, #tpu.memory_space<vmem>>, %arg3: memref<1x64xf32, #tpu.memory_space<vmem>>, %arg4: memref<16x64xbf16, #tpu.memory_space<vmem>>) attributes {dimension_semantics = [#tpu.dimension_semantics<parallel>], iteration_bounds = array<i64: 1>, scalar_prefetch = 0 : i64, scratch_operands = 0 : i64, tpu.core_type = #tpu.core_type<tc>, window_params = [{transform_indices = @transform_0, window_bounds = array<i64: 16, 64>}, {pipeline_mode = #tpu.pipeline_mode<synchronous>, transform_indices = @transform_1, window_bounds = array<i64: 1, 64>}, {pipeline_mode = #tpu.pipeline_mode<synchronous>, transform_indices = @transform_2, window_bounds = array<i64: 1, 64>}, {transform_indices = @transform_3, window_bounds = array<i64: 16, 64>}]} {
    %c0 = arith.constant 0 : index
    %c0_0 = arith.constant 0 : index
    %0 = vector.load %arg1[%c0, %c0_0] : memref<16x64xbf16, #tpu.memory_space<vmem>>, vector<16x64xbf16>
    %1 = arith.extf %0 : vector<16x64xbf16> to vector<16x64xf32>
    %cst = arith.constant dense<0.000000e+00> : vector<16xf32>
    %2 = vector.multi_reduction <add>, %1, %cst [1] : vector<16x64xf32> to vector<16xf32>
    %3 = vector.shape_cast %2 : vector<16xf32> to vector<16x1xf32>
    %cst_1 = arith.constant 6.400000e+01 : f32
    %4 = vector.broadcast %cst_1 : f32 to vector<16x1xf32>
    %5 = arith.divf %3, %4 : vector<16x1xf32>
    %6 = vector.broadcast %5 : vector<16x1xf32> to vector<16x64xf32>
    %7 = arith.subf %1, %6 : vector<16x64xf32>
    %8 = arith.mulf %7, %7 : vector<16x64xf32>
    %cst_2 = arith.constant dense<0.000000e+00> : vector<16xf32>
    %9 = vector.multi_reduction <add>, %8, %cst_2 [1] : vector<16x64xf32> to vector<16xf32>
    %10 = vector.shape_cast %9 : vector<16xf32> to vector<16x1xf32>
    %cst_3 = arith.constant 6.400000e+01 : f32
    %11 = vector.broadcast %cst_3 : f32 to vector<16x1xf32>
    %12 = arith.divf %10, %11 : vector<16x1xf32>
    %cst_4 = arith.constant 9.99999974E-6 : f32
    %13 = vector.broadcast %cst_4 : f32 to vector<16x1xf32>
    %14 = arith.addf %12, %13 : vector<16x1xf32>
    %15 = math.rsqrt %14 : vector<16x1xf32>
    %16 = vector.broadcast %15 : vector<16x1xf32> to vector<16x64xf32>
    %17 = arith.mulf %7, %16 : vector<16x64xf32>
    %c0_5 = arith.constant 0 : index
    %c0_6 = arith.constant 0 : index
    %18 = vector.load %arg2[%c0_5, %c0_6] : memref<1x64xf32, #tpu.memory_space<vmem>>, vector<1x64xf32>
    %19 = vector.broadcast %18 : vector<1x64xf32> to vector<16x64xf32>
    %20 = arith.mulf %17, %19 : vector<16x64xf32>
    %c0_7 = arith.constant 0 : index
    %c0_8 = arith.constant 0 : index
    %21 = vector.load %arg3[%c0_7, %c0_8] : memref<1x64xf32, #tpu.memory_space<vmem>>, vector<1x64xf32>
    %22 = vector.broadcast %21 : vector<1x64xf32> to vector<16x64xf32>
    %23 = arith.addf %20, %22 : vector<16x64xf32>
    %24 = arith.truncf %23 : vector<16x64xf32> to vector<16x64xbf16>
    %c0_9 = arith.constant 0 : index
    %c0_10 = arith.constant 0 : index
    %25 = vector.load %arg4[%c0_9, %c0_10] : memref<16x64xbf16, #tpu.memory_space<vmem>>, vector<16x64xbf16>
    tpu.vector_store %arg4[%c0_9, %c0_10], %24 {strides = array<i32>} : memref<16x64xbf16, #tpu.memory_space<vmem>>, vector<16x64xbf16>,
    return
  }
  func.func @transform_0(%arg0: i32) -> (i32, i32) {
    %c0_i32 = arith.constant 0 : i32
    %c0_i32_0 = arith.constant 0 : i32
    return %arg0, %c0_i32 : i32, i32
  }
  func.func @transform_1(%arg0: i32) -> (i32, i32) {
    %c0_i32 = arith.constant 0 : i32
    %c0_i32_0 = arith.constant 0 : i32
    %c0_i32_1 = arith.constant 0 : i32
    return %c0_i32, %c0_i32_0 : i32, i32
  }
  func.func @transform_2(%arg0: i32) -> (i32, i32) {
    %c0_i32 = arith.constant 0 : i32
    %c0_i32_0 = arith.constant 0 : i32
    %c0_i32_1 = arith.constant 0 : i32
    return %c0_i32, %c0_i32_0 : i32, i32
  }
  func.func @transform_3(%arg0: i32) -> (i32, i32) {
    %c0_i32 = arith.constant 0 : i32
    %c0_i32_0 = arith.constant 0 : i32
    return %arg0, %c0_i32 : i32, i32
  }
}

module attributes {stable_mosaic.version = 11 : i64} {
  func.func @kernel(%arg0: i32, %arg1: i32, %arg2: memref<1x1x8x16xbf16, #tpu.memory_space<vmem>>, %arg3: memref<1x1x8x16xbf16, #tpu.memory_space<vmem>>, %arg4: memref<1x1x8x16xbf16, #tpu.memory_space<vmem>>, %arg5: memref<1x8x8xbf16, #tpu.memory_space<vmem>>, %arg6: memref<1x1x8x16xbf16, #tpu.memory_space<vmem>>) attributes {dimension_semantics = [#tpu.dimension_semantics<parallel>, #tpu.dimension_semantics<arbitrary>], iteration_bounds = array<i64: 2, 4>, scalar_prefetch = 0 : i64, scratch_operands = 0 : i64, tpu.core_type = #tpu.core_type<tc>, window_params = [{transform_indices = @transform_0, window_bounds = array<i64: 1, 1, 8, 16>}, {transform_indices = @transform_1, window_bounds = array<i64: 1, 1, 8, 16>}, {transform_indices = @transform_2, window_bounds = array<i64: 1, 1, 8, 16>}, {transform_indices = @transform_3, window_bounds = array<i64: 1, 8, 8>}, {transform_indices = @transform_4, window_bounds = array<i64: 1, 1, 8, 16>}]} {
    %c0 = arith.constant 0 : index
    %c0_0 = arith.constant 0 : index
    %c0_1 = arith.constant 0 : index
    %c0_2 = arith.constant 0 : index
    %0 = vector.load %arg2[%c0, %c0_0, %c0_1, %c0_2] : memref<1x1x8x16xbf16, #tpu.memory_space<vmem>>, vector<1x1x8x16xbf16>
    %1 = vector.shape_cast %0 : vector<1x1x8x16xbf16> to vector<8x16xbf16>
    %c0_3 = arith.constant 0 : index
    %c0_4 = arith.constant 0 : index
    %c0_5 = arith.constant 0 : index
    %c0_6 = arith.constant 0 : index
    %2 = vector.load %arg3[%c0_3, %c0_4, %c0_5, %c0_6] : memref<1x1x8x16xbf16, #tpu.memory_space<vmem>>, vector<1x1x8x16xbf16>
    %3 = vector.shape_cast %2 : vector<1x1x8x16xbf16> to vector<8x16xbf16>
    %c0_7 = arith.constant 0 : index
    %c0_8 = arith.constant 0 : index
    %c0_9 = arith.constant 0 : index
    %c0_10 = arith.constant 0 : index
    %4 = vector.load %arg4[%c0_7, %c0_8, %c0_9, %c0_10] : memref<1x1x8x16xbf16, #tpu.memory_space<vmem>>, vector<1x1x8x16xbf16>
    %5 = vector.shape_cast %4 : vector<1x1x8x16xbf16> to vector<8x16xbf16>
    %cst = arith.constant dense<0.000000e+00> : vector<8x8xf32>
    %6 = tpu.matmul %1, %3, %cst {dimension_numbers = #tpu.dot_dimension_numbers<[1], [1], [0], [0], [0, 0, 1, 0], [], []>} : vector<8x16xbf16>, vector<8x16xbf16>, vector<8x8xf32> -> vector<8x8xf32>
    %c0_11 = arith.constant 0 : index
    %c0_12 = arith.constant 0 : index
    %c0_13 = arith.constant 0 : index
    %7 = vector.load %arg5[%c0_11, %c0_12, %c0_13] : memref<1x8x8xbf16, #tpu.memory_space<vmem>>, vector<1x8x8xbf16>
    %8 = vector.shape_cast %7 : vector<1x8x8xbf16> to vector<8x8xbf16>
    %9 = arith.extf %8 : vector<8x8xbf16> to vector<8x8xf32>
    %10 = arith.addf %6, %9 : vector<8x8xf32>
    %cst_14 = arith.constant dense<0xFF800000> : vector<8xf32>
    %11 = vector.multi_reduction <maximumf>, %10, %cst_14 [1] : vector<8x8xf32> to vector<8xf32>
    %12 = vector.shape_cast %11 : vector<8xf32> to vector<8x1xf32>
    %13 = vector.broadcast %12 : vector<8x1xf32> to vector<8x8xf32>
    %14 = arith.subf %10, %13 : vector<8x8xf32>
    %15 = math.exp %14 : vector<8x8xf32>
    %cst_15 = arith.constant dense<0.000000e+00> : vector<8xf32>
    %16 = vector.multi_reduction <add>, %15, %cst_15 [1] : vector<8x8xf32> to vector<8xf32>
    %17 = vector.shape_cast %16 : vector<8xf32> to vector<8x1xf32>
    %18 = tpu.reciprocal %17 {approx = true} : vector<8x1xf32> -> vector<8x1xf32>
    %19 = vector.broadcast %18 : vector<8x1xf32> to vector<8x8xf32>
    %20 = arith.mulf %15, %19 : vector<8x8xf32>
    %21 = arith.truncf %20 : vector<8x8xf32> to vector<8x8xbf16>
    %cst_16 = arith.constant dense<0.000000e+00> : vector<8x16xf32>
    %22 = tpu.matmul %21, %5, %cst_16 {dimension_numbers = #tpu.dot_dimension_numbers<[1], [0], [0], [1], [0, 0, 1, 1], [], []>} : vector<8x8xbf16>, vector<8x16xbf16>, vector<8x16xf32> -> vector<8x16xf32>
    %23 = arith.truncf %22 : vector<8x16xf32> to vector<8x16xbf16>
    %c0_17 = arith.constant 0 : index
    %c0_18 = arith.constant 0 : index
    %c0_19 = arith.constant 0 : index
    %c0_20 = arith.constant 0 : index
    %24 = vector.load %arg6[%c0_17, %c0_18, %c0_19, %c0_20] : memref<1x1x8x16xbf16, #tpu.memory_space<vmem>>, vector<1x1x8x16xbf16>
    %25 = vector.shape_cast %24 : vector<1x1x8x16xbf16> to vector<8x16xbf16>
    %26 = vector.shape_cast %23 : vector<8x16xbf16> to vector<1x1x8x16xbf16>
    tpu.vector_store %arg6[%c0_17, %c0_18, %c0_19, %c0_20], %26 {strides = array<i32>} : memref<1x1x8x16xbf16, #tpu.memory_space<vmem>>, vector<1x1x8x16xbf16>,
    return
  }
  func.func @transform_0(%arg0: i32, %arg1: i32) -> (i32, i32, i32, i32) {
    %c0_i32 = arith.constant 0 : i32
    %c0_i32_0 = arith.constant 0 : i32
    %c0_i32_1 = arith.constant 0 : i32
    return %arg0, %arg1, %c0_i32, %c0_i32_0 : i32, i32, i32, i32
  }
  func.func @transform_1(%arg0: i32, %arg1: i32) -> (i32, i32, i32, i32) {
    %c0_i32 = arith.constant 0 : i32
    %c0_i32_0 = arith.constant 0 : i32
    %c0_i32_1 = arith.constant 0 : i32
    return %arg0, %arg1, %c0_i32, %c0_i32_0 : i32, i32, i32, i32
  }
  func.func @transform_2(%arg0: i32, %arg1: i32) -> (i32, i32, i32, i32) {
    %c0_i32 = arith.constant 0 : i32
    %c0_i32_0 = arith.constant 0 : i32
    %c0_i32_1 = arith.constant 0 : i32
    return %arg0, %arg1, %c0_i32, %c0_i32_0 : i32, i32, i32, i32
  }
  func.func @transform_3(%arg0: i32, %arg1: i32) -> (i32, i32, i32) {
    %c0_i32 = arith.constant 0 : i32
    %c0_i32_0 = arith.constant 0 : i32
    %c0_i32_1 = arith.constant 0 : i32
    return %arg1, %c0_i32, %c0_i32_0 : i32, i32, i32
  }
  func.func @transform_4(%arg0: i32, %arg1: i32) -> (i32, i32, i32, i32) {
    %c0_i32 = arith.constant 0 : i32
    %c0_i32_0 = arith.constant 0 : i32
    %c0_i32_1 = arith.constant 0 : i32
    return %arg0, %arg1, %c0_i32, %c0_i32_0 : i32, i32, i32, i32
  }
}

module attributes {stable_mosaic.version = 11 : i64} {
  func.func @kernel(%arg0: i32, %arg1: i32, %arg2: i32, %arg3: memref<16x256xbf16, #tpu.memory_space<vmem>>, %arg4: memref<256x128xbf16, #tpu.memory_space<vmem>>, %arg5: memref<1x128xf32, #tpu.memory_space<vmem>>, %arg6: memref<16x128xbf16, #tpu.memory_space<vmem>>, %arg7: memref<16x128xf32, #tpu.memory_space<vmem>>) attributes {dimension_semantics = [#tpu.dimension_semantics<parallel>, #tpu.dimension_semantics<parallel>, #tpu.dimension_semantics<arbitrary>], iteration_bounds = array<i64: 1, 1, 1>, scalar_prefetch = 0 : i64, scratch_operands = 1 : i64, tpu.core_type = #tpu.core_type<tc>, window_params = [{transform_indices = @transform_0, window_bounds = array<i64: 16, 256>}, {transform_indices = @transform_1, window_bounds = array<i64: 256, 128>}, {transform_indices = @transform_2, window_bounds = array<i64: 1, 128>}, {transform_indices = @transform_3, window_bounds = array<i64: 16, 128>}]} {
    %c0_i32 = arith.constant 0 : i32
    %0 = arith.cmpi eq, %arg2, %c0_i32 : i32
    %1 = arith.extui %0 : i1 to i32
    %c0_i32_0 = arith.constant 0 : i32
    %2 = arith.cmpi ne, %1, %c0_i32_0 : i32
    scf.if %2 {
      %cst_10 = arith.constant 0.000000e+00 : f32
      %12 = vector.broadcast %cst_10 : f32 to vector<16x128xf32>
      %c0_11 = arith.constant 0 : index
      %c0_12 = arith.constant 0 : index
      %13 = vector.load %arg7[%c0_11, %c0_12] : memref<16x128xf32, #tpu.memory_space<vmem>>, vector<16x128xf32>
      tpu.vector_store %arg7[%c0_11, %c0_12], %12 {strides = array<i32>} : memref<16x128xf32, #tpu.memory_space<vmem>>, vector<16x128xf32>,
    } else {
    }
    %c0 = arith.constant 0 : index
    %c0_1 = arith.constant 0 : index
    %3 = vector.load %arg7[%c0, %c0_1] : memref<16x128xf32, #tpu.memory_space<vmem>>, vector<16x128xf32>
    %c0_2 = arith.constant 0 : index
    %c0_3 = arith.constant 0 : index
    %4 = vector.load %arg3[%c0_2, %c0_3] : memref<16x256xbf16, #tpu.memory_space<vmem>>, vector<16x256xbf16>
    %c0_4 = arith.constant 0 : index
    %c0_5 = arith.constant 0 : index
    %5 = vector.load %arg4[%c0_4, %c0_5] : memref<256x128xbf16, #tpu.memory_space<vmem>>, vector<256x128xbf16>
    %cst = arith.constant dense<0.000000e+00> : vector<16x128xf32>
    %6 = tpu.matmul %4, %5, %cst {dimension_numbers = #tpu.dot_dimension_numbers<[1], [0], [0], [1], [0, 0, 1, 1], [], []>} : vector<16x256xbf16>, vector<256x128xbf16>, vector<16x128xf32> -> vector<16x128xf32>
    %7 = arith.addf %3, %6 : vector<16x128xf32>
    %c0_6 = arith.constant 0 : index
    %c0_7 = arith.constant 0 : index
    %8 = vector.load %arg7[%c0_6, %c0_7] : memref<16x128xf32, #tpu.memory_space<vmem>>, vector<16x128xf32>
    tpu.vector_store %arg7[%c0_6, %c0_7], %7 {strides = array<i32>} : memref<16x128xf32, #tpu.memory_space<vmem>>, vector<16x128xf32>,
    %c0_i32_8 = arith.constant 0 : i32
    %9 = arith.cmpi eq, %arg2, %c0_i32_8 : i32
    %10 = arith.extui %9 : i1 to i32
    %c0_i32_9 = arith.constant 0 : i32
    %11 = arith.cmpi ne, %10, %c0_i32_9 : i32
    scf.if %11 {
      %c0_10 = arith.constant 0 : index
      %c0_11 = arith.constant 0 : index
      %12 = vector.load %arg7[%c0_10, %c0_11] : memref<16x128xf32, #tpu.memory_space<vmem>>, vector<16x128xf32>
      %c0_12 = arith.constant 0 : index
      %c0_13 = arith.constant 0 : index
      %13 = vector.load %arg5[%c0_12, %c0_13] : memref<1x128xf32, #tpu.memory_space<vmem>>, vector<1x128xf32>
      %14 = vector.broadcast %13 : vector<1x128xf32> to vector<16x128xf32>
      %15 = arith.addf %12, %14 : vector<16x128xf32>
      %16 = arith.truncf %15 : vector<16x128xf32> to vector<16x128xbf16>
      %c0_14 = arith.constant 0 : index
      %c0_15 = arith.constant 0 : index
      %17 = vector.load %arg6[%c0_14, %c0_15] : memref<16x128xbf16, #tpu.memory_space<vmem>>, vector<16x128xbf16>
      tpu.vector_store %arg6[%c0_14, %c0_15], %16 {strides = array<i32>} : memref<16x128xbf16, #tpu.memory_space<vmem>>, vector<16x128xbf16>,
    } else {
    }
    return
  }
  func.func @transform_0(%arg0: i32, %arg1: i32, %arg2: i32) -> (i32, i32) {
    %c0_i32 = arith.constant 0 : i32
    return %arg0, %arg2 : i32, i32
  }
  func.func @transform_1(%arg0: i32, %arg1: i32, %arg2: i32) -> (i32, i32) {
    %c0_i32 = arith.constant 0 : i32
    return %arg2, %arg1 : i32, i32
  }
  func.func @transform_2(%arg0: i32, %arg1: i32, %arg2: i32) -> (i32, i32) {
    %c0_i32 = arith.constant 0 : i32
    %c0_i32_0 = arith.constant 0 : i32
    return %c0_i32, %arg1 : i32, i32
  }
  func.func @transform_3(%arg0: i32, %arg1: i32, %arg2: i32) -> (i32, i32) {
    %c0_i32 = arith.constant 0 : i32
    return %arg0, %arg1 : i32, i32
  }
}

module attributes {stable_mosaic.version = 11 : i64} {
  func.func @kernel(%arg0: i32, %arg1: i32, %arg2: i32, %arg3: memref<16x128xbf16, #tpu.memory_space<vmem>>, %arg4: memref<128x256xbf16, #tpu.memory_space<vmem>>, %arg5: memref<1x256xf32, #tpu.memory_space<vmem>>, %arg6: memref<16x256xbf16, #tpu.memory_space<vmem>>, %arg7: memref<16x256xf32, #tpu.memory_space<vmem>>) attributes {dimension_semantics = [#tpu.dimension_semantics<parallel>, #tpu.dimension_semantics<parallel>, #tpu.dimension_semantics<arbitrary>], iteration_bounds = array<i64: 1, 1, 1>, scalar_prefetch = 0 : i64, scratch_operands = 1 : i64, tpu.core_type = #tpu.core_type<tc>, window_params = [{transform_indices = @transform_0, window_bounds = array<i64: 16, 128>}, {transform_indices = @transform_1, window_bounds = array<i64: 128, 256>}, {transform_indices = @transform_2, window_bounds = array<i64: 1, 256>}, {transform_indices = @transform_3, window_bounds = array<i64: 16, 256>}]} {
    %c0_i32 = arith.constant 0 : i32
    %0 = arith.cmpi eq, %arg2, %c0_i32 : i32
    %1 = arith.extui %0 : i1 to i32
    %c0_i32_0 = arith.constant 0 : i32
    %2 = arith.cmpi ne, %1, %c0_i32_0 : i32
    scf.if %2 {
      %cst_10 = arith.constant 0.000000e+00 : f32
      %12 = vector.broadcast %cst_10 : f32 to vector<16x256xf32>
      %c0_11 = arith.constant 0 : index
      %c0_12 = arith.constant 0 : index
      %13 = vector.load %arg7[%c0_11, %c0_12] : memref<16x256xf32, #tpu.memory_space<vmem>>, vector<16x256xf32>
      tpu.vector_store %arg7[%c0_11, %c0_12], %12 {strides = array<i32>} : memref<16x256xf32, #tpu.memory_space<vmem>>, vector<16x256xf32>,
    } else {
    }
    %c0 = arith.constant 0 : index
    %c0_1 = arith.constant 0 : index
    %3 = vector.load %arg7[%c0, %c0_1] : memref<16x256xf32, #tpu.memory_space<vmem>>, vector<16x256xf32>
    %c0_2 = arith.constant 0 : index
    %c0_3 = arith.constant 0 : index
    %4 = vector.load %arg3[%c0_2, %c0_3] : memref<16x128xbf16, #tpu.memory_space<vmem>>, vector<16x128xbf16>
    %c0_4 = arith.constant 0 : index
    %c0_5 = arith.constant 0 : index
    %5 = vector.load %arg4[%c0_4, %c0_5] : memref<128x256xbf16, #tpu.memory_space<vmem>>, vector<128x256xbf16>
    %cst = arith.constant dense<0.000000e+00> : vector<16x256xf32>
    %6 = tpu.matmul %4, %5, %cst {dimension_numbers = #tpu.dot_dimension_numbers<[1], [0], [0], [1], [0, 0, 1, 1], [], []>} : vector<16x128xbf16>, vector<128x256xbf16>, vector<16x256xf32> -> vector<16x256xf32>
    %7 = arith.addf %3, %6 : vector<16x256xf32>
    %c0_6 = arith.constant 0 : index
    %c0_7 = arith.constant 0 : index
    %8 = vector.load %arg7[%c0_6, %c0_7] : memref<16x256xf32, #tpu.memory_space<vmem>>, vector<16x256xf32>
    tpu.vector_store %arg7[%c0_6, %c0_7], %7 {strides = array<i32>} : memref<16x256xf32, #tpu.memory_space<vmem>>, vector<16x256xf32>,
    %c0_i32_8 = arith.constant 0 : i32
    %9 = arith.cmpi eq, %arg2, %c0_i32_8 : i32
    %10 = arith.extui %9 : i1 to i32
    %c0_i32_9 = arith.constant 0 : i32
    %11 = arith.cmpi ne, %10, %c0_i32_9 : i32
    scf.if %11 {
      %c0_10 = arith.constant 0 : index
      %c0_11 = arith.constant 0 : index
      %12 = vector.load %arg7[%c0_10, %c0_11] : memref<16x256xf32, #tpu.memory_space<vmem>>, vector<16x256xf32>
      %c0_12 = arith.constant 0 : index
      %c0_13 = arith.constant 0 : index
      %13 = vector.load %arg5[%c0_12, %c0_13] : memref<1x256xf32, #tpu.memory_space<vmem>>, vector<1x256xf32>
      %14 = vector.broadcast %13 : vector<1x256xf32> to vector<16x256xf32>
      %15 = arith.addf %12, %14 : vector<16x256xf32>
      %cst_14 = arith.constant 5.000000e-01 : f32
      %16 = vector.broadcast %cst_14 : f32 to vector<16x256xf32>
      %17 = arith.mulf %16, %15 : vector<16x256xf32>
      %cst_15 = arith.constant 4.471500e-02 : f32
      %18 = vector.broadcast %cst_15 : f32 to vector<16x256xf32>
      %19 = arith.mulf %18, %15 : vector<16x256xf32>
      %20 = arith.mulf %19, %15 : vector<16x256xf32>
      %21 = arith.mulf %20, %15 : vector<16x256xf32>
      %22 = arith.addf %15, %21 : vector<16x256xf32>
      %cst_16 = arith.constant 0.797884583 : f32
      %23 = vector.broadcast %cst_16 : f32 to vector<16x256xf32>
      %24 = arith.mulf %23, %22 : vector<16x256xf32>
      %25 = math.tanh %24 : vector<16x256xf32>
      %cst_17 = arith.constant 1.000000e+00 : f32
      %26 = vector.broadcast %cst_17 : f32 to vector<16x256xf32>
      %27 = arith.addf %26, %25 : vector<16x256xf32>
      %28 = arith.mulf %17, %27 : vector<16x256xf32>
      %29 = arith.truncf %28 : vector<16x256xf32> to vector<16x256xbf16>
      %c0_18 = arith.constant 0 : index
      %c0_19 = arith.constant 0 : index
      %30 = vector.load %arg6[%c0_18, %c0_19] : memref<16x256xbf16, #tpu.memory_space<vmem>>, vector<16x256xbf16>
      tpu.vector_store %arg6[%c0_18, %c0_19], %29 {strides = array<i32>} : memref<16x256xbf16, #tpu.memory_space<vmem>>, vector<16x256xbf16>,
    } else {
    }
    return
  }
  func.func @transform_0(%arg0: i32, %arg1: i32, %arg2: i32) -> (i32, i32) {
    %c0_i32 = arith.constant 0 : i32
    return %arg0, %arg2 : i32, i32
  }
  func.func @transform_1(%arg0: i32, %arg1: i32, %arg2: i32) -> (i32, i32) {
    %c0_i32 = arith.constant 0 : i32
    return %arg2, %arg1 : i32, i32
  }
  func.func @transform_2(%arg0: i32, %arg1: i32, %arg2: i32) -> (i32, i32) {
    %c0_i32 = arith.constant 0 : i32
    %c0_i32_0 = arith.constant 0 : i32
    return %c0_i32, %arg1 : i32, i32
  }
  func.func @transform_3(%arg0: i32, %arg1: i32, %arg2: i32) -> (i32, i32) {
    %c0_i32 = arith.constant 0 : i32
    return %arg0, %arg1 : i32, i32
  }
}

module attributes {stable_mosaic.version = 11 : i64} {
  func.func @kernel(%arg0: i32, %arg1: i32, %arg2: i32, %arg3: memref<8x256xbf16, #tpu.memory_space<vmem>>, %arg4: memref<256x128xbf16, #tpu.memory_space<vmem>>, %arg5: memref<1x128xf32, #tpu.memory_space<vmem>>, %arg6: memref<8x128xbf16, #tpu.memory_space<vmem>>, %arg7: memref<8x128xf32, #tpu.memory_space<vmem>>) attributes {dimension_semantics = [#tpu.dimension_semantics<parallel>, #tpu.dimension_semantics<parallel>, #tpu.dimension_semantics<arbitrary>], iteration_bounds = array<i64: 1, 1, 1>, scalar_prefetch = 0 : i64, scratch_operands = 1 : i64, tpu.core_type = #tpu.core_type<tc>, window_params = [{transform_indices = @transform_0, window_bounds = array<i64: 8, 256>}, {transform_indices = @transform_1, window_bounds = array<i64: 256, 128>}, {transform_indices = @transform_2, window_bounds = array<i64: 1, 128>}, {transform_indices = @transform_3, window_bounds = array<i64: 8, 128>}]} {
    %c0_i32 = arith.constant 0 : i32
    %0 = arith.cmpi eq, %arg2, %c0_i32 : i32
    %1 = arith.extui %0 : i1 to i32
    %c0_i32_0 = arith.constant 0 : i32
    %2 = arith.cmpi ne, %1, %c0_i32_0 : i32
    scf.if %2 {
      %cst_10 = arith.constant 0.000000e+00 : f32
      %12 = vector.broadcast %cst_10 : f32 to vector<8x128xf32>
      %c0_11 = arith.constant 0 : index
      %c0_12 = arith.constant 0 : index
      %13 = vector.load %arg7[%c0_11, %c0_12] : memref<8x128xf32, #tpu.memory_space<vmem>>, vector<8x128xf32>
      tpu.vector_store %arg7[%c0_11, %c0_12], %12 {strides = array<i32>} : memref<8x128xf32, #tpu.memory_space<vmem>>, vector<8x128xf32>,
    } else {
    }
    %c0 = arith.constant 0 : index
    %c0_1 = arith.constant 0 : index
    %3 = vector.load %arg7[%c0, %c0_1] : memref<8x128xf32, #tpu.memory_space<vmem>>, vector<8x128xf32>
    %c0_2 = arith.constant 0 : index
    %c0_3 = arith.constant 0 : index
    %4 = vector.load %arg3[%c0_2, %c0_3] : memref<8x256xbf16, #tpu.memory_space<vmem>>, vector<8x256xbf16>
    %c0_4 = arith.constant 0 : index
    %c0_5 = arith.constant 0 : index
    %5 = vector.load %arg4[%c0_4, %c0_5] : memref<256x128xbf16, #tpu.memory_space<vmem>>, vector<256x128xbf16>
    %cst = arith.constant dense<0.000000e+00> : vector<8x128xf32>
    %6 = tpu.matmul %4, %5, %cst {dimension_numbers = #tpu.dot_dimension_numbers<[1], [0], [0], [1], [0, 0, 1, 1], [], []>} : vector<8x256xbf16>, vector<256x128xbf16>, vector<8x128xf32> -> vector<8x128xf32>
    %7 = arith.addf %3, %6 : vector<8x128xf32>
    %c0_6 = arith.constant 0 : index
    %c0_7 = arith.constant 0 : index
    %8 = vector.load %arg7[%c0_6, %c0_7] : memref<8x128xf32, #tpu.memory_space<vmem>>, vector<8x128xf32>
    tpu.vector_store %arg7[%c0_6, %c0_7], %7 {strides = array<i32>} : memref<8x128xf32, #tpu.memory_space<vmem>>, vector<8x128xf32>,
    %c0_i32_8 = arith.constant 0 : i32
    %9 = arith.cmpi eq, %arg2, %c0_i32_8 : i32
    %10 = arith.extui %9 : i1 to i32
    %c0_i32_9 = arith.constant 0 : i32
    %11 = arith.cmpi ne, %10, %c0_i32_9 : i32
    scf.if %11 {
      %c0_10 = arith.constant 0 : index
      %c0_11 = arith.constant 0 : index
      %12 = vector.load %arg7[%c0_10, %c0_11] : memref<8x128xf32, #tpu.memory_space<vmem>>, vector<8x128xf32>
      %c0_12 = arith.constant 0 : index
      %c0_13 = arith.constant 0 : index
      %13 = vector.load %arg5[%c0_12, %c0_13] : memref<1x128xf32, #tpu.memory_space<vmem>>, vector<1x128xf32>
      %14 = vector.broadcast %13 : vector<1x128xf32> to vector<8x128xf32>
      %15 = arith.addf %12, %14 : vector<8x128xf32>
      %16 = arith.truncf %15 : vector<8x128xf32> to vector<8x128xbf16>
      %c0_14 = arith.constant 0 : index
      %c0_15 = arith.constant 0 : index
      %17 = vector.load %arg6[%c0_14, %c0_15] : memref<8x128xbf16, #tpu.memory_space<vmem>>, vector<8x128xbf16>
      tpu.vector_store %arg6[%c0_14, %c0_15], %16 {strides = array<i32>} : memref<8x128xbf16, #tpu.memory_space<vmem>>, vector<8x128xbf16>,
    } else {
    }
    return
  }
  func.func @transform_0(%arg0: i32, %arg1: i32, %arg2: i32) -> (i32, i32) {
    %c0_i32 = arith.constant 0 : i32
    return %arg0, %arg2 : i32, i32
  }
  func.func @transform_1(%arg0: i32, %arg1: i32, %arg2: i32) -> (i32, i32) {
    %c0_i32 = arith.constant 0 : i32
    return %arg2, %arg1 : i32, i32
  }
  func.func @transform_2(%arg0: i32, %arg1: i32, %arg2: i32) -> (i32, i32) {
    %c0_i32 = arith.constant 0 : i32
    %c0_i32_0 = arith.constant 0 : i32
    return %c0_i32, %arg1 : i32, i32
  }
  func.func @transform_3(%arg0: i32, %arg1: i32, %arg2: i32) -> (i32, i32) {
    %c0_i32 = arith.constant 0 : i32
    return %arg0, %arg1 : i32, i32
  }
}

module attributes {stable_mosaic.version = 11 : i64} {
  func.func @kernel(%arg0: i32, %arg1: memref<8x128xbf16, #tpu.memory_space<vmem>>, %arg2: memref<1x128xf32, #tpu.memory_space<vmem>>, %arg3: memref<1x128xf32, #tpu.memory_space<vmem>>, %arg4: memref<8x128xbf16, #tpu.memory_space<vmem>>) attributes {dimension_semantics = [#tpu.dimension_semantics<parallel>], iteration_bounds = array<i64: 1>, scalar_prefetch = 0 : i64, scratch_operands = 0 : i64, tpu.core_type = #tpu.core_type<tc>, window_params = [{transform_indices = @transform_0, window_bounds = array<i64: 8, 128>}, {pipeline_mode = #tpu.pipeline_mode<synchronous>, transform_indices = @transform_1, window_bounds = array<i64: 1, 128>}, {pipeline_mode = #tpu.pipeline_mode<synchronous>, transform_indices = @transform_2, window_bounds = array<i64: 1, 128>}, {transform_indices = @transform_3, window_bounds = array<i64: 8, 128>}]} {
    %c0 = arith.constant 0 : index
    %c0_0 = arith.constant 0 : index
    %0 = vector.load %arg1[%c0, %c0_0] : memref<8x128xbf16, #tpu.memory_space<vmem>>, vector<8x128xbf16>
    %1 = arith.extf %0 : vector<8x128xbf16> to vector<8x128xf32>
    %cst = arith.constant dense<0.000000e+00> : vector<8xf32>
    %2 = vector.multi_reduction <add>, %1, %cst [1] : vector<8x128xf32> to vector<8xf32>
    %3 = vector.shape_cast %2 : vector<8xf32> to vector<8x1xf32>
    %cst_1 = arith.constant 1.280000e+02 : f32
    %4 = vector.broadcast %cst_1 : f32 to vector<8x1xf32>
    %5 = arith.divf %3, %4 : vector<8x1xf32>
    %6 = vector.broadcast %5 : vector<8x1xf32> to vector<8x128xf32>
    %7 = arith.subf %1, %6 : vector<8x128xf32>
    %8 = arith.mulf %7, %7 : vector<8x128xf32>
    %cst_2 = arith.constant dense<0.000000e+00> : vector<8xf32>
    %9 = vector.multi_reduction <add>, %8, %cst_2 [1] : vector<8x128xf32> to vector<8xf32>
    %10 = vector.shape_cast %9 : vector<8xf32> to vector<8x1xf32>
    %cst_3 = arith.constant 1.280000e+02 : f32
    %11 = vector.broadcast %cst_3 : f32 to vector<8x1xf32>
    %12 = arith.divf %10, %11 : vector<8x1xf32>
    %cst_4 = arith.constant 9.99999974E-6 : f32
    %13 = vector.broadcast %cst_4 : f32 to vector<8x1xf32>
    %14 = arith.addf %12, %13 : vector<8x1xf32>
    %15 = math.rsqrt %14 : vector<8x1xf32>
    %16 = vector.broadcast %15 : vector<8x1xf32> to vector<8x128xf32>
    %17 = arith.mulf %7, %16 : vector<8x128xf32>
    %c0_5 = arith.constant 0 : index
    %c0_6 = arith.constant 0 : index
    %18 = vector.load %arg2[%c0_5, %c0_6] : memref<1x128xf32, #tpu.memory_space<vmem>>, vector<1x128xf32>
    %19 = vector.broadcast %18 : vector<1x128xf32> to vector<8x128xf32>
    %20 = arith.mulf %17, %19 : vector<8x128xf32>
    %c0_7 = arith.constant 0 : index
    %c0_8 = arith.constant 0 : index
    %21 = vector.load %arg3[%c0_7, %c0_8] : memref<1x128xf32, #tpu.memory_space<vmem>>, vector<1x128xf32>
    %22 = vector.broadcast %21 : vector<1x128xf32> to vector<8x128xf32>
    %23 = arith.addf %20, %22 : vector<8x128xf32>
    %24 = arith.truncf %23 : vector<8x128xf32> to vector<8x128xbf16>
    %c0_9 = arith.constant 0 : index
    %c0_10 = arith.constant 0 : index
    %25 = vector.load %arg4[%c0_9, %c0_10] : memref<8x128xbf16, #tpu.memory_space<vmem>>, vector<8x128xbf16>
    tpu.vector_store %arg4[%c0_9, %c0_10], %24 {strides = array<i32>} : memref<8x128xbf16, #tpu.memory_space<vmem>>, vector<8x128xbf16>,
    return
  }
  func.func @transform_0(%arg0: i32) -> (i32, i32) {
    %c0_i32 = arith.constant 0 : i32
    %c0_i32_0 = arith.constant 0 : i32
    return %arg0, %c0_i32 : i32, i32
  }
  func.func @transform_1(%arg0: i32) -> (i32, i32) {
    %c0_i32 = arith.constant 0 : i32
    %c0_i32_0 = arith.constant 0 : i32
    %c0_i32_1 = arith.constant 0 : i32
    return %c0_i32, %c0_i32_0 : i32, i32
  }
  func.func @transform_2(%arg0: i32) -> (i32, i32) {
    %c0_i32 = arith.constant 0 : i32
    %c0_i32_0 = arith.constant 0 : i32
    %c0_i32_1 = arith.constant 0 : i32
    return %c0_i32, %c0_i32_0 : i32, i32
  }
  func.func @transform_3(%arg0: i32) -> (i32, i32) {
    %c0_i32 = arith.constant 0 : i32
    %c0_i32_0 = arith.constant 0 : i32
    return %arg0, %c0_i32 : i32, i32
  }
}

module attributes {stable_mosaic.version = 11 : i64} {
  func.func @kernel(%arg0: i32, %arg1: memref<8x256xbf16, #tpu.memory_space<vmem>>, %arg2: memref<1x256xf32, #tpu.memory_space<vmem>>, %arg3: memref<1x256xf32, #tpu.memory_space<vmem>>, %arg4: memref<8x256xbf16, #tpu.memory_space<vmem>>) attributes {dimension_semantics = [#tpu.dimension_semantics<parallel>], iteration_bounds = array<i64: 1>, scalar_prefetch = 0 : i64, scratch_operands = 0 : i64, tpu.core_type = #tpu.core_type<tc>, window_params = [{transform_indices = @transform_0, window_bounds = array<i64: 8, 256>}, {pipeline_mode = #tpu.pipeline_mode<synchronous>, transform_indices = @transform_1, window_bounds = array<i64: 1, 256>}, {pipeline_mode = #tpu.pipeline_mode<synchronous>, transform_indices = @transform_2, window_bounds = array<i64: 1, 256>}, {transform_indices = @transform_3, window_bounds = array<i64: 8, 256>}]} {
    %c0 = arith.constant 0 : index
    %c0_0 = arith.constant 0 : index
    %0 = vector.load %arg1[%c0, %c0_0] : memref<8x256xbf16, #tpu.memory_space<vmem>>, vector<8x256xbf16>
    %1 = arith.extf %0 : vector<8x256xbf16> to vector<8x256xf32>
    %cst = arith.constant dense<0.000000e+00> : vector<8xf32>
    %2 = vector.multi_reduction <add>, %1, %cst [1] : vector<8x256xf32> to vector<8xf32>
    %3 = vector.shape_cast %2 : vector<8xf32> to vector<8x1xf32>
    %cst_1 = arith.constant 2.560000e+02 : f32
    %4 = vector.broadcast %cst_1 : f32 to vector<8x1xf32>
    %5 = arith.divf %3, %4 : vector<8x1xf32>
    %6 = vector.broadcast %5 : vector<8x1xf32> to vector<8x256xf32>
    %7 = arith.subf %1, %6 : vector<8x256xf32>
    %8 = arith.mulf %7, %7 : vector<8x256xf32>
    %cst_2 = arith.constant dense<0.000000e+00> : vector<8xf32>
    %9 = vector.multi_reduction <add>, %8, %cst_2 [1] : vector<8x256xf32> to vector<8xf32>
    %10 = vector.shape_cast %9 : vector<8xf32> to vector<8x1xf32>
    %cst_3 = arith.constant 2.560000e+02 : f32
    %11 = vector.broadcast %cst_3 : f32 to vector<8x1xf32>
    %12 = arith.divf %10, %11 : vector<8x1xf32>
    %cst_4 = arith.constant 9.99999974E-6 : f32
    %13 = vector.broadcast %cst_4 : f32 to vector<8x1xf32>
    %14 = arith.addf %12, %13 : vector<8x1xf32>
    %15 = math.rsqrt %14 : vector<8x1xf32>
    %16 = vector.broadcast %15 : vector<8x1xf32> to vector<8x256xf32>
    %17 = arith.mulf %7, %16 : vector<8x256xf32>
    %c0_5 = arith.constant 0 : index
    %c0_6 = arith.constant 0 : index
    %18 = vector.load %arg2[%c0_5, %c0_6] : memref<1x256xf32, #tpu.memory_space<vmem>>, vector<1x256xf32>
    %19 = vector.broadcast %18 : vector<1x256xf32> to vector<8x256xf32>
    %20 = arith.mulf %17, %19 : vector<8x256xf32>
    %c0_7 = arith.constant 0 : index
    %c0_8 = arith.constant 0 : index
    %21 = vector.load %arg3[%c0_7, %c0_8] : memref<1x256xf32, #tpu.memory_space<vmem>>, vector<1x256xf32>
    %22 = vector.broadcast %21 : vector<1x256xf32> to vector<8x256xf32>
    %23 = arith.addf %20, %22 : vector<8x256xf32>
    %24 = arith.truncf %23 : vector<8x256xf32> to vector<8x256xbf16>
    %c0_9 = arith.constant 0 : index
    %c0_10 = arith.constant 0 : index
    %25 = vector.load %arg4[%c0_9, %c0_10] : memref<8x256xbf16, #tpu.memory_space<vmem>>, vector<8x256xbf16>
    tpu.vector_store %arg4[%c0_9, %c0_10], %24 {strides = array<i32>} : memref<8x256xbf16, #tpu.memory_space<vmem>>, vector<8x256xbf16>,
    return
  }
  func.func @transform_0(%arg0: i32) -> (i32, i32) {
    %c0_i32 = arith.constant 0 : i32
    %c0_i32_0 = arith.constant 0 : i32
    return %arg0, %c0_i32 : i32, i32
  }
  func.func @transform_1(%arg0: i32) -> (i32, i32) {
    %c0_i32 = arith.constant 0 : i32
    %c0_i32_0 = arith.constant 0 : i32
    %c0_i32_1 = arith.constant 0 : i32
    return %c0_i32, %c0_i32_0 : i32, i32
  }
  func.func @transform_2(%arg0: i32) -> (i32, i32) {
    %c0_i32 = arith.constant 0 : i32
    %c0_i32_0 = arith.constant 0 : i32
    %c0_i32_1 = arith.constant 0 : i32
    return %c0_i32, %c0_i32_0 : i32, i32
  }
  func.func @transform_3(%arg0: i32) -> (i32, i32) {
    %c0_i32 = arith.constant 0 : i32
    %c0_i32_0 = arith.constant 0 : i32
    return %arg0, %c0_i32 : i32, i32
  }
}

module attributes {stable_mosaic.version = 11 : i64} {
  func.func @kernel(%arg0: i32, %arg1: i32, %arg2: i32, %arg3: memref<8x128xbf16, #tpu.memory_space<vmem>>, %arg4: memref<128x384xbf16, #tpu.memory_space<vmem>>, %arg5: memref<1x384xf32, #tpu.memory_space<vmem>>, %arg6: memref<8x384xbf16, #tpu.memory_space<vmem>>, %arg7: memref<8x384xf32, #tpu.memory_space<vmem>>) attributes {dimension_semantics = [#tpu.dimension_semantics<parallel>, #tpu.dimension_semantics<parallel>, #tpu.dimension_semantics<arbitrary>], iteration_bounds = array<i64: 1, 1, 1>, scalar_prefetch = 0 : i64, scratch_operands = 1 : i64, tpu.core_type = #tpu.core_type<tc>, window_params = [{transform_indices = @transform_0, window_bounds = array<i64: 8, 128>}, {transform_indices = @transform_1, window_bounds = array<i64: 128, 384>}, {transform_indices = @transform_2, window_bounds = array<i64: 1, 384>}, {transform_indices = @transform_3, window_bounds = array<i64: 8, 384>}]} {
    %c0_i32 = arith.constant 0 : i32
    %0 = arith.cmpi eq, %arg2, %c0_i32 : i32
    %1 = arith.extui %0 : i1 to i32
    %c0_i32_0 = arith.constant 0 : i32
    %2 = arith.cmpi ne, %1, %c0_i32_0 : i32
    scf.if %2 {
      %cst_10 = arith.constant 0.000000e+00 : f32
      %12 = vector.broadcast %cst_10 : f32 to vector<8x384xf32>
      %c0_11 = arith.constant 0 : index
      %c0_12 = arith.constant 0 : index
      %13 = vector.load %arg7[%c0_11, %c0_12] : memref<8x384xf32, #tpu.memory_space<vmem>>, vector<8x384xf32>
      tpu.vector_store %arg7[%c0_11, %c0_12], %12 {strides = array<i32>} : memref<8x384xf32, #tpu.memory_space<vmem>>, vector<8x384xf32>,
    } else {
    }
    %c0 = arith.constant 0 : index
    %c0_1 = arith.constant 0 : index
    %3 = vector.load %arg7[%c0, %c0_1] : memref<8x384xf32, #tpu.memory_space<vmem>>, vector<8x384xf32>
    %c0_2 = arith.constant 0 : index
    %c0_3 = arith.constant 0 : index
    %4 = vector.load %arg3[%c0_2, %c0_3] : memref<8x128xbf16, #tpu.memory_space<vmem>>, vector<8x128xbf16>
    %c0_4 = arith.constant 0 : index
    %c0_5 = arith.constant 0 : index
    %5 = vector.load %arg4[%c0_4, %c0_5] : memref<128x384xbf16, #tpu.memory_space<vmem>>, vector<128x384xbf16>
    %cst = arith.constant dense<0.000000e+00> : vector<8x384xf32>
    %6 = tpu.matmul %4, %5, %cst {dimension_numbers = #tpu.dot_dimension_numbers<[1], [0], [0], [1], [0, 0, 1, 1], [], []>} : vector<8x128xbf16>, vector<128x384xbf16>, vector<8x384xf32> -> vector<8x384xf32>
    %7 = arith.addf %3, %6 : vector<8x384xf32>
    %c0_6 = arith.constant 0 : index
    %c0_7 = arith.constant 0 : index
    %8 = vector.load %arg7[%c0_6, %c0_7] : memref<8x384xf32, #tpu.memory_space<vmem>>, vector<8x384xf32>
    tpu.vector_store %arg7[%c0_6, %c0_7], %7 {strides = array<i32>} : memref<8x384xf32, #tpu.memory_space<vmem>>, vector<8x384xf32>,
    %c0_i32_8 = arith.constant 0 : i32
    %9 = arith.cmpi eq, %arg2, %c0_i32_8 : i32
    %10 = arith.extui %9 : i1 to i32
    %c0_i32_9 = arith.constant 0 : i32
    %11 = arith.cmpi ne, %10, %c0_i32_9 : i32
    scf.if %11 {
      %c0_10 = arith.constant 0 : index
      %c0_11 = arith.constant 0 : index
      %12 = vector.load %arg7[%c0_10, %c0_11] : memref<8x384xf32, #tpu.memory_space<vmem>>, vector<8x384xf32>
      %c0_12 = arith.constant 0 : index
      %c0_13 = arith.constant 0 : index
      %13 = vector.load %arg5[%c0_12, %c0_13] : memref<1x384xf32, #tpu.memory_space<vmem>>, vector<1x384xf32>
      %14 = vector.broadcast %13 : vector<1x384xf32> to vector<8x384xf32>
      %15 = arith.addf %12, %14 : vector<8x384xf32>
      %16 = arith.truncf %15 : vector<8x384xf32> to vector<8x384xbf16>
      %c0_14 = arith.constant 0 : index
      %c0_15 = arith.constant 0 : index
      %17 = vector.load %arg6[%c0_14, %c0_15] : memref<8x384xbf16, #tpu.memory_space<vmem>>, vector<8x384xbf16>
      tpu.vector_store %arg6[%c0_14, %c0_15], %16 {strides = array<i32>} : memref<8x384xbf16, #tpu.memory_space<vmem>>, vector<8x384xbf16>,
    } else {
    }
    return
  }
  func.func @transform_0(%arg0: i32, %arg1: i32, %arg2: i32) -> (i32, i32) {
    %c0_i32 = arith.constant 0 : i32
    return %arg0, %arg2 : i32, i32
  }
  func.func @transform_1(%arg0: i32, %arg1: i32, %arg2: i32) -> (i32, i32) {
    %c0_i32 = arith.constant 0 : i32
    return %arg2, %arg1 : i32, i32
  }
  func.func @transform_2(%arg0: i32, %arg1: i32, %arg2: i32) -> (i32, i32) {
    %c0_i32 = arith.constant 0 : i32
    %c0_i32_0 = arith.constant 0 : i32
    return %c0_i32, %arg1 : i32, i32
  }
  func.func @transform_3(%arg0: i32, %arg1: i32, %arg2: i32) -> (i32, i32) {
    %c0_i32 = arith.constant 0 : i32
    return %arg0, %arg1 : i32, i32
  }
}

module attributes {stable_mosaic.version = 11 : i64} {
  func.func @kernel(%arg0: i32, %arg1: i32, %arg2: memref<1x1x2x16xbf16, #tpu.memory_space<vmem>>, %arg3: memref<1x1x2x16xbf16, #tpu.memory_space<vmem>>, %arg4: memref<1x1x2x16xbf16, #tpu.memory_space<vmem>>, %arg5: memref<1x2x2xbf16, #tpu.memory_space<vmem>>, %arg6: memref<1x1x2x16xbf16, #tpu.memory_space<vmem>>) attributes {dimension_semantics = [#tpu.dimension_semantics<parallel>, #tpu.dimension_semantics<arbitrary>], iteration_bounds = array<i64: 2, 8>, scalar_prefetch = 0 : i64, scratch_operands = 0 : i64, tpu.core_type = #tpu.core_type<tc>, window_params = [{transform_indices = @transform_0, window_bounds = array<i64: 1, 1, 2, 16>}, {transform_indices = @transform_1, window_bounds = array<i64: 1, 1, 2, 16>}, {transform_indices = @transform_2, window_bounds = array<i64: 1, 1, 2, 16>}, {transform_indices = @transform_3, window_bounds = array<i64: 1, 2, 2>}, {transform_indices = @transform_4, window_bounds = array<i64: 1, 1, 2, 16>}]} {
    %c0 = arith.constant 0 : index
    %c0_0 = arith.constant 0 : index
    %c0_1 = arith.constant 0 : index
    %c0_2 = arith.constant 0 : index
    %0 = vector.load %arg2[%c0, %c0_0, %c0_1, %c0_2] : memref<1x1x2x16xbf16, #tpu.memory_space<vmem>>, vector<1x1x2x16xbf16>
    %1 = vector.shape_cast %0 : vector<1x1x2x16xbf16> to vector<2x16xbf16>
    %c0_3 = arith.constant 0 : index
    %c0_4 = arith.constant 0 : index
    %c0_5 = arith.constant 0 : index
    %c0_6 = arith.constant 0 : index
    %2 = vector.load %arg3[%c0_3, %c0_4, %c0_5, %c0_6] : memref<1x1x2x16xbf16, #tpu.memory_space<vmem>>, vector<1x1x2x16xbf16>
    %3 = vector.shape_cast %2 : vector<1x1x2x16xbf16> to vector<2x16xbf16>
    %c0_7 = arith.constant 0 : index
    %c0_8 = arith.constant 0 : index
    %c0_9 = arith.constant 0 : index
    %c0_10 = arith.constant 0 : index
    %4 = vector.load %arg4[%c0_7, %c0_8, %c0_9, %c0_10] : memref<1x1x2x16xbf16, #tpu.memory_space<vmem>>, vector<1x1x2x16xbf16>
    %5 = vector.shape_cast %4 : vector<1x1x2x16xbf16> to vector<2x16xbf16>
    %cst = arith.constant dense<0.000000e+00> : vector<2x2xf32>
    %6 = tpu.matmul %1, %3, %cst {dimension_numbers = #tpu.dot_dimension_numbers<[1], [1], [0], [0], [0, 0, 1, 0], [], []>} : vector<2x16xbf16>, vector<2x16xbf16>, vector<2x2xf32> -> vector<2x2xf32>
    %c0_11 = arith.constant 0 : index
    %c0_12 = arith.constant 0 : index
    %c0_13 = arith.constant 0 : index
    %7 = vector.load %arg5[%c0_11, %c0_12, %c0_13] : memref<1x2x2xbf16, #tpu.memory_space<vmem>>, vector<1x2x2xbf16>
    %8 = vector.shape_cast %7 : vector<1x2x2xbf16> to vector<2x2xbf16>
    %9 = arith.extf %8 : vector<2x2xbf16> to vector<2x2xf32>
    %10 = arith.addf %6, %9 : vector<2x2xf32>
    %cst_14 = arith.constant dense<0xFF800000> : vector<2xf32>
    %11 = vector.multi_reduction <maximumf>, %10, %cst_14 [1] : vector<2x2xf32> to vector<2xf32>
    %12 = vector.shape_cast %11 : vector<2xf32> to vector<2x1xf32>
    %13 = vector.broadcast %12 : vector<2x1xf32> to vector<2x2xf32>
    %14 = arith.subf %10, %13 : vector<2x2xf32>
    %15 = math.exp %14 : vector<2x2xf32>
    %cst_15 = arith.constant dense<0.000000e+00> : vector<2xf32>
    %16 = vector.multi_reduction <add>, %15, %cst_15 [1] : vector<2x2xf32> to vector<2xf32>
    %17 = vector.shape_cast %16 : vector<2xf32> to vector<2x1xf32>
    %18 = tpu.reciprocal %17 {approx = true} : vector<2x1xf32> -> vector<2x1xf32>
    %19 = vector.broadcast %18 : vector<2x1xf32> to vector<2x2xf32>
    %20 = arith.mulf %15, %19 : vector<2x2xf32>
    %21 = arith.truncf %20 : vector<2x2xf32> to vector<2x2xbf16>
    %cst_16 = arith.constant dense<0.000000e+00> : vector<2x16xf32>
    %22 = tpu.matmul %21, %5, %cst_16 {dimension_numbers = #tpu.dot_dimension_numbers<[1], [0], [0], [1], [0, 0, 1, 1], [], []>} : vector<2x2xbf16>, vector<2x16xbf16>, vector<2x16xf32> -> vector<2x16xf32>
    %23 = arith.truncf %22 : vector<2x16xf32> to vector<2x16xbf16>
    %c0_17 = arith.constant 0 : index
    %c0_18 = arith.constant 0 : index
    %c0_19 = arith.constant 0 : index
    %c0_20 = arith.constant 0 : index
    %24 = vector.load %arg6[%c0_17, %c0_18, %c0_19, %c0_20] : memref<1x1x2x16xbf16, #tpu.memory_space<vmem>>, vector<1x1x2x16xbf16>
    %25 = vector.shape_cast %24 : vector<1x1x2x16xbf16> to vector<2x16xbf16>
    %26 = vector.shape_cast %23 : vector<2x16xbf16> to vector<1x1x2x16xbf16>
    tpu.vector_store %arg6[%c0_17, %c0_18, %c0_19, %c0_20], %26 {strides = array<i32>} : memref<1x1x2x16xbf16, #tpu.memory_space<vmem>>, vector<1x1x2x16xbf16>,
    return
  }
  func.func @transform_0(%arg0: i32, %arg1: i32) -> (i32, i32, i32, i32) {
    %c0_i32 = arith.constant 0 : i32
    %c0_i32_0 = arith.constant 0 : i32
    %c0_i32_1 = arith.constant 0 : i32
    return %arg0, %arg1, %c0_i32, %c0_i32_0 : i32, i32, i32, i32
  }
  func.func @transform_1(%arg0: i32, %arg1: i32) -> (i32, i32, i32, i32) {
    %c0_i32 = arith.constant 0 : i32
    %c0_i32_0 = arith.constant 0 : i32
    %c0_i32_1 = arith.constant 0 : i32
    return %arg0, %arg1, %c0_i32, %c0_i32_0 : i32, i32, i32, i32
  }
  func.func @transform_2(%arg0: i32, %arg1: i32) -> (i32, i32, i32, i32) {
    %c0_i32 = arith.constant 0 : i32
    %c0_i32_0 = arith.constant 0 : i32
    %c0_i32_1 = arith.constant 0 : i32
    return %arg0, %arg1, %c0_i32, %c0_i32_0 : i32, i32, i32, i32
  }
  func.func @transform_3(%arg0: i32, %arg1: i32) -> (i32, i32, i32) {
    %c0_i32 = arith.constant 0 : i32
    %c0_i32_0 = arith.constant 0 : i32
    %c0_i32_1 = arith.constant 0 : i32
    return %arg1, %c0_i32, %c0_i32_0 : i32, i32, i32
  }
  func.func @transform_4(%arg0: i32, %arg1: i32) -> (i32, i32, i32, i32) {
    %c0_i32 = arith.constant 0 : i32
    %c0_i32_0 = arith.constant 0 : i32
    %c0_i32_1 = arith.constant 0 : i32
    return %arg0, %arg1, %c0_i32, %c0_i32_0 : i32, i32, i32, i32
  }
}

module attributes {stable_mosaic.version = 11 : i64} {
  func.func @kernel(%arg0: i32, %arg1: i32, %arg2: i32, %arg3: memref<8x128xbf16, #tpu.memory_space<vmem>>, %arg4: memref<128x128xbf16, #tpu.memory_space<vmem>>, %arg5: memref<1x128xf32, #tpu.memory_space<vmem>>, %arg6: memref<8x128xbf16, #tpu.memory_space<vmem>>, %arg7: memref<8x128xf32, #tpu.memory_space<vmem>>) attributes {dimension_semantics = [#tpu.dimension_semantics<parallel>, #tpu.dimension_semantics<parallel>, #tpu.dimension_semantics<arbitrary>], iteration_bounds = array<i64: 1, 1, 1>, scalar_prefetch = 0 : i64, scratch_operands = 1 : i64, tpu.core_type = #tpu.core_type<tc>, window_params = [{transform_indices = @transform_0, window_bounds = array<i64: 8, 128>}, {transform_indices = @transform_1, window_bounds = array<i64: 128, 128>}, {transform_indices = @transform_2, window_bounds = array<i64: 1, 128>}, {transform_indices = @transform_3, window_bounds = array<i64: 8, 128>}]} {
    %c0_i32 = arith.constant 0 : i32
    %0 = arith.cmpi eq, %arg2, %c0_i32 : i32
    %1 = arith.extui %0 : i1 to i32
    %c0_i32_0 = arith.constant 0 : i32
    %2 = arith.cmpi ne, %1, %c0_i32_0 : i32
    scf.if %2 {
      %cst_10 = arith.constant 0.000000e+00 : f32
      %12 = vector.broadcast %cst_10 : f32 to vector<8x128xf32>
      %c0_11 = arith.constant 0 : index
      %c0_12 = arith.constant 0 : index
      %13 = vector.load %arg7[%c0_11, %c0_12] : memref<8x128xf32, #tpu.memory_space<vmem>>, vector<8x128xf32>
      tpu.vector_store %arg7[%c0_11, %c0_12], %12 {strides = array<i32>} : memref<8x128xf32, #tpu.memory_space<vmem>>, vector<8x128xf32>,
    } else {
    }
    %c0 = arith.constant 0 : index
    %c0_1 = arith.constant 0 : index
    %3 = vector.load %arg7[%c0, %c0_1] : memref<8x128xf32, #tpu.memory_space<vmem>>, vector<8x128xf32>
    %c0_2 = arith.constant 0 : index
    %c0_3 = arith.constant 0 : index
    %4 = vector.load %arg3[%c0_2, %c0_3] : memref<8x128xbf16, #tpu.memory_space<vmem>>, vector<8x128xbf16>
    %c0_4 = arith.constant 0 : index
    %c0_5 = arith.constant 0 : index
    %5 = vector.load %arg4[%c0_4, %c0_5] : memref<128x128xbf16, #tpu.memory_space<vmem>>, vector<128x128xbf16>
    %cst = arith.constant dense<0.000000e+00> : vector<8x128xf32>
    %6 = tpu.matmul %4, %5, %cst {dimension_numbers = #tpu.dot_dimension_numbers<[1], [0], [0], [1], [0, 0, 1, 1], [], []>} : vector<8x128xbf16>, vector<128x128xbf16>, vector<8x128xf32> -> vector<8x128xf32>
    %7 = arith.addf %3, %6 : vector<8x128xf32>
    %c0_6 = arith.constant 0 : index
    %c0_7 = arith.constant 0 : index
    %8 = vector.load %arg7[%c0_6, %c0_7] : memref<8x128xf32, #tpu.memory_space<vmem>>, vector<8x128xf32>
    tpu.vector_store %arg7[%c0_6, %c0_7], %7 {strides = array<i32>} : memref<8x128xf32, #tpu.memory_space<vmem>>, vector<8x128xf32>,
    %c0_i32_8 = arith.constant 0 : i32
    %9 = arith.cmpi eq, %arg2, %c0_i32_8 : i32
    %10 = arith.extui %9 : i1 to i32
    %c0_i32_9 = arith.constant 0 : i32
    %11 = arith.cmpi ne, %10, %c0_i32_9 : i32
    scf.if %11 {
      %c0_10 = arith.constant 0 : index
      %c0_11 = arith.constant 0 : index
      %12 = vector.load %arg7[%c0_10, %c0_11] : memref<8x128xf32, #tpu.memory_space<vmem>>, vector<8x128xf32>
      %c0_12 = arith.constant 0 : index
      %c0_13 = arith.constant 0 : index
      %13 = vector.load %arg5[%c0_12, %c0_13] : memref<1x128xf32, #tpu.memory_space<vmem>>, vector<1x128xf32>
      %14 = vector.broadcast %13 : vector<1x128xf32> to vector<8x128xf32>
      %15 = arith.addf %12, %14 : vector<8x128xf32>
      %16 = arith.truncf %15 : vector<8x128xf32> to vector<8x128xbf16>
      %c0_14 = arith.constant 0 : index
      %c0_15 = arith.constant 0 : index
      %17 = vector.load %arg6[%c0_14, %c0_15] : memref<8x128xbf16, #tpu.memory_space<vmem>>, vector<8x128xbf16>
      tpu.vector_store %arg6[%c0_14, %c0_15], %16 {strides = array<i32>} : memref<8x128xbf16, #tpu.memory_space<vmem>>, vector<8x128xbf16>,
    } else {
    }
    return
  }
  func.func @transform_0(%arg0: i32, %arg1: i32, %arg2: i32) -> (i32, i32) {
    %c0_i32 = arith.constant 0 : i32
    return %arg0, %arg2 : i32, i32
  }
  func.func @transform_1(%arg0: i32, %arg1: i32, %arg2: i32) -> (i32, i32) {
    %c0_i32 = arith.constant 0 : i32
    return %arg2, %arg1 : i32, i32
  }
  func.func @transform_2(%arg0: i32, %arg1: i32, %arg2: i32) -> (i32, i32) {
    %c0_i32 = arith.constant 0 : i32
    %c0_i32_0 = arith.constant 0 : i32
    return %c0_i32, %arg1 : i32, i32
  }
  func.func @transform_3(%arg0: i32, %arg1: i32, %arg2: i32) -> (i32, i32) {
    %c0_i32 = arith.constant 0 : i32
    return %arg0, %arg1 : i32, i32
  }
}

module attributes {stable_mosaic.version = 11 : i64} {
  func.func @kernel(%arg0: i32, %arg1: i32, %arg2: i32, %arg3: memref<8x128xbf16, #tpu.memory_space<vmem>>, %arg4: memref<128x512xbf16, #tpu.memory_space<vmem>>, %arg5: memref<1x512xf32, #tpu.memory_space<vmem>>, %arg6: memref<8x512xbf16, #tpu.memory_space<vmem>>, %arg7: memref<8x512xf32, #tpu.memory_space<vmem>>) attributes {dimension_semantics = [#tpu.dimension_semantics<parallel>, #tpu.dimension_semantics<parallel>, #tpu.dimension_semantics<arbitrary>], iteration_bounds = array<i64: 1, 1, 1>, scalar_prefetch = 0 : i64, scratch_operands = 1 : i64, tpu.core_type = #tpu.core_type<tc>, window_params = [{transform_indices = @transform_0, window_bounds = array<i64: 8, 128>}, {transform_indices = @transform_1, window_bounds = array<i64: 128, 512>}, {transform_indices = @transform_2, window_bounds = array<i64: 1, 512>}, {transform_indices = @transform_3, window_bounds = array<i64: 8, 512>}]} {
    %c0_i32 = arith.constant 0 : i32
    %0 = arith.cmpi eq, %arg2, %c0_i32 : i32
    %1 = arith.extui %0 : i1 to i32
    %c0_i32_0 = arith.constant 0 : i32
    %2 = arith.cmpi ne, %1, %c0_i32_0 : i32
    scf.if %2 {
      %cst_10 = arith.constant 0.000000e+00 : f32
      %12 = vector.broadcast %cst_10 : f32 to vector<8x512xf32>
      %c0_11 = arith.constant 0 : index
      %c0_12 = arith.constant 0 : index
      %13 = vector.load %arg7[%c0_11, %c0_12] : memref<8x512xf32, #tpu.memory_space<vmem>>, vector<8x512xf32>
      tpu.vector_store %arg7[%c0_11, %c0_12], %12 {strides = array<i32>} : memref<8x512xf32, #tpu.memory_space<vmem>>, vector<8x512xf32>,
    } else {
    }
    %c0 = arith.constant 0 : index
    %c0_1 = arith.constant 0 : index
    %3 = vector.load %arg7[%c0, %c0_1] : memref<8x512xf32, #tpu.memory_space<vmem>>, vector<8x512xf32>
    %c0_2 = arith.constant 0 : index
    %c0_3 = arith.constant 0 : index
    %4 = vector.load %arg3[%c0_2, %c0_3] : memref<8x128xbf16, #tpu.memory_space<vmem>>, vector<8x128xbf16>
    %c0_4 = arith.constant 0 : index
    %c0_5 = arith.constant 0 : index
    %5 = vector.load %arg4[%c0_4, %c0_5] : memref<128x512xbf16, #tpu.memory_space<vmem>>, vector<128x512xbf16>
    %cst = arith.constant dense<0.000000e+00> : vector<8x512xf32>
    %6 = tpu.matmul %4, %5, %cst {dimension_numbers = #tpu.dot_dimension_numbers<[1], [0], [0], [1], [0, 0, 1, 1], [], []>} : vector<8x128xbf16>, vector<128x512xbf16>, vector<8x512xf32> -> vector<8x512xf32>
    %7 = arith.addf %3, %6 : vector<8x512xf32>
    %c0_6 = arith.constant 0 : index
    %c0_7 = arith.constant 0 : index
    %8 = vector.load %arg7[%c0_6, %c0_7] : memref<8x512xf32, #tpu.memory_space<vmem>>, vector<8x512xf32>
    tpu.vector_store %arg7[%c0_6, %c0_7], %7 {strides = array<i32>} : memref<8x512xf32, #tpu.memory_space<vmem>>, vector<8x512xf32>,
    %c0_i32_8 = arith.constant 0 : i32
    %9 = arith.cmpi eq, %arg2, %c0_i32_8 : i32
    %10 = arith.extui %9 : i1 to i32
    %c0_i32_9 = arith.constant 0 : i32
    %11 = arith.cmpi ne, %10, %c0_i32_9 : i32
    scf.if %11 {
      %c0_10 = arith.constant 0 : index
      %c0_11 = arith.constant 0 : index
      %12 = vector.load %arg7[%c0_10, %c0_11] : memref<8x512xf32, #tpu.memory_space<vmem>>, vector<8x512xf32>
      %c0_12 = arith.constant 0 : index
      %c0_13 = arith.constant 0 : index
      %13 = vector.load %arg5[%c0_12, %c0_13] : memref<1x512xf32, #tpu.memory_space<vmem>>, vector<1x512xf32>
      %14 = vector.broadcast %13 : vector<1x512xf32> to vector<8x512xf32>
      %15 = arith.addf %12, %14 : vector<8x512xf32>
      %cst_14 = arith.constant 5.000000e-01 : f32
      %16 = vector.broadcast %cst_14 : f32 to vector<8x512xf32>
      %17 = arith.mulf %16, %15 : vector<8x512xf32>
      %cst_15 = arith.constant 4.471500e-02 : f32
      %18 = vector.broadcast %cst_15 : f32 to vector<8x512xf32>
      %19 = arith.mulf %18, %15 : vector<8x512xf32>
      %20 = arith.mulf %19, %15 : vector<8x512xf32>
      %21 = arith.mulf %20, %15 : vector<8x512xf32>
      %22 = arith.addf %15, %21 : vector<8x512xf32>
      %cst_16 = arith.constant 0.797884583 : f32
      %23 = vector.broadcast %cst_16 : f32 to vector<8x512xf32>
      %24 = arith.mulf %23, %22 : vector<8x512xf32>
      %25 = math.tanh %24 : vector<8x512xf32>
      %cst_17 = arith.constant 1.000000e+00 : f32
      %26 = vector.broadcast %cst_17 : f32 to vector<8x512xf32>
      %27 = arith.addf %26, %25 : vector<8x512xf32>
      %28 = arith.mulf %17, %27 : vector<8x512xf32>
      %29 = arith.truncf %28 : vector<8x512xf32> to vector<8x512xbf16>
      %c0_18 = arith.constant 0 : index
      %c0_19 = arith.constant 0 : index
      %30 = vector.load %arg6[%c0_18, %c0_19] : memref<8x512xbf16, #tpu.memory_space<vmem>>, vector<8x512xbf16>
      tpu.vector_store %arg6[%c0_18, %c0_19], %29 {strides = array<i32>} : memref<8x512xbf16, #tpu.memory_space<vmem>>, vector<8x512xbf16>,
    } else {
    }
    return
  }
  func.func @transform_0(%arg0: i32, %arg1: i32, %arg2: i32) -> (i32, i32) {
    %c0_i32 = arith.constant 0 : i32
    return %arg0, %arg2 : i32, i32
  }
  func.func @transform_1(%arg0: i32, %arg1: i32, %arg2: i32) -> (i32, i32) {
    %c0_i32 = arith.constant 0 : i32
    return %arg2, %arg1 : i32, i32
  }
  func.func @transform_2(%arg0: i32, %arg1: i32, %arg2: i32) -> (i32, i32) {
    %c0_i32 = arith.constant 0 : i32
    %c0_i32_0 = arith.constant 0 : i32
    return %c0_i32, %arg1 : i32, i32
  }
  func.func @transform_3(%arg0: i32, %arg1: i32, %arg2: i32) -> (i32, i32) {
    %c0_i32 = arith.constant 0 : i32
    return %arg0, %arg1 : i32, i32
  }
}

module attributes {stable_mosaic.version = 11 : i64} {
  func.func @kernel(%arg0: i32, %arg1: memref<8x512xbf16, #tpu.memory_space<vmem>>, %arg2: memref<1x512xf32, #tpu.memory_space<vmem>>, %arg3: memref<1x512xf32, #tpu.memory_space<vmem>>, %arg4: memref<8x512xbf16, #tpu.memory_space<vmem>>) attributes {dimension_semantics = [#tpu.dimension_semantics<parallel>], iteration_bounds = array<i64: 1>, scalar_prefetch = 0 : i64, scratch_operands = 0 : i64, tpu.core_type = #tpu.core_type<tc>, window_params = [{transform_indices = @transform_0, window_bounds = array<i64: 8, 512>}, {pipeline_mode = #tpu.pipeline_mode<synchronous>, transform_indices = @transform_1, window_bounds = array<i64: 1, 512>}, {pipeline_mode = #tpu.pipeline_mode<synchronous>, transform_indices = @transform_2, window_bounds = array<i64: 1, 512>}, {transform_indices = @transform_3, window_bounds = array<i64: 8, 512>}]} {
    %c0 = arith.constant 0 : index
    %c0_0 = arith.constant 0 : index
    %0 = vector.load %arg1[%c0, %c0_0] : memref<8x512xbf16, #tpu.memory_space<vmem>>, vector<8x512xbf16>
    %1 = arith.extf %0 : vector<8x512xbf16> to vector<8x512xf32>
    %cst = arith.constant dense<0.000000e+00> : vector<8xf32>
    %2 = vector.multi_reduction <add>, %1, %cst [1] : vector<8x512xf32> to vector<8xf32>
    %3 = vector.shape_cast %2 : vector<8xf32> to vector<8x1xf32>
    %cst_1 = arith.constant 5.120000e+02 : f32
    %4 = vector.broadcast %cst_1 : f32 to vector<8x1xf32>
    %5 = arith.divf %3, %4 : vector<8x1xf32>
    %6 = vector.broadcast %5 : vector<8x1xf32> to vector<8x512xf32>
    %7 = arith.subf %1, %6 : vector<8x512xf32>
    %8 = arith.mulf %7, %7 : vector<8x512xf32>
    %cst_2 = arith.constant dense<0.000000e+00> : vector<8xf32>
    %9 = vector.multi_reduction <add>, %8, %cst_2 [1] : vector<8x512xf32> to vector<8xf32>
    %10 = vector.shape_cast %9 : vector<8xf32> to vector<8x1xf32>
    %cst_3 = arith.constant 5.120000e+02 : f32
    %11 = vector.broadcast %cst_3 : f32 to vector<8x1xf32>
    %12 = arith.divf %10, %11 : vector<8x1xf32>
    %cst_4 = arith.constant 9.99999974E-6 : f32
    %13 = vector.broadcast %cst_4 : f32 to vector<8x1xf32>
    %14 = arith.addf %12, %13 : vector<8x1xf32>
    %15 = math.rsqrt %14 : vector<8x1xf32>
    %16 = vector.broadcast %15 : vector<8x1xf32> to vector<8x512xf32>
    %17 = arith.mulf %7, %16 : vector<8x512xf32>
    %c0_5 = arith.constant 0 : index
    %c0_6 = arith.constant 0 : index
    %18 = vector.load %arg2[%c0_5, %c0_6] : memref<1x512xf32, #tpu.memory_space<vmem>>, vector<1x512xf32>
    %19 = vector.broadcast %18 : vector<1x512xf32> to vector<8x512xf32>
    %20 = arith.mulf %17, %19 : vector<8x512xf32>
    %c0_7 = arith.constant 0 : index
    %c0_8 = arith.constant 0 : index
    %21 = vector.load %arg3[%c0_7, %c0_8] : memref<1x512xf32, #tpu.memory_space<vmem>>, vector<1x512xf32>
    %22 = vector.broadcast %21 : vector<1x512xf32> to vector<8x512xf32>
    %23 = arith.addf %20, %22 : vector<8x512xf32>
    %24 = arith.truncf %23 : vector<8x512xf32> to vector<8x512xbf16>
    %c0_9 = arith.constant 0 : index
    %c0_10 = arith.constant 0 : index
    %25 = vector.load %arg4[%c0_9, %c0_10] : memref<8x512xbf16, #tpu.memory_space<vmem>>, vector<8x512xbf16>
    tpu.vector_store %arg4[%c0_9, %c0_10], %24 {strides = array<i32>} : memref<8x512xbf16, #tpu.memory_space<vmem>>, vector<8x512xbf16>,
    return
  }
  func.func @transform_0(%arg0: i32) -> (i32, i32) {
    %c0_i32 = arith.constant 0 : i32
    %c0_i32_0 = arith.constant 0 : i32
    return %arg0, %c0_i32 : i32, i32
  }
  func.func @transform_1(%arg0: i32) -> (i32, i32) {
    %c0_i32 = arith.constant 0 : i32
    %c0_i32_0 = arith.constant 0 : i32
    %c0_i32_1 = arith.constant 0 : i32
    return %c0_i32, %c0_i32_0 : i32, i32
  }
  func.func @transform_2(%arg0: i32) -> (i32, i32) {
    %c0_i32 = arith.constant 0 : i32
    %c0_i32_0 = arith.constant 0 : i32
    %c0_i32_1 = arith.constant 0 : i32
    return %c0_i32, %c0_i32_0 : i32, i32
  }
  func.func @transform_3(%arg0: i32) -> (i32, i32) {
    %c0_i32 = arith.constant 0 : i32
    %c0_i32_0 = arith.constant 0 : i32
    return %arg0, %c0_i32 : i32, i32
  }
}

module attributes {stable_mosaic.version = 11 : i64} {
  func.func @kernel(%arg0: i32, %arg1: i32, %arg2: i32, %arg3: memref<8x512xbf16, #tpu.memory_space<vmem>>, %arg4: memref<512x128xbf16, #tpu.memory_space<vmem>>, %arg5: memref<1x128xf32, #tpu.memory_space<vmem>>, %arg6: memref<8x128xbf16, #tpu.memory_space<vmem>>, %arg7: memref<8x128xf32, #tpu.memory_space<vmem>>) attributes {dimension_semantics = [#tpu.dimension_semantics<parallel>, #tpu.dimension_semantics<parallel>, #tpu.dimension_semantics<arbitrary>], iteration_bounds = array<i64: 1, 1, 1>, scalar_prefetch = 0 : i64, scratch_operands = 1 : i64, tpu.core_type = #tpu.core_type<tc>, window_params = [{transform_indices = @transform_0, window_bounds = array<i64: 8, 512>}, {transform_indices = @transform_1, window_bounds = array<i64: 512, 128>}, {transform_indices = @transform_2, window_bounds = array<i64: 1, 128>}, {transform_indices = @transform_3, window_bounds = array<i64: 8, 128>}]} {
    %c0_i32 = arith.constant 0 : i32
    %0 = arith.cmpi eq, %arg2, %c0_i32 : i32
    %1 = arith.extui %0 : i1 to i32
    %c0_i32_0 = arith.constant 0 : i32
    %2 = arith.cmpi ne, %1, %c0_i32_0 : i32
    scf.if %2 {
      %cst_10 = arith.constant 0.000000e+00 : f32
      %12 = vector.broadcast %cst_10 : f32 to vector<8x128xf32>
      %c0_11 = arith.constant 0 : index
      %c0_12 = arith.constant 0 : index
      %13 = vector.load %arg7[%c0_11, %c0_12] : memref<8x128xf32, #tpu.memory_space<vmem>>, vector<8x128xf32>
      tpu.vector_store %arg7[%c0_11, %c0_12], %12 {strides = array<i32>} : memref<8x128xf32, #tpu.memory_space<vmem>>, vector<8x128xf32>,
    } else {
    }
    %c0 = arith.constant 0 : index
    %c0_1 = arith.constant 0 : index
    %3 = vector.load %arg7[%c0, %c0_1] : memref<8x128xf32, #tpu.memory_space<vmem>>, vector<8x128xf32>
    %c0_2 = arith.constant 0 : index
    %c0_3 = arith.constant 0 : index
    %4 = vector.load %arg3[%c0_2, %c0_3] : memref<8x512xbf16, #tpu.memory_space<vmem>>, vector<8x512xbf16>
    %c0_4 = arith.constant 0 : index
    %c0_5 = arith.constant 0 : index
    %5 = vector.load %arg4[%c0_4, %c0_5] : memref<512x128xbf16, #tpu.memory_space<vmem>>, vector<512x128xbf16>
    %cst = arith.constant dense<0.000000e+00> : vector<8x128xf32>
    %6 = tpu.matmul %4, %5, %cst {dimension_numbers = #tpu.dot_dimension_numbers<[1], [0], [0], [1], [0, 0, 1, 1], [], []>} : vector<8x512xbf16>, vector<512x128xbf16>, vector<8x128xf32> -> vector<8x128xf32>
    %7 = arith.addf %3, %6 : vector<8x128xf32>
    %c0_6 = arith.constant 0 : index
    %c0_7 = arith.constant 0 : index
    %8 = vector.load %arg7[%c0_6, %c0_7] : memref<8x128xf32, #tpu.memory_space<vmem>>, vector<8x128xf32>
    tpu.vector_store %arg7[%c0_6, %c0_7], %7 {strides = array<i32>} : memref<8x128xf32, #tpu.memory_space<vmem>>, vector<8x128xf32>,
    %c0_i32_8 = arith.constant 0 : i32
    %9 = arith.cmpi eq, %arg2, %c0_i32_8 : i32
    %10 = arith.extui %9 : i1 to i32
    %c0_i32_9 = arith.constant 0 : i32
    %11 = arith.cmpi ne, %10, %c0_i32_9 : i32
    scf.if %11 {
      %c0_10 = arith.constant 0 : index
      %c0_11 = arith.constant 0 : index
      %12 = vector.load %arg7[%c0_10, %c0_11] : memref<8x128xf32, #tpu.memory_space<vmem>>, vector<8x128xf32>
      %c0_12 = arith.constant 0 : index
      %c0_13 = arith.constant 0 : index
      %13 = vector.load %arg5[%c0_12, %c0_13] : memref<1x128xf32, #tpu.memory_space<vmem>>, vector<1x128xf32>
      %14 = vector.broadcast %13 : vector<1x128xf32> to vector<8x128xf32>
      %15 = arith.addf %12, %14 : vector<8x128xf32>
      %16 = arith.truncf %15 : vector<8x128xf32> to vector<8x128xbf16>
      %c0_14 = arith.constant 0 : index
      %c0_15 = arith.constant 0 : index
      %17 = vector.load %arg6[%c0_14, %c0_15] : memref<8x128xbf16, #tpu.memory_space<vmem>>, vector<8x128xbf16>
      tpu.vector_store %arg6[%c0_14, %c0_15], %16 {strides = array<i32>} : memref<8x128xbf16, #tpu.memory_space<vmem>>, vector<8x128xbf16>,
    } else {
    }
    return
  }
  func.func @transform_0(%arg0: i32, %arg1: i32, %arg2: i32) -> (i32, i32) {
    %c0_i32 = arith.constant 0 : i32
    return %arg0, %arg2 : i32, i32
  }
  func.func @transform_1(%arg0: i32, %arg1: i32, %arg2: i32) -> (i32, i32) {
    %c0_i32 = arith.constant 0 : i32
    return %arg2, %arg1 : i32, i32
  }
  func.func @transform_2(%arg0: i32, %arg1: i32, %arg2: i32) -> (i32, i32) {
    %c0_i32 = arith.constant 0 : i32
    %c0_i32_0 = arith.constant 0 : i32
    return %c0_i32, %arg1 : i32, i32
  }
  func.func @transform_3(%arg0: i32, %arg1: i32, %arg2: i32) -> (i32, i32) {
    %c0_i32 = arith.constant 0 : i32
    return %arg0, %arg1 : i32, i32
  }
}

module attributes {stable_mosaic.version = 11 : i64} {
  func.func @kernel(%arg0: i32, %arg1: i32, %arg2: i32, %arg3: memref<8x512xbf16, #tpu.memory_space<vmem>>, %arg4: memref<512x256xbf16, #tpu.memory_space<vmem>>, %arg5: memref<1x256xf32, #tpu.memory_space<vmem>>, %arg6: memref<8x256xbf16, #tpu.memory_space<vmem>>, %arg7: memref<8x256xf32, #tpu.memory_space<vmem>>) attributes {dimension_semantics = [#tpu.dimension_semantics<parallel>, #tpu.dimension_semantics<parallel>, #tpu.dimension_semantics<arbitrary>], iteration_bounds = array<i64: 1, 1, 1>, scalar_prefetch = 0 : i64, scratch_operands = 1 : i64, tpu.core_type = #tpu.core_type<tc>, window_params = [{transform_indices = @transform_0, window_bounds = array<i64: 8, 512>}, {transform_indices = @transform_1, window_bounds = array<i64: 512, 256>}, {transform_indices = @transform_2, window_bounds = array<i64: 1, 256>}, {transform_indices = @transform_3, window_bounds = array<i64: 8, 256>}]} {
    %c0_i32 = arith.constant 0 : i32
    %0 = arith.cmpi eq, %arg2, %c0_i32 : i32
    %1 = arith.extui %0 : i1 to i32
    %c0_i32_0 = arith.constant 0 : i32
    %2 = arith.cmpi ne, %1, %c0_i32_0 : i32
    scf.if %2 {
      %cst_10 = arith.constant 0.000000e+00 : f32
      %12 = vector.broadcast %cst_10 : f32 to vector<8x256xf32>
      %c0_11 = arith.constant 0 : index
      %c0_12 = arith.constant 0 : index
      %13 = vector.load %arg7[%c0_11, %c0_12] : memref<8x256xf32, #tpu.memory_space<vmem>>, vector<8x256xf32>
      tpu.vector_store %arg7[%c0_11, %c0_12], %12 {strides = array<i32>} : memref<8x256xf32, #tpu.memory_space<vmem>>, vector<8x256xf32>,
    } else {
    }
    %c0 = arith.constant 0 : index
    %c0_1 = arith.constant 0 : index
    %3 = vector.load %arg7[%c0, %c0_1] : memref<8x256xf32, #tpu.memory_space<vmem>>, vector<8x256xf32>
    %c0_2 = arith.constant 0 : index
    %c0_3 = arith.constant 0 : index
    %4 = vector.load %arg3[%c0_2, %c0_3] : memref<8x512xbf16, #tpu.memory_space<vmem>>, vector<8x512xbf16>
    %c0_4 = arith.constant 0 : index
    %c0_5 = arith.constant 0 : index
    %5 = vector.load %arg4[%c0_4, %c0_5] : memref<512x256xbf16, #tpu.memory_space<vmem>>, vector<512x256xbf16>
    %cst = arith.constant dense<0.000000e+00> : vector<8x256xf32>
    %6 = tpu.matmul %4, %5, %cst {dimension_numbers = #tpu.dot_dimension_numbers<[1], [0], [0], [1], [0, 0, 1, 1], [], []>} : vector<8x512xbf16>, vector<512x256xbf16>, vector<8x256xf32> -> vector<8x256xf32>
    %7 = arith.addf %3, %6 : vector<8x256xf32>
    %c0_6 = arith.constant 0 : index
    %c0_7 = arith.constant 0 : index
    %8 = vector.load %arg7[%c0_6, %c0_7] : memref<8x256xf32, #tpu.memory_space<vmem>>, vector<8x256xf32>
    tpu.vector_store %arg7[%c0_6, %c0_7], %7 {strides = array<i32>} : memref<8x256xf32, #tpu.memory_space<vmem>>, vector<8x256xf32>,
    %c0_i32_8 = arith.constant 0 : i32
    %9 = arith.cmpi eq, %arg2, %c0_i32_8 : i32
    %10 = arith.extui %9 : i1 to i32
    %c0_i32_9 = arith.constant 0 : i32
    %11 = arith.cmpi ne, %10, %c0_i32_9 : i32
    scf.if %11 {
      %c0_10 = arith.constant 0 : index
      %c0_11 = arith.constant 0 : index
      %12 = vector.load %arg7[%c0_10, %c0_11] : memref<8x256xf32, #tpu.memory_space<vmem>>, vector<8x256xf32>
      %c0_12 = arith.constant 0 : index
      %c0_13 = arith.constant 0 : index
      %13 = vector.load %arg5[%c0_12, %c0_13] : memref<1x256xf32, #tpu.memory_space<vmem>>, vector<1x256xf32>
      %14 = vector.broadcast %13 : vector<1x256xf32> to vector<8x256xf32>
      %15 = arith.addf %12, %14 : vector<8x256xf32>
      %16 = arith.truncf %15 : vector<8x256xf32> to vector<8x256xbf16>
      %c0_14 = arith.constant 0 : index
      %c0_15 = arith.constant 0 : index
      %17 = vector.load %arg6[%c0_14, %c0_15] : memref<8x256xbf16, #tpu.memory_space<vmem>>, vector<8x256xbf16>
      tpu.vector_store %arg6[%c0_14, %c0_15], %16 {strides = array<i32>} : memref<8x256xbf16, #tpu.memory_space<vmem>>, vector<8x256xbf16>,
    } else {
    }
    return
  }
  func.func @transform_0(%arg0: i32, %arg1: i32, %arg2: i32) -> (i32, i32) {
    %c0_i32 = arith.constant 0 : i32
    return %arg0, %arg2 : i32, i32
  }
  func.func @transform_1(%arg0: i32, %arg1: i32, %arg2: i32) -> (i32, i32) {
    %c0_i32 = arith.constant 0 : i32
    return %arg2, %arg1 : i32, i32
  }
  func.func @transform_2(%arg0: i32, %arg1: i32, %arg2: i32) -> (i32, i32) {
    %c0_i32 = arith.constant 0 : i32
    %c0_i32_0 = arith.constant 0 : i32
    return %c0_i32, %arg1 : i32, i32
  }
  func.func @transform_3(%arg0: i32, %arg1: i32, %arg2: i32) -> (i32, i32) {
    %c0_i32 = arith.constant 0 : i32
    return %arg0, %arg1 : i32, i32
  }
}

module attributes {stable_mosaic.version = 11 : i64} {
  func.func @kernel(%arg0: i32, %arg1: i32, %arg2: i32, %arg3: memref<8x256xbf16, #tpu.memory_space<vmem>>, %arg4: memref<256x512xbf16, #tpu.memory_space<vmem>>, %arg5: memref<1x512xf32, #tpu.memory_space<vmem>>, %arg6: memref<8x512xbf16, #tpu.memory_space<vmem>>, %arg7: memref<8x512xf32, #tpu.memory_space<vmem>>) attributes {dimension_semantics = [#tpu.dimension_semantics<parallel>, #tpu.dimension_semantics<parallel>, #tpu.dimension_semantics<arbitrary>], iteration_bounds = array<i64: 1, 2, 1>, scalar_prefetch = 0 : i64, scratch_operands = 1 : i64, tpu.core_type = #tpu.core_type<tc>, window_params = [{transform_indices = @transform_0, window_bounds = array<i64: 8, 256>}, {transform_indices = @transform_1, window_bounds = array<i64: 256, 512>}, {transform_indices = @transform_2, window_bounds = array<i64: 1, 512>}, {transform_indices = @transform_3, window_bounds = array<i64: 8, 512>}]} {
    %c0_i32 = arith.constant 0 : i32
    %0 = arith.cmpi eq, %arg2, %c0_i32 : i32
    %1 = arith.extui %0 : i1 to i32
    %c0_i32_0 = arith.constant 0 : i32
    %2 = arith.cmpi ne, %1, %c0_i32_0 : i32
    scf.if %2 {
      %cst_10 = arith.constant 0.000000e+00 : f32
      %12 = vector.broadcast %cst_10 : f32 to vector<8x512xf32>
      %c0_11 = arith.constant 0 : index
      %c0_12 = arith.constant 0 : index
      %13 = vector.load %arg7[%c0_11, %c0_12] : memref<8x512xf32, #tpu.memory_space<vmem>>, vector<8x512xf32>
      tpu.vector_store %arg7[%c0_11, %c0_12], %12 {strides = array<i32>} : memref<8x512xf32, #tpu.memory_space<vmem>>, vector<8x512xf32>,
    } else {
    }
    %c0 = arith.constant 0 : index
    %c0_1 = arith.constant 0 : index
    %3 = vector.load %arg7[%c0, %c0_1] : memref<8x512xf32, #tpu.memory_space<vmem>>, vector<8x512xf32>
    %c0_2 = arith.constant 0 : index
    %c0_3 = arith.constant 0 : index
    %4 = vector.load %arg3[%c0_2, %c0_3] : memref<8x256xbf16, #tpu.memory_space<vmem>>, vector<8x256xbf16>
    %c0_4 = arith.constant 0 : index
    %c0_5 = arith.constant 0 : index
    %5 = vector.load %arg4[%c0_4, %c0_5] : memref<256x512xbf16, #tpu.memory_space<vmem>>, vector<256x512xbf16>
    %cst = arith.constant dense<0.000000e+00> : vector<8x512xf32>
    %6 = tpu.matmul %4, %5, %cst {dimension_numbers = #tpu.dot_dimension_numbers<[1], [0], [0], [1], [0, 0, 1, 1], [], []>} : vector<8x256xbf16>, vector<256x512xbf16>, vector<8x512xf32> -> vector<8x512xf32>
    %7 = arith.addf %3, %6 : vector<8x512xf32>
    %c0_6 = arith.constant 0 : index
    %c0_7 = arith.constant 0 : index
    %8 = vector.load %arg7[%c0_6, %c0_7] : memref<8x512xf32, #tpu.memory_space<vmem>>, vector<8x512xf32>
    tpu.vector_store %arg7[%c0_6, %c0_7], %7 {strides = array<i32>} : memref<8x512xf32, #tpu.memory_space<vmem>>, vector<8x512xf32>,
    %c0_i32_8 = arith.constant 0 : i32
    %9 = arith.cmpi eq, %arg2, %c0_i32_8 : i32
    %10 = arith.extui %9 : i1 to i32
    %c0_i32_9 = arith.constant 0 : i32
    %11 = arith.cmpi ne, %10, %c0_i32_9 : i32
    scf.if %11 {
      %c0_10 = arith.constant 0 : index
      %c0_11 = arith.constant 0 : index
      %12 = vector.load %arg7[%c0_10, %c0_11] : memref<8x512xf32, #tpu.memory_space<vmem>>, vector<8x512xf32>
      %c0_12 = arith.constant 0 : index
      %c0_13 = arith.constant 0 : index
      %13 = vector.load %arg5[%c0_12, %c0_13] : memref<1x512xf32, #tpu.memory_space<vmem>>, vector<1x512xf32>
      %14 = vector.broadcast %13 : vector<1x512xf32> to vector<8x512xf32>
      %15 = arith.addf %12, %14 : vector<8x512xf32>
      %16 = arith.truncf %15 : vector<8x512xf32> to vector<8x512xbf16>
      %c0_14 = arith.constant 0 : index
      %c0_15 = arith.constant 0 : index
      %17 = vector.load %arg6[%c0_14, %c0_15] : memref<8x512xbf16, #tpu.memory_space<vmem>>, vector<8x512xbf16>
      tpu.vector_store %arg6[%c0_14, %c0_15], %16 {strides = array<i32>} : memref<8x512xbf16, #tpu.memory_space<vmem>>, vector<8x512xbf16>,
    } else {
    }
    return
  }
  func.func @transform_0(%arg0: i32, %arg1: i32, %arg2: i32) -> (i32, i32) {
    %c0_i32 = arith.constant 0 : i32
    return %arg0, %arg2 : i32, i32
  }
  func.func @transform_1(%arg0: i32, %arg1: i32, %arg2: i32) -> (i32, i32) {
    %c0_i32 = arith.constant 0 : i32
    return %arg2, %arg1 : i32, i32
  }
  func.func @transform_2(%arg0: i32, %arg1: i32, %arg2: i32) -> (i32, i32) {
    %c0_i32 = arith.constant 0 : i32
    %c0_i32_0 = arith.constant 0 : i32
    return %c0_i32, %arg1 : i32, i32
  }
  func.func @transform_3(%arg0: i32, %arg1: i32, %arg2: i32) -> (i32, i32) {
    %c0_i32 = arith.constant 0 : i32
    return %arg0, %arg1 : i32, i32
  }
}

module attributes {stable_mosaic.version = 11 : i64} {
  func.func @kernel(%arg0: i32, %arg1: i32, %arg2: memref<1x1x2x16xbf16, #tpu.memory_space<vmem>>, %arg3: memref<1x1x2x16xbf16, #tpu.memory_space<vmem>>, %arg4: memref<1x1x2x16xbf16, #tpu.memory_space<vmem>>, %arg5: memref<1x2x2xbf16, #tpu.memory_space<vmem>>, %arg6: memref<1x1x2x16xbf16, #tpu.memory_space<vmem>>) attributes {dimension_semantics = [#tpu.dimension_semantics<parallel>, #tpu.dimension_semantics<arbitrary>], iteration_bounds = array<i64: 2, 16>, scalar_prefetch = 0 : i64, scratch_operands = 0 : i64, tpu.core_type = #tpu.core_type<tc>, window_params = [{transform_indices = @transform_0, window_bounds = array<i64: 1, 1, 2, 16>}, {transform_indices = @transform_1, window_bounds = array<i64: 1, 1, 2, 16>}, {transform_indices = @transform_2, window_bounds = array<i64: 1, 1, 2, 16>}, {transform_indices = @transform_3, window_bounds = array<i64: 1, 2, 2>}, {transform_indices = @transform_4, window_bounds = array<i64: 1, 1, 2, 16>}]} {
    %c0 = arith.constant 0 : index
    %c0_0 = arith.constant 0 : index
    %c0_1 = arith.constant 0 : index
    %c0_2 = arith.constant 0 : index
    %0 = vector.load %arg2[%c0, %c0_0, %c0_1, %c0_2] : memref<1x1x2x16xbf16, #tpu.memory_space<vmem>>, vector<1x1x2x16xbf16>
    %1 = vector.shape_cast %0 : vector<1x1x2x16xbf16> to vector<2x16xbf16>
    %c0_3 = arith.constant 0 : index
    %c0_4 = arith.constant 0 : index
    %c0_5 = arith.constant 0 : index
    %c0_6 = arith.constant 0 : index
    %2 = vector.load %arg3[%c0_3, %c0_4, %c0_5, %c0_6] : memref<1x1x2x16xbf16, #tpu.memory_space<vmem>>, vector<1x1x2x16xbf16>
    %3 = vector.shape_cast %2 : vector<1x1x2x16xbf16> to vector<2x16xbf16>
    %c0_7 = arith.constant 0 : index
    %c0_8 = arith.constant 0 : index
    %c0_9 = arith.constant 0 : index
    %c0_10 = arith.constant 0 : index
    %4 = vector.load %arg4[%c0_7, %c0_8, %c0_9, %c0_10] : memref<1x1x2x16xbf16, #tpu.memory_space<vmem>>, vector<1x1x2x16xbf16>
    %5 = vector.shape_cast %4 : vector<1x1x2x16xbf16> to vector<2x16xbf16>
    %cst = arith.constant dense<0.000000e+00> : vector<2x2xf32>
    %6 = tpu.matmul %1, %3, %cst {dimension_numbers = #tpu.dot_dimension_numbers<[1], [1], [0], [0], [0, 0, 1, 0], [], []>} : vector<2x16xbf16>, vector<2x16xbf16>, vector<2x2xf32> -> vector<2x2xf32>
    %c0_11 = arith.constant 0 : index
    %c0_12 = arith.constant 0 : index
    %c0_13 = arith.constant 0 : index
    %7 = vector.load %arg5[%c0_11, %c0_12, %c0_13] : memref<1x2x2xbf16, #tpu.memory_space<vmem>>, vector<1x2x2xbf16>
    %8 = vector.shape_cast %7 : vector<1x2x2xbf16> to vector<2x2xbf16>
    %9 = arith.extf %8 : vector<2x2xbf16> to vector<2x2xf32>
    %10 = arith.addf %6, %9 : vector<2x2xf32>
    %cst_14 = arith.constant dense<0xFF800000> : vector<2xf32>
    %11 = vector.multi_reduction <maximumf>, %10, %cst_14 [1] : vector<2x2xf32> to vector<2xf32>
    %12 = vector.shape_cast %11 : vector<2xf32> to vector<2x1xf32>
    %13 = vector.broadcast %12 : vector<2x1xf32> to vector<2x2xf32>
    %14 = arith.subf %10, %13 : vector<2x2xf32>
    %15 = math.exp %14 : vector<2x2xf32>
    %cst_15 = arith.constant dense<0.000000e+00> : vector<2xf32>
    %16 = vector.multi_reduction <add>, %15, %cst_15 [1] : vector<2x2xf32> to vector<2xf32>
    %17 = vector.shape_cast %16 : vector<2xf32> to vector<2x1xf32>
    %18 = tpu.reciprocal %17 {approx = true} : vector<2x1xf32> -> vector<2x1xf32>
    %19 = vector.broadcast %18 : vector<2x1xf32> to vector<2x2xf32>
    %20 = arith.mulf %15, %19 : vector<2x2xf32>
    %21 = arith.truncf %20 : vector<2x2xf32> to vector<2x2xbf16>
    %cst_16 = arith.constant dense<0.000000e+00> : vector<2x16xf32>
    %22 = tpu.matmul %21, %5, %cst_16 {dimension_numbers = #tpu.dot_dimension_numbers<[1], [0], [0], [1], [0, 0, 1, 1], [], []>} : vector<2x2xbf16>, vector<2x16xbf16>, vector<2x16xf32> -> vector<2x16xf32>
    %23 = arith.truncf %22 : vector<2x16xf32> to vector<2x16xbf16>
    %c0_17 = arith.constant 0 : index
    %c0_18 = arith.constant 0 : index
    %c0_19 = arith.constant 0 : index
    %c0_20 = arith.constant 0 : index
    %24 = vector.load %arg6[%c0_17, %c0_18, %c0_19, %c0_20] : memref<1x1x2x16xbf16, #tpu.memory_space<vmem>>, vector<1x1x2x16xbf16>
    %25 = vector.shape_cast %24 : vector<1x1x2x16xbf16> to vector<2x16xbf16>
    %26 = vector.shape_cast %23 : vector<2x16xbf16> to vector<1x1x2x16xbf16>
    tpu.vector_store %arg6[%c0_17, %c0_18, %c0_19, %c0_20], %26 {strides = array<i32>} : memref<1x1x2x16xbf16, #tpu.memory_space<vmem>>, vector<1x1x2x16xbf16>,
    return
  }
  func.func @transform_0(%arg0: i32, %arg1: i32) -> (i32, i32, i32, i32) {
    %c0_i32 = arith.constant 0 : i32
    %c0_i32_0 = arith.constant 0 : i32
    %c0_i32_1 = arith.constant 0 : i32
    return %arg0, %arg1, %c0_i32, %c0_i32_0 : i32, i32, i32, i32
  }
  func.func @transform_1(%arg0: i32, %arg1: i32) -> (i32, i32, i32, i32) {
    %c0_i32 = arith.constant 0 : i32
    %c0_i32_0 = arith.constant 0 : i32
    %c0_i32_1 = arith.constant 0 : i32
    return %arg0, %arg1, %c0_i32, %c0_i32_0 : i32, i32, i32, i32
  }
  func.func @transform_2(%arg0: i32, %arg1: i32) -> (i32, i32, i32, i32) {
    %c0_i32 = arith.constant 0 : i32
    %c0_i32_0 = arith.constant 0 : i32
    %c0_i32_1 = arith.constant 0 : i32
    return %arg0, %arg1, %c0_i32, %c0_i32_0 : i32, i32, i32, i32
  }
  func.func @transform_3(%arg0: i32, %arg1: i32) -> (i32, i32, i32) {
    %c0_i32 = arith.constant 0 : i32
    %c0_i32_0 = arith.constant 0 : i32
    %c0_i32_1 = arith.constant 0 : i32
    return %arg1, %c0_i32, %c0_i32_0 : i32, i32, i32
  }
  func.func @transform_4(%arg0: i32, %arg1: i32) -> (i32, i32, i32, i32) {
    %c0_i32 = arith.constant 0 : i32
    %c0_i32_0 = arith.constant 0 : i32
    %c0_i32_1 = arith.constant 0 : i32
    return %arg0, %arg1, %c0_i32, %c0_i32_0 : i32, i32, i32, i32
  }
}

module attributes {stable_mosaic.version = 11 : i64} {
  func.func @kernel(%arg0: i32, %arg1: i32, %arg2: i32, %arg3: memref<8x256xbf16, #tpu.memory_space<vmem>>, %arg4: memref<256x256xbf16, #tpu.memory_space<vmem>>, %arg5: memref<1x256xf32, #tpu.memory_space<vmem>>, %arg6: memref<8x256xbf16, #tpu.memory_space<vmem>>, %arg7: memref<8x256xf32, #tpu.memory_space<vmem>>) attributes {dimension_semantics = [#tpu.dimension_semantics<parallel>, #tpu.dimension_semantics<parallel>, #tpu.dimension_semantics<arbitrary>], iteration_bounds = array<i64: 1, 1, 1>, scalar_prefetch = 0 : i64, scratch_operands = 1 : i64, tpu.core_type = #tpu.core_type<tc>, window_params = [{transform_indices = @transform_0, window_bounds = array<i64: 8, 256>}, {transform_indices = @transform_1, window_bounds = array<i64: 256, 256>}, {transform_indices = @transform_2, window_bounds = array<i64: 1, 256>}, {transform_indices = @transform_3, window_bounds = array<i64: 8, 256>}]} {
    %c0_i32 = arith.constant 0 : i32
    %0 = arith.cmpi eq, %arg2, %c0_i32 : i32
    %1 = arith.extui %0 : i1 to i32
    %c0_i32_0 = arith.constant 0 : i32
    %2 = arith.cmpi ne, %1, %c0_i32_0 : i32
    scf.if %2 {
      %cst_10 = arith.constant 0.000000e+00 : f32
      %12 = vector.broadcast %cst_10 : f32 to vector<8x256xf32>
      %c0_11 = arith.constant 0 : index
      %c0_12 = arith.constant 0 : index
      %13 = vector.load %arg7[%c0_11, %c0_12] : memref<8x256xf32, #tpu.memory_space<vmem>>, vector<8x256xf32>
      tpu.vector_store %arg7[%c0_11, %c0_12], %12 {strides = array<i32>} : memref<8x256xf32, #tpu.memory_space<vmem>>, vector<8x256xf32>,
    } else {
    }
    %c0 = arith.constant 0 : index
    %c0_1 = arith.constant 0 : index
    %3 = vector.load %arg7[%c0, %c0_1] : memref<8x256xf32, #tpu.memory_space<vmem>>, vector<8x256xf32>
    %c0_2 = arith.constant 0 : index
    %c0_3 = arith.constant 0 : index
    %4 = vector.load %arg3[%c0_2, %c0_3] : memref<8x256xbf16, #tpu.memory_space<vmem>>, vector<8x256xbf16>
    %c0_4 = arith.constant 0 : index
    %c0_5 = arith.constant 0 : index
    %5 = vector.load %arg4[%c0_4, %c0_5] : memref<256x256xbf16, #tpu.memory_space<vmem>>, vector<256x256xbf16>
    %cst = arith.constant dense<0.000000e+00> : vector<8x256xf32>
    %6 = tpu.matmul %4, %5, %cst {dimension_numbers = #tpu.dot_dimension_numbers<[1], [0], [0], [1], [0, 0, 1, 1], [], []>} : vector<8x256xbf16>, vector<256x256xbf16>, vector<8x256xf32> -> vector<8x256xf32>
    %7 = arith.addf %3, %6 : vector<8x256xf32>
    %c0_6 = arith.constant 0 : index
    %c0_7 = arith.constant 0 : index
    %8 = vector.load %arg7[%c0_6, %c0_7] : memref<8x256xf32, #tpu.memory_space<vmem>>, vector<8x256xf32>
    tpu.vector_store %arg7[%c0_6, %c0_7], %7 {strides = array<i32>} : memref<8x256xf32, #tpu.memory_space<vmem>>, vector<8x256xf32>,
    %c0_i32_8 = arith.constant 0 : i32
    %9 = arith.cmpi eq, %arg2, %c0_i32_8 : i32
    %10 = arith.extui %9 : i1 to i32
    %c0_i32_9 = arith.constant 0 : i32
    %11 = arith.cmpi ne, %10, %c0_i32_9 : i32
    scf.if %11 {
      %c0_10 = arith.constant 0 : index
      %c0_11 = arith.constant 0 : index
      %12 = vector.load %arg7[%c0_10, %c0_11] : memref<8x256xf32, #tpu.memory_space<vmem>>, vector<8x256xf32>
      %c0_12 = arith.constant 0 : index
      %c0_13 = arith.constant 0 : index
      %13 = vector.load %arg5[%c0_12, %c0_13] : memref<1x256xf32, #tpu.memory_space<vmem>>, vector<1x256xf32>
      %14 = vector.broadcast %13 : vector<1x256xf32> to vector<8x256xf32>
      %15 = arith.addf %12, %14 : vector<8x256xf32>
      %16 = arith.truncf %15 : vector<8x256xf32> to vector<8x256xbf16>
      %c0_14 = arith.constant 0 : index
      %c0_15 = arith.constant 0 : index
      %17 = vector.load %arg6[%c0_14, %c0_15] : memref<8x256xbf16, #tpu.memory_space<vmem>>, vector<8x256xbf16>
      tpu.vector_store %arg6[%c0_14, %c0_15], %16 {strides = array<i32>} : memref<8x256xbf16, #tpu.memory_space<vmem>>, vector<8x256xbf16>,
    } else {
    }
    return
  }
  func.func @transform_0(%arg0: i32, %arg1: i32, %arg2: i32) -> (i32, i32) {
    %c0_i32 = arith.constant 0 : i32
    return %arg0, %arg2 : i32, i32
  }
  func.func @transform_1(%arg0: i32, %arg1: i32, %arg2: i32) -> (i32, i32) {
    %c0_i32 = arith.constant 0 : i32
    return %arg2, %arg1 : i32, i32
  }
  func.func @transform_2(%arg0: i32, %arg1: i32, %arg2: i32) -> (i32, i32) {
    %c0_i32 = arith.constant 0 : i32
    %c0_i32_0 = arith.constant 0 : i32
    return %c0_i32, %arg1 : i32, i32
  }
  func.func @transform_3(%arg0: i32, %arg1: i32, %arg2: i32) -> (i32, i32) {
    %c0_i32 = arith.constant 0 : i32
    return %arg0, %arg1 : i32, i32
  }
}

module attributes {stable_mosaic.version = 11 : i64} {
  func.func @kernel(%arg0: i32, %arg1: memref<8x256xbf16, #tpu.memory_space<vmem>>, %arg2: memref<1x256xf32, #tpu.memory_space<vmem>>, %arg3: memref<1x256xf32, #tpu.memory_space<vmem>>, %arg4: memref<8x256xbf16, #tpu.memory_space<vmem>>) attributes {dimension_semantics = [#tpu.dimension_semantics<parallel>], iteration_bounds = array<i64: 1>, scalar_prefetch = 0 : i64, scratch_operands = 0 : i64, tpu.core_type = #tpu.core_type<tc>, window_params = [{transform_indices = @transform_0, window_bounds = array<i64: 8, 256>}, {pipeline_mode = #tpu.pipeline_mode<synchronous>, transform_indices = @transform_1, window_bounds = array<i64: 1, 256>}, {pipeline_mode = #tpu.pipeline_mode<synchronous>, transform_indices = @transform_2, window_bounds = array<i64: 1, 256>}, {transform_indices = @transform_3, window_bounds = array<i64: 8, 256>}]} {
    %c0 = arith.constant 0 : index
    %c0_0 = arith.constant 0 : index
    %0 = vector.load %arg1[%c0, %c0_0] : memref<8x256xbf16, #tpu.memory_space<vmem>>, vector<8x256xbf16>
    %1 = arith.extf %0 : vector<8x256xbf16> to vector<8x256xf32>
    %cst = arith.constant dense<0.000000e+00> : vector<8xf32>
    %2 = vector.multi_reduction <add>, %1, %cst [1] : vector<8x256xf32> to vector<8xf32>
    %3 = vector.shape_cast %2 : vector<8xf32> to vector<8x1xf32>
    %cst_1 = arith.constant 2.560000e+02 : f32
    %4 = vector.broadcast %cst_1 : f32 to vector<8x1xf32>
    %5 = arith.divf %3, %4 : vector<8x1xf32>
    %6 = vector.broadcast %5 : vector<8x1xf32> to vector<8x256xf32>
    %7 = arith.subf %1, %6 : vector<8x256xf32>
    %8 = arith.mulf %7, %7 : vector<8x256xf32>
    %cst_2 = arith.constant dense<0.000000e+00> : vector<8xf32>
    %9 = vector.multi_reduction <add>, %8, %cst_2 [1] : vector<8x256xf32> to vector<8xf32>
    %10 = vector.shape_cast %9 : vector<8xf32> to vector<8x1xf32>
    %cst_3 = arith.constant 2.560000e+02 : f32
    %11 = vector.broadcast %cst_3 : f32 to vector<8x1xf32>
    %12 = arith.divf %10, %11 : vector<8x1xf32>
    %cst_4 = arith.constant 9.99999974E-6 : f32
    %13 = vector.broadcast %cst_4 : f32 to vector<8x1xf32>
    %14 = arith.addf %12, %13 : vector<8x1xf32>
    %15 = math.rsqrt %14 : vector<8x1xf32>
    %16 = vector.broadcast %15 : vector<8x1xf32> to vector<8x256xf32>
    %17 = arith.mulf %7, %16 : vector<8x256xf32>
    %c0_5 = arith.constant 0 : index
    %c0_6 = arith.constant 0 : index
    %18 = vector.load %arg2[%c0_5, %c0_6] : memref<1x256xf32, #tpu.memory_space<vmem>>, vector<1x256xf32>
    %19 = vector.broadcast %18 : vector<1x256xf32> to vector<8x256xf32>
    %20 = arith.mulf %17, %19 : vector<8x256xf32>
    %c0_7 = arith.constant 0 : index
    %c0_8 = arith.constant 0 : index
    %21 = vector.load %arg3[%c0_7, %c0_8] : memref<1x256xf32, #tpu.memory_space<vmem>>, vector<1x256xf32>
    %22 = vector.broadcast %21 : vector<1x256xf32> to vector<8x256xf32>
    %23 = arith.addf %20, %22 : vector<8x256xf32>
    %24 = arith.truncf %23 : vector<8x256xf32> to vector<8x256xbf16>
    %c0_9 = arith.constant 0 : index
    %c0_10 = arith.constant 0 : index
    %25 = vector.load %arg4[%c0_9, %c0_10] : memref<8x256xbf16, #tpu.memory_space<vmem>>, vector<8x256xbf16>
    tpu.vector_store %arg4[%c0_9, %c0_10], %24 {strides = array<i32>} : memref<8x256xbf16, #tpu.memory_space<vmem>>, vector<8x256xbf16>,
    return
  }
  func.func @transform_0(%arg0: i32) -> (i32, i32) {
    %c0_i32 = arith.constant 0 : i32
    %c0_i32_0 = arith.constant 0 : i32
    return %arg0, %c0_i32 : i32, i32
  }
  func.func @transform_1(%arg0: i32) -> (i32, i32) {
    %c0_i32 = arith.constant 0 : i32
    %c0_i32_0 = arith.constant 0 : i32
    %c0_i32_1 = arith.constant 0 : i32
    return %c0_i32, %c0_i32_0 : i32, i32
  }
  func.func @transform_2(%arg0: i32) -> (i32, i32) {
    %c0_i32 = arith.constant 0 : i32
    %c0_i32_0 = arith.constant 0 : i32
    %c0_i32_1 = arith.constant 0 : i32
    return %c0_i32, %c0_i32_0 : i32, i32
  }
  func.func @transform_3(%arg0: i32) -> (i32, i32) {
    %c0_i32 = arith.constant 0 : i32
    %c0_i32_0 = arith.constant 0 : i32
    return %arg0, %c0_i32 : i32, i32
  }
}

module attributes {stable_mosaic.version = 11 : i64} {
  func.func @kernel(%arg0: i32, %arg1: i32, %arg2: i32, %arg3: memref<8x256xbf16, #tpu.memory_space<vmem>>, %arg4: memref<256x512xbf16, #tpu.memory_space<vmem>>, %arg5: memref<1x512xf32, #tpu.memory_space<vmem>>, %arg6: memref<8x512xbf16, #tpu.memory_space<vmem>>, %arg7: memref<8x512xf32, #tpu.memory_space<vmem>>) attributes {dimension_semantics = [#tpu.dimension_semantics<parallel>, #tpu.dimension_semantics<parallel>, #tpu.dimension_semantics<arbitrary>], iteration_bounds = array<i64: 1, 2, 1>, scalar_prefetch = 0 : i64, scratch_operands = 1 : i64, tpu.core_type = #tpu.core_type<tc>, window_params = [{transform_indices = @transform_0, window_bounds = array<i64: 8, 256>}, {transform_indices = @transform_1, window_bounds = array<i64: 256, 512>}, {transform_indices = @transform_2, window_bounds = array<i64: 1, 512>}, {transform_indices = @transform_3, window_bounds = array<i64: 8, 512>}]} {
    %c0_i32 = arith.constant 0 : i32
    %0 = arith.cmpi eq, %arg2, %c0_i32 : i32
    %1 = arith.extui %0 : i1 to i32
    %c0_i32_0 = arith.constant 0 : i32
    %2 = arith.cmpi ne, %1, %c0_i32_0 : i32
    scf.if %2 {
      %cst_10 = arith.constant 0.000000e+00 : f32
      %12 = vector.broadcast %cst_10 : f32 to vector<8x512xf32>
      %c0_11 = arith.constant 0 : index
      %c0_12 = arith.constant 0 : index
      %13 = vector.load %arg7[%c0_11, %c0_12] : memref<8x512xf32, #tpu.memory_space<vmem>>, vector<8x512xf32>
      tpu.vector_store %arg7[%c0_11, %c0_12], %12 {strides = array<i32>} : memref<8x512xf32, #tpu.memory_space<vmem>>, vector<8x512xf32>,
    } else {
    }
    %c0 = arith.constant 0 : index
    %c0_1 = arith.constant 0 : index
    %3 = vector.load %arg7[%c0, %c0_1] : memref<8x512xf32, #tpu.memory_space<vmem>>, vector<8x512xf32>
    %c0_2 = arith.constant 0 : index
    %c0_3 = arith.constant 0 : index
    %4 = vector.load %arg3[%c0_2, %c0_3] : memref<8x256xbf16, #tpu.memory_space<vmem>>, vector<8x256xbf16>
    %c0_4 = arith.constant 0 : index
    %c0_5 = arith.constant 0 : index
    %5 = vector.load %arg4[%c0_4, %c0_5] : memref<256x512xbf16, #tpu.memory_space<vmem>>, vector<256x512xbf16>
    %cst = arith.constant dense<0.000000e+00> : vector<8x512xf32>
    %6 = tpu.matmul %4, %5, %cst {dimension_numbers = #tpu.dot_dimension_numbers<[1], [0], [0], [1], [0, 0, 1, 1], [], []>} : vector<8x256xbf16>, vector<256x512xbf16>, vector<8x512xf32> -> vector<8x512xf32>
    %7 = arith.addf %3, %6 : vector<8x512xf32>
    %c0_6 = arith.constant 0 : index
    %c0_7 = arith.constant 0 : index
    %8 = vector.load %arg7[%c0_6, %c0_7] : memref<8x512xf32, #tpu.memory_space<vmem>>, vector<8x512xf32>
    tpu.vector_store %arg7[%c0_6, %c0_7], %7 {strides = array<i32>} : memref<8x512xf32, #tpu.memory_space<vmem>>, vector<8x512xf32>,
    %c0_i32_8 = arith.constant 0 : i32
    %9 = arith.cmpi eq, %arg2, %c0_i32_8 : i32
    %10 = arith.extui %9 : i1 to i32
    %c0_i32_9 = arith.constant 0 : i32
    %11 = arith.cmpi ne, %10, %c0_i32_9 : i32
    scf.if %11 {
      %c0_10 = arith.constant 0 : index
      %c0_11 = arith.constant 0 : index
      %12 = vector.load %arg7[%c0_10, %c0_11] : memref<8x512xf32, #tpu.memory_space<vmem>>, vector<8x512xf32>
      %c0_12 = arith.constant 0 : index
      %c0_13 = arith.constant 0 : index
      %13 = vector.load %arg5[%c0_12, %c0_13] : memref<1x512xf32, #tpu.memory_space<vmem>>, vector<1x512xf32>
      %14 = vector.broadcast %13 : vector<1x512xf32> to vector<8x512xf32>
      %15 = arith.addf %12, %14 : vector<8x512xf32>
      %cst_14 = arith.constant 5.000000e-01 : f32
      %16 = vector.broadcast %cst_14 : f32 to vector<8x512xf32>
      %17 = arith.mulf %16, %15 : vector<8x512xf32>
      %cst_15 = arith.constant 4.471500e-02 : f32
      %18 = vector.broadcast %cst_15 : f32 to vector<8x512xf32>
      %19 = arith.mulf %18, %15 : vector<8x512xf32>
      %20 = arith.mulf %19, %15 : vector<8x512xf32>
      %21 = arith.mulf %20, %15 : vector<8x512xf32>
      %22 = arith.addf %15, %21 : vector<8x512xf32>
      %cst_16 = arith.constant 0.797884583 : f32
      %23 = vector.broadcast %cst_16 : f32 to vector<8x512xf32>
      %24 = arith.mulf %23, %22 : vector<8x512xf32>
      %25 = math.tanh %24 : vector<8x512xf32>
      %cst_17 = arith.constant 1.000000e+00 : f32
      %26 = vector.broadcast %cst_17 : f32 to vector<8x512xf32>
      %27 = arith.addf %26, %25 : vector<8x512xf32>
      %28 = arith.mulf %17, %27 : vector<8x512xf32>
      %29 = arith.truncf %28 : vector<8x512xf32> to vector<8x512xbf16>
      %c0_18 = arith.constant 0 : index
      %c0_19 = arith.constant 0 : index
      %30 = vector.load %arg6[%c0_18, %c0_19] : memref<8x512xbf16, #tpu.memory_space<vmem>>, vector<8x512xbf16>
      tpu.vector_store %arg6[%c0_18, %c0_19], %29 {strides = array<i32>} : memref<8x512xbf16, #tpu.memory_space<vmem>>, vector<8x512xbf16>,
    } else {
    }
    return
  }
  func.func @transform_0(%arg0: i32, %arg1: i32, %arg2: i32) -> (i32, i32) {
    %c0_i32 = arith.constant 0 : i32
    return %arg0, %arg2 : i32, i32
  }
  func.func @transform_1(%arg0: i32, %arg1: i32, %arg2: i32) -> (i32, i32) {
    %c0_i32 = arith.constant 0 : i32
    return %arg2, %arg1 : i32, i32
  }
  func.func @transform_2(%arg0: i32, %arg1: i32, %arg2: i32) -> (i32, i32) {
    %c0_i32 = arith.constant 0 : i32
    %c0_i32_0 = arith.constant 0 : i32
    return %c0_i32, %arg1 : i32, i32
  }
  func.func @transform_3(%arg0: i32, %arg1: i32, %arg2: i32) -> (i32, i32) {
    %c0_i32 = arith.constant 0 : i32
    return %arg0, %arg1 : i32, i32
  }
}

module attributes {stable_mosaic.version = 11 : i64} {
  func.func @kernel(%arg0: i32, %arg1: i32, %arg2: i32, %arg3: memref<8x512xbf16, #tpu.memory_space<vmem>>, %arg4: memref<512x256xbf16, #tpu.memory_space<vmem>>, %arg5: memref<1x256xf32, #tpu.memory_space<vmem>>, %arg6: memref<8x256xbf16, #tpu.memory_space<vmem>>, %arg7: memref<8x256xf32, #tpu.memory_space<vmem>>) attributes {dimension_semantics = [#tpu.dimension_semantics<parallel>, #tpu.dimension_semantics<parallel>, #tpu.dimension_semantics<arbitrary>], iteration_bounds = array<i64: 1, 1, 2>, scalar_prefetch = 0 : i64, scratch_operands = 1 : i64, tpu.core_type = #tpu.core_type<tc>, window_params = [{transform_indices = @transform_0, window_bounds = array<i64: 8, 512>}, {transform_indices = @transform_1, window_bounds = array<i64: 512, 256>}, {transform_indices = @transform_2, window_bounds = array<i64: 1, 256>}, {transform_indices = @transform_3, window_bounds = array<i64: 8, 256>}]} {
    %c0_i32 = arith.constant 0 : i32
    %0 = arith.cmpi eq, %arg2, %c0_i32 : i32
    %1 = arith.extui %0 : i1 to i32
    %c0_i32_0 = arith.constant 0 : i32
    %2 = arith.cmpi ne, %1, %c0_i32_0 : i32
    scf.if %2 {
      %cst_9 = arith.constant 0.000000e+00 : f32
      %12 = vector.broadcast %cst_9 : f32 to vector<8x256xf32>
      %c0_10 = arith.constant 0 : index
      %c0_11 = arith.constant 0 : index
      %13 = vector.load %arg7[%c0_10, %c0_11] : memref<8x256xf32, #tpu.memory_space<vmem>>, vector<8x256xf32>
      tpu.vector_store %arg7[%c0_10, %c0_11], %12 {strides = array<i32>} : memref<8x256xf32, #tpu.memory_space<vmem>>, vector<8x256xf32>,
    } else {
    }
    %c0 = arith.constant 0 : index
    %c0_1 = arith.constant 0 : index
    %3 = vector.load %arg7[%c0, %c0_1] : memref<8x256xf32, #tpu.memory_space<vmem>>, vector<8x256xf32>
    %c0_2 = arith.constant 0 : index
    %c0_3 = arith.constant 0 : index
    %4 = vector.load %arg3[%c0_2, %c0_3] : memref<8x512xbf16, #tpu.memory_space<vmem>>, vector<8x512xbf16>
    %c0_4 = arith.constant 0 : index
    %c0_5 = arith.constant 0 : index
    %5 = vector.load %arg4[%c0_4, %c0_5] : memref<512x256xbf16, #tpu.memory_space<vmem>>, vector<512x256xbf16>
    %cst = arith.constant dense<0.000000e+00> : vector<8x256xf32>
    %6 = tpu.matmul %4, %5, %cst {dimension_numbers = #tpu.dot_dimension_numbers<[1], [0], [0], [1], [0, 0, 1, 1], [], []>} : vector<8x512xbf16>, vector<512x256xbf16>, vector<8x256xf32> -> vector<8x256xf32>
    %7 = arith.addf %3, %6 : vector<8x256xf32>
    %c0_6 = arith.constant 0 : index
    %c0_7 = arith.constant 0 : index
    %8 = vector.load %arg7[%c0_6, %c0_7] : memref<8x256xf32, #tpu.memory_space<vmem>>, vector<8x256xf32>
    tpu.vector_store %arg7[%c0_6, %c0_7], %7 {strides = array<i32>} : memref<8x256xf32, #tpu.memory_space<vmem>>, vector<8x256xf32>,
    %c1_i32 = arith.constant 1 : i32
    %9 = arith.cmpi eq, %arg2, %c1_i32 : i32
    %10 = arith.extui %9 : i1 to i32
    %c0_i32_8 = arith.constant 0 : i32
    %11 = arith.cmpi ne, %10, %c0_i32_8 : i32
    scf.if %11 {
      %c0_9 = arith.constant 0 : index
      %c0_10 = arith.constant 0 : index
      %12 = vector.load %arg7[%c0_9, %c0_10] : memref<8x256xf32, #tpu.memory_space<vmem>>, vector<8x256xf32>
      %c0_11 = arith.constant 0 : index
      %c0_12 = arith.constant 0 : index
      %13 = vector.load %arg5[%c0_11, %c0_12] : memref<1x256xf32, #tpu.memory_space<vmem>>, vector<1x256xf32>
      %14 = vector.broadcast %13 : vector<1x256xf32> to vector<8x256xf32>
      %15 = arith.addf %12, %14 : vector<8x256xf32>
      %16 = arith.truncf %15 : vector<8x256xf32> to vector<8x256xbf16>
      %c0_13 = arith.constant 0 : index
      %c0_14 = arith.constant 0 : index
      %17 = vector.load %arg6[%c0_13, %c0_14] : memref<8x256xbf16, #tpu.memory_space<vmem>>, vector<8x256xbf16>
      tpu.vector_store %arg6[%c0_13, %c0_14], %16 {strides = array<i32>} : memref<8x256xbf16, #tpu.memory_space<vmem>>, vector<8x256xbf16>,
    } else {
    }
    return
  }
  func.func @transform_0(%arg0: i32, %arg1: i32, %arg2: i32) -> (i32, i32) {
    %c0_i32 = arith.constant 0 : i32
    return %arg0, %arg2 : i32, i32
  }
  func.func @transform_1(%arg0: i32, %arg1: i32, %arg2: i32) -> (i32, i32) {
    %c0_i32 = arith.constant 0 : i32
    return %arg2, %arg1 : i32, i32
  }
  func.func @transform_2(%arg0: i32, %arg1: i32, %arg2: i32) -> (i32, i32) {
    %c0_i32 = arith.constant 0 : i32
    %c0_i32_0 = arith.constant 0 : i32
    return %c0_i32, %arg1 : i32, i32
  }
  func.func @transform_3(%arg0: i32, %arg1: i32, %arg2: i32) -> (i32, i32) {
    %c0_i32 = arith.constant 0 : i32
    return %arg0, %arg1 : i32, i32
  }
}

module attributes {stable_mosaic.version = 11 : i64} {
  func.func @kernel(%arg0: i32, %arg1: memref<8x256xbf16, #tpu.memory_space<vmem>>, %arg2: memref<1x256xf32, #tpu.memory_space<vmem>>, %arg3: memref<1x256xf32, #tpu.memory_space<vmem>>, %arg4: memref<8x256xf32, #tpu.memory_space<vmem>>) attributes {dimension_semantics = [#tpu.dimension_semantics<parallel>], iteration_bounds = array<i64: 1>, scalar_prefetch = 0 : i64, scratch_operands = 0 : i64, tpu.core_type = #tpu.core_type<tc>, window_params = [{transform_indices = @transform_0, window_bounds = array<i64: 8, 256>}, {pipeline_mode = #tpu.pipeline_mode<synchronous>, transform_indices = @transform_1, window_bounds = array<i64: 1, 256>}, {pipeline_mode = #tpu.pipeline_mode<synchronous>, transform_indices = @transform_2, window_bounds = array<i64: 1, 256>}, {transform_indices = @transform_3, window_bounds = array<i64: 8, 256>}]} {
    %c0 = arith.constant 0 : index
    %c0_0 = arith.constant 0 : index
    %0 = vector.load %arg1[%c0, %c0_0] : memref<8x256xbf16, #tpu.memory_space<vmem>>, vector<8x256xbf16>
    %1 = arith.extf %0 : vector<8x256xbf16> to vector<8x256xf32>
    %cst = arith.constant dense<0.000000e+00> : vector<8xf32>
    %2 = vector.multi_reduction <add>, %1, %cst [1] : vector<8x256xf32> to vector<8xf32>
    %3 = vector.shape_cast %2 : vector<8xf32> to vector<8x1xf32>
    %cst_1 = arith.constant 2.560000e+02 : f32
    %4 = vector.broadcast %cst_1 : f32 to vector<8x1xf32>
    %5 = arith.divf %3, %4 : vector<8x1xf32>
    %6 = vector.broadcast %5 : vector<8x1xf32> to vector<8x256xf32>
    %7 = arith.subf %1, %6 : vector<8x256xf32>
    %8 = arith.mulf %7, %7 : vector<8x256xf32>
    %cst_2 = arith.constant dense<0.000000e+00> : vector<8xf32>
    %9 = vector.multi_reduction <add>, %8, %cst_2 [1] : vector<8x256xf32> to vector<8xf32>
    %10 = vector.shape_cast %9 : vector<8xf32> to vector<8x1xf32>
    %cst_3 = arith.constant 2.560000e+02 : f32
    %11 = vector.broadcast %cst_3 : f32 to vector<8x1xf32>
    %12 = arith.divf %10, %11 : vector<8x1xf32>
    %cst_4 = arith.constant 9.99999974E-6 : f32
    %13 = vector.broadcast %cst_4 : f32 to vector<8x1xf32>
    %14 = arith.addf %12, %13 : vector<8x1xf32>
    %15 = math.rsqrt %14 : vector<8x1xf32>
    %16 = vector.broadcast %15 : vector<8x1xf32> to vector<8x256xf32>
    %17 = arith.mulf %7, %16 : vector<8x256xf32>
    %c0_5 = arith.constant 0 : index
    %c0_6 = arith.constant 0 : index
    %18 = vector.load %arg2[%c0_5, %c0_6] : memref<1x256xf32, #tpu.memory_space<vmem>>, vector<1x256xf32>
    %19 = vector.broadcast %18 : vector<1x256xf32> to vector<8x256xf32>
    %20 = arith.mulf %17, %19 : vector<8x256xf32>
    %c0_7 = arith.constant 0 : index
    %c0_8 = arith.constant 0 : index
    %21 = vector.load %arg3[%c0_7, %c0_8] : memref<1x256xf32, #tpu.memory_space<vmem>>, vector<1x256xf32>
    %22 = vector.broadcast %21 : vector<1x256xf32> to vector<8x256xf32>
    %23 = arith.addf %20, %22 : vector<8x256xf32>
    %c0_9 = arith.constant 0 : index
    %c0_10 = arith.constant 0 : index
    %24 = vector.load %arg4[%c0_9, %c0_10] : memref<8x256xf32, #tpu.memory_space<vmem>>, vector<8x256xf32>
    tpu.vector_store %arg4[%c0_9, %c0_10], %23 {strides = array<i32>} : memref<8x256xf32, #tpu.memory_space<vmem>>, vector<8x256xf32>,
    return
  }
  func.func @transform_0(%arg0: i32) -> (i32, i32) {
    %c0_i32 = arith.constant 0 : i32
    %c0_i32_0 = arith.constant 0 : i32
    return %arg0, %c0_i32 : i32, i32
  }
  func.func @transform_1(%arg0: i32) -> (i32, i32) {
    %c0_i32 = arith.constant 0 : i32
    %c0_i32_0 = arith.constant 0 : i32
    %c0_i32_1 = arith.constant 0 : i32
    return %c0_i32, %c0_i32_0 : i32, i32
  }
  func.func @transform_2(%arg0: i32) -> (i32, i32) {
    %c0_i32 = arith.constant 0 : i32
    %c0_i32_0 = arith.constant 0 : i32
    %c0_i32_1 = arith.constant 0 : i32
    return %c0_i32, %c0_i32_0 : i32, i32
  }
  func.func @transform_3(%arg0: i32) -> (i32, i32) {
    %c0_i32 = arith.constant 0 : i32
    %c0_i32_0 = arith.constant 0 : i32
    return %arg0, %c0_i32 : i32, i32
  }
}

</mosaic_0001>

<bundles_post_ra>
// kernel: viedoswin_forward.65
= control target key start
LH: loop header
LB: loop body
LE: loop exit
PB: predicated region body
PF: predicated region fallthrough
CT: control target
= control target key end

     0   :  { %s469_s1 = inlined_call_operand.vmem [shape: bf16[128,128], index: 1, kind: input, shape index: {}]   ;;  %s470_s0 = inlined_call_operand.vmem [shape: bf16[64,128], index: 0, kind: input, shape index: {}]   ;;  %s471_s2 = inlined_call_operand.vmem [shape: f32[1,128], index: 2, kind: input, shape index: {}]   ;;  %s472_s3 = inlined_call_operand.vmem [shape: bf16[64,128], index: 3, kind: output, shape index: {}]  }
   0x1   :  { %v386_v0 = vld [vmem:[%s469_s1] sm:$0xff]   ;;  %v387_v1 = vld [vmem:[%s469_s1 + $0x8] sm:$0xff]   ;;  %v388_v2 = vld [vmem:[%s469_s1 + $0x10] sm:$0xff]  }
   0x2   :  { %346 = vmatprep.subr.bf16.mxu0 %v386_v0  ;;  %370 = vmatprep.subr.bf16.mxu1 %v386_v0  ;;  %v389_v3 = vld [vmem:[%s469_s1 + $0x18] sm:$0xff]   ;;  %v394_v4 = vld [vmem:[%s470_s0] sm:$0xff]   ;;  %v395_v5 = vld [vmem:[%s470_s0 + $0x10] sm:$0xff]  }
   0x3   :  { %347 = vmatpush3.bf16.msra.mxu0 %v386_v0  ;;  %378 = vmatpush3.bf16.msra.mxu1 %v386_v0  ;;  %v390_v6 = vld [vmem:[%s469_s1 + $0x20] sm:$0xff]   ;;  %v391_v7 = vld [vmem:[%s469_s1 + $0x28] sm:$0xff]   ;;  %v392_v8 = vld [vmem:[%s469_s1 + $0x30] sm:$0xff]  }
   0x4   :  { %348 = vmatprep.subr.bf16.mxu0 %v387_v1  ;;  %371 = vmatprep.subr.bf16.mxu1 %v387_v1  ;;  %v393_v9 = vld [vmem:[%s469_s1 + $0x38] sm:$0xff]   ;;  %v396_v10 = vld [vmem:[%s470_s0 + $0x8] sm:$0xff]   ;;  %v294_v13 = vld [vmem:[%s471_s2] ss:$0 sm:$0xff] }
   0x5   :  { %362 = vmatprep.mubr.bf16.mxu0 %v394_v4  ;;  %366 = vmatprep.mubr.bf16.mxu1 %v395_v5  ;;  %v397_v11 = vld [vmem:[%s470_s0 + $0x18] sm:$0xff]  }
   0x7   :  { %349 = vmatpush3.bf16.msra.mxu0 %v387_v1  ;;  %379 = vmatpush3.bf16.msra.mxu1 %v387_v1 }
   0x8   :  { %350 = vmatprep.subr.bf16.mxu0 %v388_v2  ;;  %372 = vmatprep.subr.bf16.mxu1 %v388_v2 }
   0xb   :  { %351 = vmatpush3.bf16.msra.mxu0 %v388_v2  ;;  %380 = vmatpush3.bf16.msra.mxu1 %v388_v2 }
   0xc   :  { %352 = vmatprep.subr.bf16.mxu0 %v389_v3  ;;  %373 = vmatprep.subr.bf16.mxu1 %v389_v3 }
   0xf   :  { %353 = vmatpush3.bf16.msra.mxu0 %v389_v3  ;;  %381 = vmatpush3.bf16.msra.mxu1 %v389_v3 }
  0x10   :  { %354 = vmatprep.subr.bf16.mxu0 %v390_v6  ;;  %374 = vmatprep.subr.bf16.mxu1 %v390_v6 }
  0x13   :  { %355 = vmatpush3.bf16.msra.mxu0 %v390_v6  ;;  %382 = vmatpush3.bf16.msra.mxu1 %v390_v6 }
  0x14   :  { %356 = vmatprep.subr.bf16.mxu0 %v391_v7  ;;  %375 = vmatprep.subr.bf16.mxu1 %v391_v7 }
  0x17   :  { %357 = vmatpush3.bf16.msra.mxu0 %v391_v7  ;;  %383 = vmatpush3.bf16.msra.mxu1 %v391_v7 }
  0x18   :  { %358 = vmatprep.subr.bf16.mxu0 %v392_v8  ;;  %376 = vmatprep.subr.bf16.mxu1 %v392_v8 }
  0x1b   :  { %359 = vmatpush3.bf16.msra.mxu0 %v392_v8  ;;  %384 = vmatpush3.bf16.msra.mxu1 %v392_v8 }
  0x1c   :  { %360 = vmatprep.subr.bf16.mxu0 %v393_v9  ;;  %377 = vmatprep.subr.bf16.mxu1 %v393_v9 }
  0x1f   :  { %361 = vmatpush3.bf16.msra.mxu0 %v393_v9  ;;  %385 = vmatpush3.bf16.msra.mxu1 %v393_v9 }
  0x22   :  { %363 = vmatmul.mubr.bf16.vlgmr.msra.gmra.mrb[0].mxu0 %v396_v10  ;;  %367 = vmatmul.mubr.bf16.vlgmr.msra.gmra.mrb[0].mxu1 %v397_v11 }
  0xf5   :  { %v364_v12 = vpop.f32.mrb[0].mxu0  ;;  %v368_v14 = vpop.f32.mrb[0].mxu1 }
  0xf6   :  { %v165_v15 = vpop.f32.mrb[1].mxu0  ;;  %v181_v16 = vpop.f32.mrb[1].mxu1  ;;  %v232_v19 = vadd.f32 %v364_v12, %v294_v13  ;;  %v236_v20 = vadd.f32 %v368_v14, %v294_v13 }
  0xf7   :  { %v365_v17 = vpop.f32.mrb[2].mxu0  ;;  %v369_v18 = vpop.f32.mrb[2].mxu1  ;;  %v230_v25 = vadd.f32 %v294_v13, %v165_v15  ;;  %v234_v26 = vadd.f32 %v294_v13, %v181_v16 }
  0xf8   :  { %v233_v21 = vadd.f32 %v365_v17, %v294_v13  ;;  %v237_v22 = vadd.f32 %v369_v18, %v294_v13  ;;  %v168_v23 = vpop.f32.mrb[3].mxu0  ;;  %v184_v24 = vpop.f32.mrb[3].mxu1 }
  0xf9   :  { %v231_v27 = vadd.f32 %v294_v13, %v168_v23  ;;  %v235_v28 = vadd.f32 %v294_v13, %v184_v24 }
  0xfa   :  { %v319_v29 = vpack.c.bf16 %v233_v21, %v232_v19  ;;  %v329_v30 = vpack.c.bf16 %v237_v22, %v236_v20 }
  0xfb   :  { %v314_v31 = vpack.c.bf16 %v231_v27, %v230_v25  ;;  %v324_v32 = vpack.c.bf16 %v235_v28, %v234_v26 }
  0xfc   :  { %331 = vst [vmem:[%s472_s3 + $0x8] sm:$0xff] %v319_v29   ;;  %333 = vst [vmem:[%s472_s3 + $0x18] sm:$0xff] %v329_v30  }
  0xfd   :  { %315 = vst [vmem:[%s472_s3] sm:$0xff] %v314_v31   ;;  %332 = vst [vmem:[%s472_s3 + $0x10] sm:$0xff] %v324_v32  }

// kernel: viedoswin_forward.66
= control target key start
LH: loop header
LB: loop body
LE: loop exit
PB: predicated region body
PF: predicated region fallthrough
CT: control target
= control target key end

     0   :  { %8 = vsyncpa [#allocation3], 0  ;;  %s486_s0 = inlined_call_operand.vmem [shape: bf16[64,32], index: 0, kind: input, shape index: {}]   ;;  %s487_s1 = inlined_call_operand.hbm [shape: f32[1,32], index: 1, kind: input, shape index: {}]   ;;  %s488_s2 = inlined_call_operand.hbm [shape: f32[1,32], index: 2, kind: input, shape index: {}]   ;;  %s489_s3 = inlined_call_operand.vmem [shape: bf16[64,32], index: 3, kind: output, shape index: {}]  }
   0x1   :  { %9 = vsyncpa [#allocation5], 0  ;;  %s340_s12 = smov [#allocation2]   ;;  %s341_s14 = smov [#allocation4]  }
   0x2   :  { %s18_s13 = sshll.u32 %s340_s12, 4  ;;  %s28_s15 = sshll.u32 %s341_s14, 4  ;;  %s19_s13 = int_to_ptr.vmem [resolvable:$true] %s18_s13  ;;  %s29_s15 = int_to_ptr.vmem [resolvable:$true] %s28_s15 }
   0x3   :  { %s292_s18 = scalar_lea.hbm %s487_s1, 16 }
   0x4   :  { %p293_p0 = scmp.ne.s32.totalorder %s487_s1, %s292_s18  ;;  %p296_p1 = scmp.lt.u32.totalorder %s292_s18, %s487_s1 }
   0x6   :  { %p298_p2 = pnand %p296_p1, %p293_p0 }
   0x8   :  { %301 = shalt.err (!%p298_p2)
}
   0x9   :  { %s302_s23 = scalar_lea.vmem %s19_s13, 16  ;;  %s306_s24 = scalar_lea.vmem %s19_s13, 32 }
   0xa   :  { %p303_p3 = scmp.ne.s32.totalorder %s19_s13, %s302_s23  ;;  %p307_p4 = scmp.lt.s32.totalorder %s19_s13, %s19_s13 }
   0xb   :  { %p308_p5 = scmp.lt.s32.totalorder %s306_s24, %s302_s23 }
   0xd   :  { %p309_p6 = por %p308_p5, %p307_p4 }
   0xf   :  { %p310_p7 = pnand %p309_p6, %p303_p3 }
  0x11   :  { %313 = shalt.err (!%p310_p7)
}
  0x12   :  { %21 = dma.hbm_to_vmem [thread:$0]  %s487_s1, 16, %s19_s13, [#allocation3]  }
  0x13   :  { %s314_s29 = scalar_lea.hbm %s488_s2, 16 }
  0x14   :  { %p315_p8 = scmp.ne.s32.totalorder %s488_s2, %s314_s29  ;;  %p318_p9 = scmp.lt.u32.totalorder %s314_s29, %s488_s2 }
  0x16   :  { %p320_p10 = pnand %p318_p9, %p315_p8 }
  0x18   :  { %323 = shalt.err (!%p320_p10)
}
  0x19   :  { %s324_s7 = scalar_lea.vmem %s29_s15, 16  ;;  %s328_s8 = scalar_lea.vmem %s29_s15, 32 }
  0x1a   :  { %p325_p11 = scmp.ne.s32.totalorder %s29_s15, %s324_s7  ;;  %p329_p12 = scmp.lt.s32.totalorder %s29_s15, %s29_s15 }
  0x1b   :  { %p330_p13 = scmp.lt.s32.totalorder %s328_s8, %s324_s7 }
  0x1d   :  { %p331_p0 = por %p330_p13, %p329_p12 }
  0x1f   :  { %p332_p1 = pnand %p331_p0, %p325_p11 }
  0x21   :  { %335 = shalt.err (!%p332_p1)
}
  0x22   :  { %31 = dma.hbm_to_vmem [thread:$0]  %s488_s2, 16, %s29_s15, [#allocation5]  }
  0x23   :  { %336 = dma.done.wait [#allocation3], 16  }
  0x24   :  { %337 = vsyncadd [#allocation3], 4294967280 }
  0x25   :  { %338 = dma.done.wait [#allocation5], 16  }
  0x26   :  { %339 = vsyncadd [#allocation5], 4294967280  ;;  %v256_v0 = vld [vmem:[%s486_s0] sm:$0xff]   ;;  %vm54_vm0 = vcmask 261120   ;;  %v271_v1 = vld [vmem:[%s486_s0 + $0x8] sm:$0xff]   ;;  %vm222_vm1 = vcmask 257024  }
  0x27   :  { %v257_v2 = vunpack.c.l.bf16 %v256_v0  ;;  %v261_v3 = vunpack.c.l.bf16 %v271_v1  ;;  %v258_v4 = vunpack.c.h.bf16 %v256_v0  ;;  %v262_v5 = vunpack.c.h.bf16 %v271_v1  ;;  %v272_v6 = vld [vmem:[%s486_s0 + $0x10] sm:$0xff]   ;;  %v273_v13 = vld [vmem:[%s486_s0 + $0x18] sm:$0xff]  }
  0x28   :  { %v265_v11 = vunpack.c.l.bf16 %v272_v6  ;;  %v266_v12 = vunpack.c.h.bf16 %v272_v6  ;;  %v269_v16 = vunpack.c.l.bf16 %v273_v13  ;;  %v270_v17 = vunpack.c.h.bf16 %v273_v13 }
  0x29   :  { %v55_v7 = vsel %vm54_vm0, %v257_v2, 0.0  ;;  %v61_v8 = vsel %vm54_vm0, %v261_v3, 0.0  ;;  %v58_v9 = vsel %vm54_vm0, %v258_v4, 0.0  ;;  %v64_v10 = vsel %vm54_vm0, %v262_v5, 0.0 }
  0x2a   :  { %56 = vadd.xlane.f32.xlu0 %v55_v7  ;;  %62 = vadd.xlane.f32.xlu1 %v61_v8  ;;  %v67_v14 = vsel %vm54_vm0, %v265_v11, 0.0  ;;  %v70_v15 = vsel %vm54_vm0, %v266_v12, 0.0  ;;  %v73_v18 = vsel %vm54_vm0, %v269_v16, 0.0  ;;  %v76_v19 = vsel %vm54_vm0, %v270_v17, 0.0 }
  0x2e   :  { %59 = vadd.xlane.f32.xlu0 %v58_v9  ;;  %65 = vadd.xlane.f32.xlu1 %v64_v10 }
  0x32   :  { %68 = vadd.xlane.f32.xlu0 %v67_v14  ;;  %71 = vadd.xlane.f32.xlu1 %v70_v15 }
  0x36   :  { %74 = vadd.xlane.f32.xlu0 %v73_v18  ;;  %77 = vadd.xlane.f32.xlu1 %v76_v19 }
  0xb7   :  { %v57_v20 = vpop.xlane.xlu0 %56  ;;  %v63_v21 = vpop.xlane.xlu1 %62 }
  0xb8   :  { %v80_v22 = vmul.f32 0.03125, %v57_v20  ;;  %v82_v23 = vmul.f32 0.03125, %v63_v21  ;;  %v238_v21 = vld [vmem:[#allocation4] ss:$0 sm:$0xff] }
  0xba   :  { %v406_v24 = vsub.f32 %v257_v2, %v80_v22  ;;  %v408_v25 = vsub.f32 %v261_v3, %v82_v23 }
  0xbb   :  { %v60_v26 = vpop.xlane.xlu0 %59  ;;  %v66_v27 = vpop.xlane.xlu1 %65 }
  0xbc   :  { %v81_v28 = vmul.f32 0.03125, %v60_v26  ;;  %v83_v29 = vmul.f32 0.03125, %v66_v27  ;;  %v96_v30 = vmul.f32 %v406_v24, %v406_v24  ;;  %v98_v31 = vmul.f32 %v408_v25, %v408_v25 }
  0xbe   :  { %v414_v32 = vsub.f32 %v258_v4, %v81_v28  ;;  %v416_v33 = vsub.f32 %v262_v5, %v83_v29  ;;  %v104_v34 = vsel %vm54_vm0, %v96_v30, 0.0  ;;  %v110_v37 = vsel %vm54_vm0, %v98_v31, 0.0 }
  0xbf   :  { %105 = vadd.xlane.f32.xlu0 %v104_v34  ;;  %v69_v35 = vpop.xlane.xlu0 %68  ;;  %v72_v36 = vpop.xlane.xlu1 %71 }
  0xc0   :  { %v84_v38 = vmul.f32 0.03125, %v69_v35  ;;  %v85_v39 = vmul.f32 0.03125, %v72_v36  ;;  %v97_v40 = vmul.f32 %v414_v32, %v414_v32  ;;  %v99_v41 = vmul.f32 %v416_v33, %v416_v33 }
  0xc2   :  { %v424_v42 = vsub.f32 %v265_v11, %v84_v38  ;;  %v426_v43 = vsub.f32 %v266_v12, %v85_v39  ;;  %v107_v44 = vsel %vm54_vm0, %v97_v40, 0.0  ;;  %v113_v47 = vsel %vm54_vm0, %v99_v41, 0.0 }
  0xc3   :  { %111 = vadd.xlane.f32.xlu0 %v110_v37  ;;  %108 = vadd.xlane.f32.xlu1 %v107_v44  ;;  %v75_v45 = vpop.xlane.xlu0 %74  ;;  %v78_v46 = vpop.xlane.xlu1 %77 }
  0xc4   :  { %v86_v48 = vmul.f32 0.03125, %v75_v45  ;;  %v87_v49 = vmul.f32 0.03125, %v78_v46  ;;  %v100_v50 = vmul.f32 %v424_v42, %v424_v42  ;;  %v101_v51 = vmul.f32 %v426_v43, %v426_v43 }
  0xc6   :  { %v434_v52 = vsub.f32 %v269_v16, %v86_v48  ;;  %v436_v53 = vsub.f32 %v270_v17, %v87_v49  ;;  %v116_v54 = vsel %vm54_vm0, %v100_v50, 0.0  ;;  %v119_v55 = vsel %vm54_vm0, %v101_v51, 0.0  ;;  %v237_v16 = vld [vmem:[#allocation2] ss:$0 sm:$0xff] }
  0xc7   :  { %114 = vadd.xlane.f32.xlu1 %v113_v47  ;;  %117 = vadd.xlane.f32.xlu0 %v116_v54 }
  0xc8   :  { %v102_v56 = vmul.f32 %v434_v52, %v434_v52  ;;  %v103_v57 = vmul.f32 %v436_v53, %v436_v53 }
  0xca   :  { %v122_v58 = vsel %vm54_vm0, %v102_v56, 0.0  ;;  %v125_v59 = vsel %vm54_vm0, %v103_v57, 0.0 }
  0xcb   :  { %120 = vadd.xlane.f32.xlu1 %v119_v55  ;;  %123 = vadd.xlane.f32.xlu0 %v122_v58 }
  0xcf   :  { %126 = vadd.xlane.f32.xlu1 %v125_v59 }
 0x14c   :  { %v106_v60 = vpop.xlane.xlu0 %105 }
 0x14d   :  { %v128_v61 = vmul.f32 0.03125, %v106_v60 }
 0x14f   :  { %v136_v62 = vadd.f32 1e-05, %v128_v61 }
 0x150   :  { %v109_v63 = vpop.xlane.xlu1 %108  ;;  %v112_v0 = vpop.xlane.xlu0 %111 }
 0x151   :  { %276 = vrsqrt.f32 %v136_v62  ;;  %v129_v1 = vmul.f32 0.03125, %v109_v63  ;;  %v130_v2 = vmul.f32 0.03125, %v112_v0 }
 0x153   :  { %v137_v3 = vadd.f32 1e-05, %v129_v1  ;;  %v138_v4 = vadd.f32 1e-05, %v130_v2 }
 0x154   :  { %v115_v5 = vpop.xlane.xlu1 %114  ;;  %v118_v6 = vpop.xlane.xlu0 %117 }
 0x155   :  { %278 = vrsqrt.f32 %v137_v3  ;;  %v131_v7 = vmul.f32 0.03125, %v115_v5  ;;  %v132_v8 = vmul.f32 0.03125, %v118_v6 }
 0x156   :  { %280 = vrsqrt.f32 %v138_v4 }
 0x157   :  { %v139_v9 = vadd.f32 1e-05, %v131_v7  ;;  %v140_v10 = vadd.f32 1e-05, %v132_v8 }
 0x158   :  { %v121_v11 = vpop.xlane.xlu1 %120  ;;  %v124_v12 = vpop.xlane.xlu0 %123 }
 0x159   :  { %282 = vrsqrt.f32 %v139_v9  ;;  %v133_v13 = vmul.f32 0.03125, %v121_v11  ;;  %v134_v14 = vmul.f32 0.03125, %v124_v12 }
 0x15a   :  { %284 = vrsqrt.f32 %v140_v10 }
 0x15b   :  { %v277_v15 = vpop.eup %276  ;;  %v141_v17 = vadd.f32 1e-05, %v133_v13  ;;  %v142_v18 = vadd.f32 1e-05, %v134_v14 }
 0x15c   :  { %v152_v19 = vmul.f32 %v277_v15, %v406_v24  ;;  %v127_v20 = vpop.xlane.xlu1 %126 }
 0x15d   :  { %286 = vrsqrt.f32 %v141_v17  ;;  %v135_v22 = vmul.f32 0.03125, %v127_v20 }
 0x15e   :  { %v167_v23 = vmul.f32 %v237_v16, %v152_v19  ;;  %288 = vrsqrt.f32 %v142_v18 }
 0x15f   :  { %v279_v26 = vpop.eup %278  ;;  %v143_v27 = vadd.f32 1e-05, %v135_v22 }
 0x160   :  { %v281_v28 = vpop.eup %280  ;;  %v182_v29 = vadd.f32 %v238_v21, %v167_v23  ;;  %v153_v30 = vmul.f32 %v279_v26, %v414_v32 }
 0x161   :  { %v154_v31 = vmul.f32 %v281_v28, %v408_v25  ;;  %290 = vrsqrt.f32 %v143_v27 }
 0x162   :  { %v247_v34 = vpack.c.bf16 %v182_v29, %v182_v29  ;;  %v168_v35 = vmul.f32 %v237_v16, %v153_v30 }
 0x163   :  { %v283_v36 = vpop.eup %282  ;;  %v169_v24 = vmul.f32 %v237_v16, %v154_v31 }
 0x164   :  { %v285_v37 = vpop.eup %284  ;;  %223 = vst.msk [vmem:[%s489_s3] sm:$0xf] %vm222_vm1, %v247_v34  ;;  %v183_v38 = vadd.f32 %v238_v21, %v168_v35  ;;  %v155_v39 = vmul.f32 %v283_v36, %v416_v33 }
 0x165   :  { %v184_v40 = vadd.f32 %v238_v21, %v169_v24  ;;  %v156_v32 = vmul.f32 %v285_v37, %v424_v42 }
 0x166   :  { %v248_v41 = vpack.c.bf16 %v183_v38, %v183_v38  ;;  %v170_v44 = vmul.f32 %v237_v16, %v155_v39 }
 0x167   :  { %v287_v25 = vpop.eup %286  ;;  %v249_v45 = vpack.c.bf16 %v184_v40, %v184_v40  ;;  %v171_v46 = vmul.f32 %v237_v16, %v156_v32 }
 0x168   :  { %v289_v47 = vpop.eup %288  ;;  %224 = vst.msk [vmem:[%s489_s3 + $0x4] sm:$0xf] %vm222_vm1, %v248_v41  ;;  %v185_v48 = vadd.f32 %v238_v21, %v170_v44  ;;  %v157_v49 = vmul.f32 %v287_v25, %v426_v43 }
 0x169   :  { %225 = vst.msk [vmem:[%s489_s3 + $0x8] sm:$0xf] %vm222_vm1, %v249_v45  ;;  %v186_v33 = vadd.f32 %v238_v21, %v171_v46  ;;  %v158_v42 = vmul.f32 %v289_v47, %v434_v52 }
 0x16a   :  { %v250_v50 = vpack.c.bf16 %v185_v48, %v185_v48  ;;  %v172_v51 = vmul.f32 %v237_v16, %v157_v49 }
 0x16b   :  { %v291_v54 = vpop.eup %290  ;;  %v251_v55 = vpack.c.bf16 %v186_v33, %v186_v33  ;;  %v173_v56 = vmul.f32 %v237_v16, %v158_v42 }
 0x16c   :  { %226 = vst.msk [vmem:[%s489_s3 + $0xc] sm:$0xf] %vm222_vm1, %v250_v50  ;;  %v187_v57 = vadd.f32 %v238_v21, %v172_v51  ;;  %v159_v43 = vmul.f32 %v291_v54, %v436_v53 }
 0x16d   :  { %227 = vst.msk [vmem:[%s489_s3 + $0x10] sm:$0xf] %vm222_vm1, %v251_v55  ;;  %v188_v58 = vadd.f32 %v238_v21, %v173_v56 }
 0x16e   :  { %v252_v52 = vpack.c.bf16 %v187_v57, %v187_v57  ;;  %v174_v59 = vmul.f32 %v237_v16, %v159_v43 }
 0x16f   :  { %v253_v60 = vpack.c.bf16 %v188_v58, %v188_v58 }
 0x170   :  { %228 = vst.msk [vmem:[%s489_s3 + $0x14] sm:$0xf] %vm222_vm1, %v252_v52  ;;  %v189_v61 = vadd.f32 %v238_v21, %v174_v59 }
 0x171   :  { %229 = vst.msk [vmem:[%s489_s3 + $0x18] sm:$0xf] %vm222_vm1, %v253_v60 }
 0x172   :  { %v254_v53 = vpack.c.bf16 %v189_v61, %v189_v61 }
 0x174   :  { %230 = vst.msk [vmem:[%s489_s3 + $0x1c] sm:$0xf] %vm222_vm1, %v254_v53 }
 0x175   :  { %235 = vsyncpa [#allocation3], 1 }
 0x176   :  { %236 = vsyncpa [#allocation5], 1 }

// kernel: viedoswin_forward.69
= control target key start
LH: loop header
LB: loop body
LE: loop exit
PB: predicated region body
PF: predicated region fallthrough
CT: control target
= control target key end

     0   :  { %s911_s15 = smov 0   ;;  %s913_s16 = smov 0   ;;  %s987_s0 = inlined_call_operand.vmem [shape: bf16[2,2,32,16], index: 0, kind: input, shape index: {}]   ;;  %s988_s1 = inlined_call_operand.vmem [shape: bf16[2,2,32,16], index: 1, kind: input, shape index: {}]   ;;  %s989_s2 = inlined_call_operand.vmem [shape: bf16[2,2,32,16], index: 2, kind: input, shape index: {}]   ;;  %s990_s3 = inlined_call_operand.vmem [shape: bf16[2,32,32], index: 3, kind: input, shape index: {}]   ;;  %s991_s4 = inlined_call_operand.vmem [shape: bf16[2,2,32,16], index: 4, kind: output, shape index: {}]  }
   0x1   :  { %s915_s17 = smov 0   ;;  %s917_s18 = smov 0  }
   0x2   :  { %s919_s19 = smov 0  }
   0x3 LB: > { %s23_s20 = sadd.s32 1, %s876_s17  ;;  %s26_s21 = sadd.s32 1, %s880_s18  ;;  %s884_s19 = sphi %s919_s19, %s14_s19   ;;  %s880_s18 = sphi %s917_s18, %s995_s18   ;;  %s876_s17 = sphi %s915_s17, %s994_s17   ;;  %s872_s16 = sphi %s913_s16, %s993_s16   ;;  %s868_s15 = sphi %s911_s15, %s992_s15  }
   0x4   : > { %p24_p0 = scmp.ge.s32.totalorder %s23_s20, 2  ;;  %p713_p1 = scmp.ge.s32.totalorder %s884_s19, 1 }
   0x5   : > { %p224_p2 = scmp.lt.s32.totalorder %s884_s19, 5 }
   0x6   : > { %s997_s20 = smov (%p24_p0, %s23_s20), 0  ;;  %s999_s21 = smov (!%p24_p0, %s26_s21), %s880_s18 }
   0x7   : > { %p225_p3 = pnand %p713_p1, %p224_p2  ;;  %p28_p4 = scmp.ge.s32.totalorder %s999_s21, 2 }
   0x8   : > { %p281_p5 = scmp.lt.s32.totalorder (!%p225_p3), %s872_s16, 1  ;;  %p283_p6 = scmp.lt.s32.totalorder (!%p225_p3), %s868_s15, 1  ;;  %vm363_vm0 = vcmask (!%p225_p3), 130048   ;;  %vm425_vm1 = vcmask (!%p225_p3), 261120   ;;  %vm555_vm2 = vcmask (!%p225_p3), 125952  }
   0x9   : > { %s1001_s21 = smov (%p28_p4, %s999_s21), 0  ;;  %228 = sbr.rel (%p225_p3) target bundleno = 795 (0x31b), region = 36 }
  0x10   : > { %s1003_s16 = smov (!%p281_p5, %s872_s16), 1  ;;  %s1005_s15 = smov (!%p283_p6, %s868_s15), 1 }
  0x11   : > { %s715_s22 = sshll.u32 %s1003_s16, 3  ;;  %s714_s23 = sshll.u32 %s1005_s15, 2 }
  0x12   : > { %s287_s24 = sadd.s32 %s715_s22, %s714_s23  ;;  %s744_s6 = sshll.u32 %s1005_s15, 4 }
  0x13   : > { %s941_s25 = sshll.u32 %s287_s24, 2  ;;  %s312_s9 = scalar_lea.vmem %s990_s3, %s744_s6 }
  0x14   : > { %s298_s28 = scalar_lea.vmem %s988_s1, %s941_s25  ;;  %s289_s5 = scalar_lea.vmem %s987_s0, %s941_s25  ;;  %v757_v6 = vld [vmem:[%s312_s9 + $0x8] sm:$0xff]   ;;  %v750_v7 = vld [vmem:[%s312_s9] sm:$0xff]  }
  0x15   : > { %v824_v0 = vld [vmem:[%s298_s28] sm:$0xff]   ;;  %v825_v1 = vld [vmem:[%s298_s28 + $0x8] sm:$0xff]   ;;  %v755_v8 = vunpack.c.l.bf16 %v757_v6  ;;  %v751_v9 = vunpack.c.l.bf16 %v750_v7  ;;  %v756_v10 = vunpack.c.h.bf16 %v757_v6  ;;  %v752_v12 = vunpack.c.h.bf16 %v750_v7  ;;  %s307_s12 = scalar_lea.vmem %s989_s2, %s941_s25  ;;  %s321_s15 = scalar_lea.vmem %s991_s4, %s941_s25 }
  0x16   : > { %782 = vmatprep.subr.msk.bf16.mxu0 %vm363_vm0, %v824_v0  ;;  %v371_v2 = vsel %vm363_vm0, %v824_v0, 0  ;;  %v826_v3 = vld [vmem:[%s289_s5] sm:$0xff]   ;;  %v374_v4 = vsel %vm363_vm0, %v825_v1, 0  ;;  %v827_v5 = vld [vmem:[%s289_s5 + $0x8] sm:$0xff]  }
  0x17   : > { %767 = vmatpush3.bf16.xpose.msra.mxu0 %v371_v2  ;;  %770 = vmatprep.mubr.msk.bf16.mxu0 %vm363_vm0, %v826_v3  ;;  %v828_v44 = vld [vmem:[%s307_s12] sm:$0xff]   ;;  %v829_v45 = vld [vmem:[%s307_s12 + $0x8] sm:$0xff]  }
  0x18   : > { %783 = vmatprep.subr.msk.bf16.mxu0 %vm363_vm0, %v825_v1  ;;  %774 = vmatprep.subr.bf16.mxu1 %v828_v44 }
  0x19   : > { %775 = vmatpush3.bf16.msra.mxu1 %v828_v44 }
  0x1a   : > { %776 = vmatprep.subr.bf16.mxu1 %v829_v45 }
  0x1d   : > { %777 = vmatpush3.bf16.msra.mxu1 %v829_v45 }
  0x1f   : > { %769 = vmatpush3.bf16.xpose.msra.mxu0 %v374_v4 }
  0x26   : > { %771 = vmatmul.mubr.msk.bf16.vlgmr.msra.gmra.mrb[0].mxu0 %vm363_vm0, %v827_v5 }
  0xf9   : > { %v772_v11 = vpop.f32.mrb[0].mxu0 }
  0xfa   : > { %v419_v13 = vadd.f32 %v772_v11, %v755_v8  ;;  %v410_v14 = vpop.f32.mrb[1].mxu0 }
  0xfb   : > { %v411_v15 = vadd.f32 %v751_v9, %v410_v14  ;;  %v773_v16 = vpop.f32.mrb[2].mxu0 }
  0xfc   : > { %v422_v17 = vadd.f32 %v773_v16, %v756_v10  ;;  %v413_v18 = vpop.f32.mrb[3].mxu0  ;;  %v432_v19 = vsel %vm425_vm1, %v419_v13, -inf }
  0xfd   : > { %v414_v20 = vadd.f32 %v752_v12, %v413_v18  ;;  %433 = vmax.xlane.f32.xlu1 %v432_v19  ;;  %v426_v21 = vsel %vm425_vm1, %v411_v15, -inf }
  0xfe   : > { %427 = vmax.xlane.f32.xlu0 %v426_v21  ;;  %v435_v22 = vsel %vm425_vm1, %v422_v17, -inf }
  0xff   : > { %v429_v23 = vsel %vm425_vm1, %v414_v20, -inf }
 0x101   : > { %436 = vmax.xlane.f32.xlu1 %v435_v22 }
 0x102   : > { %430 = vmax.xlane.f32.xlu0 %v429_v23 }
 0x18a   : > { %v434_v24 = vpop.xlane.xlu1 %433 }
 0x18b   : > { %v440_v25 = vsub.f32 %v419_v13, %v434_v24  ;;  %v428_v26 = vpop.xlane.xlu0 %427 }
 0x18c   : > { %v438_v27 = vsub.f32 %v411_v15, %v428_v26 }
 0x18d   : > { %v446_v28 = vmul.f32 1.442695, %v440_v25 }
 0x18e   : > { %v442_v29 = vmul.f32 1.442695, %v438_v27  ;;  %v437_v30 = vpop.xlane.xlu1 %436 }
 0x18f   : > { %v441_v31 = vsub.f32 %v422_v17, %v437_v30  ;;  %v431_v32 = vpop.xlane.xlu0 %430 }
 0x190   : > { %830 = vpow2.f32 %v442_v29  ;;  %v439_v33 = vsub.f32 %v414_v20, %v431_v32 }
 0x191   : > { %832 = vpow2.f32 %v446_v28  ;;  %v448_v34 = vmul.f32 1.442695, %v441_v31 }
 0x192   : > { %v444_v35 = vmul.f32 1.442695, %v439_v33 }
 0x194   : > { %834 = vpow2.f32 %v444_v35 }
 0x195   : > { %836 = vpow2.f32 %v448_v34 }
 0x19a   : > { %v831_v36 = vpop.eup %830 }
 0x19b   : > { %v450_v37 = vsel %vm425_vm1, %v831_v36, 0.0  ;;  %v833_v38 = vpop.eup %832 }
 0x19c   : > { %451 = vadd.xlane.f32.xlu0 %v450_v37  ;;  %v456_v40 = vsel %vm425_vm1, %v833_v38, 0.0 }
 0x19e   : > { %v835_v39 = vpop.eup %834 }
 0x19f   : > { %v453_v41 = vsel %vm425_vm1, %v835_v39, 0.0  ;;  %v837_v42 = vpop.eup %836 }
 0x1a0   : > { %457 = vadd.xlane.f32.xlu0 %v456_v40  ;;  %454 = vadd.xlane.f32.xlu1 %v453_v41  ;;  %v459_v43 = vsel %vm425_vm1, %v837_v42, 0.0 }
 0x1a4   : > { %460 = vadd.xlane.f32.xlu1 %v459_v43 }
 0x229   : > { %v452_v46 = vpop.xlane.xlu0 %451 }
 0x22a   : > { %838 = vrcp.f32 %v452_v46 }
 0x22d   : > { %v455_v47 = vpop.xlane.xlu1 %454  ;;  %v458_v48 = vpop.xlane.xlu0 %457 }
 0x22e   : > { %840 = vrcp.f32 %v455_v47 }
 0x22f   : > { %842 = vrcp.f32 %v458_v48 }
 0x231   : > { %v461_v49 = vpop.xlane.xlu1 %460 }
 0x232   : > { %844 = vrcp.f32 %v461_v49 }
 0x234   : > { %v839_v50 = vpop.eup %838 }
 0x235   : > { %v466_v52 = vmul.f32 %v839_v50, %v831_v36 }
 0x238   : > { %v841_v51 = vpop.eup %840 }
 0x239   : > { %v467_v53 = vmul.f32 %v841_v51, %v835_v39  ;;  %v843_v54 = vpop.eup %842 }
 0x23a   : > { %v468_v57 = vmul.f32 %v843_v54, %v833_v38 }
 0x23b   : > { %v470_v55 = vpack.c.bf16 %v467_v53, %v466_v52 }
 0x23c   : > { %v845_v56 = vpop.eup %844 }
 0x23d   : > { %778 = vmatprep.mubr.msk.bf16.mxu1 %vm425_vm1, %v470_v55  ;;  %v469_v58 = vmul.f32 %v845_v56, %v837_v42 }
 0x23f   : > { %v471_v59 = vpack.c.bf16 %v469_v58, %v468_v57 }
 0x241   : > { %779 = vmatmul.mubr.msk.bf16.vlgmr.msra.gmra.mrb[0].mxu1 %vm425_vm1, %v471_v59 }
 0x314   : > { %v780_v60 = vpop.f32.mrb[0].mxu1 }
 0x315   : > { %v747_v61 = vpack.c.bf16 %v780_v60, %v780_v60  ;;  %v524_v62 = vpop.f32.mrb[1].mxu1 }
 0x316   : > { %v745_v63 = vpack.c.bf16 %v524_v62, %v524_v62  ;;  %v781_v0 = vpop.f32.mrb[2].mxu1 }
 0x317   : > { %558 = vst.msk [vmem:[%s321_s15 + $0x8] sm:$0xf] %vm555_vm2, %v747_v61  ;;  %v748_v1 = vpack.c.bf16 %v781_v0, %v781_v0  ;;  %v527_v2 = vpop.f32.mrb[3].mxu1 }
 0x318   : > { %556 = vst.msk [vmem:[%s321_s15] sm:$0xf] %vm555_vm2, %v745_v63  ;;  %v746_v3 = vpack.c.bf16 %v527_v2, %v527_v2 }
 0x319   : > { %559 = vst.msk [vmem:[%s321_s15 + $0xc] sm:$0xf] %vm555_vm2, %v748_v1 }
 0x31a   : > { %557 = vst.msk [vmem:[%s321_s15 + $0x4] sm:$0xf] %vm555_vm2, %v746_v3 }
 0x31b PF: > { %s14_s19 = sadd.s32 1, %s884_s19   ;;  %s992_s15 = smov %s876_s17 }
 0x31c   : > { %p11_p7 = scmp.ge.s32.totalorder %s14_s19, 6   ;;  %s993_s16 = smov %s880_s18 }
 0x31d   : > { %s994_s17 = smov %s997_s20  ;;  %s995_s18 = smov %s1001_s21 }
 0x31e   :  { %13 = sbr.rel (!%p11_p7) target bundleno = 3 (0x3), region = 75 }

// kernel: viedoswin_forward.81
= control target key start
LH: loop header
LB: loop body
LE: loop exit
PB: predicated region body
PF: predicated region fallthrough
CT: control target
= control target key end

     0   :  { %8 = vsyncpa [#allocation3], 0  ;;  %s220_s0 = inlined_call_operand.vmem [shape: bf16[16,128], index: 0, kind: input, shape index: {}]   ;;  %s221_s1 = inlined_call_operand.hbm [shape: f32[1,128], index: 1, kind: input, shape index: {}]   ;;  %s222_s2 = inlined_call_operand.hbm [shape: f32[1,128], index: 2, kind: input, shape index: {}]   ;;  %s223_s3 = inlined_call_operand.vmem [shape: bf16[16,128], index: 3, kind: output, shape index: {}]  }
   0x1   :  { %9 = vsyncpa [#allocation5], 0  ;;  %s168_s12 = smov [#allocation2]   ;;  %s169_s14 = smov [#allocation4]  }
   0x2   :  { %s18_s13 = sshll.u32 %s168_s12, 4  ;;  %s28_s15 = sshll.u32 %s169_s14, 4  ;;  %s19_s13 = int_to_ptr.vmem [resolvable:$true] %s18_s13  ;;  %s29_s15 = int_to_ptr.vmem [resolvable:$true] %s28_s15 }
   0x3   :  { %s120_s18 = scalar_lea.hbm %s221_s1, 16 }
   0x4   :  { %p121_p0 = scmp.ne.s32.totalorder %s221_s1, %s120_s18  ;;  %p124_p1 = scmp.lt.u32.totalorder %s120_s18, %s221_s1 }
   0x6   :  { %p126_p2 = pnand %p124_p1, %p121_p0 }
   0x8   :  { %129 = shalt.err (!%p126_p2)
}
   0x9   :  { %s130_s23 = scalar_lea.vmem %s19_s13, 16  ;;  %s134_s24 = scalar_lea.vmem %s19_s13, 32 }
   0xa   :  { %p131_p3 = scmp.ne.s32.totalorder %s19_s13, %s130_s23  ;;  %p135_p4 = scmp.lt.s32.totalorder %s19_s13, %s19_s13 }
   0xb   :  { %p136_p5 = scmp.lt.s32.totalorder %s134_s24, %s130_s23 }
   0xd   :  { %p137_p6 = por %p136_p5, %p135_p4 }
   0xf   :  { %p138_p7 = pnand %p137_p6, %p131_p3 }
  0x11   :  { %141 = shalt.err (!%p138_p7)
}
  0x12   :  { %21 = dma.hbm_to_vmem [thread:$0]  %s221_s1, 16, %s19_s13, [#allocation3]  }
  0x13   :  { %s142_s29 = scalar_lea.hbm %s222_s2, 16 }
  0x14   :  { %p143_p8 = scmp.ne.s32.totalorder %s222_s2, %s142_s29  ;;  %p146_p9 = scmp.lt.u32.totalorder %s142_s29, %s222_s2 }
  0x16   :  { %p148_p10 = pnand %p146_p9, %p143_p8 }
  0x18   :  { %151 = shalt.err (!%p148_p10)
}
  0x19   :  { %s152_s7 = scalar_lea.vmem %s29_s15, 16  ;;  %s156_s8 = scalar_lea.vmem %s29_s15, 32 }
  0x1a   :  { %p153_p11 = scmp.ne.s32.totalorder %s29_s15, %s152_s7  ;;  %p157_p12 = scmp.lt.s32.totalorder %s29_s15, %s29_s15 }
  0x1b   :  { %p158_p13 = scmp.lt.s32.totalorder %s156_s8, %s152_s7 }
  0x1d   :  { %p159_p0 = por %p158_p13, %p157_p12 }
  0x1f   :  { %p160_p1 = pnand %p159_p0, %p153_p11 }
  0x21   :  { %163 = shalt.err (!%p160_p1)
}
  0x22   :  { %31 = dma.hbm_to_vmem [thread:$0]  %s222_s2, 16, %s29_s15, [#allocation5]  }
  0x23   :  { %164 = dma.done.wait [#allocation3], 16  }
  0x24   :  { %165 = vsyncadd [#allocation3], 4294967280 }
  0x25   :  { %166 = dma.done.wait [#allocation5], 16  }
  0x26   :  { %167 = vsyncadd [#allocation5], 4294967280  ;;  %v106_v0 = vld [vmem:[%s220_s0] sm:$0xff]  }
  0x27   :  { %v107_v1 = vunpack.c.l.bf16 %v106_v0  ;;  %v108_v2 = vunpack.c.h.bf16 %v106_v0  ;;  %v99_v19 = vld [vmem:[#allocation2] ss:$0 sm:$0xff]  ;;  %v100_v23 = vld [vmem:[#allocation4] ss:$0 sm:$0xff] }
  0x29   :  { %42 = vadd.xlane.f32.xlu0 %v107_v1 }
  0x2d   :  { %44 = vadd.xlane.f32.xlu0 %v108_v2 }
  0xb6   :  { %v43_v3 = vpop.xlane.xlu0 %42 }
  0xb7   :  { %v47_v4 = vmul.f32 0.0078125, %v43_v3 }
  0xb9   :  { %v49_v5 = vsub.f32 %v107_v1, %v47_v4 }
  0xba   :  { %v45_v6 = vpop.xlane.xlu0 %44 }
  0xbb   :  { %v48_v7 = vmul.f32 0.0078125, %v45_v6  ;;  %v51_v8 = vmul.f32 %v49_v5, %v49_v5 }
  0xbd   :  { %v50_v9 = vsub.f32 %v108_v2, %v48_v7  ;;  %53 = vadd.xlane.f32.xlu1 %v51_v8 }
  0xbf   :  { %v52_v10 = vmul.f32 %v50_v9, %v50_v9 }
  0xc1   :  { %55 = vadd.xlane.f32.xlu1 %v52_v10 }
 0x14a   :  { %v54_v11 = vpop.xlane.xlu1 %53 }
 0x14b   :  { %v57_v12 = vmul.f32 0.0078125, %v54_v11 }
 0x14d   :  { %v59_v13 = vadd.f32 1e-05, %v57_v12 }
 0x14e   :  { %v56_v14 = vpop.xlane.xlu1 %55 }
 0x14f   :  { %116 = vrsqrt.f32 %v59_v13  ;;  %v58_v15 = vmul.f32 0.0078125, %v56_v14 }
 0x151   :  { %v60_v16 = vadd.f32 1e-05, %v58_v15 }
 0x153   :  { %118 = vrsqrt.f32 %v60_v16 }
 0x159   :  { %v117_v17 = vpop.eup %116 }
 0x15a   :  { %v63_v18 = vmul.f32 %v117_v17, %v49_v5 }
 0x15c   :  { %v72_v21 = vmul.f32 %v99_v19, %v63_v18 }
 0x15d   :  { %v119_v20 = vpop.eup %118 }
 0x15e   :  { %v64_v22 = vmul.f32 %v119_v20, %v50_v9  ;;  %v81_v25 = vadd.f32 %v100_v23, %v72_v21 }
 0x160   :  { %v73_v24 = vmul.f32 %v99_v19, %v64_v22 }
 0x162   :  { %v82_v26 = vadd.f32 %v100_v23, %v73_v24 }
 0x164   :  { %v112_v27 = vpack.c.bf16 %v82_v26, %v81_v25 }
 0x166   :  { %113 = vst [vmem:[%s223_s3] sm:$0xff] %v112_v27  }
 0x167   :  { %97 = vsyncpa [#allocation3], 1 }
 0x168   :  { %98 = vsyncpa [#allocation5], 1 }

// kernel: viedoswin_forward.72
= control target key start
LH: loop header
LB: loop body
LE: loop exit
PB: predicated region body
PF: predicated region fallthrough
CT: control target
= control target key end

     0   :  { %8 = vsyncpa [#allocation4], 0  ;;  %s524_s12 = smov [#allocation3]   ;;  %s640_s0 = inlined_call_operand.vmem [shape: bf16[64,128], index: 0, kind: input, shape index: {}]   ;;  %s641_s1 = inlined_call_operand.vmem [shape: bf16[128,128], index: 1, kind: input, shape index: {}]   ;;  %s642_s2 = inlined_call_operand.hbm [shape: f32[1,128], index: 2, kind: input, shape index: {}]   ;;  %s643_s3 = inlined_call_operand.vmem [shape: bf16[64,128], index: 3, kind: output, shape index: {}]  }
   0x1   :  { %s19_s13 = sshll.u32 %s524_s12, 4  ;;  %s500_s16 = scalar_lea.hbm %s642_s2, 16  ;;  %s20_s13 = int_to_ptr.vmem [resolvable:$true] %s19_s13 }
   0x2   :  { %p501_p0 = scmp.ne.s32.totalorder %s642_s2, %s500_s16  ;;  %p504_p1 = scmp.lt.u32.totalorder %s500_s16, %s642_s2 }
   0x4   :  { %p506_p2 = pnand %p504_p1, %p501_p0 }
   0x6   :  { %509 = shalt.err (!%p506_p2)
}
   0x7   :  { %s510_s21 = scalar_lea.vmem %s20_s13, 16  ;;  %s514_s22 = scalar_lea.vmem %s20_s13, 32 }
   0x8   :  { %p511_p3 = scmp.ne.s32.totalorder %s20_s13, %s510_s21  ;;  %p515_p4 = scmp.lt.s32.totalorder %s20_s13, %s20_s13 }
   0x9   :  { %p516_p5 = scmp.lt.s32.totalorder %s514_s22, %s510_s21 }
   0xb   :  { %p517_p6 = por %p516_p5, %p515_p4 }
   0xd   :  { %p518_p7 = pnand %p517_p6, %p511_p3 }
   0xf   :  { %521 = shalt.err (!%p518_p7)
}
  0x10   :  { %22 = dma.hbm_to_vmem [thread:$0]  %s642_s2, 16, %s20_s13, [#allocation4]  }
  0x11   :  { %522 = dma.done.wait [#allocation4], 16  }
  0x12   :  { %523 = vsyncadd [#allocation4], 4294967280  ;;  %v472_v0 = vld [vmem:[%s641_s1] sm:$0xff]   ;;  %v473_v1 = vld [vmem:[%s641_s1 + $0x8] sm:$0xff]  }
  0x13   :  { %431 = vmatprep.subr.bf16.mxu0 %v472_v0  ;;  %455 = vmatprep.subr.bf16.mxu1 %v472_v0  ;;  %v474_v2 = vld [vmem:[%s641_s1 + $0x10] sm:$0xff]   ;;  %v475_v3 = vld [vmem:[%s641_s1 + $0x18] sm:$0xff]   ;;  %v480_v4 = vld [vmem:[%s640_s0] sm:$0xff]  }
  0x14   :  { %432 = vmatpush3.bf16.msra.mxu0 %v472_v0  ;;  %463 = vmatpush3.bf16.msra.mxu1 %v472_v0  ;;  %v481_v5 = vld [vmem:[%s640_s0 + $0x10] sm:$0xff]   ;;  %v476_v6 = vld [vmem:[%s641_s1 + $0x20] sm:$0xff]   ;;  %v477_v7 = vld [vmem:[%s641_s1 + $0x28] sm:$0xff]  }
  0x15   :  { %433 = vmatprep.subr.bf16.mxu0 %v473_v1  ;;  %456 = vmatprep.subr.bf16.mxu1 %v473_v1  ;;  %v478_v8 = vld [vmem:[%s641_s1 + $0x30] sm:$0xff]   ;;  %v479_v9 = vld [vmem:[%s641_s1 + $0x38] sm:$0xff]   ;;  %v482_v10 = vld [vmem:[%s640_s0 + $0x8] sm:$0xff]  }
  0x16   :  { %447 = vmatprep.mubr.bf16.mxu0 %v480_v4  ;;  %451 = vmatprep.mubr.bf16.mxu1 %v481_v5  ;;  %v483_v11 = vld [vmem:[%s640_s0 + $0x18] sm:$0xff]   ;;  %v379_v12 = vld [vmem:[#allocation3] ss:$0 sm:$0xff] }
  0x18   :  { %434 = vmatpush3.bf16.msra.mxu0 %v473_v1  ;;  %464 = vmatpush3.bf16.msra.mxu1 %v473_v1 }
  0x19   :  { %435 = vmatprep.subr.bf16.mxu0 %v474_v2  ;;  %457 = vmatprep.subr.bf16.mxu1 %v474_v2 }
  0x1c   :  { %436 = vmatpush3.bf16.msra.mxu0 %v474_v2  ;;  %465 = vmatpush3.bf16.msra.mxu1 %v474_v2 }
  0x1d   :  { %437 = vmatprep.subr.bf16.mxu0 %v475_v3  ;;  %458 = vmatprep.subr.bf16.mxu1 %v475_v3 }
  0x20   :  { %438 = vmatpush3.bf16.msra.mxu0 %v475_v3  ;;  %466 = vmatpush3.bf16.msra.mxu1 %v475_v3 }
  0x21   :  { %439 = vmatprep.subr.bf16.mxu0 %v476_v6  ;;  %459 = vmatprep.subr.bf16.mxu1 %v476_v6 }
  0x24   :  { %440 = vmatpush3.bf16.msra.mxu0 %v476_v6  ;;  %467 = vmatpush3.bf16.msra.mxu1 %v476_v6 }
  0x25   :  { %441 = vmatprep.subr.bf16.mxu0 %v477_v7  ;;  %460 = vmatprep.subr.bf16.mxu1 %v477_v7 }
  0x28   :  { %442 = vmatpush3.bf16.msra.mxu0 %v477_v7  ;;  %468 = vmatpush3.bf16.msra.mxu1 %v477_v7 }
  0x29   :  { %443 = vmatprep.subr.bf16.mxu0 %v478_v8  ;;  %461 = vmatprep.subr.bf16.mxu1 %v478_v8 }
  0x2c   :  { %444 = vmatpush3.bf16.msra.mxu0 %v478_v8  ;;  %469 = vmatpush3.bf16.msra.mxu1 %v478_v8 }
  0x2d   :  { %445 = vmatprep.subr.bf16.mxu0 %v479_v9  ;;  %462 = vmatprep.subr.bf16.mxu1 %v479_v9 }
  0x30   :  { %446 = vmatpush3.bf16.msra.mxu0 %v479_v9  ;;  %470 = vmatpush3.bf16.msra.mxu1 %v479_v9 }
  0x33   :  { %448 = vmatmul.mubr.bf16.vlgmr.msra.gmra.mrb[0].mxu0 %v482_v10  ;;  %452 = vmatmul.mubr.bf16.vlgmr.msra.gmra.mrb[0].mxu1 %v483_v11 }
 0x106   :  { %v449_v13 = vpop.f32.mrb[0].mxu0  ;;  %v453_v14 = vpop.f32.mrb[0].mxu1 }
 0x107   :  { %v593_v15 = vadd.f32 %v449_v13, %v379_v12  ;;  %v595_v16 = vadd.f32 %v453_v14, %v379_v12  ;;  %v177_v17 = vpop.f32.mrb[1].mxu0  ;;  %v193_v18 = vpop.f32.mrb[1].mxu1 }
 0x108   :  { %v597_v19 = vadd.f32 %v379_v12, %v177_v17  ;;  %v599_v20 = vadd.f32 %v379_v12, %v193_v18  ;;  %v450_v21 = vpop.f32.mrb[2].mxu0  ;;  %v454_v22 = vpop.f32.mrb[2].mxu1 }
 0x109   :  { %v260_v23 = vmul.f32 0.044715, %v593_v15  ;;  %v264_v24 = vmul.f32 0.044715, %v595_v16  ;;  %v245_v29 = vadd.f32 %v450_v21, %v379_v12  ;;  %v249_v30 = vadd.f32 %v454_v22, %v379_v12  ;;  %v180_v31 = vpop.f32.mrb[3].mxu0  ;;  %v196_v32 = vpop.f32.mrb[3].mxu1 }
 0x10a   :  { %v258_v25 = vmul.f32 0.044715, %v597_v19  ;;  %v262_v26 = vmul.f32 0.044715, %v599_v20  ;;  %v609_v35 = vadd.f32 %v379_v12, %v180_v31  ;;  %v247_v45 = vadd.f32 %v379_v12, %v196_v32 }
 0x10b   :  { %v268_v27 = vmul.f32 %v260_v23, %v593_v15  ;;  %v272_v28 = vmul.f32 %v264_v24, %v595_v16  ;;  %v261_v38 = vmul.f32 0.044715, %v245_v29  ;;  %v265_v41 = vmul.f32 0.044715, %v249_v30 }
 0x10c   :  { %v266_v33 = vmul.f32 %v258_v25, %v597_v19  ;;  %v270_v34 = vmul.f32 %v262_v26, %v599_v20  ;;  %v259_v48 = vmul.f32 0.044715, %v609_v35  ;;  %v263_v57 = vmul.f32 0.044715, %v247_v45 }
 0x10d   :  { %v276_v36 = vmul.f32 %v268_v27, %v593_v15  ;;  %v280_v37 = vmul.f32 %v272_v28, %v595_v16  ;;  %v269_v44 = vmul.f32 %v261_v38, %v245_v29  ;;  %v273_v47 = vmul.f32 %v265_v41, %v249_v30 }
 0x10e   :  { %v274_v39 = vmul.f32 %v266_v33, %v597_v19  ;;  %v278_v40 = vmul.f32 %v270_v34, %v599_v20  ;;  %v267_v55 = vmul.f32 %v259_v48, %v609_v35  ;;  %v271_v62 = vmul.f32 %v263_v57, %v247_v45 }
 0x10f   :  { %v284_v42 = vadd.f32 %v276_v36, %v593_v15  ;;  %v288_v43 = vadd.f32 %v280_v37, %v595_v16  ;;  %v277_v52 = vmul.f32 %v269_v44, %v245_v29  ;;  %v281_v54 = vmul.f32 %v273_v47, %v249_v30 }
 0x110   :  { %v282_v46 = vadd.f32 %v274_v39, %v597_v19  ;;  %v286_v51 = vadd.f32 %v278_v40, %v599_v20  ;;  %v275_v59 = vmul.f32 %v267_v55, %v609_v35  ;;  %v279_v1 = vmul.f32 %v271_v62, %v247_v45 }
 0x111   :  { %v292_v49 = vmul.f32 0.7978846, %v284_v42  ;;  %v296_v50 = vmul.f32 0.7978846, %v288_v43  ;;  %v285_v56 = vadd.f32 %v277_v52, %v245_v29  ;;  %v289_v58 = vadd.f32 %v281_v54, %v249_v30 }
 0x112   :  { %v290_v53 = vmul.f32 0.7978846, %v282_v46  ;;  %v294_v60 = vmul.f32 0.7978846, %v286_v51  ;;  %v283_v0 = vadd.f32 %v275_v59, %v609_v35  ;;  %v287_v3 = vadd.f32 %v279_v1, %v247_v45 }
 0x113   :  { %484 = vtanh.f32 %v292_v49  ;;  %v293_v61 = vmul.f32 0.7978846, %v285_v56  ;;  %v297_v63 = vmul.f32 0.7978846, %v289_v58  ;;  %v252_v12 = vmul.f32 0.5, %v593_v15 }
 0x114   :  { %486 = vtanh.f32 %v296_v50  ;;  %v291_v2 = vmul.f32 0.7978846, %v283_v0  ;;  %v295_v4 = vmul.f32 0.7978846, %v287_v3  ;;  %v253_v13 = vmul.f32 0.5, %v245_v29 }
 0x115   :  { %488 = vtanh.f32 %v290_v53  ;;  %v256_v18 = vmul.f32 0.5, %v595_v16  ;;  %v257_v22 = vmul.f32 0.5, %v249_v30  ;;  %v250_v26 = vmul.f32 0.5, %v597_v19 }
 0x116   :  { %490 = vtanh.f32 %v293_v61  ;;  %v251_v32 = vmul.f32 0.5, %v609_v35  ;;  %v254_v16 = vmul.f32 0.5, %v599_v20  ;;  %v255_v30 = vmul.f32 0.5, %v247_v45 }
 0x117   :  { %492 = vtanh.f32 %v297_v63 }
 0x118   :  { %494 = vtanh.f32 %v294_v60 }
 0x119   :  { %496 = vtanh.f32 %v291_v2 }
 0x11a   :  { %498 = vtanh.f32 %v295_v4 }
 0x11d   :  { %v485_v5 = vpop.eup %484 }
 0x11e   :  { %v487_v6 = vpop.eup %486  ;;  %v308_v8 = vadd.f32 1.0, %v485_v5 }
 0x11f   :  { %v489_v7 = vpop.eup %488  ;;  %v312_v10 = vadd.f32 1.0, %v487_v6 }
 0x120   :  { %v491_v9 = vpop.eup %490  ;;  %v306_v21 = vadd.f32 1.0, %v489_v7  ;;  %v316_v25 = vmul.f32 %v308_v8, %v252_v12 }
 0x121   :  { %v493_v11 = vpop.eup %492  ;;  %v309_v14 = vadd.f32 1.0, %v491_v9  ;;  %v320_v28 = vmul.f32 %v312_v10, %v256_v18 }
 0x122   :  { %v495_v17 = vpop.eup %494  ;;  %v313_v23 = vadd.f32 1.0, %v493_v11  ;;  %v314_v36 = vmul.f32 %v306_v21, %v250_v26 }
 0x123   :  { %v497_v24 = vpop.eup %496  ;;  %v317_v27 = vmul.f32 %v309_v14, %v253_v13  ;;  %v310_v34 = vadd.f32 1.0, %v495_v17 }
 0x124   :  { %v321_v31 = vmul.f32 %v313_v23, %v257_v22  ;;  %v307_v33 = vadd.f32 1.0, %v497_v24  ;;  %v499_v29 = vpop.eup %498 }
 0x125   :  { %v404_v15 = vpack.c.bf16 %v317_v27, %v316_v25  ;;  %v311_v19 = vadd.f32 1.0, %v499_v29  ;;  %v318_v39 = vmul.f32 %v310_v34, %v254_v16 }
 0x126   :  { %v414_v37 = vpack.c.bf16 %v321_v31, %v320_v28  ;;  %v315_v38 = vmul.f32 %v307_v33, %v251_v32 }
 0x127   :  { %416 = vst [vmem:[%s643_s3 + $0x8] sm:$0xff] %v404_v15   ;;  %v319_v40 = vmul.f32 %v311_v19, %v255_v30 }
 0x128   :  { %418 = vst [vmem:[%s643_s3 + $0x18] sm:$0xff] %v414_v37   ;;  %v399_v35 = vpack.c.bf16 %v315_v38, %v314_v36 }
 0x129   :  { %v409_v41 = vpack.c.bf16 %v319_v40, %v318_v39 }
 0x12a   :  { %400 = vst [vmem:[%s643_s3] sm:$0xff] %v399_v35  }
 0x12b   :  { %417 = vst [vmem:[%s643_s3 + $0x10] sm:$0xff] %v409_v41  }
 0x12c   :  { %366 = vsyncpa [#allocation4], 1 }

// kernel: viedoswin_forward.82
= control target key start
LH: loop header
LB: loop body
LE: loop exit
PB: predicated region body
PF: predicated region fallthrough
CT: control target
= control target key end

     0   :  { %v227_v0 = vmov 0.0   ;;  %vm228_vm0 = vmmov 0   ;;  %s282_s1 = inlined_call_operand.vmem [shape: bf16[128,128], index: 1, kind: input, shape index: {}]   ;;  %s283_s0 = inlined_call_operand.vmem [shape: bf16[16,128], index: 0, kind: input, shape index: {}]   ;;  %s284_s2 = inlined_call_operand.vmem [shape: f32[1,128], index: 2, kind: input, shape index: {}]   ;;  %s285_s3 = inlined_call_operand.vmem [shape: bf16[16,128], index: 3, kind: output, shape index: {}]  }
   0x1   :  { %196 = vmatprep.subr.bf16.mxu0 %v227_v0  ;;  %v218_v1 = vld [vmem:[%s282_s1] sm:$0xff]   ;;  %212 = vmatprep.mubr.msk.bf16.mxu0 %vm228_vm0, %v227_v0  ;;  %v219_v2 = vld [vmem:[%s282_s1 + $0x8] sm:$0xff]   ;;  %v220_v3 = vld [vmem:[%s282_s1 + $0x10] sm:$0xff]  }
   0x2   :  { %197 = vmatpush3.bf16.msra.mxu0 %v218_v1  ;;  %v221_v4 = vld [vmem:[%s282_s1 + $0x18] sm:$0xff]   ;;  %v222_v5 = vld [vmem:[%s282_s1 + $0x20] sm:$0xff]   ;;  %v223_v6 = vld [vmem:[%s282_s1 + $0x28] sm:$0xff]  }
   0x3   :  { %198 = vmatprep.subr.bf16.mxu0 %v227_v0  ;;  %v224_v7 = vld [vmem:[%s282_s1 + $0x30] sm:$0xff]   ;;  %v225_v8 = vld [vmem:[%s282_s1 + $0x38] sm:$0xff]   ;;  %v226_v9 = vld [vmem:[%s283_s0] sm:$0xff]  }
   0x4   :  { %v177_v11 = vld [vmem:[%s284_s2] ss:$0 sm:$0xff] }
   0x6   :  { %199 = vmatpush3.bf16.msra.mxu0 %v219_v2 }
   0x7   :  { %200 = vmatprep.subr.bf16.mxu0 %v227_v0 }
   0xa   :  { %201 = vmatpush3.bf16.msra.mxu0 %v220_v3 }
   0xb   :  { %202 = vmatprep.subr.bf16.mxu0 %v227_v0 }
   0xe   :  { %203 = vmatpush3.bf16.msra.mxu0 %v221_v4 }
   0xf   :  { %204 = vmatprep.subr.bf16.mxu0 %v227_v0 }
  0x12   :  { %205 = vmatpush3.bf16.msra.mxu0 %v222_v5 }
  0x13   :  { %206 = vmatprep.subr.bf16.mxu0 %v227_v0 }
  0x16   :  { %207 = vmatpush3.bf16.msra.mxu0 %v223_v6 }
  0x17   :  { %208 = vmatprep.subr.bf16.mxu0 %v227_v0 }
  0x1a   :  { %209 = vmatpush3.bf16.msra.mxu0 %v224_v7 }
  0x1b   :  { %210 = vmatprep.subr.bf16.mxu0 %v227_v0 }
  0x1e   :  { %211 = vmatpush3.bf16.msra.mxu0 %v225_v8 }
  0x21   :  { %213 = vmatmul.mubr.bf16.vlgmr.msra.gmra.mrb[0].mxu0 %v226_v9 }
  0xf4   :  { %v129_v10 = vpop.f32.mrb[0].mxu0 }
  0xf5   :  { %v214_v12 = vpop.f32.mrb[1].mxu0  ;;  %v152_v14 = vadd.f32 %v177_v11, %v129_v10 }
  0xf6   :  { %v132_v13 = vpop.f32.mrb[2].mxu0 }
  0xf7   :  { %v153_v15 = vadd.f32 %v177_v11, %v132_v13  ;;  %v215_v16 = vpop.f32.mrb[3].mxu0 }
  0xf9   :  { %v185_v17 = vpack.c.bf16 %v153_v15, %v152_v14 }
  0xfb   :  { %186 = vst [vmem:[%s285_s3] sm:$0xff] %v185_v17  }

// kernel: viedoswin_forward.84
= control target key start
LH: loop header
LB: loop body
LE: loop exit
PB: predicated region body
PF: predicated region fallthrough
CT: control target
= control target key end

     0   :  { %v270_v1 = vmov 0   ;;  %v191_v18 = vlaneseq  ;;  %s351_s1 = inlined_call_operand.vmem [shape: bf16[128,256], index: 1, kind: input, shape index: {}]   ;;  %s352_s0 = inlined_call_operand.vmem [shape: bf16[16,128], index: 0, kind: input, shape index: {}]   ;;  %s353_s2 = inlined_call_operand.vmem [shape: f32[1,256], index: 2, kind: input, shape index: {}]   ;;  %s354_s3 = inlined_call_operand.vmem [shape: bf16[16,256], index: 3, kind: output, shape index: {}]  }
   0x1   :  { %v245_v0 = vld [vmem:[%s351_s1 + $0x4] ss:$8 sps:$4 sm:$0xff]   ;;  %163 = vmatprep.mubr.bf16.mxu0 %v270_v1  ;;  %v247_v2 = vld [vmem:[%s351_s1] ss:$8 sps:$4 sm:$0xff]   ;;  %v248_v3 = vld [vmem:[%s351_s1 + $0x14] ss:$8 sps:$4 sm:$0xff]  }
   0x2   :  { %131 = vmatprep.subr.bf16.mxu0 %v245_v0  ;;  %v250_v4 = vld [vmem:[%s351_s1 + $0x10] ss:$8 sps:$4 sm:$0xff]   ;;  %v251_v5 = vld [vmem:[%s351_s1 + $0x24] ss:$8 sps:$4 sm:$0xff]   ;;  %v253_v6 = vld [vmem:[%s351_s1 + $0x20] ss:$8 sps:$4 sm:$0xff]  }
   0x3   :  { %132 = vmatpush1.bf16.msra.mxu0 %v247_v2  ;;  %v254_v7 = vld [vmem:[%s351_s1 + $0x34] ss:$8 sps:$4 sm:$0xff]   ;;  %v256_v8 = vld [vmem:[%s351_s1 + $0x30] ss:$8 sps:$4 sm:$0xff]   ;;  %v257_v9 = vld [vmem:[%s351_s1 + $0x44] ss:$8 sps:$4 sm:$0xff]  }
   0x4   :  { %133 = vmatprep.subr.bf16.mxu0 %v248_v3  ;;  %v259_v10 = vld [vmem:[%s351_s1 + $0x40] ss:$8 sps:$4 sm:$0xff]   ;;  %v260_v11 = vld [vmem:[%s351_s1 + $0x54] ss:$8 sps:$4 sm:$0xff]   ;;  %v262_v12 = vld [vmem:[%s351_s1 + $0x50] ss:$8 sps:$4 sm:$0xff]  }
   0x5   :  { %v263_v13 = vld [vmem:[%s351_s1 + $0x64] ss:$8 sps:$4 sm:$0xff]   ;;  %v265_v14 = vld [vmem:[%s351_s1 + $0x60] ss:$8 sps:$4 sm:$0xff]   ;;  %v266_v15 = vld [vmem:[%s351_s1 + $0x74] ss:$8 sps:$4 sm:$0xff]  }
   0x6   :  { %v268_v16 = vld [vmem:[%s351_s1 + $0x70] ss:$8 sps:$4 sm:$0xff]   ;;  %v269_v17 = vld [vmem:[%s352_s0] sm:$0xff]   ;;  %v192_v19 = vshrl.u32 %v191_v18, 7 }
   0x7   :  { %134 = vmatpush1.bf16.msra.mxu0 %v250_v4  ;;  %v189_v21 = vld [vmem:[%s353_s2] sm:$0x3] }
   0x8   :  { %135 = vmatprep.subr.bf16.mxu0 %v251_v5  ;;  %v193_v20 = vsub.s32 0, %v192_v19  ;;  %v197_v22 = vsub.s32 1, %v192_v19 }
   0xa   :  { %v194_v23 = vrot.slane %v189_v21, %v193_v20  ;;  %v198_v24 = vrot.slane %v189_v21, %v197_v22 }
   0xb   :  { %136 = vmatpush1.bf16.msra.mxu0 %v253_v6 }
   0xc   :  { %137 = vmatprep.subr.bf16.mxu0 %v254_v7 }
   0xf   :  { %138 = vmatpush1.bf16.msra.mxu0 %v256_v8 }
  0x10   :  { %139 = vmatprep.subr.bf16.mxu0 %v257_v9 }
  0x13   :  { %140 = vmatpush1.bf16.msra.mxu0 %v259_v10 }
  0x14   :  { %141 = vmatprep.subr.bf16.mxu0 %v260_v11 }
  0x17   :  { %142 = vmatpush1.bf16.msra.mxu0 %v262_v12 }
  0x18   :  { %143 = vmatprep.subr.bf16.mxu0 %v263_v13 }
  0x1b   :  { %144 = vmatpush1.bf16.msra.mxu0 %v265_v14 }
  0x1c   :  { %145 = vmatprep.subr.bf16.mxu0 %v266_v15 }
  0x1f   :  { %146 = vmatpush1.bf16.msra.mxu0 %v268_v16 }
  0x22   :  { %164 = vmatmul.mubr.bf16.vlgmr.msra.gmra.mrb[0].mxu0 %v269_v17 }
  0xf5   :  { %v165_v25 = vpop.f32.mrb[0].mxu0 }
  0xf6   :  { %v201_v26 = vadd.f32 %v194_v23, %v165_v25  ;;  %v167_v27 = vpop.f32.mrb[1].mxu0 }
  0xf7   :  { %v202_v28 = vadd.f32 %v198_v24, %v167_v27  ;;  %v169_v29 = vpop.f32.mrb[2].mxu0 }
  0xf8   :  { %v203_v30 = vadd.f32 %v194_v23, %v169_v29  ;;  %v171_v31 = vpop.f32.mrb[3].mxu0 }
  0xf9   :  { %v242_v32 = vpack.c.bf16 %v202_v28, %v201_v26  ;;  %v204_v33 = vadd.f32 %v198_v24, %v171_v31 }
  0xfb   :  { %217 = vst [vmem:[%s354_s3] sm:$0xff] %v242_v32  ;;  %v243_v34 = vpack.c.bf16 %v204_v33, %v203_v30 }
  0xfd   :  { %218 = vst [vmem:[%s354_s3 + $0x8] sm:$0xff] %v243_v34 }

// kernel: viedoswin_forward.83
= control target key start
LH: loop header
LB: loop body
LE: loop exit
PB: predicated region body
PF: predicated region fallthrough
CT: control target
= control target key end

     0   :  { %8 = vsyncpa [#allocation3], 0  ;;  %s228_s0 = inlined_call_operand.vmem [shape: bf16[16,64], index: 0, kind: input, shape index: {}]   ;;  %s229_s1 = inlined_call_operand.hbm [shape: f32[1,64], index: 1, kind: input, shape index: {}]   ;;  %s230_s2 = inlined_call_operand.hbm [shape: f32[1,64], index: 2, kind: input, shape index: {}]   ;;  %s231_s3 = inlined_call_operand.vmem [shape: bf16[16,64], index: 3, kind: output, shape index: {}]  }
   0x1   :  { %9 = vsyncpa [#allocation5], 0  ;;  %s169_s12 = smov [#allocation2]   ;;  %s170_s14 = smov [#allocation4]  }
   0x2   :  { %s18_s13 = sshll.u32 %s169_s12, 4  ;;  %s28_s15 = sshll.u32 %s170_s14, 4  ;;  %s19_s13 = int_to_ptr.vmem [resolvable:$true] %s18_s13  ;;  %s29_s15 = int_to_ptr.vmem [resolvable:$true] %s28_s15 }
   0x3   :  { %s121_s18 = scalar_lea.hbm %s229_s1, 16 }
   0x4   :  { %p122_p0 = scmp.ne.s32.totalorder %s229_s1, %s121_s18  ;;  %p125_p1 = scmp.lt.u32.totalorder %s121_s18, %s229_s1 }
   0x6   :  { %p127_p2 = pnand %p125_p1, %p122_p0 }
   0x8   :  { %130 = shalt.err (!%p127_p2)
}
   0x9   :  { %s131_s23 = scalar_lea.vmem %s19_s13, 16  ;;  %s135_s24 = scalar_lea.vmem %s19_s13, 32 }
   0xa   :  { %p132_p3 = scmp.ne.s32.totalorder %s19_s13, %s131_s23  ;;  %p136_p4 = scmp.lt.s32.totalorder %s19_s13, %s19_s13 }
   0xb   :  { %p137_p5 = scmp.lt.s32.totalorder %s135_s24, %s131_s23 }
   0xd   :  { %p138_p6 = por %p137_p5, %p136_p4 }
   0xf   :  { %p139_p7 = pnand %p138_p6, %p132_p3 }
  0x11   :  { %142 = shalt.err (!%p139_p7)
}
  0x12   :  { %21 = dma.hbm_to_vmem [thread:$0]  %s229_s1, 16, %s19_s13, [#allocation3]  }
  0x13   :  { %s143_s29 = scalar_lea.hbm %s230_s2, 16 }
  0x14   :  { %p144_p8 = scmp.ne.s32.totalorder %s230_s2, %s143_s29  ;;  %p147_p9 = scmp.lt.u32.totalorder %s143_s29, %s230_s2 }
  0x16   :  { %p149_p10 = pnand %p147_p9, %p144_p8 }
  0x18   :  { %152 = shalt.err (!%p149_p10)
}
  0x19   :  { %s153_s7 = scalar_lea.vmem %s29_s15, 16  ;;  %s157_s8 = scalar_lea.vmem %s29_s15, 32 }
  0x1a   :  { %p154_p11 = scmp.ne.s32.totalorder %s29_s15, %s153_s7  ;;  %p158_p12 = scmp.lt.s32.totalorder %s29_s15, %s29_s15 }
  0x1b   :  { %p159_p13 = scmp.lt.s32.totalorder %s157_s8, %s153_s7 }
  0x1d   :  { %p160_p0 = por %p159_p13, %p158_p12 }
  0x1f   :  { %p161_p1 = pnand %p160_p0, %p154_p11 }
  0x21   :  { %164 = shalt.err (!%p161_p1)
}
  0x22   :  { %31 = dma.hbm_to_vmem [thread:$0]  %s230_s2, 16, %s29_s15, [#allocation5]  }
  0x23   :  { %165 = dma.done.wait [#allocation3], 16  }
  0x24   :  { %166 = vsyncadd [#allocation3], 4294967280 }
  0x25   :  { %167 = dma.done.wait [#allocation5], 16  }
  0x26   :  { %168 = vsyncadd [#allocation5], 4294967280  ;;  %v112_v0 = vld [vmem:[%s228_s0] sm:$0xff]   ;;  %vm42_vm0 = vcmask 523264   ;;  %vm96_vm1 = vcmask 519168  }
  0x27   :  { %v113_v1 = vunpack.c.l.bf16 %v112_v0  ;;  %v114_v2 = vunpack.c.h.bf16 %v112_v0  ;;  %v105_v22 = vld [vmem:[#allocation2] ss:$0 sm:$0xff]  ;;  %v106_v24 = vld [vmem:[#allocation4] ss:$0 sm:$0xff] }
  0x29   :  { %v43_v3 = vsel %vm42_vm0, %v113_v1, 0.0  ;;  %v46_v4 = vsel %vm42_vm0, %v114_v2, 0.0 }
  0x2a   :  { %44 = vadd.xlane.f32.xlu0 %v43_v3 }
  0x2e   :  { %47 = vadd.xlane.f32.xlu0 %v46_v4 }
  0xb7   :  { %v45_v5 = vpop.xlane.xlu0 %44 }
  0xb8   :  { %v50_v6 = vmul.f32 0.015625, %v45_v5 }
  0xba   :  { %v52_v7 = vsub.f32 %v113_v1, %v50_v6 }
  0xbb   :  { %v48_v8 = vpop.xlane.xlu0 %47 }
  0xbc   :  { %v51_v9 = vmul.f32 0.015625, %v48_v8  ;;  %v54_v10 = vmul.f32 %v52_v7, %v52_v7 }
  0xbe   :  { %v53_v11 = vsub.f32 %v114_v2, %v51_v9  ;;  %v56_v12 = vsel %vm42_vm0, %v54_v10, 0.0 }
  0xbf   :  { %57 = vadd.xlane.f32.xlu1 %v56_v12 }
  0xc0   :  { %v55_v13 = vmul.f32 %v53_v11, %v53_v11 }
  0xc2   :  { %v59_v14 = vsel %vm42_vm0, %v55_v13, 0.0 }
  0xc3   :  { %60 = vadd.xlane.f32.xlu1 %v59_v14 }
 0x14c   :  { %v58_v15 = vpop.xlane.xlu1 %57 }
 0x14d   :  { %v62_v16 = vmul.f32 0.015625, %v58_v15 }
 0x14f   :  { %v64_v17 = vadd.f32 1e-05, %v62_v16 }
 0x150   :  { %v61_v18 = vpop.xlane.xlu1 %60 }
 0x151   :  { %117 = vrsqrt.f32 %v64_v17  ;;  %v63_v19 = vmul.f32 0.015625, %v61_v18 }
 0x153   :  { %v65_v20 = vadd.f32 1e-05, %v63_v19 }
 0x155   :  { %119 = vrsqrt.f32 %v65_v20 }
 0x15b   :  { %v118_v21 = vpop.eup %117 }
 0x15c   :  { %v68_v23 = vmul.f32 %v118_v21, %v52_v7 }
 0x15e   :  { %v77_v25 = vmul.f32 %v105_v22, %v68_v23 }
 0x15f   :  { %v120_v26 = vpop.eup %119 }
 0x160   :  { %v86_v27 = vadd.f32 %v106_v24, %v77_v25  ;;  %v69_v28 = vmul.f32 %v120_v26, %v53_v11 }
 0x162   :  { %v109_v29 = vpack.c.bf16 %v86_v27, %v86_v27  ;;  %v78_v30 = vmul.f32 %v105_v22, %v69_v28 }
 0x164   :  { %97 = vst.msk [vmem:[%s231_s3] sm:$0xf] %vm96_vm1, %v109_v29  ;;  %v87_v31 = vadd.f32 %v106_v24, %v78_v30 }
 0x166   :  { %v110_v32 = vpack.c.bf16 %v87_v31, %v87_v31 }
 0x168   :  { %98 = vst.msk [vmem:[%s231_s3 + $0x4] sm:$0xf] %vm96_vm1, %v110_v32 }
 0x169   :  { %103 = vsyncpa [#allocation3], 1 }
 0x16a   :  { %104 = vsyncpa [#allocation5], 1 }

// kernel: viedoswin_forward.85
= control target key start
LH: loop header
LB: loop body
LE: loop exit
PB: predicated region body
PF: predicated region fallthrough
CT: control target
= control target key end

     0   :  { %s705_s15 = smov 0   ;;  %s707_s16 = smov 0   ;;  %s774_s0 = inlined_call_operand.vmem [shape: bf16[2,4,8,16], index: 0, kind: input, shape index: {}]   ;;  %s775_s1 = inlined_call_operand.vmem [shape: bf16[2,4,8,16], index: 1, kind: input, shape index: {}]   ;;  %s776_s2 = inlined_call_operand.vmem [shape: bf16[2,4,8,16], index: 2, kind: input, shape index: {}]   ;;  %s777_s3 = inlined_call_operand.vmem [shape: bf16[4,8,8], index: 3, kind: input, shape index: {}]   ;;  %s778_s4 = inlined_call_operand.vmem [shape: bf16[2,4,8,16], index: 4, kind: output, shape index: {}]  }
   0x1   :  { %s709_s17 = smov 0   ;;  %s711_s18 = smov 0  }
   0x2   :  { %s713_s19 = smov 0  }
   0x3 LB: > { %s23_s20 = sadd.s32 1, %s668_s17  ;;  %s26_s21 = sadd.s32 1, %s672_s18  ;;  %s676_s19 = sphi %s713_s19, %s14_s19   ;;  %s672_s18 = sphi %s711_s18, %s782_s18   ;;  %s668_s17 = sphi %s709_s17, %s781_s17   ;;  %s664_s16 = sphi %s707_s16, %s780_s16   ;;  %s660_s15 = sphi %s705_s15, %s779_s15  }
   0x4   : > { %p24_p0 = scmp.ge.s32.totalorder %s23_s20, 4  ;;  %p562_p1 = scmp.ge.s32.totalorder %s676_s19, 1 }
   0x5   : > { %p220_p2 = scmp.lt.s32.totalorder %s676_s19, 9 }
   0x6   : > { %s784_s20 = smov (%p24_p0, %s23_s20), 0  ;;  %s786_s21 = smov (!%p24_p0, %s26_s21), %s672_s18 }
   0x7   : > { %p221_p3 = pnand %p562_p1, %p220_p2  ;;  %p28_p4 = scmp.ge.s32.totalorder %s786_s21, 2 }
   0x8   : > { %p272_p5 = scmp.lt.s32.totalorder (!%p221_p3), %s664_s16, 1  ;;  %p274_p6 = scmp.lt.s32.totalorder (!%p221_p3), %s660_s15, 3  ;;  %v678_v0 = vmov (!%p221_p3), 0.0   ;;  %vm679_vm0 = vmmov (!%p221_p3), 0   ;;  %vm314_vm1 = vcmask (!%p221_p3), 130048   ;;  %vm361_vm2 = vcmask (!%p221_p3), 64512  }
   0x9   : > { %s788_s21 = smov (%p28_p4, %s786_s21), 0  ;;  %224 = sbr.rel (%p221_p3) target bundleno = 775 (0x307), region = 36 }
   0xa   : > { %580 = vmatprep.subr.bf16.mxu0 (!%p221_p3), %v678_v0  ;;  %582 = vmatprep.mubr.msk.bf16.mxu0 (!%p221_p3), %vm679_vm0, %v678_v0  ;;  %vm377_vm3 = vcmask (!%p221_p3), 1043456   ;;  %vm422_vm4 = vcmask (!%p221_p3), 125952  }
   0xb   : > { %586 = vmatprep.subr.bf16.mxu1 (!%p221_p3), %v678_v0  ;;  %588 = vmatprep.mubr.msk.bf16.mxu1 (!%p221_p3), %vm679_vm0, %v678_v0 }
  0x10   : > { %s790_s16 = smov (!%p272_p5, %s664_s16), 1  ;;  %s792_s15 = smov (!%p274_p6, %s660_s15), 3 }
  0x11   : > { %s563_s22 = sshll.u32 %s790_s16, 2  ;;  %s569_s5 = sshll.u32 %s792_s15, 2 }
  0x12   : > { %s277_s23 = sadd.s32 %s563_s22, %s792_s15  ;;  %s299_s8 = scalar_lea.vmem %s777_s3, %s569_s5 }
  0x13   : > { %s735_s24 = sshll.u32 %s277_s23, 2  ;;  %v312_v4 = vld [vmem:[%s299_s8] sm:$0xf] }
  0x14   : > { %s287_s27 = scalar_lea.vmem %s775_s1, %s735_s24  ;;  %s279_s30 = scalar_lea.vmem %s774_s0, %s735_s24  ;;  %v313_v5 = vunpack.c.l.bf16 %v312_v4 }
  0x15   : > { %v310_v1 = vld [vmem:[%s287_s27] sm:$0xf]  ;;  %s295_s11 = scalar_lea.vmem %s776_s2, %s735_s24  ;;  %s307_s14 = scalar_lea.vmem %s778_s4, %s735_s24 }
  0x16   : > { %v319_v2 = vsel %vm314_vm1, %v310_v1, 0  ;;  %v309_v3 = vld [vmem:[%s279_s30] sm:$0xf] }
  0x17   : > { %581 = vmatpush3.bf16.xpose.msra.mxu0 %v319_v2  ;;  %v311_v17 = vld [vmem:[%s295_s11] sm:$0xf] }
  0x18   : > { %v379_v18 = vsel %vm377_vm3, %v311_v17, 0 }
  0x19   : > { %587 = vmatpush3.bf16.msra.mxu1 %v379_v18 }
  0x1e   : > { %583 = vmatmul.mubr.msk.bf16.vlgmr.msra.gmra.mrb[0].mxu0 %vm314_vm1, %v309_v3 }
  0xf1   : > { %v355_v6 = vpop.f32.mrb[0].mxu0 }
  0xf2   : > { %v356_v7 = vadd.f32 %v355_v6, %v313_v5  ;;  %v584_v8 = vpop.f32.mrb[1].mxu0 }
  0xf3   : > { %v358_v9 = vpop.f32.mrb[2].mxu0 }
  0xf4   : > { %v585_v10 = vpop.f32.mrb[3].mxu0  ;;  %v362_v11 = vsel %vm361_vm2, %v356_v7, -inf }
  0xf5   : > { %363 = vmax.xlane.f32.xlu0 %v362_v11 }
 0x182   : > { %v364_v12 = vpop.xlane.xlu0 %363 }
 0x183   : > { %v365_v13 = vsub.f32 %v356_v7, %v364_v12 }
 0x185   : > { %v366_v14 = vmul.f32 1.442695, %v365_v13 }
 0x187   : > { %634 = vpow2.f32 %v366_v14 }
 0x191   : > { %v635_v15 = vpop.eup %634 }
 0x192   : > { %v368_v16 = vsel %vm361_vm2, %v635_v15, 0.0 }
 0x193   : > { %369 = vadd.xlane.f32.xlu0 %v368_v16 }
 0x220   : > { %v370_v19 = vpop.xlane.xlu0 %369 }
 0x221   : > { %636 = vrcp.f32 %v370_v19 }
 0x22b   : > { %v637_v20 = vpop.eup %636 }
 0x22c   : > { %v372_v21 = vmul.f32 %v637_v20, %v635_v15 }
 0x22e   : > { %v373_v22 = vpack.c.bf16 %v372_v21, %v372_v21 }
 0x230   : > { %589 = vmatmul.mubr.msk.bf16.vlgmr.msra.gmra.mrb[0].mxu1 %vm361_vm2, %v373_v22 }
 0x303   : > { %v415_v23 = vpop.f32.mrb[0].mxu1 }
 0x304   : > { %v421_v24 = vpack.c.bf16 %v415_v23, %v415_v23  ;;  %v590_v25 = vpop.f32.mrb[1].mxu1 }
 0x305   : > { %v418_v26 = vpop.f32.mrb[2].mxu1 }
 0x306   : > { %423 = vst.msk [vmem:[%s307_s14] sm:$0xf] %vm422_vm4, %v421_v24  ;;  %v591_v27 = vpop.f32.mrb[3].mxu1 }
 0x307 PF: > { %s14_s19 = sadd.s32 1, %s676_s19   ;;  %s779_s15 = smov %s668_s17 }
 0x308   : > { %p11_p7 = scmp.ge.s32.totalorder %s14_s19, 10   ;;  %s780_s16 = smov %s672_s18 }
 0x309   : > { %s781_s17 = smov %s784_s20  ;;  %s782_s18 = smov %s788_s21 }
 0x30a   :  { %13 = sbr.rel (!%p11_p7) target bundleno = 3 (0x3), region = 75 }

// kernel: viedoswin_forward.89
= control target key start
LH: loop header
LB: loop body
LE: loop exit
PB: predicated region body
PF: predicated region fallthrough
CT: control target
= control target key end

     0   :  { %s385_s1 = inlined_call_operand.vmem [shape: bf16[256,128], index: 1, kind: input, shape index: {}]   ;;  %s386_s0 = inlined_call_operand.vmem [shape: bf16[16,256], index: 0, kind: input, shape index: {}]   ;;  %s387_s2 = inlined_call_operand.vmem [shape: f32[1,128], index: 2, kind: input, shape index: {}]   ;;  %s388_s3 = inlined_call_operand.vmem [shape: bf16[16,128], index: 3, kind: output, shape index: {}]  }
   0x1   :  { %v286_v0 = vld [vmem:[%s385_s1 + $0x40] sm:$0xff]   ;;  %v288_v2 = vld [vmem:[%s385_s1 + $0x48] sm:$0xff]   ;;  %v290_v4 = vld [vmem:[%s385_s1 + $0x50] sm:$0xff]  }
   0x2   :  { %v287_v1 = vld [vmem:[%s385_s1] sm:$0xff]   ;;  %264 = vmatprep.subr.bf16.mxu0 %v286_v0  ;;  %v289_v3 = vld [vmem:[%s385_s1 + $0x8] sm:$0xff]   ;;  %v291_v5 = vld [vmem:[%s385_s1 + $0x10] sm:$0xff]  }
   0x3   :  { %265 = vmatpush3.bf16.msra.mxu0 %v287_v1  ;;  %v292_v6 = vld [vmem:[%s385_s1 + $0x58] sm:$0xff]   ;;  %v294_v8 = vld [vmem:[%s385_s1 + $0x60] sm:$0xff]   ;;  %v296_v10 = vld [vmem:[%s385_s1 + $0x68] sm:$0xff]  }
   0x4   :  { %266 = vmatprep.subr.bf16.mxu0 %v288_v2  ;;  %v293_v7 = vld [vmem:[%s385_s1 + $0x18] sm:$0xff]   ;;  %v295_v9 = vld [vmem:[%s385_s1 + $0x20] sm:$0xff]   ;;  %v297_v12 = vld [vmem:[%s385_s1 + $0x28] sm:$0xff]  }
   0x5   :  { %v304_v11 = vld [vmem:[%s386_s0 + $0x4] ss:$8 sps:$4 sm:$0xff]   ;;  %v298_v13 = vld [vmem:[%s385_s1 + $0x70] sm:$0xff]   ;;  %v300_v15 = vld [vmem:[%s385_s1 + $0x78] sm:$0xff]  }
   0x6   :  { %195 = vmatprep.mubr.bf16.mxu0 %v304_v11  ;;  %v299_v14 = vld [vmem:[%s385_s1 + $0x30] sm:$0xff]   ;;  %v301_v16 = vld [vmem:[%s385_s1 + $0x38] sm:$0xff]   ;;  %v302_v17 = vld [vmem:[%s386_s0] ss:$8 sps:$4 sm:$0xff]  }
   0x7   :  { %267 = vmatpush3.bf16.msra.mxu0 %v289_v3  ;;  %v254_v22 = vld [vmem:[%s387_s2] ss:$0 sm:$0xff] }
   0x8   :  { %268 = vmatprep.subr.bf16.mxu0 %v290_v4 }
   0xb   :  { %269 = vmatpush3.bf16.msra.mxu0 %v291_v5 }
   0xc   :  { %270 = vmatprep.subr.bf16.mxu0 %v292_v6 }
   0xf   :  { %271 = vmatpush3.bf16.msra.mxu0 %v293_v7 }
  0x10   :  { %272 = vmatprep.subr.bf16.mxu0 %v294_v8 }
  0x13   :  { %273 = vmatpush3.bf16.msra.mxu0 %v295_v9 }
  0x14   :  { %274 = vmatprep.subr.bf16.mxu0 %v296_v10 }
  0x17   :  { %275 = vmatpush3.bf16.msra.mxu0 %v297_v12 }
  0x18   :  { %276 = vmatprep.subr.bf16.mxu0 %v298_v13 }
  0x1b   :  { %277 = vmatpush3.bf16.msra.mxu0 %v299_v14 }
  0x1c   :  { %278 = vmatprep.subr.bf16.mxu0 %v300_v15 }
  0x1f   :  { %279 = vmatpush3.bf16.msra.mxu0 %v301_v16 }
  0x22   :  { %196 = vmatmul.mubr.bf16.vlgmr.msra.gmra.mrb[0].mxu0 %v302_v17 }
  0xf5   :  { %v280_v18 = vpop.f32.mrb[0].mxu0 }
  0xf6   :  { %v281_v19 = vpop.f32.mrb[1].mxu0 }
  0xf7   :  { %v282_v20 = vadd.f32 %v281_v19, %v280_v18  ;;  %v283_v21 = vpop.f32.mrb[2].mxu0 }
  0xf8   :  { %v284_v23 = vpop.f32.mrb[3].mxu0 }
  0xf9   :  { %v285_v24 = vadd.f32 %v284_v23, %v283_v21  ;;  %v220_v25 = vadd.f32 %v282_v20, %v254_v22 }
  0xfb   :  { %v221_v26 = vadd.f32 %v285_v24, %v254_v22 }
  0xfd   :  { %v262_v27 = vpack.c.bf16 %v221_v26, %v220_v25 }
  0xff   :  { %263 = vst [vmem:[%s388_s3] sm:$0xff] %v262_v27  }

// kernel: viedoswin_forward.88
= control target key start
LH: loop header
LB: loop body
LE: loop exit
PB: predicated region body
PF: predicated region fallthrough
CT: control target
= control target key end

     0   :  { %8 = vsyncpa [#allocation4], 0  ;;  %s352_s12 = smov [#allocation3]   ;;  %s443_s0 = inlined_call_operand.vmem [shape: bf16[16,128], index: 0, kind: input, shape index: {}]   ;;  %s444_s1 = inlined_call_operand.vmem [shape: bf16[128,256], index: 1, kind: input, shape index: {}]   ;;  %s445_s2 = inlined_call_operand.hbm [shape: f32[1,256], index: 2, kind: input, shape index: {}]   ;;  %s446_s3 = inlined_call_operand.vmem [shape: bf16[16,256], index: 3, kind: output, shape index: {}]  }
   0x1   :  { %s19_s13 = sshll.u32 %s352_s12, 4  ;;  %s328_s16 = scalar_lea.hbm %s445_s2, 32  ;;  %s20_s13 = int_to_ptr.vmem [resolvable:$true] %s19_s13 }
   0x2   :  { %p329_p0 = scmp.ne.s32.totalorder %s445_s2, %s328_s16  ;;  %p332_p1 = scmp.lt.u32.totalorder %s328_s16, %s445_s2 }
   0x4   :  { %p334_p2 = pnand %p332_p1, %p329_p0 }
   0x6   :  { %337 = shalt.err (!%p334_p2)
}
   0x7   :  { %s338_s21 = scalar_lea.vmem %s20_s13, 32  ;;  %p343_p4 = scmp.lt.s32.totalorder %s20_s13, %s20_s13 }
   0x8   :  { %p339_p3 = scmp.ne.s32.totalorder %s20_s13, %s338_s21  ;;  %p344_p5 = scmp.lt.s32.totalorder %s338_s21, %s338_s21 }
   0xa   :  { %p345_p6 = por %p344_p5, %p343_p4 }
   0xc   :  { %p346_p7 = pnand %p345_p6, %p339_p3 }
   0xe   :  { %349 = shalt.err (!%p346_p7)
}
   0xf   :  { %22 = dma.hbm_to_vmem [thread:$0]  %s445_s2, 32, %s20_s13, [#allocation4]  }
  0x10   :  { %350 = dma.done.wait [#allocation4], 32  }
  0x11   :  { %351 = vsyncadd [#allocation4], 4294967264  ;;  %v353_v0 = vmov 0   ;;  %v295_v1 = vld [vmem:[%s444_s1 + $0x4] ss:$8 sps:$4 sm:$0xff]   ;;  %v203_v18 = vlaneseq }
  0x12   :  { %175 = vmatprep.mubr.bf16.mxu0 %v353_v0  ;;  %v297_v2 = vld [vmem:[%s444_s1] ss:$8 sps:$4 sm:$0xff]   ;;  %143 = vmatprep.subr.bf16.mxu0 %v295_v1  ;;  %v298_v3 = vld [vmem:[%s444_s1 + $0x14] ss:$8 sps:$4 sm:$0xff]   ;;  %v300_v4 = vld [vmem:[%s444_s1 + $0x10] ss:$8 sps:$4 sm:$0xff]  }
  0x13   :  { %144 = vmatpush1.bf16.msra.mxu0 %v297_v2  ;;  %v301_v5 = vld [vmem:[%s444_s1 + $0x24] ss:$8 sps:$4 sm:$0xff]   ;;  %v303_v6 = vld [vmem:[%s444_s1 + $0x20] ss:$8 sps:$4 sm:$0xff]   ;;  %v304_v7 = vld [vmem:[%s444_s1 + $0x34] ss:$8 sps:$4 sm:$0xff]  }
  0x14   :  { %145 = vmatprep.subr.bf16.mxu0 %v298_v3  ;;  %v306_v8 = vld [vmem:[%s444_s1 + $0x30] ss:$8 sps:$4 sm:$0xff]   ;;  %v307_v9 = vld [vmem:[%s444_s1 + $0x44] ss:$8 sps:$4 sm:$0xff]   ;;  %v309_v10 = vld [vmem:[%s444_s1 + $0x40] ss:$8 sps:$4 sm:$0xff]  }
  0x15   :  { %v310_v11 = vld [vmem:[%s444_s1 + $0x54] ss:$8 sps:$4 sm:$0xff]   ;;  %v312_v12 = vld [vmem:[%s444_s1 + $0x50] ss:$8 sps:$4 sm:$0xff]   ;;  %v313_v13 = vld [vmem:[%s444_s1 + $0x64] ss:$8 sps:$4 sm:$0xff]  }
  0x16   :  { %v315_v14 = vld [vmem:[%s444_s1 + $0x60] ss:$8 sps:$4 sm:$0xff]   ;;  %v316_v15 = vld [vmem:[%s444_s1 + $0x74] ss:$8 sps:$4 sm:$0xff]   ;;  %v318_v16 = vld [vmem:[%s444_s1 + $0x70] ss:$8 sps:$4 sm:$0xff]  }
  0x17   :  { %146 = vmatpush1.bf16.msra.mxu0 %v300_v4  ;;  %v319_v17 = vld [vmem:[%s443_s0] sm:$0xff]   ;;  %v204_v19 = vshrl.u32 %v203_v18, 7 }
  0x18   :  { %147 = vmatprep.subr.bf16.mxu0 %v301_v5  ;;  %v201_v21 = vld [vmem:[#allocation3] sm:$0x3] }
  0x19   :  { %v205_v20 = vsub.s32 0, %v204_v19  ;;  %v209_v22 = vsub.s32 1, %v204_v19 }
  0x1b   :  { %148 = vmatpush1.bf16.msra.mxu0 %v303_v6  ;;  %v206_v23 = vrot.slane %v201_v21, %v205_v20  ;;  %v210_v24 = vrot.slane %v201_v21, %v209_v22 }
  0x1c   :  { %149 = vmatprep.subr.bf16.mxu0 %v304_v7 }
  0x1f   :  { %150 = vmatpush1.bf16.msra.mxu0 %v306_v8 }
  0x20   :  { %151 = vmatprep.subr.bf16.mxu0 %v307_v9 }
  0x23   :  { %152 = vmatpush1.bf16.msra.mxu0 %v309_v10 }
  0x24   :  { %153 = vmatprep.subr.bf16.mxu0 %v310_v11 }
  0x27   :  { %154 = vmatpush1.bf16.msra.mxu0 %v312_v12 }
  0x28   :  { %155 = vmatprep.subr.bf16.mxu0 %v313_v13 }
  0x2b   :  { %156 = vmatpush1.bf16.msra.mxu0 %v315_v14 }
  0x2c   :  { %157 = vmatprep.subr.bf16.mxu0 %v316_v15 }
  0x2f   :  { %158 = vmatpush1.bf16.msra.mxu0 %v318_v16 }
  0x32   :  { %176 = vmatmul.mubr.bf16.vlgmr.msra.gmra.mrb[0].mxu0 %v319_v17 }
 0x105   :  { %v177_v25 = vpop.f32.mrb[0].mxu0 }
 0x106   :  { %v213_v26 = vadd.f32 %v206_v23, %v177_v25  ;;  %v179_v27 = vpop.f32.mrb[1].mxu0 }
 0x107   :  { %v214_v28 = vadd.f32 %v210_v24, %v179_v27  ;;  %v181_v29 = vpop.f32.mrb[2].mxu0 }
 0x108   :  { %v221_v30 = vmul.f32 0.044715, %v213_v26  ;;  %v215_v31 = vadd.f32 %v206_v23, %v181_v29  ;;  %v183_v32 = vpop.f32.mrb[3].mxu0  ;;  %v217_v55 = vmul.f32 0.5, %v213_v26 }
 0x109   :  { %v222_v33 = vmul.f32 0.044715, %v214_v28  ;;  %v216_v34 = vadd.f32 %v210_v24, %v183_v32  ;;  %v218_v58 = vmul.f32 0.5, %v214_v28 }
 0x10a   :  { %v225_v35 = vmul.f32 %v221_v30, %v213_v26  ;;  %v223_v36 = vmul.f32 0.044715, %v215_v31  ;;  %v219_v62 = vmul.f32 0.5, %v215_v31 }
 0x10b   :  { %v226_v37 = vmul.f32 %v222_v33, %v214_v28  ;;  %v224_v38 = vmul.f32 0.044715, %v216_v34  ;;  %v220_v1 = vmul.f32 0.5, %v216_v34 }
 0x10c   :  { %v229_v39 = vmul.f32 %v225_v35, %v213_v26  ;;  %v227_v40 = vmul.f32 %v223_v36, %v215_v31 }
 0x10d   :  { %v230_v41 = vmul.f32 %v226_v37, %v214_v28  ;;  %v228_v42 = vmul.f32 %v224_v38, %v216_v34 }
 0x10e   :  { %v233_v43 = vadd.f32 %v229_v39, %v213_v26  ;;  %v231_v44 = vmul.f32 %v227_v40, %v215_v31 }
 0x10f   :  { %v234_v45 = vadd.f32 %v230_v41, %v214_v28  ;;  %v232_v46 = vmul.f32 %v228_v42, %v216_v34 }
 0x110   :  { %v237_v47 = vmul.f32 0.7978846, %v233_v43  ;;  %v235_v48 = vadd.f32 %v231_v44, %v215_v31 }
 0x111   :  { %v238_v49 = vmul.f32 0.7978846, %v234_v45  ;;  %v236_v50 = vadd.f32 %v232_v46, %v216_v34 }
 0x112   :  { %320 = vtanh.f32 %v237_v47  ;;  %v239_v51 = vmul.f32 0.7978846, %v235_v48 }
 0x113   :  { %322 = vtanh.f32 %v238_v49  ;;  %v240_v52 = vmul.f32 0.7978846, %v236_v50 }
 0x114   :  { %324 = vtanh.f32 %v239_v51 }
 0x115   :  { %326 = vtanh.f32 %v240_v52 }
 0x11c   :  { %v321_v53 = vpop.eup %320 }
 0x11d   :  { %v323_v54 = vpop.eup %322  ;;  %v245_v56 = vadd.f32 1.0, %v321_v53 }
 0x11e   :  { %v325_v57 = vpop.eup %324  ;;  %v246_v59 = vadd.f32 1.0, %v323_v54 }
 0x11f   :  { %v327_v60 = vpop.eup %326  ;;  %v249_v61 = vmul.f32 %v245_v56, %v217_v55  ;;  %v247_v63 = vadd.f32 1.0, %v325_v57 }
 0x120   :  { %v250_v0 = vmul.f32 %v246_v59, %v218_v58  ;;  %v248_v2 = vadd.f32 1.0, %v327_v60 }
 0x121   :  { %v251_v3 = vmul.f32 %v247_v63, %v219_v62 }
 0x122   :  { %v291_v4 = vpack.c.bf16 %v250_v0, %v249_v61  ;;  %v252_v5 = vmul.f32 %v248_v2, %v220_v1 }
 0x124   :  { %265 = vst [vmem:[%s446_s3] sm:$0xff] %v291_v4  ;;  %v292_v6 = vpack.c.bf16 %v252_v5, %v251_v3 }
 0x126   :  { %266 = vst [vmem:[%s446_s3 + $0x8] sm:$0xff] %v292_v6 }
 0x127   :  { %271 = vsyncpa [#allocation4], 1 }

// kernel: viedoswin_forward.98
= control target key start
LH: loop header
LB: loop body
LE: loop exit
PB: predicated region body
PF: predicated region fallthrough
CT: control target
= control target key end

     0   :  { %8 = vsyncpa [#allocation4], 0  ;;  %s318_s12 = smov [#allocation3]   ;;  %s362_s0 = inlined_call_operand.vmem [shape: bf16[8,256], index: 0, kind: input, shape index: {}]   ;;  %s363_s1 = inlined_call_operand.hbm [shape: bf16[256,128], index: 1, kind: input, shape index: {}]   ;;  %s364_s2 = inlined_call_operand.vmem [shape: f32[1,128], index: 2, kind: input, shape index: {}]   ;;  %s365_s3 = inlined_call_operand.vmem [shape: bf16[8,128], index: 3, kind: output, shape index: {}]  }
   0x1   :  { %s16_s13 = sshll.u32 %s318_s12, 4  ;;  %s294_s16 = scalar_lea.hbm %s363_s1, 2048  ;;  %s17_s13 = int_to_ptr.vmem [resolvable:$true] %s16_s13 }
   0x2   :  { %p295_p0 = scmp.ne.s32.totalorder %s363_s1, %s294_s16  ;;  %p298_p1 = scmp.lt.u32.totalorder %s294_s16, %s363_s1 }
   0x4   :  { %p300_p2 = pnand %p298_p1, %p295_p0 }
   0x6   :  { %303 = shalt.err (!%p300_p2)
}
   0x7   :  { %s304_s21 = scalar_lea.vmem %s17_s13, 2048  ;;  %p309_p4 = scmp.lt.s32.totalorder %s17_s13, %s17_s13 }
   0x8   :  { %p305_p3 = scmp.ne.s32.totalorder %s17_s13, %s304_s21  ;;  %p310_p5 = scmp.lt.s32.totalorder %s304_s21, %s304_s21 }
   0xa   :  { %p311_p6 = por %p310_p5, %p309_p4 }
   0xc   :  { %p312_p7 = pnand %p311_p6, %p305_p3 }
   0xe   :  { %315 = shalt.err (!%p312_p7)
}
   0xf   :  { %s319_s22 = smov 64   ;;  %s320_s23 = smov 4  }
  0x10   :  { %22 = dma.hbm_to_vmem [thread:$0]  %s363_s1, 2048, %s17_s13, [#allocation4], %s319_s22, %s319_s22, %s320_s23  }
  0x11   :  { %316 = dma.done.wait [#allocation4], 2048  }
  0x12   :  { %317 = vsyncadd [#allocation4], 4294965248  ;;  %v276_v0 = vld [vmem:[#allocation3 + $0x40] sm:$0xff]   ;;  %v278_v2 = vld [vmem:[#allocation3 + $0x48] sm:$0xff]  }
  0x13   :  { %v277_v1 = vld [vmem:[#allocation3] sm:$0xff]   ;;  %251 = vmatprep.subr.bf16.mxu0 %v276_v0  ;;  %v279_v3 = vld [vmem:[#allocation3 + $0x8] sm:$0xff]   ;;  %v280_v4 = vld [vmem:[#allocation3 + $0x50] sm:$0xff]  }
  0x14   :  { %252 = vmatpush3.bf16.msra.mxu0 %v277_v1  ;;  %v281_v5 = vld [vmem:[#allocation3 + $0x10] sm:$0xff]   ;;  %v282_v6 = vld [vmem:[#allocation3 + $0x58] sm:$0xff]   ;;  %v284_v8 = vld [vmem:[#allocation3 + $0x60] sm:$0xff]  }
  0x15   :  { %253 = vmatprep.subr.bf16.mxu0 %v278_v2  ;;  %v283_v7 = vld [vmem:[#allocation3 + $0x18] sm:$0xff]   ;;  %v285_v9 = vld [vmem:[#allocation3 + $0x20] sm:$0xff]   ;;  %v286_v10 = vld [vmem:[#allocation3 + $0x68] sm:$0xff]  }
  0x16   :  { %v35_v11 = vld [vmem:[%s362_s0] sm:$0xff]  ;;  %v287_v13 = vld [vmem:[#allocation3 + $0x28] sm:$0xff]   ;;  %v288_v14 = vld [vmem:[#allocation3 + $0x70] sm:$0xff]  }
  0x17   :  { %v233_v12 = vcombine.high %v35_v11, %v35_v11  ;;  %v289_v15 = vld [vmem:[#allocation3 + $0x30] sm:$0xff]   ;;  %v290_v16 = vld [vmem:[#allocation3 + $0x78] sm:$0xff]   ;;  %v232_v18 = vcombine.low %v35_v11, %v35_v11  ;;  %v250_v21 = vld [vmem:[%s364_s2] ss:$0 sm:$0xff] }
  0x18   :  { %254 = vmatpush3.bf16.msra.mxu0 %v279_v3  ;;  %v291_v17 = vld [vmem:[#allocation3 + $0x38] sm:$0xff]  }
  0x19   :  { %255 = vmatprep.subr.bf16.mxu0 %v280_v4  ;;  %203 = vmatprep.mubr.bf16.mxu0 %v233_v12 }
  0x1c   :  { %256 = vmatpush3.bf16.msra.mxu0 %v281_v5 }
  0x1d   :  { %257 = vmatprep.subr.bf16.mxu0 %v282_v6 }
  0x20   :  { %258 = vmatpush3.bf16.msra.mxu0 %v283_v7 }
  0x21   :  { %259 = vmatprep.subr.bf16.mxu0 %v284_v8 }
  0x24   :  { %260 = vmatpush3.bf16.msra.mxu0 %v285_v9 }
  0x25   :  { %261 = vmatprep.subr.bf16.mxu0 %v286_v10 }
  0x28   :  { %262 = vmatpush3.bf16.msra.mxu0 %v287_v13 }
  0x29   :  { %263 = vmatprep.subr.bf16.mxu0 %v288_v14 }
  0x2c   :  { %264 = vmatpush3.bf16.msra.mxu0 %v289_v15 }
  0x2d   :  { %265 = vmatprep.subr.bf16.mxu0 %v290_v16 }
  0x30   :  { %266 = vmatpush3.bf16.msra.mxu0 %v291_v17 }
  0x33   :  { %204 = vmatmul.mubr.bf16.vlgmr.msra.gmra.mrb[0].mxu0 %v232_v18 }
 0x106   :  { %v267_v19 = vpop.f32.mrb[0].mxu0 }
 0x107   :  { %v268_v20 = vpop.f32.mrb[1].mxu0 }
 0x108   :  { %v269_v22 = vadd.f32 %v268_v20, %v267_v19  ;;  %v270_v23 = vpop.f32.mrb[2].mxu0 }
 0x109   :  { %v271_v24 = vpop.f32.mrb[3].mxu0 }
 0x10a   :  { %v224_v25 = vadd.f32 %v269_v22, %v250_v21 }
 0x10c   :  { %v225_v26 = vpack.c.bf16 %v224_v25, %v224_v25 }
 0x10e   :  { %226 = vst [vmem:[%s365_s3] sm:$0xf] %v225_v26 }
 0x10f   :  { %231 = vsyncpa [#allocation4], 1 }

// kernel: viedoswin_forward.99
= control target key start
LH: loop header
LB: loop body
LE: loop exit
PB: predicated region body
PF: predicated region fallthrough
CT: control target
= control target key end

     0   :  { %8 = vsyncpa [#allocation3], 0  ;;  %s182_s0 = inlined_call_operand.vmem [shape: bf16[8,128], index: 0, kind: input, shape index: {}]   ;;  %s183_s1 = inlined_call_operand.hbm [shape: f32[1,128], index: 1, kind: input, shape index: {}]   ;;  %s184_s2 = inlined_call_operand.hbm [shape: f32[1,128], index: 2, kind: input, shape index: {}]   ;;  %s185_s3 = inlined_call_operand.vmem [shape: bf16[8,128], index: 3, kind: output, shape index: {}]  }
   0x1   :  { %9 = vsyncpa [#allocation5], 0  ;;  %s130_s12 = smov [#allocation2]   ;;  %s131_s14 = smov [#allocation4]  }
   0x2   :  { %s18_s13 = sshll.u32 %s130_s12, 4  ;;  %s28_s15 = sshll.u32 %s131_s14, 4  ;;  %s19_s13 = int_to_ptr.vmem [resolvable:$true] %s18_s13  ;;  %s29_s15 = int_to_ptr.vmem [resolvable:$true] %s28_s15 }
   0x3   :  { %s82_s18 = scalar_lea.hbm %s183_s1, 16 }
   0x4   :  { %p83_p0 = scmp.ne.s32.totalorder %s183_s1, %s82_s18  ;;  %p86_p1 = scmp.lt.u32.totalorder %s82_s18, %s183_s1 }
   0x6   :  { %p88_p2 = pnand %p86_p1, %p83_p0 }
   0x8   :  { %91 = shalt.err (!%p88_p2)
}
   0x9   :  { %s92_s23 = scalar_lea.vmem %s19_s13, 16  ;;  %s96_s24 = scalar_lea.vmem %s19_s13, 32 }
   0xa   :  { %p93_p3 = scmp.ne.s32.totalorder %s19_s13, %s92_s23  ;;  %p97_p4 = scmp.lt.s32.totalorder %s19_s13, %s19_s13 }
   0xb   :  { %p98_p5 = scmp.lt.s32.totalorder %s96_s24, %s92_s23 }
   0xd   :  { %p99_p6 = por %p98_p5, %p97_p4 }
   0xf   :  { %p100_p7 = pnand %p99_p6, %p93_p3 }
  0x11   :  { %103 = shalt.err (!%p100_p7)
}
  0x12   :  { %21 = dma.hbm_to_vmem [thread:$0]  %s183_s1, 16, %s19_s13, [#allocation3]  }
  0x13   :  { %s104_s29 = scalar_lea.hbm %s184_s2, 16 }
  0x14   :  { %p105_p8 = scmp.ne.s32.totalorder %s184_s2, %s104_s29  ;;  %p108_p9 = scmp.lt.u32.totalorder %s104_s29, %s184_s2 }
  0x16   :  { %p110_p10 = pnand %p108_p9, %p105_p8 }
  0x18   :  { %113 = shalt.err (!%p110_p10)
}
  0x19   :  { %s114_s7 = scalar_lea.vmem %s29_s15, 16  ;;  %s118_s8 = scalar_lea.vmem %s29_s15, 32 }
  0x1a   :  { %p115_p11 = scmp.ne.s32.totalorder %s29_s15, %s114_s7  ;;  %p119_p12 = scmp.lt.s32.totalorder %s29_s15, %s29_s15 }
  0x1b   :  { %p120_p13 = scmp.lt.s32.totalorder %s118_s8, %s114_s7 }
  0x1d   :  { %p121_p0 = por %p120_p13, %p119_p12 }
  0x1f   :  { %p122_p1 = pnand %p121_p0, %p115_p11 }
  0x21   :  { %125 = shalt.err (!%p122_p1)
}
  0x22   :  { %31 = dma.hbm_to_vmem [thread:$0]  %s184_s2, 16, %s29_s15, [#allocation5]  }
  0x23   :  { %126 = dma.done.wait [#allocation3], 16  }
  0x24   :  { %127 = vsyncadd [#allocation3], 4294967280 }
  0x25   :  { %128 = dma.done.wait [#allocation5], 16  }
  0x26   :  { %129 = vsyncadd [#allocation5], 4294967280  ;;  %v38_v0 = vld [vmem:[%s182_s0] sm:$0xf] }
  0x27   :  { %v39_v1 = vunpack.c.l.bf16 %v38_v0  ;;  %v76_v10 = vld [vmem:[#allocation2] ss:$0 sm:$0xff]  ;;  %v77_v12 = vld [vmem:[#allocation4] ss:$0 sm:$0xff] }
  0x29   :  { %40 = vadd.xlane.f32.xlu0 %v39_v1 }
  0xb6   :  { %v41_v2 = vpop.xlane.xlu0 %40 }
  0xb7   :  { %v43_v3 = vmul.f32 0.0078125, %v41_v2 }
  0xb9   :  { %v44_v4 = vsub.f32 %v39_v1, %v43_v3 }
  0xbb   :  { %v45_v5 = vmul.f32 %v44_v4, %v44_v4 }
  0xbd   :  { %46 = vadd.xlane.f32.xlu0 %v45_v5 }
 0x14a   :  { %v47_v6 = vpop.xlane.xlu0 %46 }
 0x14b   :  { %v48_v7 = vmul.f32 0.0078125, %v47_v6 }
 0x14d   :  { %v49_v8 = vadd.f32 1e-05, %v48_v7 }
 0x14f   :  { %80 = vrsqrt.f32 %v49_v8 }
 0x159   :  { %v81_v9 = vpop.eup %80 }
 0x15a   :  { %v51_v11 = vmul.f32 %v81_v9, %v44_v4 }
 0x15c   :  { %v59_v13 = vmul.f32 %v76_v10, %v51_v11 }
 0x15e   :  { %v67_v14 = vadd.f32 %v77_v12, %v59_v13 }
 0x160   :  { %v68_v15 = vpack.c.bf16 %v67_v14, %v67_v14 }
 0x162   :  { %69 = vst [vmem:[%s185_s3] sm:$0xf] %v68_v15 }
 0x163   :  { %74 = vsyncpa [#allocation3], 1 }
 0x164   :  { %75 = vsyncpa [#allocation5], 1 }

// kernel: viedoswin_forward.97
= control target key start
LH: loop header
LB: loop body
LE: loop exit
PB: predicated region body
PF: predicated region fallthrough
CT: control target
= control target key end

     0   :  { %8 = vsyncpa [#allocation3], 0  ;;  %s207_s0 = inlined_call_operand.vmem [shape: bf16[8,256], index: 0, kind: input, shape index: {}]   ;;  %s208_s1 = inlined_call_operand.hbm [shape: f32[1,256], index: 1, kind: input, shape index: {}]   ;;  %s209_s2 = inlined_call_operand.hbm [shape: f32[1,256], index: 2, kind: input, shape index: {}]   ;;  %s210_s3 = inlined_call_operand.vmem [shape: bf16[8,256], index: 3, kind: output, shape index: {}]  }
   0x1   :  { %9 = vsyncpa [#allocation5], 0  ;;  %s155_s12 = smov [#allocation2]   ;;  %s156_s14 = smov [#allocation4]  }
   0x2   :  { %s18_s13 = sshll.u32 %s155_s12, 4  ;;  %s28_s15 = sshll.u32 %s156_s14, 4  ;;  %s19_s13 = int_to_ptr.vmem [resolvable:$true] %s18_s13  ;;  %s29_s15 = int_to_ptr.vmem [resolvable:$true] %s28_s15 }
   0x3   :  { %s107_s18 = scalar_lea.hbm %s208_s1, 32 }
   0x4   :  { %p108_p0 = scmp.ne.s32.totalorder %s208_s1, %s107_s18  ;;  %p111_p1 = scmp.lt.u32.totalorder %s107_s18, %s208_s1 }
   0x6   :  { %p113_p2 = pnand %p111_p1, %p108_p0 }
   0x8   :  { %116 = shalt.err (!%p113_p2)
}
   0x9   :  { %s117_s23 = scalar_lea.vmem %s19_s13, 32  ;;  %p122_p4 = scmp.lt.s32.totalorder %s19_s13, %s19_s13 }
   0xa   :  { %p118_p3 = scmp.ne.s32.totalorder %s19_s13, %s117_s23  ;;  %p123_p5 = scmp.lt.s32.totalorder %s117_s23, %s117_s23 }
   0xc   :  { %p124_p6 = por %p123_p5, %p122_p4 }
   0xe   :  { %p125_p7 = pnand %p124_p6, %p118_p3 }
  0x10   :  { %128 = shalt.err (!%p125_p7)
}
  0x11   :  { %21 = dma.hbm_to_vmem [thread:$0]  %s208_s1, 32, %s19_s13, [#allocation3]  }
  0x12   :  { %s129_s28 = scalar_lea.hbm %s209_s2, 32 }
  0x13   :  { %p130_p8 = scmp.ne.s32.totalorder %s209_s2, %s129_s28  ;;  %p133_p9 = scmp.lt.u32.totalorder %s129_s28, %s209_s2 }
  0x15   :  { %p135_p10 = pnand %p133_p9, %p130_p8 }
  0x17   :  { %138 = shalt.err (!%p135_p10)
}
  0x18   :  { %s139_s6 = scalar_lea.vmem %s29_s15, 32  ;;  %p144_p12 = scmp.lt.s32.totalorder %s29_s15, %s29_s15 }
  0x19   :  { %p140_p11 = scmp.ne.s32.totalorder %s29_s15, %s139_s6  ;;  %p145_p13 = scmp.lt.s32.totalorder %s139_s6, %s139_s6 }
  0x1b   :  { %p146_p0 = por %p145_p13, %p144_p12 }
  0x1d   :  { %p147_p1 = pnand %p146_p0, %p140_p11 }
  0x1f   :  { %150 = shalt.err (!%p147_p1)
}
  0x20   :  { %31 = dma.hbm_to_vmem [thread:$0]  %s209_s2, 32, %s29_s15, [#allocation5]  }
  0x21   :  { %151 = dma.done.wait [#allocation3], 32  }
  0x22   :  { %152 = vsyncadd [#allocation3], 4294967264 }
  0x23   :  { %153 = dma.done.wait [#allocation5], 32  }
  0x24   :  { %154 = vsyncadd [#allocation5], 4294967264  ;;  %v38_v0 = vld [vmem:[%s207_s0] sm:$0xff]  ;;  %v60_v13 = vlaneseq }
  0x25   :  { %v39_v1 = vunpack.c.l.bf16 %v38_v0  ;;  %v40_v2 = vunpack.c.h.bf16 %v38_v0  ;;  %v58_v18 = vld [vmem:[#allocation2] sm:$0x3]  ;;  %v72_v19 = vld [vmem:[#allocation4] sm:$0x3] }
  0x26   :  { %v61_v15 = vshrl.u32 %v60_v13, 7 }
  0x27   :  { %v41_v3 = vadd.f32 %v40_v2, %v39_v1 }
  0x28   :  { %v62_v16 = vsub.s32 0, %v61_v15  ;;  %v66_v17 = vsub.s32 1, %v61_v15 }
  0x29   :  { %42 = vadd.xlane.f32.xlu0 %v41_v3 }
  0x2a   :  { %v63_v20 = vrot.slane %v58_v18, %v62_v16  ;;  %v67_v21 = vrot.slane %v58_v18, %v66_v17  ;;  %v77_v23 = vrot.slane %v72_v19, %v62_v16  ;;  %v81_v24 = vrot.slane %v72_v19, %v66_v17 }
  0xb6   :  { %v43_v4 = vpop.xlane.xlu0 %42 }
  0xb7   :  { %v45_v5 = vmul.f32 0.00390625, %v43_v4 }
  0xb9   :  { %v46_v6 = vsub.f32 %v39_v1, %v45_v5  ;;  %v47_v7 = vsub.f32 %v40_v2, %v45_v5 }
  0xbb   :  { %v48_v8 = vmul.f32 %v46_v6, %v46_v6  ;;  %v49_v9 = vmul.f32 %v47_v7, %v47_v7 }
  0xbd   :  { %v50_v10 = vadd.f32 %v49_v9, %v48_v8 }
  0xbf   :  { %51 = vadd.xlane.f32.xlu0 %v50_v10 }
 0x14c   :  { %v52_v11 = vpop.xlane.xlu0 %51 }
 0x14d   :  { %v53_v12 = vmul.f32 0.00390625, %v52_v11 }
 0x14f   :  { %v54_v14 = vadd.f32 1e-05, %v53_v12 }
 0x151   :  { %105 = vrsqrt.f32 %v54_v14 }
 0x15b   :  { %v106_v22 = vpop.eup %105 }
 0x15c   :  { %v56_v25 = vmul.f32 %v106_v22, %v46_v6  ;;  %v57_v26 = vmul.f32 %v106_v22, %v47_v7 }
 0x15e   :  { %v70_v27 = vmul.f32 %v63_v20, %v56_v25  ;;  %v71_v28 = vmul.f32 %v67_v21, %v57_v26 }
 0x160   :  { %v84_v29 = vadd.f32 %v77_v23, %v70_v27  ;;  %v85_v30 = vadd.f32 %v81_v24, %v71_v28 }
 0x162   :  { %v102_v31 = vpack.c.bf16 %v85_v30, %v84_v29 }
 0x164   :  { %94 = vst [vmem:[%s210_s3] sm:$0xff] %v102_v31 }
 0x165   :  { %99 = vsyncpa [#allocation3], 1 }
 0x166   :  { %100 = vsyncpa [#allocation5], 1 }

// kernel: viedoswin_forward.100
= control target key start
LH: loop header
LB: loop body
LE: loop exit
PB: predicated region body
PF: predicated region fallthrough
CT: control target
= control target key end

     0   :  { %8 = vsyncpa [#allocation4], 0  ;;  %s452_s12 = smov [#allocation3]   ;;  %s502_s0 = inlined_call_operand.vmem [shape: bf16[8,128], index: 0, kind: input, shape index: {}]   ;;  %s503_s1 = inlined_call_operand.hbm [shape: bf16[128,384], index: 1, kind: input, shape index: {}]   ;;  %s504_s2 = inlined_call_operand.vmem [shape: f32[1,384], index: 2, kind: input, shape index: {}]   ;;  %s505_s3 = inlined_call_operand.vmem [shape: bf16[8,384], index: 3, kind: output, shape index: {}]  }
   0x1   :  { %s16_s13 = sshll.u32 %s452_s12, 4  ;;  %s428_s16 = scalar_lea.hbm %s503_s1, 3072  ;;  %s17_s13 = int_to_ptr.vmem [resolvable:$true] %s16_s13 }
   0x2   :  { %p429_p0 = scmp.ne.s32.totalorder %s503_s1, %s428_s16  ;;  %p432_p1 = scmp.lt.u32.totalorder %s428_s16, %s503_s1 }
   0x4   :  { %p434_p2 = pnand %p432_p1, %p429_p0 }
   0x6   :  { %437 = shalt.err (!%p434_p2)
}
   0x7   :  { %s438_s21 = scalar_lea.vmem %s17_s13, 3072  ;;  %p443_p4 = scmp.lt.s32.totalorder %s17_s13, %s17_s13 }
   0x8   :  { %p439_p3 = scmp.ne.s32.totalorder %s17_s13, %s438_s21  ;;  %p444_p5 = scmp.lt.s32.totalorder %s438_s21, %s438_s21 }
   0xa   :  { %p445_p6 = por %p444_p5, %p443_p4 }
   0xc   :  { %p446_p7 = pnand %p445_p6, %p439_p3 }
   0xe   :  { %449 = shalt.err (!%p446_p7)
}
   0xf   :  { %s453_s22 = smov 192   ;;  %s454_s23 = smov 12  }
  0x10   :  { %22 = dma.hbm_to_vmem [thread:$0]  %s503_s1, 3072, %s17_s13, [#allocation4], %s453_s22, %s453_s22, %s454_s23  }
  0x11   :  { %450 = dma.done.wait [#allocation4], 3072  }
  0x12   :  { %451 = vsyncadd [#allocation4], 4294964224  ;;  %v455_v0 = vmov 0.0   ;;  %vm456_vm0 = vmmov 0   ;;  %v457_v1 = vmov 0   ;;  %v295_v27 = vlaneseq }
  0x13   :  { %370 = vmatprep.subr.bf16.mxu1 %v455_v0  ;;  %386 = vmatprep.mubr.msk.bf16.mxu1 %vm456_vm0, %v455_v0  ;;  %v396_v2 = vld [vmem:[#allocation3 + $0x4] ss:$12 sps:$4 sm:$0xff]   ;;  %v398_v3 = vld [vmem:[#allocation3 + $0x8] ss:$12 sps:$4 sm:$0xff]   ;;  %v399_v4 = vld [vmem:[#allocation3] ss:$12 sps:$4 sm:$0xff]  }
  0x14   :  { %232 = vmatprep.mubr.bf16.mxu0 %v457_v1  ;;  %200 = vmatprep.subr.bf16.mxu0 %v396_v2  ;;  %v400_v5 = vld [vmem:[#allocation3 + $0x1c] ss:$12 sps:$4 sm:$0xff]   ;;  %v402_v6 = vld [vmem:[#allocation3 + $0x20] ss:$12 sps:$4 sm:$0xff]   ;;  %v403_v7 = vld [vmem:[#allocation3 + $0x18] ss:$12 sps:$4 sm:$0xff]  }
  0x15   :  { %371 = vmatpush3.bf16.msra.mxu1 %v398_v3  ;;  %201 = vmatpush1.bf16.msra.mxu0 %v399_v4  ;;  %v404_v8 = vld [vmem:[#allocation3 + $0x34] ss:$12 sps:$4 sm:$0xff]   ;;  %v406_v9 = vld [vmem:[#allocation3 + $0x38] ss:$12 sps:$4 sm:$0xff]   ;;  %v407_v10 = vld [vmem:[#allocation3 + $0x30] ss:$12 sps:$4 sm:$0xff]  }
  0x16   :  { %372 = vmatprep.subr.bf16.mxu1 %v455_v0  ;;  %202 = vmatprep.subr.bf16.mxu0 %v400_v5  ;;  %v408_v11 = vld [vmem:[#allocation3 + $0x4c] ss:$12 sps:$4 sm:$0xff]   ;;  %v410_v12 = vld [vmem:[#allocation3 + $0x50] ss:$12 sps:$4 sm:$0xff]   ;;  %v411_v13 = vld [vmem:[#allocation3 + $0x48] ss:$12 sps:$4 sm:$0xff]  }
  0x17   :  { %v412_v14 = vld [vmem:[#allocation3 + $0x64] ss:$12 sps:$4 sm:$0xff]   ;;  %v414_v15 = vld [vmem:[#allocation3 + $0x68] ss:$12 sps:$4 sm:$0xff]   ;;  %v415_v16 = vld [vmem:[#allocation3 + $0x60] ss:$12 sps:$4 sm:$0xff]  }
  0x18   :  { %v416_v17 = vld [vmem:[#allocation3 + $0x7c] ss:$12 sps:$4 sm:$0xff]   ;;  %v418_v18 = vld [vmem:[#allocation3 + $0x80] ss:$12 sps:$4 sm:$0xff]   ;;  %v419_v19 = vld [vmem:[#allocation3 + $0x78] ss:$12 sps:$4 sm:$0xff]  }
  0x19   :  { %373 = vmatpush3.bf16.msra.mxu1 %v402_v6  ;;  %203 = vmatpush1.bf16.msra.mxu0 %v403_v7  ;;  %v420_v20 = vld [vmem:[#allocation3 + $0x94] ss:$12 sps:$4 sm:$0xff]   ;;  %v422_v21 = vld [vmem:[#allocation3 + $0x98] ss:$12 sps:$4 sm:$0xff]   ;;  %v423_v22 = vld [vmem:[#allocation3 + $0x90] ss:$12 sps:$4 sm:$0xff]  }
  0x1a   :  { %374 = vmatprep.subr.bf16.mxu1 %v455_v0  ;;  %204 = vmatprep.subr.bf16.mxu0 %v404_v8  ;;  %v424_v23 = vld [vmem:[#allocation3 + $0xac] ss:$12 sps:$4 sm:$0xff]   ;;  %v426_v24 = vld [vmem:[#allocation3 + $0xb0] ss:$12 sps:$4 sm:$0xff]   ;;  %v427_v25 = vld [vmem:[#allocation3 + $0xa8] ss:$12 sps:$4 sm:$0xff]  }
  0x1b   :  { %v39_v26 = vld [vmem:[%s502_s0] sm:$0xf]  ;;  %v296_v28 = vshrl.u32 %v295_v27, 7 }
  0x1c   :  { %v293_v30 = vld [vmem:[%s504_s2] sm:$0x7] }
  0x1d   :  { %375 = vmatpush3.bf16.msra.mxu1 %v406_v9  ;;  %205 = vmatpush1.bf16.msra.mxu0 %v407_v10  ;;  %v305_v29 = vsub.s32 2, %v296_v28  ;;  %v297_v31 = vsub.s32 0, %v296_v28  ;;  %v301_v32 = vsub.s32 1, %v296_v28 }
  0x1e   :  { %376 = vmatprep.subr.bf16.mxu1 %v455_v0  ;;  %206 = vmatprep.subr.bf16.mxu0 %v408_v11 }
  0x1f   :  { %v306_v33 = vrot.slane %v293_v30, %v305_v29  ;;  %v298_v34 = vrot.slane %v293_v30, %v297_v31  ;;  %v302_v35 = vrot.slane %v293_v30, %v301_v32 }
  0x21   :  { %377 = vmatpush3.bf16.msra.mxu1 %v410_v12  ;;  %207 = vmatpush1.bf16.msra.mxu0 %v411_v13 }
  0x22   :  { %378 = vmatprep.subr.bf16.mxu1 %v455_v0  ;;  %208 = vmatprep.subr.bf16.mxu0 %v412_v14 }
  0x25   :  { %379 = vmatpush3.bf16.msra.mxu1 %v414_v15  ;;  %209 = vmatpush1.bf16.msra.mxu0 %v415_v16 }
  0x26   :  { %380 = vmatprep.subr.bf16.mxu1 %v455_v0  ;;  %210 = vmatprep.subr.bf16.mxu0 %v416_v17 }
  0x29   :  { %381 = vmatpush3.bf16.msra.mxu1 %v418_v18  ;;  %211 = vmatpush1.bf16.msra.mxu0 %v419_v19 }
  0x2a   :  { %382 = vmatprep.subr.bf16.mxu1 %v455_v0  ;;  %212 = vmatprep.subr.bf16.mxu0 %v420_v20 }
  0x2d   :  { %383 = vmatpush3.bf16.msra.mxu1 %v422_v21  ;;  %213 = vmatpush1.bf16.msra.mxu0 %v423_v22 }
  0x2e   :  { %384 = vmatprep.subr.bf16.mxu1 %v455_v0  ;;  %214 = vmatprep.subr.bf16.mxu0 %v424_v23 }
  0x31   :  { %385 = vmatpush3.bf16.msra.mxu1 %v426_v24  ;;  %215 = vmatpush1.bf16.msra.mxu0 %v427_v25 }
  0x34   :  { %387 = vmatmul.mubr.bf16.vlgmr.msra.gmra.mrb[0].mxu1 %v39_v26  ;;  %233 = vmatmul.mubr.bf16.vlgmr.msra.gmra.mrb[0].mxu0 %v39_v26 }
 0x107   :  { %v275_v36 = vpop.f32.mrb[0].mxu1  ;;  %v234_v38 = vpop.f32.mrb[0].mxu0 }
 0x108   :  { %v312_v37 = vadd.f32 %v306_v33, %v275_v36  ;;  %v388_v39 = vpop.f32.mrb[1].mxu1  ;;  %v310_v40 = vadd.f32 %v298_v34, %v234_v38  ;;  %v236_v41 = vpop.f32.mrb[1].mxu0 }
 0x109   :  { %v278_v42 = vpop.f32.mrb[2].mxu1  ;;  %v311_v44 = vadd.f32 %v302_v35, %v236_v41  ;;  %v238_v45 = vpop.f32.mrb[2].mxu0 }
 0x10a   :  { %v360_v43 = vpack.c.bf16 %v312_v37, %v312_v37  ;;  %v389_v46 = vpop.f32.mrb[3].mxu1  ;;  %v239_v47 = vpop.f32.mrb[3].mxu0 }
 0x10b   :  { %v359_v48 = vpack.c.bf16 %v311_v44, %v310_v40 }
 0x10c   :  { %327 = vst [vmem:[%s505_s3 + $0x8] sm:$0xf] %v360_v43 }
 0x10d   :  { %326 = vst [vmem:[%s505_s3] sm:$0xff] %v359_v48 }
 0x10e   :  { %332 = vsyncpa [#allocation4], 1 }

// kernel: viedoswin_forward.101
= control target key start
LH: loop header
LB: loop body
LE: loop exit
PB: predicated region body
PF: predicated region fallthrough
CT: control target
= control target key end

     0   :  { %s669_s15 = smov 0   ;;  %s671_s16 = smov 0   ;;  %s735_s0 = inlined_call_operand.vmem [shape: bf16[2,8,2,16], index: 0, kind: input, shape index: {}]   ;;  %s736_s1 = inlined_call_operand.vmem [shape: bf16[2,8,2,16], index: 1, kind: input, shape index: {}]   ;;  %s737_s2 = inlined_call_operand.vmem [shape: bf16[2,8,2,16], index: 2, kind: input, shape index: {}]   ;;  %s738_s3 = inlined_call_operand.vmem [shape: bf16[8,2,2], index: 3, kind: input, shape index: {}]   ;;  %s739_s4 = inlined_call_operand.vmem [shape: bf16[2,8,2,16], index: 4, kind: output, shape index: {}]  }
   0x1   :  { %s673_s17 = smov 0   ;;  %s675_s18 = smov 0  }
   0x2   :  { %s677_s19 = smov 0  }
   0x3 LB: > { %s23_s20 = sadd.s32 1, %s632_s17  ;;  %s26_s21 = sadd.s32 1, %s636_s18  ;;  %s640_s19 = sphi %s677_s19, %s14_s19   ;;  %s636_s18 = sphi %s675_s18, %s743_s18   ;;  %s632_s17 = sphi %s673_s17, %s742_s17   ;;  %s628_s16 = sphi %s671_s16, %s741_s16   ;;  %s624_s15 = sphi %s669_s15, %s740_s15  }
   0x4   : > { %p24_p0 = scmp.ge.s32.totalorder %s23_s20, 8  ;;  %p531_p1 = scmp.ge.s32.totalorder %s640_s19, 1 }
   0x5   : > { %p216_p2 = scmp.lt.s32.totalorder %s640_s19, 17 }
   0x6   : > { %s745_s20 = smov (%p24_p0, %s23_s20), 0  ;;  %s747_s21 = smov (!%p24_p0, %s26_s21), %s636_s18 }
   0x7   : > { %p217_p3 = pnand %p531_p1, %p216_p2  ;;  %p28_p4 = scmp.ge.s32.totalorder %s747_s21, 2 }
   0x8   : > { %p263_p5 = scmp.lt.s32.totalorder (!%p217_p3), %s628_s16, 1  ;;  %p265_p6 = scmp.lt.s32.totalorder (!%p217_p3), %s624_s15, 7  ;;  %v642_v0 = vmov (!%p217_p3), 0.0   ;;  %vm643_vm0 = vmmov (!%p217_p3), 0   ;;  %vm300_vm1 = vcmask (!%p217_p3), 130048   ;;  %vm347_vm2 = vcmask (!%p217_p3), 9216  }
   0x9   : > { %s749_s21 = smov (%p28_p4, %s747_s21), 0  ;;  %220 = sbr.rel (%p217_p3) target bundleno = 774 (0x306), region = 36 }
   0xa   : > { %544 = vmatprep.subr.bf16.mxu0 (!%p217_p3), %v642_v0  ;;  %546 = vmatprep.mubr.msk.bf16.mxu0 (!%p217_p3), %vm643_vm0, %v642_v0  ;;  %vm364_vm3 = vcmask (!%p217_p3), 1040384   ;;  %vm360_vm4 = vcmask (!%p217_p3), 15360   ;;  %vm409_vm5 = vcmask (!%p217_p3), 122880  }
   0xb   : > { %550 = vmatprep.subr.bf16.mxu1 (!%p217_p3), %v642_v0  ;;  %552 = vmatprep.mubr.msk.bf16.mxu1 (!%p217_p3), %vm643_vm0, %v642_v0 }
  0x10   : > { %s751_s16 = smov (!%p263_p5, %s628_s16), 1  ;;  %s753_s15 = smov (!%p265_p6, %s624_s15), 7 }
  0x11   : > { %s532_s22 = sshll.u32 %s751_s16, 3  ;;  %s286_s6 = scalar_lea.vmem %s738_s3, %s753_s15 }
  0x12   : > { %s699_s23 = sadd.s32 %s532_s22, %s753_s15  ;;  %v298_v4 = vld [vmem:[%s286_s6] sm:$0x1] }
  0x13   : > { %s276_s26 = scalar_lea.vmem %s736_s1, %s699_s23  ;;  %s269_s29 = scalar_lea.vmem %s735_s0, %s699_s23  ;;  %v299_v5 = vunpack.c.l.bf16 %v298_v4 }
  0x14   : > { %v296_v1 = vld [vmem:[%s276_s26] sm:$0x1]  ;;  %s283_s9 = scalar_lea.vmem %s737_s2, %s699_s23  ;;  %s293_s12 = scalar_lea.vmem %s739_s4, %s699_s23 }
  0x15   : > { %v305_v2 = vsel %vm300_vm1, %v296_v1, 0  ;;  %v295_v3 = vld [vmem:[%s269_s29] sm:$0x1] }
  0x16   : > { %545 = vmatpush3.bf16.xpose.msra.mxu0 %v305_v2  ;;  %v297_v17 = vld [vmem:[%s283_s9] sm:$0x1] }
  0x17   : > { %v366_v18 = vsel %vm364_vm3, %v297_v17, 0 }
  0x18   : > { %551 = vmatpush3.bf16.msra.mxu1 %v366_v18 }
  0x1d   : > { %547 = vmatmul.mubr.msk.bf16.vlgmr.msra.gmra.mrb[0].mxu0 %vm300_vm1, %v295_v3 }
  0xf0   : > { %v341_v6 = vpop.f32.mrb[0].mxu0 }
  0xf1   : > { %v342_v7 = vadd.f32 %v341_v6, %v299_v5  ;;  %v548_v8 = vpop.f32.mrb[1].mxu0 }
  0xf2   : > { %v344_v9 = vpop.f32.mrb[2].mxu0 }
  0xf3   : > { %v549_v10 = vpop.f32.mrb[3].mxu0  ;;  %v348_v11 = vsel %vm347_vm2, %v342_v7, -inf }
  0xf4   : > { %349 = vmax.xlane.f32.xlu0 %v348_v11 }
 0x181   : > { %v350_v12 = vpop.xlane.xlu0 %349 }
 0x182   : > { %v351_v13 = vsub.f32 %v342_v7, %v350_v12 }
 0x184   : > { %v352_v14 = vmul.f32 1.442695, %v351_v13 }
 0x186   : > { %598 = vpow2.f32 %v352_v14 }
 0x190   : > { %v599_v15 = vpop.eup %598 }
 0x191   : > { %v354_v16 = vsel %vm347_vm2, %v599_v15, 0.0 }
 0x192   : > { %355 = vadd.xlane.f32.xlu0 %v354_v16 }
 0x21f   : > { %v356_v19 = vpop.xlane.xlu0 %355 }
 0x220   : > { %600 = vrcp.f32 %v356_v19 }
 0x22a   : > { %v601_v20 = vpop.eup %600 }
 0x22b   : > { %v358_v21 = vmul.f32 %v601_v20, %v599_v15 }
 0x22d   : > { %v359_v22 = vpack.c.bf16 %v358_v21, %v358_v21 }
 0x22f   : > { %553 = vmatmul.mubr.msk.bf16.vlgmr.msra.gmra.mrb[0].mxu1 %vm360_vm4, %v359_v22 }
 0x302   : > { %v402_v23 = vpop.f32.mrb[0].mxu1 }
 0x303   : > { %v408_v24 = vpack.c.bf16 %v402_v23, %v402_v23  ;;  %v554_v25 = vpop.f32.mrb[1].mxu1 }
 0x304   : > { %v405_v26 = vpop.f32.mrb[2].mxu1 }
 0x305   : > { %410 = vst.msk [vmem:[%s293_s12] sm:$0x1] %vm409_vm5, %v408_v24  ;;  %v555_v27 = vpop.f32.mrb[3].mxu1 }
 0x306 PF: > { %s14_s19 = sadd.s32 1, %s640_s19   ;;  %s740_s15 = smov %s632_s17 }
 0x307   : > { %p11_p7 = scmp.ge.s32.totalorder %s14_s19, 18   ;;  %s741_s16 = smov %s636_s18 }
 0x308   : > { %s742_s17 = smov %s745_s20  ;;  %s743_s18 = smov %s749_s21 }
 0x309   :  { %13 = sbr.rel (!%p11_p7) target bundleno = 3 (0x3), region = 75 }

// kernel: viedoswin_forward.102
= control target key start
LH: loop header
LB: loop body
LE: loop exit
PB: predicated region body
PF: predicated region fallthrough
CT: control target
= control target key end

     0   :  { %8 = vsyncpa [#allocation4], 0  ;;  %s330_s0 = inlined_call_operand.vmem [shape: bf16[8,128], index: 0, kind: input, shape index: {}]   ;;  %s331_s1 = inlined_call_operand.hbm [shape: bf16[128,128], index: 1, kind: input, shape index: {}]   ;;  %s332_s2 = inlined_call_operand.hbm [shape: f32[1,128], index: 2, kind: input, shape index: {}]   ;;  %s333_s3 = inlined_call_operand.vmem [shape: bf16[8,128], index: 3, kind: output, shape index: {}]  }
   0x1   :  { %9 = vsyncpa [#allocation6], 0  ;;  %s274_s12 = smov [#allocation3]   ;;  %s226_s16 = scalar_lea.hbm %s331_s1, 1024 }
   0x2   :  { %s17_s13 = sshll.u32 %s274_s12, 4  ;;  %p227_p0 = scmp.ne.s32.totalorder %s331_s1, %s226_s16  ;;  %s18_s13 = int_to_ptr.vmem [resolvable:$true] %s17_s13 }
   0x3   :  { %p230_p1 = scmp.lt.u32.totalorder %s226_s16, %s331_s1 }
   0x5   :  { %p232_p2 = pnand %p230_p1, %p227_p0 }
   0x7   :  { %235 = shalt.err (!%p232_p2)
}
   0x8   :  { %s236_s21 = scalar_lea.vmem %s18_s13, 1024  ;;  %p241_p4 = scmp.lt.s32.totalorder %s18_s13, %s18_s13 }
   0x9   :  { %p237_p3 = scmp.ne.s32.totalorder %s18_s13, %s236_s21  ;;  %p242_p5 = scmp.lt.s32.totalorder %s236_s21, %s236_s21 }
   0xb   :  { %p243_p6 = por %p242_p5, %p241_p4 }
   0xd   :  { %p244_p7 = pnand %p243_p6, %p237_p3 }
   0xf   :  { %247 = shalt.err (!%p244_p7)
}
  0x10   :  { %s275_s22 = smov 64   ;;  %s276_s23 = smov 4  }
  0x11   :  { %23 = dma.hbm_to_vmem [thread:$0]  %s331_s1, 1024, %s18_s13, [#allocation4], %s275_s22, %s275_s22, %s276_s23  }
  0x12   :  { %s277_s26 = smov [#allocation5]   ;;  %s248_s30 = scalar_lea.hbm %s332_s2, 16 }
  0x13   :  { %s30_s27 = sshll.u32 %s277_s26, 4  ;;  %p249_p8 = scmp.ne.s32.totalorder %s332_s2, %s248_s30  ;;  %s31_s27 = int_to_ptr.vmem [resolvable:$true] %s30_s27 }
  0x14   :  { %p252_p9 = scmp.lt.u32.totalorder %s248_s30, %s332_s2 }
  0x16   :  { %p254_p10 = pnand %p252_p9, %p249_p8 }
  0x18   :  { %257 = shalt.err (!%p254_p10)
}
  0x19   :  { %s258_s8 = scalar_lea.vmem %s31_s27, 16  ;;  %s262_s1 = scalar_lea.vmem %s31_s27, 32 }
  0x1a   :  { %p259_p11 = scmp.ne.s32.totalorder %s31_s27, %s258_s8  ;;  %p263_p12 = scmp.lt.s32.totalorder %s31_s27, %s31_s27 }
  0x1b   :  { %p264_p13 = scmp.lt.s32.totalorder %s262_s1, %s258_s8 }
  0x1d   :  { %p265_p0 = por %p264_p13, %p263_p12 }
  0x1f   :  { %p266_p1 = pnand %p265_p0, %p259_p11 }
  0x21   :  { %269 = shalt.err (!%p266_p1)
}
  0x22   :  { %33 = dma.hbm_to_vmem [thread:$0]  %s332_s2, 16, %s31_s27, [#allocation6]  }
  0x23   :  { %270 = dma.done.wait [#allocation4], 1024  }
  0x24   :  { %271 = vsyncadd [#allocation4], 4294966272 }
  0x25   :  { %272 = dma.done.wait [#allocation6], 16  }
  0x26   :  { %273 = vsyncadd [#allocation6], 4294967280  ;;  %v278_v0 = vmov 0.0   ;;  %vm279_vm0 = vmmov 0   ;;  %v218_v1 = vld [vmem:[#allocation3] sm:$0xff]   ;;  %v219_v2 = vld [vmem:[#allocation3 + $0x8] sm:$0xff]  }
  0x27   :  { %192 = vmatprep.subr.bf16.mxu0 %v278_v0  ;;  %208 = vmatprep.mubr.msk.bf16.mxu0 %vm279_vm0, %v278_v0  ;;  %v220_v3 = vld [vmem:[#allocation3 + $0x10] sm:$0xff]   ;;  %v221_v4 = vld [vmem:[#allocation3 + $0x18] sm:$0xff]   ;;  %v222_v5 = vld [vmem:[#allocation3 + $0x20] sm:$0xff]  }
  0x28   :  { %193 = vmatpush3.bf16.msra.mxu0 %v218_v1  ;;  %v223_v6 = vld [vmem:[#allocation3 + $0x28] sm:$0xff]   ;;  %v224_v7 = vld [vmem:[#allocation3 + $0x30] sm:$0xff]   ;;  %v225_v8 = vld [vmem:[#allocation3 + $0x38] sm:$0xff]  }
  0x29   :  { %194 = vmatprep.subr.bf16.mxu0 %v278_v0  ;;  %v47_v9 = vld [vmem:[%s330_s0] sm:$0xf] }
  0x2a   :  { %v182_v10 = vld [vmem:[#allocation5] ss:$0 sm:$0xff] }
  0x2c   :  { %195 = vmatpush3.bf16.msra.mxu0 %v219_v2 }
  0x2d   :  { %196 = vmatprep.subr.bf16.mxu0 %v278_v0 }
  0x30   :  { %197 = vmatpush3.bf16.msra.mxu0 %v220_v3 }
  0x31   :  { %198 = vmatprep.subr.bf16.mxu0 %v278_v0 }
  0x34   :  { %199 = vmatpush3.bf16.msra.mxu0 %v221_v4 }
  0x35   :  { %200 = vmatprep.subr.bf16.mxu0 %v278_v0 }
  0x38   :  { %201 = vmatpush3.bf16.msra.mxu0 %v222_v5 }
  0x39   :  { %202 = vmatprep.subr.bf16.mxu0 %v278_v0 }
  0x3c   :  { %203 = vmatpush3.bf16.msra.mxu0 %v223_v6 }
  0x3d   :  { %204 = vmatprep.subr.bf16.mxu0 %v278_v0 }
  0x40   :  { %205 = vmatpush3.bf16.msra.mxu0 %v224_v7 }
  0x41   :  { %206 = vmatprep.subr.bf16.mxu0 %v278_v0 }
  0x44   :  { %207 = vmatpush3.bf16.msra.mxu0 %v225_v8 }
  0x47   :  { %209 = vmatmul.mubr.bf16.vlgmr.msra.gmra.mrb[0].mxu0 %v47_v9 }
 0x11a   :  { %v146_v11 = vpop.f32.mrb[0].mxu0 }
 0x11b   :  { %v165_v12 = vadd.f32 %v182_v10, %v146_v11  ;;  %v210_v13 = vpop.f32.mrb[1].mxu0 }
 0x11c   :  { %v149_v14 = vpop.f32.mrb[2].mxu0 }
 0x11d   :  { %v166_v15 = vpack.c.bf16 %v165_v12, %v165_v12  ;;  %v211_v16 = vpop.f32.mrb[3].mxu0 }
 0x11f   :  { %167 = vst [vmem:[%s333_s3] sm:$0xf] %v166_v15 }
 0x120   :  { %172 = vsyncpa [#allocation4], 1 }
 0x121   :  { %173 = vsyncpa [#allocation6], 1 }

// kernel: viedoswin_forward.104
= control target key start
LH: loop header
LB: loop body
LE: loop exit
PB: predicated region body
PF: predicated region fallthrough
CT: control target
= control target key end

     0   :  { %8 = vsyncpa [#allocation4], 0  ;;  %s632_s0 = inlined_call_operand.vmem [shape: bf16[8,128], index: 0, kind: input, shape index: {}]   ;;  %s633_s1 = inlined_call_operand.hbm [shape: bf16[128,512], index: 1, kind: input, shape index: {}]   ;;  %s634_s2 = inlined_call_operand.hbm [shape: f32[1,512], index: 2, kind: input, shape index: {}]   ;;  %s635_s3 = inlined_call_operand.vmem [shape: bf16[8,512], index: 3, kind: output, shape index: {}]  }
   0x1   :  { %9 = vsyncpa [#allocation6], 0  ;;  %s574_s12 = smov [#allocation3]   ;;  %s526_s16 = scalar_lea.hbm %s633_s1, 4096 }
   0x2   :  { %s17_s13 = sshll.u32 %s574_s12, 4  ;;  %p527_p0 = scmp.ne.s32.totalorder %s633_s1, %s526_s16  ;;  %s18_s13 = int_to_ptr.vmem [resolvable:$true] %s17_s13 }
   0x3   :  { %p530_p1 = scmp.lt.u32.totalorder %s526_s16, %s633_s1 }
   0x5   :  { %p532_p2 = pnand %p530_p1, %p527_p0 }
   0x7   :  { %535 = shalt.err (!%p532_p2)
}
   0x8   :  { %s536_s21 = scalar_lea.vmem %s18_s13, 4096  ;;  %p541_p4 = scmp.lt.s32.totalorder %s18_s13, %s18_s13 }
   0x9   :  { %p537_p3 = scmp.ne.s32.totalorder %s18_s13, %s536_s21  ;;  %p542_p5 = scmp.lt.s32.totalorder %s536_s21, %s536_s21 }
   0xb   :  { %p543_p6 = por %p542_p5, %p541_p4 }
   0xd   :  { %p544_p7 = pnand %p543_p6, %p537_p3 }
   0xf   :  { %547 = shalt.err (!%p544_p7)
}
  0x10   :  { %s575_s22 = smov 256   ;;  %s576_s23 = smov 16  }
  0x11   :  { %23 = dma.hbm_to_vmem [thread:$0]  %s633_s1, 4096, %s18_s13, [#allocation4], %s575_s22, %s575_s22, %s576_s23  }
  0x12   :  { %s577_s26 = smov [#allocation5]   ;;  %s548_s30 = scalar_lea.hbm %s634_s2, 64 }
  0x13   :  { %s30_s27 = sshll.u32 %s577_s26, 4  ;;  %p549_p8 = scmp.ne.s32.totalorder %s634_s2, %s548_s30  ;;  %s31_s27 = int_to_ptr.vmem [resolvable:$true] %s30_s27 }
  0x14   :  { %p552_p9 = scmp.lt.u32.totalorder %s548_s30, %s634_s2 }
  0x16   :  { %p554_p10 = pnand %p552_p9, %p549_p8 }
  0x18   :  { %557 = shalt.err (!%p554_p10)
}
  0x19   :  { %s558_s8 = scalar_lea.vmem %s31_s27, 64  ;;  %p563_p12 = scmp.lt.s32.totalorder %s31_s27, %s31_s27 }
  0x1a   :  { %p559_p11 = scmp.ne.s32.totalorder %s31_s27, %s558_s8  ;;  %p564_p13 = scmp.lt.s32.totalorder %s558_s8, %s558_s8 }
  0x1c   :  { %p565_p0 = por %p564_p13, %p563_p12 }
  0x1e   :  { %p566_p1 = pnand %p565_p0, %p559_p11 }
  0x20   :  { %569 = shalt.err (!%p566_p1)
}
  0x21   :  { %33 = dma.hbm_to_vmem [thread:$0]  %s634_s2, 64, %s31_s27, [#allocation6]  }
  0x22   :  { %570 = dma.done.wait [#allocation4], 4096  }
  0x23   :  { %571 = vsyncadd [#allocation4], 4294963200 }
  0x24   :  { %572 = dma.done.wait [#allocation6], 64  }
  0x25   :  { %573 = vsyncadd [#allocation6], 4294967232  ;;  %v578_v0 = vmov 0   ;;  %v470_v1 = vld [vmem:[#allocation3 + $0x4] ss:$16 sps:$4 sm:$0xff]   ;;  %v345_v34 = vlaneseq }
  0x26   :  { %278 = vmatprep.mubr.bf16.mxu0 %v578_v0  ;;  %319 = vmatprep.mubr.bf16.mxu1 %v578_v0  ;;  %v472_v2 = vld [vmem:[#allocation3 + $0xc] ss:$16 sps:$4 sm:$0xff]   ;;  %v474_v3 = vld [vmem:[#allocation3] ss:$16 sps:$4 sm:$0xff]   ;;  %v475_v4 = vld [vmem:[#allocation3 + $0x8] ss:$16 sps:$4 sm:$0xff]  }
  0x27   :  { %246 = vmatprep.subr.bf16.mxu0 %v470_v1  ;;  %287 = vmatprep.subr.bf16.mxu1 %v472_v2  ;;  %v476_v5 = vld [vmem:[#allocation3 + $0x24] ss:$16 sps:$4 sm:$0xff]   ;;  %v478_v6 = vld [vmem:[#allocation3 + $0x2c] ss:$16 sps:$4 sm:$0xff]   ;;  %v480_v7 = vld [vmem:[#allocation3 + $0x20] ss:$16 sps:$4 sm:$0xff]  }
  0x28   :  { %247 = vmatpush1.bf16.msra.mxu0 %v474_v3  ;;  %288 = vmatpush1.bf16.msra.mxu1 %v475_v4  ;;  %v481_v8 = vld [vmem:[#allocation3 + $0x28] ss:$16 sps:$4 sm:$0xff]   ;;  %v482_v9 = vld [vmem:[#allocation3 + $0x44] ss:$16 sps:$4 sm:$0xff]   ;;  %v484_v10 = vld [vmem:[#allocation3 + $0x4c] ss:$16 sps:$4 sm:$0xff]  }
  0x29   :  { %248 = vmatprep.subr.bf16.mxu0 %v476_v5  ;;  %289 = vmatprep.subr.bf16.mxu1 %v478_v6  ;;  %v486_v11 = vld [vmem:[#allocation3 + $0x40] ss:$16 sps:$4 sm:$0xff]   ;;  %v487_v12 = vld [vmem:[#allocation3 + $0x48] ss:$16 sps:$4 sm:$0xff]   ;;  %v488_v13 = vld [vmem:[#allocation3 + $0x64] ss:$16 sps:$4 sm:$0xff]  }
  0x2a   :  { %v490_v14 = vld [vmem:[#allocation3 + $0x6c] ss:$16 sps:$4 sm:$0xff]   ;;  %v492_v15 = vld [vmem:[#allocation3 + $0x60] ss:$16 sps:$4 sm:$0xff]   ;;  %v493_v16 = vld [vmem:[#allocation3 + $0x68] ss:$16 sps:$4 sm:$0xff]  }
  0x2b   :  { %v494_v17 = vld [vmem:[#allocation3 + $0x84] ss:$16 sps:$4 sm:$0xff]   ;;  %v496_v18 = vld [vmem:[#allocation3 + $0x8c] ss:$16 sps:$4 sm:$0xff]   ;;  %v498_v19 = vld [vmem:[#allocation3 + $0x80] ss:$16 sps:$4 sm:$0xff]  }
  0x2c   :  { %249 = vmatpush1.bf16.msra.mxu0 %v480_v7  ;;  %290 = vmatpush1.bf16.msra.mxu1 %v481_v8  ;;  %v499_v20 = vld [vmem:[#allocation3 + $0x88] ss:$16 sps:$4 sm:$0xff]   ;;  %v500_v21 = vld [vmem:[#allocation3 + $0xa4] ss:$16 sps:$4 sm:$0xff]   ;;  %v502_v22 = vld [vmem:[#allocation3 + $0xac] ss:$16 sps:$4 sm:$0xff]  }
  0x2d   :  { %250 = vmatprep.subr.bf16.mxu0 %v482_v9  ;;  %291 = vmatprep.subr.bf16.mxu1 %v484_v10  ;;  %v504_v23 = vld [vmem:[#allocation3 + $0xa0] ss:$16 sps:$4 sm:$0xff]   ;;  %v505_v24 = vld [vmem:[#allocation3 + $0xa8] ss:$16 sps:$4 sm:$0xff]   ;;  %v506_v25 = vld [vmem:[#allocation3 + $0xc4] ss:$16 sps:$4 sm:$0xff]  }
  0x2e   :  { %v508_v26 = vld [vmem:[#allocation3 + $0xcc] ss:$16 sps:$4 sm:$0xff]   ;;  %v510_v27 = vld [vmem:[#allocation3 + $0xc0] ss:$16 sps:$4 sm:$0xff]   ;;  %v511_v28 = vld [vmem:[#allocation3 + $0xc8] ss:$16 sps:$4 sm:$0xff]  }
  0x2f   :  { %v512_v29 = vld [vmem:[#allocation3 + $0xe4] ss:$16 sps:$4 sm:$0xff]   ;;  %v514_v30 = vld [vmem:[#allocation3 + $0xec] ss:$16 sps:$4 sm:$0xff]   ;;  %v516_v31 = vld [vmem:[#allocation3 + $0xe0] ss:$16 sps:$4 sm:$0xff]  }
  0x30   :  { %251 = vmatpush1.bf16.msra.mxu0 %v486_v11  ;;  %292 = vmatpush1.bf16.msra.mxu1 %v487_v12  ;;  %v517_v32 = vld [vmem:[#allocation3 + $0xe8] ss:$16 sps:$4 sm:$0xff]   ;;  %v53_v33 = vld [vmem:[%s632_s0] sm:$0xf]  ;;  %v346_v35 = vshrl.u32 %v345_v34, 7 }
  0x31   :  { %252 = vmatprep.subr.bf16.mxu0 %v488_v13  ;;  %293 = vmatprep.subr.bf16.mxu1 %v490_v14  ;;  %v343_v38 = vld [vmem:[#allocation5] sm:$0xf] }
  0x32   :  { %v347_v36 = vsub.s32 0, %v346_v35  ;;  %v355_v37 = vsub.s32 2, %v346_v35  ;;  %v351_v39 = vsub.s32 1, %v346_v35  ;;  %v359_v40 = vsub.s32 3, %v346_v35 }
  0x34   :  { %253 = vmatpush1.bf16.msra.mxu0 %v492_v15  ;;  %294 = vmatpush1.bf16.msra.mxu1 %v493_v16  ;;  %v348_v41 = vrot.slane %v343_v38, %v347_v36  ;;  %v356_v42 = vrot.slane %v343_v38, %v355_v37  ;;  %v352_v43 = vrot.slane %v343_v38, %v351_v39 }
  0x35   :  { %254 = vmatprep.subr.bf16.mxu0 %v494_v17  ;;  %295 = vmatprep.subr.bf16.mxu1 %v496_v18  ;;  %v360_v44 = vrot.slane %v343_v38, %v359_v40 }
  0x38   :  { %255 = vmatpush1.bf16.msra.mxu0 %v498_v19  ;;  %296 = vmatpush1.bf16.msra.mxu1 %v499_v20 }
  0x39   :  { %256 = vmatprep.subr.bf16.mxu0 %v500_v21  ;;  %297 = vmatprep.subr.bf16.mxu1 %v502_v22 }
  0x3c   :  { %257 = vmatpush1.bf16.msra.mxu0 %v504_v23  ;;  %298 = vmatpush1.bf16.msra.mxu1 %v505_v24 }
  0x3d   :  { %258 = vmatprep.subr.bf16.mxu0 %v506_v25  ;;  %299 = vmatprep.subr.bf16.mxu1 %v508_v26 }
  0x40   :  { %259 = vmatpush1.bf16.msra.mxu0 %v510_v27  ;;  %300 = vmatpush1.bf16.msra.mxu1 %v511_v28 }
  0x41   :  { %260 = vmatprep.subr.bf16.mxu0 %v512_v29  ;;  %301 = vmatprep.subr.bf16.mxu1 %v514_v30 }
  0x44   :  { %261 = vmatpush1.bf16.msra.mxu0 %v516_v31  ;;  %302 = vmatpush1.bf16.msra.mxu1 %v517_v32 }
  0x47   :  { %279 = vmatmul.mubr.bf16.vlgmr.msra.gmra.mrb[0].mxu0 %v53_v33  ;;  %320 = vmatmul.mubr.bf16.vlgmr.msra.gmra.mrb[0].mxu1 %v53_v33 }
 0x11a   :  { %v280_v45 = vpop.f32.mrb[0].mxu0  ;;  %v321_v46 = vpop.f32.mrb[0].mxu1 }
 0x11b   :  { %v365_v47 = vadd.f32 %v348_v41, %v280_v45  ;;  %v367_v48 = vadd.f32 %v356_v42, %v321_v46  ;;  %v282_v49 = vpop.f32.mrb[1].mxu0  ;;  %v323_v50 = vpop.f32.mrb[1].mxu1 }
 0x11c   :  { %v366_v51 = vadd.f32 %v352_v43, %v282_v49  ;;  %v368_v52 = vadd.f32 %v360_v44, %v323_v50  ;;  %v284_v53 = vpop.f32.mrb[2].mxu0  ;;  %v325_v54 = vpop.f32.mrb[2].mxu1 }
 0x11d   :  { %v373_v55 = vmul.f32 0.044715, %v365_v47  ;;  %v375_v56 = vmul.f32 0.044715, %v367_v48  ;;  %v285_v61 = vpop.f32.mrb[3].mxu0  ;;  %v326_v62 = vpop.f32.mrb[3].mxu1 }
 0x11e   :  { %v374_v57 = vmul.f32 0.044715, %v366_v51  ;;  %v376_v58 = vmul.f32 0.044715, %v368_v52  ;;  %v369_v15 = vmul.f32 0.5, %v365_v47  ;;  %v371_v18 = vmul.f32 0.5, %v367_v48 }
 0x11f   :  { %v377_v59 = vmul.f32 %v373_v55, %v365_v47  ;;  %v379_v60 = vmul.f32 %v375_v56, %v367_v48  ;;  %v370_v22 = vmul.f32 0.5, %v366_v51  ;;  %v372_v25 = vmul.f32 0.5, %v368_v52 }
 0x120   :  { %v378_v63 = vmul.f32 %v374_v57, %v366_v51  ;;  %v380_v0 = vmul.f32 %v376_v58, %v368_v52 }
 0x121   :  { %v381_v1 = vmul.f32 %v377_v59, %v365_v47  ;;  %v383_v2 = vmul.f32 %v379_v60, %v367_v48 }
 0x122   :  { %v382_v3 = vmul.f32 %v378_v63, %v366_v51  ;;  %v384_v4 = vmul.f32 %v380_v0, %v368_v52 }
 0x123   :  { %v385_v5 = vadd.f32 %v381_v1, %v365_v47  ;;  %v387_v6 = vadd.f32 %v383_v2, %v367_v48 }
 0x124   :  { %v386_v7 = vadd.f32 %v382_v3, %v366_v51  ;;  %v388_v8 = vadd.f32 %v384_v4, %v368_v52 }
 0x125   :  { %v389_v9 = vmul.f32 0.7978846, %v385_v5  ;;  %v391_v10 = vmul.f32 0.7978846, %v387_v6 }
 0x126   :  { %v390_v11 = vmul.f32 0.7978846, %v386_v7  ;;  %v392_v12 = vmul.f32 0.7978846, %v388_v8 }
 0x127   :  { %518 = vtanh.f32 %v389_v9 }
 0x128   :  { %520 = vtanh.f32 %v391_v10 }
 0x129   :  { %522 = vtanh.f32 %v390_v11 }
 0x12a   :  { %524 = vtanh.f32 %v392_v12 }
 0x131   :  { %v519_v13 = vpop.eup %518 }
 0x132   :  { %v521_v14 = vpop.eup %520  ;;  %v397_v16 = vadd.f32 1.0, %v519_v13 }
 0x133   :  { %v523_v17 = vpop.eup %522  ;;  %v399_v19 = vadd.f32 1.0, %v521_v14 }
 0x134   :  { %v525_v20 = vpop.eup %524  ;;  %v401_v21 = vmul.f32 %v397_v16, %v369_v15  ;;  %v398_v23 = vadd.f32 1.0, %v523_v17 }
 0x135   :  { %v403_v24 = vmul.f32 %v399_v19, %v371_v18  ;;  %v400_v26 = vadd.f32 1.0, %v525_v20 }
 0x136   :  { %v402_v27 = vmul.f32 %v398_v23, %v370_v22 }
 0x137   :  { %v404_v28 = vmul.f32 %v400_v26, %v372_v25 }
 0x138   :  { %v463_v29 = vpack.c.bf16 %v402_v27, %v401_v21 }
 0x139   :  { %v464_v30 = vpack.c.bf16 %v404_v28, %v403_v24 }
 0x13a   :  { %421 = vst [vmem:[%s635_s3] sm:$0xff] %v463_v29 }
 0x13b   :  { %422 = vst [vmem:[%s635_s3 + $0x8] sm:$0xff] %v464_v30 }
 0x13c   :  { %427 = vsyncpa [#allocation4], 1 }
 0x13d   :  { %428 = vsyncpa [#allocation6], 1 }

// kernel: viedoswin_forward.113
= control target key start
LH: loop header
LB: loop body
LE: loop exit
PB: predicated region body
PF: predicated region fallthrough
CT: control target
= control target key end

     0   :  { %8 = vsyncpa [#allocation3], 0  ;;  %s261_s0 = inlined_call_operand.vmem [shape: bf16[8,512], index: 0, kind: input, shape index: {}]   ;;  %s262_s1 = inlined_call_operand.hbm [shape: f32[1,512], index: 1, kind: input, shape index: {}]   ;;  %s263_s2 = inlined_call_operand.hbm [shape: f32[1,512], index: 2, kind: input, shape index: {}]   ;;  %s264_s3 = inlined_call_operand.vmem [shape: bf16[8,512], index: 3, kind: output, shape index: {}]  }
   0x1   :  { %9 = vsyncpa [#allocation5], 0  ;;  %s203_s12 = smov [#allocation2]   ;;  %s204_s14 = smov [#allocation4]  }
   0x2   :  { %s18_s13 = sshll.u32 %s203_s12, 4  ;;  %s28_s15 = sshll.u32 %s204_s14, 4  ;;  %s19_s13 = int_to_ptr.vmem [resolvable:$true] %s18_s13  ;;  %s29_s15 = int_to_ptr.vmem [resolvable:$true] %s28_s15 }
   0x3   :  { %s155_s18 = scalar_lea.hbm %s262_s1, 64 }
   0x4   :  { %p156_p0 = scmp.ne.s32.totalorder %s262_s1, %s155_s18  ;;  %p159_p1 = scmp.lt.u32.totalorder %s155_s18, %s262_s1 }
   0x6   :  { %p161_p2 = pnand %p159_p1, %p156_p0 }
   0x8   :  { %164 = shalt.err (!%p161_p2)
}
   0x9   :  { %s165_s23 = scalar_lea.vmem %s19_s13, 64  ;;  %p170_p4 = scmp.lt.s32.totalorder %s19_s13, %s19_s13 }
   0xa   :  { %p166_p3 = scmp.ne.s32.totalorder %s19_s13, %s165_s23  ;;  %p171_p5 = scmp.lt.s32.totalorder %s165_s23, %s165_s23 }
   0xc   :  { %p172_p6 = por %p171_p5, %p170_p4 }
   0xe   :  { %p173_p7 = pnand %p172_p6, %p166_p3 }
  0x10   :  { %176 = shalt.err (!%p173_p7)
}
  0x11   :  { %21 = dma.hbm_to_vmem [thread:$0]  %s262_s1, 64, %s19_s13, [#allocation3]  }
  0x12   :  { %s177_s28 = scalar_lea.hbm %s263_s2, 64 }
  0x13   :  { %p178_p8 = scmp.ne.s32.totalorder %s263_s2, %s177_s28  ;;  %p181_p9 = scmp.lt.u32.totalorder %s177_s28, %s263_s2 }
  0x15   :  { %p183_p10 = pnand %p181_p9, %p178_p8 }
  0x17   :  { %186 = shalt.err (!%p183_p10)
}
  0x18   :  { %s187_s6 = scalar_lea.vmem %s29_s15, 64  ;;  %p192_p12 = scmp.lt.s32.totalorder %s29_s15, %s29_s15 }
  0x19   :  { %p188_p11 = scmp.ne.s32.totalorder %s29_s15, %s187_s6  ;;  %p193_p13 = scmp.lt.s32.totalorder %s187_s6, %s187_s6 }
  0x1b   :  { %p194_p0 = por %p193_p13, %p192_p12 }
  0x1d   :  { %p195_p1 = pnand %p194_p0, %p188_p11 }
  0x1f   :  { %198 = shalt.err (!%p195_p1)
}
  0x20   :  { %31 = dma.hbm_to_vmem [thread:$0]  %s263_s2, 64, %s29_s15, [#allocation5]  }
  0x21   :  { %199 = dma.done.wait [#allocation3], 64  }
  0x22   :  { %200 = vsyncadd [#allocation3], 4294967232 }
  0x23   :  { %201 = dma.done.wait [#allocation5], 64  }
  0x24   :  { %202 = vsyncadd [#allocation5], 4294967232  ;;  %v38_v0 = vld [vmem:[%s261_s0] sm:$0xff]  ;;  %v39_v1 = vld [vmem:[%s261_s0 + $0x8] sm:$0xff]  ;;  %v73_v24 = vlaneseq }
  0x25   :  { %v40_v2 = vunpack.c.l.bf16 %v38_v0  ;;  %v41_v3 = vunpack.c.h.bf16 %v38_v0  ;;  %v42_v4 = vunpack.c.l.bf16 %v39_v1  ;;  %v43_v5 = vunpack.c.h.bf16 %v39_v1  ;;  %v71_v31 = vld [vmem:[#allocation2] sm:$0xf]  ;;  %v97_v32 = vld [vmem:[#allocation4] sm:$0xf] }
  0x26   :  { %v74_v26 = vshrl.u32 %v73_v24, 7 }
  0x27   :  { %v44_v6 = vadd.f32 %v41_v3, %v40_v2 }
  0x28   :  { %v75_v27 = vsub.s32 0, %v74_v26  ;;  %v79_v28 = vsub.s32 1, %v74_v26  ;;  %v83_v29 = vsub.s32 2, %v74_v26  ;;  %v87_v30 = vsub.s32 3, %v74_v26 }
  0x29   :  { %v45_v7 = vadd.f32 %v44_v6, %v42_v4 }
  0x2a   :  { %v76_v33 = vrot.slane %v71_v31, %v75_v27  ;;  %v80_v34 = vrot.slane %v71_v31, %v79_v28  ;;  %v84_v35 = vrot.slane %v71_v31, %v83_v29  ;;  %v88_v36 = vrot.slane %v71_v31, %v87_v30 }
  0x2b   :  { %v46_v8 = vadd.f32 %v45_v7, %v43_v5  ;;  %v102_v38 = vrot.slane %v97_v32, %v75_v27  ;;  %v106_v39 = vrot.slane %v97_v32, %v79_v28  ;;  %v110_v40 = vrot.slane %v97_v32, %v83_v29 }
  0x2c   :  { %v114_v41 = vrot.slane %v97_v32, %v87_v30 }
  0x2d   :  { %47 = vadd.xlane.f32.xlu0 %v46_v8 }
  0xba   :  { %v48_v9 = vpop.xlane.xlu0 %47 }
  0xbb   :  { %v50_v10 = vmul.f32 0.001953125, %v48_v9 }
  0xbd   :  { %v51_v11 = vsub.f32 %v40_v2, %v50_v10  ;;  %v52_v12 = vsub.f32 %v41_v3, %v50_v10  ;;  %v53_v13 = vsub.f32 %v42_v4, %v50_v10  ;;  %v54_v14 = vsub.f32 %v43_v5, %v50_v10 }
  0xbf   :  { %v55_v15 = vmul.f32 %v51_v11, %v51_v11  ;;  %v56_v16 = vmul.f32 %v52_v12, %v52_v12  ;;  %v57_v17 = vmul.f32 %v53_v13, %v53_v13  ;;  %v58_v19 = vmul.f32 %v54_v14, %v54_v14 }
  0xc1   :  { %v59_v18 = vadd.f32 %v56_v16, %v55_v15 }
  0xc3   :  { %v60_v20 = vadd.f32 %v59_v18, %v57_v17 }
  0xc5   :  { %v61_v21 = vadd.f32 %v60_v20, %v58_v19 }
  0xc7   :  { %62 = vadd.xlane.f32.xlu0 %v61_v21 }
 0x154   :  { %v63_v22 = vpop.xlane.xlu0 %62 }
 0x155   :  { %v64_v23 = vmul.f32 0.001953125, %v63_v22 }
 0x157   :  { %v65_v25 = vadd.f32 1e-05, %v64_v23 }
 0x159   :  { %153 = vrsqrt.f32 %v65_v25 }
 0x163   :  { %v154_v37 = vpop.eup %153 }
 0x164   :  { %v67_v42 = vmul.f32 %v154_v37, %v51_v11  ;;  %v68_v43 = vmul.f32 %v154_v37, %v52_v12  ;;  %v69_v44 = vmul.f32 %v154_v37, %v53_v13  ;;  %v70_v45 = vmul.f32 %v154_v37, %v54_v14 }
 0x166   :  { %v93_v46 = vmul.f32 %v76_v33, %v67_v42  ;;  %v94_v47 = vmul.f32 %v80_v34, %v68_v43  ;;  %v95_v48 = vmul.f32 %v84_v35, %v69_v44  ;;  %v96_v49 = vmul.f32 %v88_v36, %v70_v45 }
 0x168   :  { %v119_v50 = vadd.f32 %v102_v38, %v93_v46  ;;  %v120_v51 = vadd.f32 %v106_v39, %v94_v47  ;;  %v121_v52 = vadd.f32 %v110_v40, %v95_v48  ;;  %v122_v53 = vadd.f32 %v114_v41, %v96_v49 }
 0x16a   :  { %v149_v54 = vpack.c.bf16 %v120_v51, %v119_v50  ;;  %v150_v55 = vpack.c.bf16 %v122_v53, %v121_v52 }
 0x16c   :  { %139 = vst [vmem:[%s264_s3] sm:$0xff] %v149_v54  ;;  %140 = vst [vmem:[%s264_s3 + $0x8] sm:$0xff] %v150_v55 }
 0x16d   :  { %145 = vsyncpa [#allocation3], 1 }
 0x16e   :  { %146 = vsyncpa [#allocation5], 1 }

// kernel: viedoswin_forward.105
= control target key start
LH: loop header
LB: loop body
LE: loop exit
PB: predicated region body
PF: predicated region fallthrough
CT: control target
= control target key end

     0   :  { %8 = vsyncpa [#allocation4], 0  ;;  %s647_s0 = inlined_call_operand.vmem [shape: bf16[8,512], index: 0, kind: input, shape index: {}]   ;;  %s648_s1 = inlined_call_operand.hbm [shape: bf16[512,128], index: 1, kind: input, shape index: {}]   ;;  %s649_s2 = inlined_call_operand.hbm [shape: f32[1,128], index: 2, kind: input, shape index: {}]   ;;  %s650_s3 = inlined_call_operand.vmem [shape: bf16[8,128], index: 3, kind: output, shape index: {}]  }
   0x1   :  { %9 = vsyncpa [#allocation6], 0  ;;  %s590_s12 = smov [#allocation3]   ;;  %s542_s16 = scalar_lea.hbm %s648_s1, 4096 }
   0x2   :  { %s17_s13 = sshll.u32 %s590_s12, 4  ;;  %p543_p0 = scmp.ne.s32.totalorder %s648_s1, %s542_s16  ;;  %s18_s13 = int_to_ptr.vmem [resolvable:$true] %s17_s13 }
   0x3   :  { %p546_p1 = scmp.lt.u32.totalorder %s542_s16, %s648_s1 }
   0x5   :  { %p548_p2 = pnand %p546_p1, %p543_p0 }
   0x7   :  { %551 = shalt.err (!%p548_p2)
}
   0x8   :  { %s552_s21 = scalar_lea.vmem %s18_s13, 4096  ;;  %p557_p4 = scmp.lt.s32.totalorder %s18_s13, %s18_s13 }
   0x9   :  { %p553_p3 = scmp.ne.s32.totalorder %s18_s13, %s552_s21  ;;  %p558_p5 = scmp.lt.s32.totalorder %s552_s21, %s552_s21 }
   0xb   :  { %p559_p6 = por %p558_p5, %p557_p4 }
   0xd   :  { %p560_p7 = pnand %p559_p6, %p553_p3 }
   0xf   :  { %563 = shalt.err (!%p560_p7)
}
  0x10   :  { %s591_s22 = smov 64   ;;  %s592_s23 = smov 4  }
  0x11   :  { %23 = dma.hbm_to_vmem [thread:$0]  %s648_s1, 4096, %s18_s13, [#allocation4], %s591_s22, %s591_s22, %s592_s23  }
  0x12   :  { %s593_s26 = smov [#allocation5]   ;;  %s564_s30 = scalar_lea.hbm %s649_s2, 16 }
  0x13   :  { %s30_s27 = sshll.u32 %s593_s26, 4  ;;  %p565_p8 = scmp.ne.s32.totalorder %s649_s2, %s564_s30  ;;  %s31_s27 = int_to_ptr.vmem [resolvable:$true] %s30_s27 }
  0x14   :  { %p568_p9 = scmp.lt.u32.totalorder %s564_s30, %s649_s2 }
  0x16   :  { %p570_p10 = pnand %p568_p9, %p565_p8 }
  0x18   :  { %573 = shalt.err (!%p570_p10)
}
  0x19   :  { %s574_s8 = scalar_lea.vmem %s31_s27, 16  ;;  %s578_s1 = scalar_lea.vmem %s31_s27, 32 }
  0x1a   :  { %p575_p11 = scmp.ne.s32.totalorder %s31_s27, %s574_s8  ;;  %p579_p12 = scmp.lt.s32.totalorder %s31_s27, %s31_s27 }
  0x1b   :  { %p580_p13 = scmp.lt.s32.totalorder %s578_s1, %s574_s8 }
  0x1d   :  { %p581_p0 = por %p580_p13, %p579_p12 }
  0x1f   :  { %p582_p1 = pnand %p581_p0, %p575_p11 }
  0x21   :  { %585 = shalt.err (!%p582_p1)
}
  0x22   :  { %33 = dma.hbm_to_vmem [thread:$0]  %s649_s2, 16, %s31_s27, [#allocation6]  }
  0x23   :  { %586 = dma.done.wait [#allocation4], 4096  }
  0x24   :  { %587 = vsyncadd [#allocation4], 4294963200 }
  0x25   :  { %588 = dma.done.wait [#allocation6], 16  }
  0x26   :  { %589 = vsyncadd [#allocation6], 4294967280  ;;  %v506_v0 = vld [vmem:[#allocation3 + $0x40] sm:$0xff]   ;;  %v510_v4 = vld [vmem:[#allocation3 + $0x48] sm:$0xff]  }
  0x27   :  { %v507_v1 = vld [vmem:[#allocation3 + $0xc0] sm:$0xff]   ;;  %458 = vmatprep.subr.bf16.mxu0 %v506_v0  ;;  %v511_v5 = vld [vmem:[#allocation3 + $0xc8] sm:$0xff]   ;;  %v514_v8 = vld [vmem:[#allocation3 + $0x50] sm:$0xff]  }
  0x28   :  { %v508_v2 = vld [vmem:[#allocation3] sm:$0xff]   ;;  %480 = vmatprep.subr.bf16.mxu1 %v507_v1  ;;  %v512_v6 = vld [vmem:[#allocation3 + $0x8] sm:$0xff]   ;;  %v515_v9 = vld [vmem:[#allocation3 + $0xd0] sm:$0xff]  }
  0x29   :  { %v509_v3 = vld [vmem:[#allocation3 + $0x80] sm:$0xff]   ;;  %459 = vmatpush3.bf16.msra.mxu0 %v508_v2  ;;  %v513_v7 = vld [vmem:[#allocation3 + $0x88] sm:$0xff]   ;;  %v516_v10 = vld [vmem:[#allocation3 + $0x10] sm:$0xff]  }
  0x2a   :  { %481 = vmatpush3.bf16.msra.mxu1 %v509_v3  ;;  %460 = vmatprep.subr.bf16.mxu0 %v510_v4  ;;  %v517_v11 = vld [vmem:[#allocation3 + $0x90] sm:$0xff]   ;;  %v518_v12 = vld [vmem:[#allocation3 + $0x58] sm:$0xff]   ;;  %v522_v16 = vld [vmem:[#allocation3 + $0x60] sm:$0xff]  }
  0x2b   :  { %482 = vmatprep.subr.bf16.mxu1 %v511_v5  ;;  %v519_v13 = vld [vmem:[#allocation3 + $0xd8] sm:$0xff]   ;;  %v523_v17 = vld [vmem:[#allocation3 + $0xe0] sm:$0xff]   ;;  %v526_v20 = vld [vmem:[#allocation3 + $0x68] sm:$0xff]  }
  0x2c   :  { %v520_v14 = vld [vmem:[#allocation3 + $0x18] sm:$0xff]   ;;  %v524_v18 = vld [vmem:[#allocation3 + $0x20] sm:$0xff]   ;;  %v527_v21 = vld [vmem:[#allocation3 + $0xe8] sm:$0xff]  }
  0x2d   :  { %461 = vmatpush3.bf16.msra.mxu0 %v512_v6  ;;  %v521_v15 = vld [vmem:[#allocation3 + $0x98] sm:$0xff]   ;;  %v525_v19 = vld [vmem:[#allocation3 + $0xa0] sm:$0xff]   ;;  %v528_v22 = vld [vmem:[#allocation3 + $0x28] sm:$0xff]  }
  0x2e   :  { %483 = vmatpush3.bf16.msra.mxu1 %v513_v7  ;;  %462 = vmatprep.subr.bf16.mxu0 %v514_v8  ;;  %v529_v23 = vld [vmem:[#allocation3 + $0xa8] sm:$0xff]   ;;  %v530_v24 = vld [vmem:[#allocation3 + $0x70] sm:$0xff]   ;;  %v534_v28 = vld [vmem:[#allocation3 + $0x78] sm:$0xff]  }
  0x2f   :  { %484 = vmatprep.subr.bf16.mxu1 %v515_v9  ;;  %v531_v25 = vld [vmem:[#allocation3 + $0xf0] sm:$0xff]   ;;  %v535_v29 = vld [vmem:[#allocation3 + $0xf8] sm:$0xff]   ;;  %v47_v32 = vld [vmem:[%s647_s0] sm:$0xff] }
  0x30   :  { %v532_v26 = vld [vmem:[#allocation3 + $0x30] sm:$0xff]   ;;  %v536_v30 = vld [vmem:[#allocation3 + $0x38] sm:$0xff]   ;;  %v48_v33 = vld [vmem:[%s647_s0 + $0x8] sm:$0xff]  ;;  %v421_v34 = vcombine.low %v47_v32, %v47_v32  ;;  %v422_v35 = vcombine.high %v47_v32, %v47_v32 }
  0x31   :  { %463 = vmatpush3.bf16.msra.mxu0 %v516_v10  ;;  %v533_v27 = vld [vmem:[#allocation3 + $0xb0] sm:$0xff]   ;;  %v537_v31 = vld [vmem:[#allocation3 + $0xb8] sm:$0xff]   ;;  %v423_v36 = vcombine.low %v48_v33, %v48_v33  ;;  %v424_v37 = vcombine.high %v48_v33, %v48_v33  ;;  %v457_v46 = vld [vmem:[#allocation5] ss:$0 sm:$0xff] }
  0x32   :  { %485 = vmatpush3.bf16.msra.mxu1 %v517_v11  ;;  %464 = vmatprep.subr.bf16.mxu0 %v518_v12 }
  0x33   :  { %486 = vmatprep.subr.bf16.mxu1 %v519_v13  ;;  %351 = vmatprep.mubr.bf16.mxu0 %v422_v35 }
  0x34   :  { %391 = vmatprep.mubr.bf16.mxu1 %v424_v37 }
  0x35   :  { %465 = vmatpush3.bf16.msra.mxu0 %v520_v14 }
  0x36   :  { %487 = vmatpush3.bf16.msra.mxu1 %v521_v15  ;;  %466 = vmatprep.subr.bf16.mxu0 %v522_v16 }
  0x37   :  { %488 = vmatprep.subr.bf16.mxu1 %v523_v17 }
  0x39   :  { %467 = vmatpush3.bf16.msra.mxu0 %v524_v18 }
  0x3a   :  { %489 = vmatpush3.bf16.msra.mxu1 %v525_v19  ;;  %468 = vmatprep.subr.bf16.mxu0 %v526_v20 }
  0x3b   :  { %490 = vmatprep.subr.bf16.mxu1 %v527_v21 }
  0x3d   :  { %469 = vmatpush3.bf16.msra.mxu0 %v528_v22 }
  0x3e   :  { %491 = vmatpush3.bf16.msra.mxu1 %v529_v23  ;;  %470 = vmatprep.subr.bf16.mxu0 %v530_v24 }
  0x3f   :  { %492 = vmatprep.subr.bf16.mxu1 %v531_v25 }
  0x41   :  { %471 = vmatpush3.bf16.msra.mxu0 %v532_v26 }
  0x42   :  { %493 = vmatpush3.bf16.msra.mxu1 %v533_v27  ;;  %472 = vmatprep.subr.bf16.mxu0 %v534_v28 }
  0x43   :  { %494 = vmatprep.subr.bf16.mxu1 %v535_v29 }
  0x45   :  { %473 = vmatpush3.bf16.msra.mxu0 %v536_v30 }
  0x46   :  { %495 = vmatpush3.bf16.msra.mxu1 %v537_v31 }
  0x48   :  { %352 = vmatmul.mubr.bf16.vlgmr.msra.gmra.mrb[0].mxu0 %v421_v34 }
  0x49   :  { %392 = vmatmul.mubr.bf16.vlgmr.msra.gmra.mrb[0].mxu1 %v423_v36 }
 0x11b   :  { %v474_v38 = vpop.f32.mrb[0].mxu0 }
 0x11c   :  { %v496_v39 = vpop.f32.mrb[0].mxu1  ;;  %v475_v40 = vpop.f32.mrb[1].mxu0 }
 0x11d   :  { %v497_v41 = vpop.f32.mrb[1].mxu1  ;;  %v476_v42 = vadd.f32 %v475_v40, %v474_v38  ;;  %v477_v44 = vpop.f32.mrb[2].mxu0 }
 0x11e   :  { %v498_v43 = vadd.f32 %v497_v41, %v496_v39  ;;  %v499_v45 = vpop.f32.mrb[2].mxu1  ;;  %v478_v47 = vpop.f32.mrb[3].mxu0 }
 0x11f   :  { %v500_v48 = vpop.f32.mrb[3].mxu1 }
 0x120   :  { %v394_v49 = vadd.f32 %v498_v43, %v476_v42 }
 0x122   :  { %v412_v50 = vadd.f32 %v457_v46, %v394_v49 }
 0x124   :  { %v413_v51 = vpack.c.bf16 %v412_v50, %v412_v50 }
 0x126   :  { %414 = vst [vmem:[%s650_s3] sm:$0xf] %v413_v51 }
 0x127   :  { %419 = vsyncpa [#allocation4], 1 }
 0x128   :  { %420 = vsyncpa [#allocation6], 1 }

// kernel: viedoswin_forward.114
= control target key start
LH: loop header
LB: loop body
LE: loop exit
PB: predicated region body
PF: predicated region fallthrough
CT: control target
= control target key end

     0   :  { %8 = vsyncpa [#allocation4], 0  ;;  %s752_s12 = smov [#allocation3]   ;;  %s799_s0 = inlined_call_operand.vmem [shape: bf16[8,512], index: 0, kind: input, shape index: {}]   ;;  %s800_s1 = inlined_call_operand.hbm [shape: bf16[512,256], index: 1, kind: input, shape index: {}]   ;;  %s801_s2 = inlined_call_operand.vmem [shape: f32[1,256], index: 2, kind: input, shape index: {}]   ;;  %s802_s3 = inlined_call_operand.vmem [shape: bf16[8,256], index: 3, kind: output, shape index: {}]  }
   0x1   :  { %s16_s13 = sshll.u32 %s752_s12, 4  ;;  %s728_s16 = scalar_lea.hbm %s800_s1, 8192  ;;  %s17_s13 = int_to_ptr.vmem [resolvable:$true] %s16_s13 }
   0x2   :  { %p729_p0 = scmp.ne.s32.totalorder %s800_s1, %s728_s16  ;;  %p732_p1 = scmp.lt.u32.totalorder %s728_s16, %s800_s1 }
   0x4   :  { %p734_p2 = pnand %p732_p1, %p729_p0 }
   0x6   :  { %737 = shalt.err (!%p734_p2)
}
   0x7   :  { %s738_s21 = scalar_lea.vmem %s17_s13, 8192  ;;  %p743_p4 = scmp.lt.s32.totalorder %s17_s13, %s17_s13 }
   0x8   :  { %p739_p3 = scmp.ne.s32.totalorder %s17_s13, %s738_s21  ;;  %p744_p5 = scmp.lt.s32.totalorder %s738_s21, %s738_s21 }
   0xa   :  { %p745_p6 = por %p744_p5, %p743_p4 }
   0xc   :  { %p746_p7 = pnand %p745_p6, %p739_p3 }
   0xe   :  { %749 = shalt.err (!%p746_p7)
}
   0xf   :  { %s753_s22 = smov 128   ;;  %s754_s23 = smov 8  }
  0x10   :  { %22 = dma.hbm_to_vmem [thread:$0]  %s800_s1, 8192, %s17_s13, [#allocation4], %s753_s22, %s753_s22, %s754_s23  }
  0x11   :  { %750 = dma.done.wait [#allocation4], 8192  }
  0x12   :  { %751 = vsyncadd [#allocation4], 4294959104  ;;  %v628_v0 = vld [vmem:[#allocation3 + $0x4] ss:$8 sps:$4 sm:$0xff]   ;;  %v632_v2 = vld [vmem:[#allocation3] ss:$8 sps:$4 sm:$0xff]  }
  0x13   :  { %v630_v1 = vld [vmem:[#allocation3 + $0x104] ss:$8 sps:$4 sm:$0xff]   ;;  %436 = vmatprep.subr.bf16.mxu0 %v628_v0  ;;  %v633_v3 = vld [vmem:[#allocation3 + $0x100] ss:$8 sps:$4 sm:$0xff]   ;;  %v634_v4 = vld [vmem:[#allocation3 + $0x14] ss:$8 sps:$4 sm:$0xff]  }
  0x14   :  { %477 = vmatprep.subr.bf16.mxu1 %v630_v1  ;;  %437 = vmatpush1.bf16.msra.mxu0 %v632_v2  ;;  %v636_v5 = vld [vmem:[#allocation3 + $0x114] ss:$8 sps:$4 sm:$0xff]   ;;  %v638_v6 = vld [vmem:[#allocation3 + $0x10] ss:$8 sps:$4 sm:$0xff]   ;;  %v640_v8 = vld [vmem:[#allocation3 + $0x24] ss:$8 sps:$4 sm:$0xff]  }
  0x15   :  { %478 = vmatpush1.bf16.msra.mxu1 %v633_v3  ;;  %438 = vmatprep.subr.bf16.mxu0 %v634_v4  ;;  %v639_v7 = vld [vmem:[#allocation3 + $0x110] ss:$8 sps:$4 sm:$0xff]   ;;  %v642_v9 = vld [vmem:[#allocation3 + $0x124] ss:$8 sps:$4 sm:$0xff]   ;;  %v644_v10 = vld [vmem:[#allocation3 + $0x20] ss:$8 sps:$4 sm:$0xff]  }
  0x16   :  { %479 = vmatprep.subr.bf16.mxu1 %v636_v5  ;;  %v645_v11 = vld [vmem:[#allocation3 + $0x120] ss:$8 sps:$4 sm:$0xff]   ;;  %v646_v12 = vld [vmem:[#allocation3 + $0x34] ss:$8 sps:$4 sm:$0xff]   ;;  %v650_v14 = vld [vmem:[#allocation3 + $0x30] ss:$8 sps:$4 sm:$0xff]  }
  0x17   :  { %v648_v13 = vld [vmem:[#allocation3 + $0x134] ss:$8 sps:$4 sm:$0xff]   ;;  %v651_v15 = vld [vmem:[#allocation3 + $0x130] ss:$8 sps:$4 sm:$0xff]   ;;  %v652_v16 = vld [vmem:[#allocation3 + $0x44] ss:$8 sps:$4 sm:$0xff]  }
  0x18   :  { %439 = vmatpush1.bf16.msra.mxu0 %v638_v6  ;;  %v654_v17 = vld [vmem:[#allocation3 + $0x144] ss:$8 sps:$4 sm:$0xff]   ;;  %v656_v18 = vld [vmem:[#allocation3 + $0x40] ss:$8 sps:$4 sm:$0xff]   ;;  %v658_v20 = vld [vmem:[#allocation3 + $0x54] ss:$8 sps:$4 sm:$0xff]   ;;  %v529_v6 = vlaneseq }
  0x19   :  { %480 = vmatpush1.bf16.msra.mxu1 %v639_v7  ;;  %440 = vmatprep.subr.bf16.mxu0 %v640_v8  ;;  %v657_v19 = vld [vmem:[#allocation3 + $0x140] ss:$8 sps:$4 sm:$0xff]   ;;  %v660_v21 = vld [vmem:[#allocation3 + $0x154] ss:$8 sps:$4 sm:$0xff]   ;;  %v662_v22 = vld [vmem:[#allocation3 + $0x50] ss:$8 sps:$4 sm:$0xff]  }
  0x1a   :  { %481 = vmatprep.subr.bf16.mxu1 %v642_v9  ;;  %v663_v23 = vld [vmem:[#allocation3 + $0x150] ss:$8 sps:$4 sm:$0xff]   ;;  %v664_v24 = vld [vmem:[#allocation3 + $0x64] ss:$8 sps:$4 sm:$0xff]   ;;  %v668_v26 = vld [vmem:[#allocation3 + $0x60] ss:$8 sps:$4 sm:$0xff]  }
  0x1b   :  { %v666_v25 = vld [vmem:[#allocation3 + $0x164] ss:$8 sps:$4 sm:$0xff]   ;;  %v669_v27 = vld [vmem:[#allocation3 + $0x160] ss:$8 sps:$4 sm:$0xff]   ;;  %v670_v28 = vld [vmem:[#allocation3 + $0x74] ss:$8 sps:$4 sm:$0xff]  }
  0x1c   :  { %441 = vmatpush1.bf16.msra.mxu0 %v644_v10  ;;  %v672_v29 = vld [vmem:[#allocation3 + $0x174] ss:$8 sps:$4 sm:$0xff]   ;;  %v674_v30 = vld [vmem:[#allocation3 + $0x70] ss:$8 sps:$4 sm:$0xff]   ;;  %v676_v32 = vld [vmem:[#allocation3 + $0x84] ss:$8 sps:$4 sm:$0xff]  }
  0x1d   :  { %482 = vmatpush1.bf16.msra.mxu1 %v645_v11  ;;  %442 = vmatprep.subr.bf16.mxu0 %v646_v12  ;;  %v675_v31 = vld [vmem:[#allocation3 + $0x170] ss:$8 sps:$4 sm:$0xff]   ;;  %v678_v33 = vld [vmem:[#allocation3 + $0x184] ss:$8 sps:$4 sm:$0xff]   ;;  %v680_v34 = vld [vmem:[#allocation3 + $0x80] ss:$8 sps:$4 sm:$0xff]  }
  0x1e   :  { %483 = vmatprep.subr.bf16.mxu1 %v648_v13  ;;  %v681_v35 = vld [vmem:[#allocation3 + $0x180] ss:$8 sps:$4 sm:$0xff]   ;;  %v682_v36 = vld [vmem:[#allocation3 + $0x94] ss:$8 sps:$4 sm:$0xff]   ;;  %v686_v38 = vld [vmem:[#allocation3 + $0x90] ss:$8 sps:$4 sm:$0xff]  }
  0x1f   :  { %v684_v37 = vld [vmem:[#allocation3 + $0x194] ss:$8 sps:$4 sm:$0xff]   ;;  %v687_v39 = vld [vmem:[#allocation3 + $0x190] ss:$8 sps:$4 sm:$0xff]   ;;  %v688_v40 = vld [vmem:[#allocation3 + $0xa4] ss:$8 sps:$4 sm:$0xff]  }
  0x20   :  { %443 = vmatpush1.bf16.msra.mxu0 %v650_v14  ;;  %v690_v41 = vld [vmem:[#allocation3 + $0x1a4] ss:$8 sps:$4 sm:$0xff]   ;;  %v692_v42 = vld [vmem:[#allocation3 + $0xa0] ss:$8 sps:$4 sm:$0xff]   ;;  %v694_v44 = vld [vmem:[#allocation3 + $0xb4] ss:$8 sps:$4 sm:$0xff]  }
  0x21   :  { %484 = vmatpush1.bf16.msra.mxu1 %v651_v15  ;;  %444 = vmatprep.subr.bf16.mxu0 %v652_v16  ;;  %v693_v43 = vld [vmem:[#allocation3 + $0x1a0] ss:$8 sps:$4 sm:$0xff]   ;;  %v696_v45 = vld [vmem:[#allocation3 + $0x1b4] ss:$8 sps:$4 sm:$0xff]   ;;  %v698_v49 = vld [vmem:[#allocation3 + $0xb0] ss:$8 sps:$4 sm:$0xff]  }
  0x22   :  { %485 = vmatprep.subr.bf16.mxu1 %v654_v17  ;;  %v36_v46 = vld [vmem:[%s799_s0] sm:$0xff]  ;;  %v37_v48 = vld [vmem:[%s799_s0 + $0x8] sm:$0xff]  ;;  %v699_v50 = vld [vmem:[#allocation3 + $0x1b0] ss:$8 sps:$4 sm:$0xff]   ;;  %v530_v7 = vshrl.u32 %v529_v6, 7 }
  0x23   :  { %v556_v47 = vcombine.high %v36_v46, %v36_v46  ;;  %v558_v51 = vcombine.high %v37_v48, %v37_v48  ;;  %v700_v52 = vld [vmem:[#allocation3 + $0xc4] ss:$8 sps:$4 sm:$0xff]   ;;  %v704_v54 = vld [vmem:[#allocation3 + $0xc0] ss:$8 sps:$4 sm:$0xff]   ;;  %v706_v56 = vld [vmem:[#allocation3 + $0xd4] ss:$8 sps:$4 sm:$0xff]   ;;  %v555_v4 = vcombine.low %v36_v46, %v36_v46  ;;  %v557_v5 = vcombine.low %v37_v48, %v37_v48 }
  0x24   :  { %445 = vmatpush1.bf16.msra.mxu0 %v656_v18  ;;  %v702_v53 = vld [vmem:[#allocation3 + $0x1c4] ss:$8 sps:$4 sm:$0xff]   ;;  %v705_v55 = vld [vmem:[#allocation3 + $0x1c0] ss:$8 sps:$4 sm:$0xff]   ;;  %v708_v57 = vld [vmem:[#allocation3 + $0x1d4] ss:$8 sps:$4 sm:$0xff]  }
  0x25   :  { %486 = vmatpush1.bf16.msra.mxu1 %v657_v19  ;;  %446 = vmatprep.subr.bf16.mxu0 %v658_v20  ;;  %v710_v58 = vld [vmem:[#allocation3 + $0xd0] ss:$8 sps:$4 sm:$0xff]   ;;  %v712_v60 = vld [vmem:[#allocation3 + $0xe4] ss:$8 sps:$4 sm:$0xff]   ;;  %v716_v62 = vld [vmem:[#allocation3 + $0xe0] ss:$8 sps:$4 sm:$0xff]  }
  0x26   :  { %487 = vmatprep.subr.bf16.mxu1 %v660_v21  ;;  %468 = vmatprep.mubr.bf16.mxu0 %v556_v47  ;;  %v711_v59 = vld [vmem:[#allocation3 + $0x1d0] ss:$8 sps:$4 sm:$0xff]   ;;  %v714_v61 = vld [vmem:[#allocation3 + $0x1e4] ss:$8 sps:$4 sm:$0xff]   ;;  %v717_v63 = vld [vmem:[#allocation3 + $0x1e0] ss:$8 sps:$4 sm:$0xff]  }
  0x27   :  { %509 = vmatprep.mubr.bf16.mxu1 %v558_v51  ;;  %v718_v0 = vld [vmem:[#allocation3 + $0xf4] ss:$8 sps:$4 sm:$0xff]   ;;  %v722_v2 = vld [vmem:[#allocation3 + $0xf0] ss:$8 sps:$4 sm:$0xff]   ;;  %v531_v8 = vsub.s32 0, %v530_v7  ;;  %v535_v10 = vsub.s32 1, %v530_v7 }
  0x28   :  { %447 = vmatpush1.bf16.msra.mxu0 %v662_v22  ;;  %v720_v1 = vld [vmem:[#allocation3 + $0x1f4] ss:$8 sps:$4 sm:$0xff]   ;;  %v723_v3 = vld [vmem:[#allocation3 + $0x1f0] ss:$8 sps:$4 sm:$0xff]   ;;  %v527_v9 = vld [vmem:[%s801_s2] sm:$0x3] }
  0x29   :  { %488 = vmatpush1.bf16.msra.mxu1 %v663_v23  ;;  %448 = vmatprep.subr.bf16.mxu0 %v664_v24  ;;  %v532_v11 = vrot.slane %v527_v9, %v531_v8  ;;  %v536_v14 = vrot.slane %v527_v9, %v535_v10 }
  0x2a   :  { %489 = vmatprep.subr.bf16.mxu1 %v666_v25 }
  0x2c   :  { %449 = vmatpush1.bf16.msra.mxu0 %v668_v26 }
  0x2d   :  { %490 = vmatpush1.bf16.msra.mxu1 %v669_v27  ;;  %450 = vmatprep.subr.bf16.mxu0 %v670_v28 }
  0x2e   :  { %491 = vmatprep.subr.bf16.mxu1 %v672_v29 }
  0x30   :  { %451 = vmatpush1.bf16.msra.mxu0 %v674_v30 }
  0x31   :  { %492 = vmatpush1.bf16.msra.mxu1 %v675_v31  ;;  %452 = vmatprep.subr.bf16.mxu0 %v676_v32 }
  0x32   :  { %493 = vmatprep.subr.bf16.mxu1 %v678_v33 }
  0x34   :  { %453 = vmatpush1.bf16.msra.mxu0 %v680_v34 }
  0x35   :  { %494 = vmatpush1.bf16.msra.mxu1 %v681_v35  ;;  %454 = vmatprep.subr.bf16.mxu0 %v682_v36 }
  0x36   :  { %495 = vmatprep.subr.bf16.mxu1 %v684_v37 }
  0x38   :  { %455 = vmatpush1.bf16.msra.mxu0 %v686_v38 }
  0x39   :  { %496 = vmatpush1.bf16.msra.mxu1 %v687_v39  ;;  %456 = vmatprep.subr.bf16.mxu0 %v688_v40 }
  0x3a   :  { %497 = vmatprep.subr.bf16.mxu1 %v690_v41 }
  0x3c   :  { %457 = vmatpush1.bf16.msra.mxu0 %v692_v42 }
  0x3d   :  { %498 = vmatpush1.bf16.msra.mxu1 %v693_v43  ;;  %458 = vmatprep.subr.bf16.mxu0 %v694_v44 }
  0x3e   :  { %499 = vmatprep.subr.bf16.mxu1 %v696_v45 }
  0x40   :  { %459 = vmatpush1.bf16.msra.mxu0 %v698_v49 }
  0x41   :  { %500 = vmatpush1.bf16.msra.mxu1 %v699_v50  ;;  %460 = vmatprep.subr.bf16.mxu0 %v700_v52 }
  0x42   :  { %501 = vmatprep.subr.bf16.mxu1 %v702_v53 }
  0x44   :  { %461 = vmatpush1.bf16.msra.mxu0 %v704_v54 }
  0x45   :  { %502 = vmatpush1.bf16.msra.mxu1 %v705_v55  ;;  %462 = vmatprep.subr.bf16.mxu0 %v706_v56 }
  0x46   :  { %503 = vmatprep.subr.bf16.mxu1 %v708_v57 }
  0x48   :  { %463 = vmatpush1.bf16.msra.mxu0 %v710_v58 }
  0x49   :  { %504 = vmatpush1.bf16.msra.mxu1 %v711_v59  ;;  %464 = vmatprep.subr.bf16.mxu0 %v712_v60 }
  0x4a   :  { %505 = vmatprep.subr.bf16.mxu1 %v714_v61 }
  0x4c   :  { %465 = vmatpush1.bf16.msra.mxu0 %v716_v62 }
  0x4d   :  { %506 = vmatpush1.bf16.msra.mxu1 %v717_v63  ;;  %466 = vmatprep.subr.bf16.mxu0 %v718_v0 }
  0x4e   :  { %507 = vmatprep.subr.bf16.mxu1 %v720_v1 }
  0x50   :  { %467 = vmatpush1.bf16.msra.mxu0 %v722_v2 }
  0x51   :  { %508 = vmatpush1.bf16.msra.mxu1 %v723_v3 }
  0x53   :  { %469 = vmatmul.mubr.bf16.vlgmr.msra.gmra.mrb[0].mxu0 %v555_v4 }
  0x54   :  { %510 = vmatmul.mubr.bf16.vlgmr.msra.gmra.mrb[0].mxu1 %v557_v5 }
 0x126   :  { %v470_v12 = vpop.f32.mrb[0].mxu0 }
 0x127   :  { %v511_v13 = vpop.f32.mrb[0].mxu1  ;;  %v472_v16 = vpop.f32.mrb[1].mxu0 }
 0x128   :  { %v512_v15 = vadd.f32 %v511_v13, %v470_v12  ;;  %v513_v17 = vpop.f32.mrb[1].mxu1  ;;  %v474_v19 = vpop.f32.mrb[2].mxu0 }
 0x129   :  { %v514_v18 = vadd.f32 %v513_v17, %v472_v16  ;;  %v515_v20 = vpop.f32.mrb[2].mxu1  ;;  %v475_v22 = vpop.f32.mrb[3].mxu0 }
 0x12a   :  { %v539_v21 = vadd.f32 %v532_v11, %v512_v15  ;;  %v516_v23 = vpop.f32.mrb[3].mxu1 }
 0x12b   :  { %v540_v24 = vadd.f32 %v536_v14, %v514_v18 }
 0x12d   :  { %v624_v25 = vpack.c.bf16 %v540_v24, %v539_v21 }
 0x12f   :  { %549 = vst [vmem:[%s802_s3] sm:$0xff] %v624_v25 }
 0x130   :  { %554 = vsyncpa [#allocation4], 1 }

// kernel: viedoswin_forward.116
= control target key start
LH: loop header
LB: loop body
LE: loop exit
PB: predicated region body
PF: predicated region fallthrough
CT: control target
= control target key end

     0   :  { %s1361_s12 = smov 0   ;;  %s1363_s13 = smov 0   ;;  %s1636_s0 = inlined_call_operand.vmem [shape: bf16[8,256], index: 0, kind: input, shape index: {}]   ;;  %s1637_s1 = inlined_call_operand.vmem [shape: bf16[256,1024], index: 1, kind: input, shape index: {}]   ;;  %s1638_s2 = inlined_call_operand.vmem [shape: f32[1,1024], index: 2, kind: input, shape index: {}]   ;;  %s1639_s3 = inlined_call_operand.vmem [shape: bf16[8,1024], index: 3, kind: output, shape index: {}]  }
   0x1   :  { %s1365_s14 = smov 0   ;;  %s1367_s15 = smov 0  }
   0x2   :  { %s1369_s16 = smov 0  }
   0x3 LB: > { %s28_s17 = sadd.s32 1, %s1335_s15  ;;  %p76_p1 = scmp.ne.s32.totalorder %s1327_s13, %s1323_s12  ;;  %s1339_s16 = sphi %s1369_s16, %s13_s16   ;;  %s1335_s15 = sphi %s1367_s15, %s1643_s15   ;;  %s1331_s14 = sphi %s1365_s14, %s1642_s14   ;;  %s1327_s13 = sphi %s1363_s13, %s1641_s13   ;;  %s1323_s12 = sphi %s1361_s12, %s1640_s12  }
   0x4   : > { %p30_p0 = scmp.ge.s32.totalorder %s28_s17, 2  ;;  %p77_p2 = scmp.eq.s32.totalorder %s1339_s16, 0 }
   0x5   : > { %s69_s19 = sadd.s32 1, %s1327_s13  ;;  %p1081_p5 = scmp.ge.s32.totalorder %s1339_s16, 2 }
   0x6   : > { %s1645_s17 = smov (%p30_p0, %s28_s17), 0  ;;  %p78_p3 = por %p77_p2, %p76_p1 }
   0x7   : > { %s65_s18 = ssub.s32 %s1335_s15, %s1645_s17  ;;  %169 = sbr.rel (%p1081_p5) target bundleno = 50 (0x32), region = 20 }
   0x8   : > { %p67_p4 = scmp.eq.s32.totalorder %s65_s18, 0 }
   0xa   : > { %s1396_s20 = scalar_select %p67_p4, %s1327_s13, %s69_s19  }
   0xe   : > { %172 = sbr.rel (!%p78_p3) target bundleno = 50 (0x32), region = 24  ;;  %s174_s21 = sand.u32 (%p78_p3), 1, %s1327_s13  }
   0xf   : > { %s1160_s22 = sshll.u32 (%p78_p3), %s1335_s15, 4  ;;  %s1082_s23 = sshll.u32 (%p78_p3), %s174_s21, 9 }
  0x10   : > { %s1404_s26 = scalar_lea.vmem (%p78_p3), %s1637_s1, %s1160_s22  ;;  %s1409_s27 = scalar_lea.vmem (%p78_p3), [#allocation3], %s1082_s23 }
  0x11   : > { %v195_v0 = vld [vmem:[%s1404_s26] sm:$0xff] (%p78_p3)  ;;  %v197_v1 = vld [vmem:[%s1404_s26 + $0x8] sm:$0xff] (%p78_p3) }
  0x12   : > { %v199_v2 = vld [vmem:[%s1404_s26 + $0x20] sm:$0xff] (%p78_p3)  ;;  %196 = vst [vmem:[%s1409_s27] sm:$0xff] (%p78_p3), %v195_v0  ;;  %198 = vst [vmem:[%s1409_s27 + $0x8] sm:$0xff] (%p78_p3), %v197_v1  ;;  %v201_v3 = vld [vmem:[%s1404_s26 + $0x28] sm:$0xff] (%p78_p3) }
  0x13   : > { %200 = vst [vmem:[%s1409_s27 + $0x10] sm:$0xff] (%p78_p3), %v199_v2  ;;  %v203_v4 = vld [vmem:[%s1404_s26 + $0x40] sm:$0xff] (%p78_p3)  ;;  %v205_v5 = vld [vmem:[%s1404_s26 + $0x48] sm:$0xff] (%p78_p3)  ;;  %202 = vst [vmem:[%s1409_s27 + $0x18] sm:$0xff] (%p78_p3), %v201_v3 }
  0x14   : > { %204 = vst [vmem:[%s1409_s27 + $0x20] sm:$0xff] (%p78_p3), %v203_v4  ;;  %206 = vst [vmem:[%s1409_s27 + $0x28] sm:$0xff] (%p78_p3), %v205_v5  ;;  %v207_v6 = vld [vmem:[%s1404_s26 + $0x60] sm:$0xff] (%p78_p3)  ;;  %v209_v7 = vld [vmem:[%s1404_s26 + $0x68] sm:$0xff] (%p78_p3) }
  0x15   : > { %v211_v8 = vld [vmem:[%s1404_s26 + $0x80] sm:$0xff]  ;;  %208 = vst [vmem:[%s1409_s27 + $0x30] sm:$0xff] %v207_v6  ;;  %210 = vst [vmem:[%s1409_s27 + $0x38] sm:$0xff] %v209_v7  ;;  %v213_v9 = vld [vmem:[%s1404_s26 + $0x88] sm:$0xff] }
  0x16   : > { %212 = vst [vmem:[%s1409_s27 + $0x40] sm:$0xff] %v211_v8  ;;  %v215_v10 = vld [vmem:[%s1404_s26 + $0xa0] sm:$0xff]  ;;  %v217_v11 = vld [vmem:[%s1404_s26 + $0xa8] sm:$0xff]  ;;  %214 = vst [vmem:[%s1409_s27 + $0x48] sm:$0xff] %v213_v9 }
  0x17   : > { %216 = vst [vmem:[%s1409_s27 + $0x50] sm:$0xff] %v215_v10  ;;  %218 = vst [vmem:[%s1409_s27 + $0x58] sm:$0xff] %v217_v11  ;;  %v219_v12 = vld [vmem:[%s1404_s26 + $0xc0] sm:$0xff]  ;;  %v221_v13 = vld [vmem:[%s1404_s26 + $0xc8] sm:$0xff] }
  0x18   : > { %v223_v14 = vld [vmem:[%s1404_s26 + $0xe0] sm:$0xff]  ;;  %220 = vst [vmem:[%s1409_s27 + $0x60] sm:$0xff] %v219_v12  ;;  %222 = vst [vmem:[%s1409_s27 + $0x68] sm:$0xff] %v221_v13  ;;  %v225_v15 = vld [vmem:[%s1404_s26 + $0xe8] sm:$0xff] }
  0x19   : > { %224 = vst [vmem:[%s1409_s27 + $0x70] sm:$0xff] %v223_v14  ;;  %v227_v16 = vld [vmem:[%s1404_s26 + $0x100] sm:$0xff]  ;;  %v229_v17 = vld [vmem:[%s1404_s26 + $0x108] sm:$0xff]  ;;  %226 = vst [vmem:[%s1409_s27 + $0x78] sm:$0xff] %v225_v15 }
  0x1a   : > { %228 = vst [vmem:[%s1409_s27 + $0x80] sm:$0xff] %v227_v16  ;;  %230 = vst [vmem:[%s1409_s27 + $0x88] sm:$0xff] %v229_v17  ;;  %v231_v18 = vld [vmem:[%s1404_s26 + $0x120] sm:$0xff]  ;;  %v233_v19 = vld [vmem:[%s1404_s26 + $0x128] sm:$0xff] }
  0x1b   : > { %v235_v20 = vld [vmem:[%s1404_s26 + $0x140] sm:$0xff]  ;;  %232 = vst [vmem:[%s1409_s27 + $0x90] sm:$0xff] %v231_v18  ;;  %234 = vst [vmem:[%s1409_s27 + $0x98] sm:$0xff] %v233_v19  ;;  %v237_v21 = vld [vmem:[%s1404_s26 + $0x148] sm:$0xff] }
  0x1c   : > { %236 = vst [vmem:[%s1409_s27 + $0xa0] sm:$0xff] %v235_v20  ;;  %v239_v22 = vld [vmem:[%s1404_s26 + $0x160] sm:$0xff]  ;;  %v241_v23 = vld [vmem:[%s1404_s26 + $0x168] sm:$0xff]  ;;  %238 = vst [vmem:[%s1409_s27 + $0xa8] sm:$0xff] %v237_v21 }
  0x1d   : > { %240 = vst [vmem:[%s1409_s27 + $0xb0] sm:$0xff] %v239_v22  ;;  %242 = vst [vmem:[%s1409_s27 + $0xb8] sm:$0xff] %v241_v23  ;;  %v243_v24 = vld [vmem:[%s1404_s26 + $0x180] sm:$0xff]  ;;  %v245_v25 = vld [vmem:[%s1404_s26 + $0x188] sm:$0xff] }
  0x1e   : > { %v247_v26 = vld [vmem:[%s1404_s26 + $0x1a0] sm:$0xff]  ;;  %244 = vst [vmem:[%s1409_s27 + $0xc0] sm:$0xff] %v243_v24  ;;  %246 = vst [vmem:[%s1409_s27 + $0xc8] sm:$0xff] %v245_v25  ;;  %v249_v27 = vld [vmem:[%s1404_s26 + $0x1a8] sm:$0xff] }
  0x1f   : > { %248 = vst [vmem:[%s1409_s27 + $0xd0] sm:$0xff] %v247_v26  ;;  %v251_v28 = vld [vmem:[%s1404_s26 + $0x1c0] sm:$0xff]  ;;  %v253_v29 = vld [vmem:[%s1404_s26 + $0x1c8] sm:$0xff]  ;;  %250 = vst [vmem:[%s1409_s27 + $0xd8] sm:$0xff] %v249_v27 }
  0x20   : > { %252 = vst [vmem:[%s1409_s27 + $0xe0] sm:$0xff] %v251_v28  ;;  %254 = vst [vmem:[%s1409_s27 + $0xe8] sm:$0xff] %v253_v29  ;;  %v255_v30 = vld [vmem:[%s1404_s26 + $0x1e0] sm:$0xff]  ;;  %v257_v31 = vld [vmem:[%s1404_s26 + $0x1e8] sm:$0xff] }
  0x21   : > { %v259_v32 = vld [vmem:[%s1404_s26 + $0x200] sm:$0xff]  ;;  %256 = vst [vmem:[%s1409_s27 + $0xf0] sm:$0xff] %v255_v30  ;;  %258 = vst [vmem:[%s1409_s27 + $0xf8] sm:$0xff] %v257_v31  ;;  %v261_v33 = vld [vmem:[%s1404_s26 + $0x208] sm:$0xff] }
  0x22   : > { %260 = vst [vmem:[%s1409_s27 + $0x100] sm:$0xff] %v259_v32  ;;  %v263_v34 = vld [vmem:[%s1404_s26 + $0x220] sm:$0xff]  ;;  %v265_v35 = vld [vmem:[%s1404_s26 + $0x228] sm:$0xff]  ;;  %262 = vst [vmem:[%s1409_s27 + $0x108] sm:$0xff] %v261_v33 }
  0x23   : > { %264 = vst [vmem:[%s1409_s27 + $0x110] sm:$0xff] %v263_v34  ;;  %266 = vst [vmem:[%s1409_s27 + $0x118] sm:$0xff] %v265_v35  ;;  %v267_v36 = vld [vmem:[%s1404_s26 + $0x240] sm:$0xff]  ;;  %v269_v37 = vld [vmem:[%s1404_s26 + $0x248] sm:$0xff] }
  0x24   : > { %v271_v38 = vld [vmem:[%s1404_s26 + $0x260] sm:$0xff]  ;;  %268 = vst [vmem:[%s1409_s27 + $0x120] sm:$0xff] %v267_v36  ;;  %270 = vst [vmem:[%s1409_s27 + $0x128] sm:$0xff] %v269_v37  ;;  %v273_v39 = vld [vmem:[%s1404_s26 + $0x268] sm:$0xff] }
  0x25   : > { %272 = vst [vmem:[%s1409_s27 + $0x130] sm:$0xff] %v271_v38  ;;  %v275_v40 = vld [vmem:[%s1404_s26 + $0x280] sm:$0xff]  ;;  %v277_v41 = vld [vmem:[%s1404_s26 + $0x288] sm:$0xff]  ;;  %274 = vst [vmem:[%s1409_s27 + $0x138] sm:$0xff] %v273_v39 }
  0x26   : > { %276 = vst [vmem:[%s1409_s27 + $0x140] sm:$0xff] %v275_v40  ;;  %278 = vst [vmem:[%s1409_s27 + $0x148] sm:$0xff] %v277_v41  ;;  %v279_v42 = vld [vmem:[%s1404_s26 + $0x2a0] sm:$0xff]  ;;  %v281_v43 = vld [vmem:[%s1404_s26 + $0x2a8] sm:$0xff] }
  0x27   : > { %v283_v44 = vld [vmem:[%s1404_s26 + $0x2c0] sm:$0xff]  ;;  %280 = vst [vmem:[%s1409_s27 + $0x150] sm:$0xff] %v279_v42  ;;  %282 = vst [vmem:[%s1409_s27 + $0x158] sm:$0xff] %v281_v43  ;;  %v285_v45 = vld [vmem:[%s1404_s26 + $0x2c8] sm:$0xff] }
  0x28   : > { %284 = vst [vmem:[%s1409_s27 + $0x160] sm:$0xff] %v283_v44  ;;  %v287_v46 = vld [vmem:[%s1404_s26 + $0x2e0] sm:$0xff]  ;;  %v289_v47 = vld [vmem:[%s1404_s26 + $0x2e8] sm:$0xff]  ;;  %286 = vst [vmem:[%s1409_s27 + $0x168] sm:$0xff] %v285_v45 }
  0x29   : > { %288 = vst [vmem:[%s1409_s27 + $0x170] sm:$0xff] %v287_v46  ;;  %290 = vst [vmem:[%s1409_s27 + $0x178] sm:$0xff] %v289_v47  ;;  %v291_v48 = vld [vmem:[%s1404_s26 + $0x300] sm:$0xff]  ;;  %v293_v49 = vld [vmem:[%s1404_s26 + $0x308] sm:$0xff] }
  0x2a   : > { %v295_v50 = vld [vmem:[%s1404_s26 + $0x320] sm:$0xff]  ;;  %292 = vst [vmem:[%s1409_s27 + $0x180] sm:$0xff] %v291_v48  ;;  %294 = vst [vmem:[%s1409_s27 + $0x188] sm:$0xff] %v293_v49  ;;  %v297_v51 = vld [vmem:[%s1404_s26 + $0x328] sm:$0xff] }
  0x2b   : > { %296 = vst [vmem:[%s1409_s27 + $0x190] sm:$0xff] %v295_v50  ;;  %v299_v52 = vld [vmem:[%s1404_s26 + $0x340] sm:$0xff]  ;;  %v301_v53 = vld [vmem:[%s1404_s26 + $0x348] sm:$0xff]  ;;  %298 = vst [vmem:[%s1409_s27 + $0x198] sm:$0xff] %v297_v51 }
  0x2c   : > { %300 = vst [vmem:[%s1409_s27 + $0x1a0] sm:$0xff] %v299_v52  ;;  %302 = vst [vmem:[%s1409_s27 + $0x1a8] sm:$0xff] %v301_v53  ;;  %v303_v54 = vld [vmem:[%s1404_s26 + $0x360] sm:$0xff]  ;;  %v305_v55 = vld [vmem:[%s1404_s26 + $0x368] sm:$0xff] }
  0x2d   : > { %v307_v56 = vld [vmem:[%s1404_s26 + $0x380] sm:$0xff]  ;;  %304 = vst [vmem:[%s1409_s27 + $0x1b0] sm:$0xff] %v303_v54  ;;  %306 = vst [vmem:[%s1409_s27 + $0x1b8] sm:$0xff] %v305_v55  ;;  %v309_v57 = vld [vmem:[%s1404_s26 + $0x388] sm:$0xff] }
  0x2e   : > { %308 = vst [vmem:[%s1409_s27 + $0x1c0] sm:$0xff] %v307_v56  ;;  %v311_v58 = vld [vmem:[%s1404_s26 + $0x3a0] sm:$0xff]  ;;  %v313_v59 = vld [vmem:[%s1404_s26 + $0x3a8] sm:$0xff]  ;;  %310 = vst [vmem:[%s1409_s27 + $0x1c8] sm:$0xff] %v309_v57 }
  0x2f   : > { %312 = vst [vmem:[%s1409_s27 + $0x1d0] sm:$0xff] %v311_v58  ;;  %314 = vst [vmem:[%s1409_s27 + $0x1d8] sm:$0xff] %v313_v59  ;;  %v315_v60 = vld [vmem:[%s1404_s26 + $0x3c0] sm:$0xff]  ;;  %v317_v61 = vld [vmem:[%s1404_s26 + $0x3c8] sm:$0xff] }
  0x30   : > { %v319_v62 = vld [vmem:[%s1404_s26 + $0x3e0] sm:$0xff]  ;;  %316 = vst [vmem:[%s1409_s27 + $0x1e0] sm:$0xff] %v315_v60  ;;  %318 = vst [vmem:[%s1409_s27 + $0x1e8] sm:$0xff] %v317_v61  ;;  %v321_v63 = vld [vmem:[%s1404_s26 + $0x3e8] sm:$0xff] }
  0x31   : > { %320 = vst [vmem:[%s1409_s27 + $0x1f0] sm:$0xff] %v319_v62  ;;  %322 = vst [vmem:[%s1409_s27 + $0x1f8] sm:$0xff] %v321_v63 }
  0x32 PF: > { %p1085_p6 = scmp.ge.s32.totalorder %s1339_s16, 1  ;;  %p335_p7 = scmp.lt.s32.totalorder %s1339_s16, 3 }
  0x34   : > { %p336_p8 = pnand %p1085_p6, %p335_p7 }
  0x35   : > { %s342_s28 = sand.u32 (!%p336_p8), 1, %s1323_s12   ;;  %v1542_v0 = vld [vmem:[%s1636_s0] sm:$0xff] (!%p336_p8)  ;;  %s1087_s6 = sshll.u32 (!%p336_p8), %s1331_s14, 2 }
  0x36   : > { %339 = sbr.rel (%p336_p8) target bundleno = 339 (0x153), region = 51  ;;  %s1086_s4 = sshll.u32 (!%p336_p8), %s342_s28, 9  ;;  %v1091_v1 = vcombine.high (!%p336_p8), %v1542_v0, %v1542_v0 }
  0x37   : > { %s1546_s5 = scalar_lea.vmem (!%p336_p8), [#allocation3], %s1086_s4  ;;  %p395_p9 = scmp.lt.s32.totalorder (!%p336_p8), %s1087_s6, 7 }
  0x38   : > { %v1203_v2 = vld [vmem:[%s1546_s5 + $0x4] ss:$16 sps:$4 sm:$0xff] (!%p336_p8)   ;;  %845 = vmatprep.mubr.bf16.mxu0 (!%p336_p8), %v1091_v1  ;;  %886 = vmatprep.mubr.bf16.mxu1 (!%p336_p8), %v1091_v1  ;;  %v1205_v3 = vld [vmem:[%s1546_s5 + $0xc] ss:$16 sps:$4 sm:$0xff] (!%p336_p8)   ;;  %v1207_v4 = vld [vmem:[%s1546_s5] ss:$16 sps:$4 sm:$0xff] (!%p336_p8)  }
  0x39   : > { %813 = vmatprep.subr.bf16.mxu0 (!%p336_p8), %v1203_v2  ;;  %v1208_v5 = vld [vmem:[%s1546_s5 + $0x8] ss:$16 sps:$4 sm:$0xff] (!%p336_p8)   ;;  %854 = vmatprep.subr.bf16.mxu1 (!%p336_p8), %v1205_v3  ;;  %v1209_v6 = vld [vmem:[%s1546_s5 + $0x24] ss:$16 sps:$4 sm:$0xff] (!%p336_p8)   ;;  %v1211_v7 = vld [vmem:[%s1546_s5 + $0x2c] ss:$16 sps:$4 sm:$0xff] (!%p336_p8)   ;;  %v1090_v3 = vcombine.low (!%p336_p8), %v1542_v0, %v1542_v0 }
  0x3a   : > { %814 = vmatpush1.bf16.msra.mxu0 (!%p336_p8), %v1207_v4  ;;  %855 = vmatpush1.bf16.msra.mxu1 (!%p336_p8), %v1208_v5  ;;  %v1213_v8 = vld [vmem:[%s1546_s5 + $0x20] ss:$16 sps:$4 sm:$0xff] (!%p336_p8)   ;;  %v1214_v9 = vld [vmem:[%s1546_s5 + $0x28] ss:$16 sps:$4 sm:$0xff] (!%p336_p8)   ;;  %v1215_v10 = vld [vmem:[%s1546_s5 + $0x44] ss:$16 sps:$4 sm:$0xff] (!%p336_p8)   ;;  %v912_v4 = vlaneseq (!%p336_p8) }
  0x3b   : > { %815 = vmatprep.subr.bf16.mxu0 (!%p336_p8), %v1209_v6  ;;  %856 = vmatprep.subr.bf16.mxu1 (!%p336_p8), %v1211_v7  ;;  %v1217_v11 = vld [vmem:[%s1546_s5 + $0x4c] ss:$16 sps:$4 sm:$0xff] (!%p336_p8)   ;;  %v1219_v12 = vld [vmem:[%s1546_s5 + $0x40] ss:$16 sps:$4 sm:$0xff] (!%p336_p8)   ;;  %v1220_v13 = vld [vmem:[%s1546_s5 + $0x48] ss:$16 sps:$4 sm:$0xff] (!%p336_p8)  }
  0x3c   : > { %v1221_v14 = vld [vmem:[%s1546_s5 + $0x64] ss:$16 sps:$4 sm:$0xff] (!%p336_p8)   ;;  %v1223_v15 = vld [vmem:[%s1546_s5 + $0x6c] ss:$16 sps:$4 sm:$0xff] (!%p336_p8)   ;;  %v1225_v16 = vld [vmem:[%s1546_s5 + $0x60] ss:$16 sps:$4 sm:$0xff] (!%p336_p8)  }
  0x3d   : > { %v1226_v17 = vld [vmem:[%s1546_s5 + $0x68] ss:$16 sps:$4 sm:$0xff]   ;;  %v1227_v18 = vld [vmem:[%s1546_s5 + $0x84] ss:$16 sps:$4 sm:$0xff]   ;;  %v1229_v19 = vld [vmem:[%s1546_s5 + $0x8c] ss:$16 sps:$4 sm:$0xff]  }
  0x3e   : > { %816 = vmatpush1.bf16.msra.mxu0 %v1213_v8  ;;  %857 = vmatpush1.bf16.msra.mxu1 %v1214_v9  ;;  %v1231_v20 = vld [vmem:[%s1546_s5 + $0x80] ss:$16 sps:$4 sm:$0xff]   ;;  %v1232_v21 = vld [vmem:[%s1546_s5 + $0x88] ss:$16 sps:$4 sm:$0xff]   ;;  %v1233_v22 = vld [vmem:[%s1546_s5 + $0xa4] ss:$16 sps:$4 sm:$0xff]  }
  0x3f   : > { %817 = vmatprep.subr.bf16.mxu0 %v1215_v10  ;;  %858 = vmatprep.subr.bf16.mxu1 %v1217_v11  ;;  %v1235_v23 = vld [vmem:[%s1546_s5 + $0xac] ss:$16 sps:$4 sm:$0xff]   ;;  %v1237_v24 = vld [vmem:[%s1546_s5 + $0xa0] ss:$16 sps:$4 sm:$0xff]   ;;  %v1238_v25 = vld [vmem:[%s1546_s5 + $0xa8] ss:$16 sps:$4 sm:$0xff]  }
  0x40   : > { %v1239_v26 = vld [vmem:[%s1546_s5 + $0xc4] ss:$16 sps:$4 sm:$0xff]   ;;  %v1241_v27 = vld [vmem:[%s1546_s5 + $0xcc] ss:$16 sps:$4 sm:$0xff]   ;;  %v1243_v28 = vld [vmem:[%s1546_s5 + $0xc0] ss:$16 sps:$4 sm:$0xff]  }
  0x41   : > { %v1244_v29 = vld [vmem:[%s1546_s5 + $0xc8] ss:$16 sps:$4 sm:$0xff]   ;;  %v1245_v30 = vld [vmem:[%s1546_s5 + $0xe4] ss:$16 sps:$4 sm:$0xff]   ;;  %v1247_v31 = vld [vmem:[%s1546_s5 + $0xec] ss:$16 sps:$4 sm:$0xff]  }
  0x42   : > { %818 = vmatpush1.bf16.msra.mxu0 %v1219_v12  ;;  %859 = vmatpush1.bf16.msra.mxu1 %v1220_v13  ;;  %v1249_v32 = vld [vmem:[%s1546_s5 + $0xe0] ss:$16 sps:$4 sm:$0xff]   ;;  %v1250_v33 = vld [vmem:[%s1546_s5 + $0xe8] ss:$16 sps:$4 sm:$0xff]   ;;  %v1251_v34 = vld [vmem:[%s1546_s5 + $0x104] ss:$16 sps:$4 sm:$0xff]  }
  0x43   : > { %819 = vmatprep.subr.bf16.mxu0 %v1221_v14  ;;  %860 = vmatprep.subr.bf16.mxu1 %v1223_v15  ;;  %v1253_v35 = vld [vmem:[%s1546_s5 + $0x10c] ss:$16 sps:$4 sm:$0xff]   ;;  %v1255_v36 = vld [vmem:[%s1546_s5 + $0x100] ss:$16 sps:$4 sm:$0xff]   ;;  %v1256_v37 = vld [vmem:[%s1546_s5 + $0x108] ss:$16 sps:$4 sm:$0xff]  }
  0x44   : > { %v1257_v38 = vld [vmem:[%s1546_s5 + $0x124] ss:$16 sps:$4 sm:$0xff]   ;;  %v1259_v39 = vld [vmem:[%s1546_s5 + $0x12c] ss:$16 sps:$4 sm:$0xff]   ;;  %v1261_v40 = vld [vmem:[%s1546_s5 + $0x120] ss:$16 sps:$4 sm:$0xff]  }
  0x45   : > { %v1262_v41 = vld [vmem:[%s1546_s5 + $0x128] ss:$16 sps:$4 sm:$0xff]   ;;  %v1263_v42 = vld [vmem:[%s1546_s5 + $0x144] ss:$16 sps:$4 sm:$0xff]   ;;  %v1265_v43 = vld [vmem:[%s1546_s5 + $0x14c] ss:$16 sps:$4 sm:$0xff]  }
  0x46   : > { %820 = vmatpush1.bf16.msra.mxu0 %v1225_v16  ;;  %861 = vmatpush1.bf16.msra.mxu1 %v1226_v17  ;;  %v1267_v44 = vld [vmem:[%s1546_s5 + $0x140] ss:$16 sps:$4 sm:$0xff]   ;;  %v1268_v45 = vld [vmem:[%s1546_s5 + $0x148] ss:$16 sps:$4 sm:$0xff]   ;;  %v1269_v46 = vld [vmem:[%s1546_s5 + $0x164] ss:$16 sps:$4 sm:$0xff]  }
  0x47   : > { %821 = vmatprep.subr.bf16.mxu0 %v1227_v18  ;;  %862 = vmatprep.subr.bf16.mxu1 %v1229_v19  ;;  %v1271_v47 = vld [vmem:[%s1546_s5 + $0x16c] ss:$16 sps:$4 sm:$0xff]   ;;  %v1273_v48 = vld [vmem:[%s1546_s5 + $0x160] ss:$16 sps:$4 sm:$0xff]   ;;  %v1274_v49 = vld [vmem:[%s1546_s5 + $0x168] ss:$16 sps:$4 sm:$0xff]  }
  0x48   : > { %v1275_v50 = vld [vmem:[%s1546_s5 + $0x184] ss:$16 sps:$4 sm:$0xff]   ;;  %v1277_v51 = vld [vmem:[%s1546_s5 + $0x18c] ss:$16 sps:$4 sm:$0xff]   ;;  %v1279_v52 = vld [vmem:[%s1546_s5 + $0x180] ss:$16 sps:$4 sm:$0xff]  }
  0x49   : > { %v1280_v53 = vld [vmem:[%s1546_s5 + $0x188] ss:$16 sps:$4 sm:$0xff]   ;;  %v1281_v54 = vld [vmem:[%s1546_s5 + $0x1a4] ss:$16 sps:$4 sm:$0xff]   ;;  %v1283_v55 = vld [vmem:[%s1546_s5 + $0x1ac] ss:$16 sps:$4 sm:$0xff]  }
  0x4a   : > { %822 = vmatpush1.bf16.msra.mxu0 %v1231_v20  ;;  %863 = vmatpush1.bf16.msra.mxu1 %v1232_v21  ;;  %v1285_v56 = vld [vmem:[%s1546_s5 + $0x1a0] ss:$16 sps:$4 sm:$0xff]   ;;  %v1286_v57 = vld [vmem:[%s1546_s5 + $0x1a8] ss:$16 sps:$4 sm:$0xff]   ;;  %v1287_v58 = vld [vmem:[%s1546_s5 + $0x1c4] ss:$16 sps:$4 sm:$0xff]  }
  0x4b   : > { %823 = vmatprep.subr.bf16.mxu0 %v1233_v22  ;;  %864 = vmatprep.subr.bf16.mxu1 %v1235_v23  ;;  %v1289_v59 = vld [vmem:[%s1546_s5 + $0x1cc] ss:$16 sps:$4 sm:$0xff]   ;;  %v1291_v60 = vld [vmem:[%s1546_s5 + $0x1c0] ss:$16 sps:$4 sm:$0xff]   ;;  %v1292_v61 = vld [vmem:[%s1546_s5 + $0x1c8] ss:$16 sps:$4 sm:$0xff]  }
  0x4c   : > { %v1293_v62 = vld [vmem:[%s1546_s5 + $0x1e4] ss:$16 sps:$4 sm:$0xff]   ;;  %v1295_v63 = vld [vmem:[%s1546_s5 + $0x1ec] ss:$16 sps:$4 sm:$0xff]   ;;  %v1297_v1 = vld [vmem:[%s1546_s5 + $0x1e0] ss:$16 sps:$4 sm:$0xff]  }
  0x4d   : > { %v1298_v2 = vld [vmem:[%s1546_s5 + $0x1e8] ss:$16 sps:$4 sm:$0xff]   ;;  %s1647_s6 = smov (!%p395_p9, %s1087_s6), 7  ;;  %v913_v5 = vshrl.u32 %v912_v4, 7 }
  0x4e   : > { %824 = vmatpush1.bf16.msra.mxu0 %v1237_v24  ;;  %865 = vmatpush1.bf16.msra.mxu1 %v1238_v25  ;;  %s397_s9 = scalar_lea.vmem %s1638_s2, %s1647_s6  ;;  %s1089_s10 = sshll.u32 %s1647_s6, 2 }
  0x4f   : > { %825 = vmatprep.subr.bf16.mxu0 %v1239_v26  ;;  %866 = vmatprep.subr.bf16.mxu1 %v1241_v27  ;;  %v914_v6 = vsub.s32 0, %v913_v5  ;;  %v922_v7 = vsub.s32 2, %v913_v5  ;;  %v910_v8 = vld [vmem:[%s397_s9] sm:$0xf]  ;;  %v918_v9 = vsub.s32 1, %v913_v5  ;;  %v926_v10 = vsub.s32 3, %v913_v5  ;;  %s407_s14 = scalar_lea.vmem %s1639_s3, %s1089_s10 }
  0x51   : > { %v915_v11 = vrot.slane %v910_v8, %v914_v6  ;;  %v923_v0 = vrot.slane %v910_v8, %v922_v7  ;;  %v919_v12 = vrot.slane %v910_v8, %v918_v9  ;;  %v927_v13 = vrot.slane %v910_v8, %v926_v10 }
  0x52   : > { %826 = vmatpush1.bf16.msra.mxu0 %v1243_v28  ;;  %867 = vmatpush1.bf16.msra.mxu1 %v1244_v29 }
  0x53   : > { %827 = vmatprep.subr.bf16.mxu0 %v1245_v30  ;;  %868 = vmatprep.subr.bf16.mxu1 %v1247_v31 }
  0x56   : > { %828 = vmatpush1.bf16.msra.mxu0 %v1249_v32  ;;  %869 = vmatpush1.bf16.msra.mxu1 %v1250_v33 }
  0x57   : > { %829 = vmatprep.subr.bf16.mxu0 %v1251_v34  ;;  %870 = vmatprep.subr.bf16.mxu1 %v1253_v35 }
  0x5a   : > { %830 = vmatpush1.bf16.msra.mxu0 %v1255_v36  ;;  %871 = vmatpush1.bf16.msra.mxu1 %v1256_v37 }
  0x5b   : > { %831 = vmatprep.subr.bf16.mxu0 %v1257_v38  ;;  %872 = vmatprep.subr.bf16.mxu1 %v1259_v39 }
  0x5e   : > { %832 = vmatpush1.bf16.msra.mxu0 %v1261_v40  ;;  %873 = vmatpush1.bf16.msra.mxu1 %v1262_v41 }
  0x5f   : > { %833 = vmatprep.subr.bf16.mxu0 %v1263_v42  ;;  %874 = vmatprep.subr.bf16.mxu1 %v1265_v43 }
  0x62   : > { %834 = vmatpush1.bf16.msra.mxu0 %v1267_v44  ;;  %875 = vmatpush1.bf16.msra.mxu1 %v1268_v45 }
  0x63   : > { %835 = vmatprep.subr.bf16.mxu0 %v1269_v46  ;;  %876 = vmatprep.subr.bf16.mxu1 %v1271_v47 }
  0x66   : > { %836 = vmatpush1.bf16.msra.mxu0 %v1273_v48  ;;  %877 = vmatpush1.bf16.msra.mxu1 %v1274_v49 }
  0x67   : > { %837 = vmatprep.subr.bf16.mxu0 %v1275_v50  ;;  %878 = vmatprep.subr.bf16.mxu1 %v1277_v51 }
  0x6a   : > { %838 = vmatpush1.bf16.msra.mxu0 %v1279_v52  ;;  %879 = vmatpush1.bf16.msra.mxu1 %v1280_v53 }
  0x6b   : > { %839 = vmatprep.subr.bf16.mxu0 %v1281_v54  ;;  %880 = vmatprep.subr.bf16.mxu1 %v1283_v55 }
  0x6e   : > { %840 = vmatpush1.bf16.msra.mxu0 %v1285_v56  ;;  %881 = vmatpush1.bf16.msra.mxu1 %v1286_v57 }
  0x6f   : > { %841 = vmatprep.subr.bf16.mxu0 %v1287_v58  ;;  %882 = vmatprep.subr.bf16.mxu1 %v1289_v59 }
  0x72   : > { %842 = vmatpush1.bf16.msra.mxu0 %v1291_v60  ;;  %883 = vmatpush1.bf16.msra.mxu1 %v1292_v61 }
  0x73   : > { %843 = vmatprep.subr.bf16.mxu0 %v1293_v62  ;;  %884 = vmatprep.subr.bf16.mxu1 %v1295_v63 }
  0x76   : > { %844 = vmatpush1.bf16.msra.mxu0 %v1297_v1  ;;  %885 = vmatpush1.bf16.msra.mxu1 %v1298_v2 }
  0x79   : > { %846 = vmatmul.mubr.bf16.vlgmr.msra.gmra.mrb[0].mxu0 %v1090_v3  ;;  %887 = vmatmul.mubr.bf16.vlgmr.msra.gmra.mrb[0].mxu1 %v1090_v3 }
 0x14c   : > { %v847_v14 = vpop.f32.mrb[0].mxu0  ;;  %v888_v15 = vpop.f32.mrb[0].mxu1 }
 0x14d   : > { %v932_v16 = vadd.f32 %v915_v11, %v847_v14  ;;  %v934_v17 = vadd.f32 %v923_v0, %v888_v15  ;;  %v849_v18 = vpop.f32.mrb[1].mxu0  ;;  %v890_v19 = vpop.f32.mrb[1].mxu1 }
 0x14e   : > { %v933_v20 = vadd.f32 %v919_v12, %v849_v18  ;;  %v935_v21 = vadd.f32 %v927_v13, %v890_v19  ;;  %v851_v22 = vpop.f32.mrb[2].mxu0  ;;  %v892_v23 = vpop.f32.mrb[2].mxu1 }
 0x14f   : > { %v852_v24 = vpop.f32.mrb[3].mxu0  ;;  %v893_v25 = vpop.f32.mrb[3].mxu1 }
 0x150   : > { %v1161_v26 = vpack.c.bf16 %v933_v20, %v932_v16  ;;  %v1162_v27 = vpack.c.bf16 %v935_v21, %v934_v17 }
 0x152   : > { %952 = vst [vmem:[%s407_s14] sm:$0xff] %v1161_v26  ;;  %953 = vst [vmem:[%s407_s14 + $0x8] sm:$0xff] %v1162_v27 }
 0x153 PF: > { %s13_s16 = sadd.s32 1, %s1339_s16   ;;  %s1640_s12 = smov %s1327_s13 }
 0x154   : > { %p10_p10 = scmp.ge.s32.totalorder %s13_s16, 4   ;;  %s1641_s13 = smov %s1396_s20 }
 0x155   : > { %s1642_s14 = smov %s1335_s15  ;;  %s1643_s15 = smov %s1645_s17 }
 0x156   :  { %12 = sbr.rel (!%p10_p10) target bundleno = 3 (0x3), region = 104 }

// kernel: viedoswin_forward.117
= control target key start
LH: loop header
LB: loop body
LE: loop exit
PB: predicated region body
PF: predicated region fallthrough
CT: control target
= control target key end

     0   :  { %s669_s15 = smov 0   ;;  %s671_s16 = smov 0   ;;  %s735_s0 = inlined_call_operand.vmem [shape: bf16[2,16,2,16], index: 0, kind: input, shape index: {}]   ;;  %s736_s1 = inlined_call_operand.vmem [shape: bf16[2,16,2,16], index: 1, kind: input, shape index: {}]   ;;  %s737_s2 = inlined_call_operand.vmem [shape: bf16[2,16,2,16], index: 2, kind: input, shape index: {}]   ;;  %s738_s3 = inlined_call_operand.vmem [shape: bf16[16,2,2], index: 3, kind: input, shape index: {}]   ;;  %s739_s4 = inlined_call_operand.vmem [shape: bf16[2,16,2,16], index: 4, kind: output, shape index: {}]  }
   0x1   :  { %s673_s17 = smov 0   ;;  %s675_s18 = smov 0  }
   0x2   :  { %s677_s19 = smov 0  }
   0x3 LB: > { %s23_s20 = sadd.s32 1, %s632_s17  ;;  %s26_s21 = sadd.s32 1, %s636_s18  ;;  %s640_s19 = sphi %s677_s19, %s14_s19   ;;  %s636_s18 = sphi %s675_s18, %s743_s18   ;;  %s632_s17 = sphi %s673_s17, %s742_s17   ;;  %s628_s16 = sphi %s671_s16, %s741_s16   ;;  %s624_s15 = sphi %s669_s15, %s740_s15  }
   0x4   : > { %p24_p0 = scmp.ge.s32.totalorder %s23_s20, 16  ;;  %p531_p1 = scmp.ge.s32.totalorder %s640_s19, 1 }
   0x5   : > { %p216_p2 = scmp.lt.s32.totalorder %s640_s19, 33 }
   0x6   : > { %s745_s20 = smov (%p24_p0, %s23_s20), 0  ;;  %s747_s21 = smov (!%p24_p0, %s26_s21), %s636_s18 }
   0x7   : > { %p217_p3 = pnand %p531_p1, %p216_p2  ;;  %p28_p4 = scmp.ge.s32.totalorder %s747_s21, 2 }
   0x8   : > { %p263_p5 = scmp.lt.s32.totalorder (!%p217_p3), %s628_s16, 1  ;;  %p265_p6 = scmp.lt.s32.totalorder (!%p217_p3), %s624_s15, 15  ;;  %v642_v0 = vmov (!%p217_p3), 0.0   ;;  %vm643_vm0 = vmmov (!%p217_p3), 0   ;;  %vm300_vm1 = vcmask (!%p217_p3), 130048   ;;  %vm347_vm2 = vcmask (!%p217_p3), 9216  }
   0x9   : > { %s749_s21 = smov (%p28_p4, %s747_s21), 0  ;;  %220 = sbr.rel (%p217_p3) target bundleno = 774 (0x306), region = 36 }
   0xa   : > { %544 = vmatprep.subr.bf16.mxu0 (!%p217_p3), %v642_v0  ;;  %546 = vmatprep.mubr.msk.bf16.mxu0 (!%p217_p3), %vm643_vm0, %v642_v0  ;;  %vm364_vm3 = vcmask (!%p217_p3), 1040384   ;;  %vm360_vm4 = vcmask (!%p217_p3), 15360   ;;  %vm409_vm5 = vcmask (!%p217_p3), 122880  }
   0xb   : > { %550 = vmatprep.subr.bf16.mxu1 (!%p217_p3), %v642_v0  ;;  %552 = vmatprep.mubr.msk.bf16.mxu1 (!%p217_p3), %vm643_vm0, %v642_v0 }
  0x10   : > { %s751_s16 = smov (!%p263_p5, %s628_s16), 1  ;;  %s753_s15 = smov (!%p265_p6, %s624_s15), 15 }
  0x11   : > { %s532_s22 = sshll.u32 %s751_s16, 4  ;;  %s286_s6 = scalar_lea.vmem %s738_s3, %s753_s15 }
  0x12   : > { %s699_s23 = sadd.s32 %s532_s22, %s753_s15  ;;  %v298_v4 = vld [vmem:[%s286_s6] sm:$0x1] }
  0x13   : > { %s276_s26 = scalar_lea.vmem %s736_s1, %s699_s23  ;;  %s269_s29 = scalar_lea.vmem %s735_s0, %s699_s23  ;;  %v299_v5 = vunpack.c.l.bf16 %v298_v4 }
  0x14   : > { %v296_v1 = vld [vmem:[%s276_s26] sm:$0x1]  ;;  %s283_s9 = scalar_lea.vmem %s737_s2, %s699_s23  ;;  %s293_s12 = scalar_lea.vmem %s739_s4, %s699_s23 }
  0x15   : > { %v305_v2 = vsel %vm300_vm1, %v296_v1, 0  ;;  %v295_v3 = vld [vmem:[%s269_s29] sm:$0x1] }
  0x16   : > { %545 = vmatpush3.bf16.xpose.msra.mxu0 %v305_v2  ;;  %v297_v17 = vld [vmem:[%s283_s9] sm:$0x1] }
  0x17   : > { %v366_v18 = vsel %vm364_vm3, %v297_v17, 0 }
  0x18   : > { %551 = vmatpush3.bf16.msra.mxu1 %v366_v18 }
  0x1d   : > { %547 = vmatmul.mubr.msk.bf16.vlgmr.msra.gmra.mrb[0].mxu0 %vm300_vm1, %v295_v3 }
  0xf0   : > { %v341_v6 = vpop.f32.mrb[0].mxu0 }
  0xf1   : > { %v342_v7 = vadd.f32 %v341_v6, %v299_v5  ;;  %v548_v8 = vpop.f32.mrb[1].mxu0 }
  0xf2   : > { %v344_v9 = vpop.f32.mrb[2].mxu0 }
  0xf3   : > { %v549_v10 = vpop.f32.mrb[3].mxu0  ;;  %v348_v11 = vsel %vm347_vm2, %v342_v7, -inf }
  0xf4   : > { %349 = vmax.xlane.f32.xlu0 %v348_v11 }
 0x181   : > { %v350_v12 = vpop.xlane.xlu0 %349 }
 0x182   : > { %v351_v13 = vsub.f32 %v342_v7, %v350_v12 }
 0x184   : > { %v352_v14 = vmul.f32 1.442695, %v351_v13 }
 0x186   : > { %598 = vpow2.f32 %v352_v14 }
 0x190   : > { %v599_v15 = vpop.eup %598 }
 0x191   : > { %v354_v16 = vsel %vm347_vm2, %v599_v15, 0.0 }
 0x192   : > { %355 = vadd.xlane.f32.xlu0 %v354_v16 }
 0x21f   : > { %v356_v19 = vpop.xlane.xlu0 %355 }
 0x220   : > { %600 = vrcp.f32 %v356_v19 }
 0x22a   : > { %v601_v20 = vpop.eup %600 }
 0x22b   : > { %v358_v21 = vmul.f32 %v601_v20, %v599_v15 }
 0x22d   : > { %v359_v22 = vpack.c.bf16 %v358_v21, %v358_v21 }
 0x22f   : > { %553 = vmatmul.mubr.msk.bf16.vlgmr.msra.gmra.mrb[0].mxu1 %vm360_vm4, %v359_v22 }
 0x302   : > { %v402_v23 = vpop.f32.mrb[0].mxu1 }
 0x303   : > { %v408_v24 = vpack.c.bf16 %v402_v23, %v402_v23  ;;  %v554_v25 = vpop.f32.mrb[1].mxu1 }
 0x304   : > { %v405_v26 = vpop.f32.mrb[2].mxu1 }
 0x305   : > { %410 = vst.msk [vmem:[%s293_s12] sm:$0x1] %vm409_vm5, %v408_v24  ;;  %v555_v27 = vpop.f32.mrb[3].mxu1 }
 0x306 PF: > { %s14_s19 = sadd.s32 1, %s640_s19   ;;  %s740_s15 = smov %s632_s17 }
 0x307   : > { %p11_p7 = scmp.ge.s32.totalorder %s14_s19, 34   ;;  %s741_s16 = smov %s636_s18 }
 0x308   : > { %s742_s17 = smov %s745_s20  ;;  %s743_s18 = smov %s749_s21 }
 0x309   :  { %13 = sbr.rel (!%p11_p7) target bundleno = 3 (0x3), region = 75 }

// kernel: viedoswin_forward.118
= control target key start
LH: loop header
LB: loop body
LE: loop exit
PB: predicated region body
PF: predicated region fallthrough
CT: control target
= control target key end

     0   :  { %v274_v35 = vlaneseq  ;;  %s510_s1 = inlined_call_operand.vmem [shape: bf16[256,256], index: 1, kind: input, shape index: {}]   ;;  %s511_s0 = inlined_call_operand.vmem [shape: bf16[8,256], index: 0, kind: input, shape index: {}]   ;;  %s512_s2 = inlined_call_operand.vmem [shape: f32[1,256], index: 2, kind: input, shape index: {}]   ;;  %s513_s3 = inlined_call_operand.vmem [shape: bf16[8,256], index: 3, kind: output, shape index: {}]  }
   0x1   :  { %v335_v0 = vld [vmem:[%s510_s1 + $0x4] ss:$8 sps:$4 sm:$0xff]   ;;  %v337_v1 = vld [vmem:[%s510_s1] ss:$8 sps:$4 sm:$0xff]   ;;  %v338_v2 = vld [vmem:[%s510_s1 + $0x14] ss:$8 sps:$4 sm:$0xff]  }
   0x2   :  { %222 = vmatprep.subr.bf16.mxu0 %v335_v0  ;;  %v340_v3 = vld [vmem:[%s510_s1 + $0x10] ss:$8 sps:$4 sm:$0xff]   ;;  %v341_v4 = vld [vmem:[%s510_s1 + $0x24] ss:$8 sps:$4 sm:$0xff]   ;;  %v343_v5 = vld [vmem:[%s510_s1 + $0x20] ss:$8 sps:$4 sm:$0xff]  }
   0x3   :  { %223 = vmatpush1.bf16.msra.mxu0 %v337_v1  ;;  %v344_v6 = vld [vmem:[%s510_s1 + $0x34] ss:$8 sps:$4 sm:$0xff]   ;;  %v346_v7 = vld [vmem:[%s510_s1 + $0x30] ss:$8 sps:$4 sm:$0xff]   ;;  %v347_v8 = vld [vmem:[%s510_s1 + $0x44] ss:$8 sps:$4 sm:$0xff]  }
   0x4   :  { %224 = vmatprep.subr.bf16.mxu0 %v338_v2  ;;  %v349_v9 = vld [vmem:[%s510_s1 + $0x40] ss:$8 sps:$4 sm:$0xff]   ;;  %v350_v10 = vld [vmem:[%s510_s1 + $0x54] ss:$8 sps:$4 sm:$0xff]   ;;  %v352_v11 = vld [vmem:[%s510_s1 + $0x50] ss:$8 sps:$4 sm:$0xff]  }
   0x5   :  { %v353_v12 = vld [vmem:[%s510_s1 + $0x64] ss:$8 sps:$4 sm:$0xff]   ;;  %v355_v15 = vld [vmem:[%s510_s1 + $0x60] ss:$8 sps:$4 sm:$0xff]   ;;  %v356_v16 = vld [vmem:[%s510_s1 + $0x74] ss:$8 sps:$4 sm:$0xff]  }
   0x6   :  { %v22_v13 = vld [vmem:[%s511_s0] sm:$0xff]  ;;  %v358_v17 = vld [vmem:[%s510_s1 + $0x70] ss:$8 sps:$4 sm:$0xff]   ;;  %v362_v20 = vld [vmem:[%s510_s1 + $0x94] ss:$8 sps:$4 sm:$0xff]   ;;  %v275_v36 = vshrl.u32 %v274_v35, 7 }
   0x7   :  { %225 = vmatpush1.bf16.msra.mxu0 %v340_v3  ;;  %v300_v14 = vcombine.high %v22_v13, %v22_v13  ;;  %v359_v18 = vld [vmem:[%s510_s1 + $0x84] ss:$8 sps:$4 sm:$0xff]   ;;  %v361_v19 = vld [vmem:[%s510_s1 + $0x80] ss:$8 sps:$4 sm:$0xff]   ;;  %v364_v21 = vld [vmem:[%s510_s1 + $0x90] ss:$8 sps:$4 sm:$0xff]   ;;  %v299_v34 = vcombine.low %v22_v13, %v22_v13 }
   0x8   :  { %226 = vmatprep.subr.bf16.mxu0 %v341_v4  ;;  %v365_v22 = vld [vmem:[%s510_s1 + $0xa4] ss:$8 sps:$4 sm:$0xff]   ;;  %v367_v23 = vld [vmem:[%s510_s1 + $0xa0] ss:$8 sps:$4 sm:$0xff]   ;;  %v368_v24 = vld [vmem:[%s510_s1 + $0xb4] ss:$8 sps:$4 sm:$0xff]  }
   0x9   :  { %254 = vmatprep.mubr.bf16.mxu0 %v300_v14  ;;  %v370_v25 = vld [vmem:[%s510_s1 + $0xb0] ss:$8 sps:$4 sm:$0xff]   ;;  %v371_v26 = vld [vmem:[%s510_s1 + $0xc4] ss:$8 sps:$4 sm:$0xff]   ;;  %v373_v27 = vld [vmem:[%s510_s1 + $0xc0] ss:$8 sps:$4 sm:$0xff]  }
   0xa   :  { %v374_v28 = vld [vmem:[%s510_s1 + $0xd4] ss:$8 sps:$4 sm:$0xff]   ;;  %v376_v29 = vld [vmem:[%s510_s1 + $0xd0] ss:$8 sps:$4 sm:$0xff]   ;;  %v377_v30 = vld [vmem:[%s510_s1 + $0xe4] ss:$8 sps:$4 sm:$0xff]  }
   0xb   :  { %227 = vmatpush1.bf16.msra.mxu0 %v343_v5  ;;  %v379_v31 = vld [vmem:[%s510_s1 + $0xe0] ss:$8 sps:$4 sm:$0xff]   ;;  %v380_v32 = vld [vmem:[%s510_s1 + $0xf4] ss:$8 sps:$4 sm:$0xff]   ;;  %v382_v33 = vld [vmem:[%s510_s1 + $0xf0] ss:$8 sps:$4 sm:$0xff]  }
   0xc   :  { %228 = vmatprep.subr.bf16.mxu0 %v344_v6  ;;  %v276_v37 = vsub.s32 0, %v275_v36  ;;  %v272_v38 = vld [vmem:[%s512_s2] sm:$0x3]  ;;  %v280_v39 = vsub.s32 1, %v275_v36 }
   0xe   :  { %v277_v40 = vrot.slane %v272_v38, %v276_v37  ;;  %v281_v41 = vrot.slane %v272_v38, %v280_v39 }
   0xf   :  { %229 = vmatpush1.bf16.msra.mxu0 %v346_v7 }
  0x10   :  { %230 = vmatprep.subr.bf16.mxu0 %v347_v8 }
  0x13   :  { %231 = vmatpush1.bf16.msra.mxu0 %v349_v9 }
  0x14   :  { %232 = vmatprep.subr.bf16.mxu0 %v350_v10 }
  0x17   :  { %233 = vmatpush1.bf16.msra.mxu0 %v352_v11 }
  0x18   :  { %234 = vmatprep.subr.bf16.mxu0 %v353_v12 }
  0x1b   :  { %235 = vmatpush1.bf16.msra.mxu0 %v355_v15 }
  0x1c   :  { %236 = vmatprep.subr.bf16.mxu0 %v356_v16 }
  0x1f   :  { %237 = vmatpush1.bf16.msra.mxu0 %v358_v17 }
  0x20   :  { %238 = vmatprep.subr.bf16.mxu0 %v359_v18 }
  0x23   :  { %239 = vmatpush1.bf16.msra.mxu0 %v361_v19 }
  0x24   :  { %240 = vmatprep.subr.bf16.mxu0 %v362_v20 }
  0x27   :  { %241 = vmatpush1.bf16.msra.mxu0 %v364_v21 }
  0x28   :  { %242 = vmatprep.subr.bf16.mxu0 %v365_v22 }
  0x2b   :  { %243 = vmatpush1.bf16.msra.mxu0 %v367_v23 }
  0x2c   :  { %244 = vmatprep.subr.bf16.mxu0 %v368_v24 }
  0x2f   :  { %245 = vmatpush1.bf16.msra.mxu0 %v370_v25 }
  0x30   :  { %246 = vmatprep.subr.bf16.mxu0 %v371_v26 }
  0x33   :  { %247 = vmatpush1.bf16.msra.mxu0 %v373_v27 }
  0x34   :  { %248 = vmatprep.subr.bf16.mxu0 %v374_v28 }
  0x37   :  { %249 = vmatpush1.bf16.msra.mxu0 %v376_v29 }
  0x38   :  { %250 = vmatprep.subr.bf16.mxu0 %v377_v30 }
  0x3b   :  { %251 = vmatpush1.bf16.msra.mxu0 %v379_v31 }
  0x3c   :  { %252 = vmatprep.subr.bf16.mxu0 %v380_v32 }
  0x3f   :  { %253 = vmatpush1.bf16.msra.mxu0 %v382_v33 }
  0x42   :  { %255 = vmatmul.mubr.bf16.vlgmr.msra.gmra.mrb[0].mxu0 %v299_v34 }
 0x115   :  { %v256_v42 = vpop.f32.mrb[0].mxu0 }
 0x116   :  { %v284_v43 = vadd.f32 %v277_v40, %v256_v42  ;;  %v258_v44 = vpop.f32.mrb[1].mxu0 }
 0x117   :  { %v285_v45 = vadd.f32 %v281_v41, %v258_v44  ;;  %v260_v46 = vpop.f32.mrb[2].mxu0 }
 0x118   :  { %v261_v47 = vpop.f32.mrb[3].mxu0 }
 0x119   :  { %v334_v48 = vpack.c.bf16 %v285_v45, %v284_v43 }
 0x11b   :  { %294 = vst [vmem:[%s513_s3] sm:$0xff] %v334_v48 }

// kernel: viedoswin_forward.119
= control target key start
LH: loop header
LB: loop body
LE: loop exit
PB: predicated region body
PF: predicated region fallthrough
CT: control target
= control target key end

     0   :  { %v36_v13 = vlaneseq  ;;  %s111_s0 = inlined_call_operand.vmem [shape: bf16[8,256], index: 0, kind: input, shape index: {}]   ;;  %s112_s1 = inlined_call_operand.vmem [shape: f32[1,256], index: 1, kind: input, shape index: {}]   ;;  %s113_s2 = inlined_call_operand.vmem [shape: f32[1,256], index: 2, kind: input, shape index: {}]   ;;  %s114_s3 = inlined_call_operand.vmem [shape: bf16[8,256], index: 3, kind: output, shape index: {}]  }
   0x1   :  { %v14_v0 = vld [vmem:[%s111_s0] sm:$0xff] }
   0x2   :  { %v15_v1 = vunpack.c.l.bf16 %v14_v0  ;;  %v16_v2 = vunpack.c.h.bf16 %v14_v0  ;;  %v37_v15 = vshrl.u32 %v36_v13, 7  ;;  %v34_v18 = vld [vmem:[%s112_s1] sm:$0x3] }
   0x3   :  { %v48_v19 = vld [vmem:[%s113_s2] sm:$0x3] }
   0x4   :  { %v17_v3 = vadd.f32 %v16_v2, %v15_v1  ;;  %v38_v16 = vsub.s32 0, %v37_v15  ;;  %v42_v17 = vsub.s32 1, %v37_v15 }
   0x6   :  { %18 = vadd.xlane.f32.xlu0 %v17_v3  ;;  %v39_v20 = vrot.slane %v34_v18, %v38_v16  ;;  %v43_v21 = vrot.slane %v34_v18, %v42_v17  ;;  %v53_v23 = vrot.slane %v48_v19, %v38_v16  ;;  %v57_v24 = vrot.slane %v48_v19, %v42_v17 }
  0x93   :  { %v19_v4 = vpop.xlane.xlu0 %18 }
  0x94   :  { %v21_v5 = vmul.f32 0.00390625, %v19_v4 }
  0x96   :  { %v22_v6 = vsub.f32 %v15_v1, %v21_v5  ;;  %v23_v7 = vsub.f32 %v16_v2, %v21_v5 }
  0x98   :  { %v24_v8 = vmul.f32 %v22_v6, %v22_v6  ;;  %v25_v9 = vmul.f32 %v23_v7, %v23_v7 }
  0x9a   :  { %v26_v10 = vadd.f32 %v25_v9, %v24_v8 }
  0x9c   :  { %27 = vadd.xlane.f32.xlu0 %v26_v10 }
 0x129   :  { %v28_v11 = vpop.xlane.xlu0 %27 }
 0x12a   :  { %v29_v12 = vmul.f32 0.00390625, %v28_v11 }
 0x12c   :  { %v30_v14 = vadd.f32 1e-05, %v29_v12 }
 0x12e   :  { %77 = vrsqrt.f32 %v30_v14 }
 0x138   :  { %v78_v22 = vpop.eup %77 }
 0x139   :  { %v32_v25 = vmul.f32 %v78_v22, %v22_v6  ;;  %v33_v26 = vmul.f32 %v78_v22, %v23_v7 }
 0x13b   :  { %v46_v27 = vmul.f32 %v39_v20, %v32_v25  ;;  %v47_v28 = vmul.f32 %v43_v21, %v33_v26 }
 0x13d   :  { %v60_v29 = vadd.f32 %v53_v23, %v46_v27  ;;  %v61_v30 = vadd.f32 %v57_v24, %v47_v28 }
 0x13f   :  { %v76_v31 = vpack.c.bf16 %v61_v30, %v60_v29 }
 0x141   :  { %70 = vst [vmem:[%s114_s3] sm:$0xff] %v76_v31 }

// kernel: viedoswin_forward.129
= control target key start
LH: loop header
LB: loop body
LE: loop exit
PB: predicated region body
PF: predicated region fallthrough
CT: control target
= control target key end

     0   :  { %v36_v13 = vlaneseq  ;;  %s105_s0 = inlined_call_operand.vmem [shape: bf16[8,256], index: 0, kind: input, shape index: {}]   ;;  %s106_s1 = inlined_call_operand.vmem [shape: f32[1,256], index: 1, kind: input, shape index: {}]   ;;  %s107_s2 = inlined_call_operand.vmem [shape: f32[1,256], index: 2, kind: input, shape index: {}]   ;;  %s108_s3 = inlined_call_operand.vmem [shape: f32[8,256], index: 3, kind: output, shape index: {}]  }
   0x1   :  { %v14_v0 = vld [vmem:[%s105_s0] sm:$0xff] }
   0x2   :  { %v15_v1 = vunpack.c.l.bf16 %v14_v0  ;;  %v16_v2 = vunpack.c.h.bf16 %v14_v0  ;;  %v37_v15 = vshrl.u32 %v36_v13, 7  ;;  %v34_v18 = vld [vmem:[%s106_s1] sm:$0x3] }
   0x3   :  { %v48_v19 = vld [vmem:[%s107_s2] sm:$0x3] }
   0x4   :  { %v17_v3 = vadd.f32 %v16_v2, %v15_v1  ;;  %v38_v16 = vsub.s32 0, %v37_v15  ;;  %v42_v17 = vsub.s32 1, %v37_v15 }
   0x6   :  { %18 = vadd.xlane.f32.xlu0 %v17_v3  ;;  %v39_v20 = vrot.slane %v34_v18, %v38_v16  ;;  %v43_v21 = vrot.slane %v34_v18, %v42_v17  ;;  %v53_v23 = vrot.slane %v48_v19, %v38_v16  ;;  %v57_v24 = vrot.slane %v48_v19, %v42_v17 }
  0x93   :  { %v19_v4 = vpop.xlane.xlu0 %18 }
  0x94   :  { %v21_v5 = vmul.f32 0.00390625, %v19_v4 }
  0x96   :  { %v22_v6 = vsub.f32 %v15_v1, %v21_v5  ;;  %v23_v7 = vsub.f32 %v16_v2, %v21_v5 }
  0x98   :  { %v24_v8 = vmul.f32 %v22_v6, %v22_v6  ;;  %v25_v9 = vmul.f32 %v23_v7, %v23_v7 }
  0x9a   :  { %v26_v10 = vadd.f32 %v25_v9, %v24_v8 }
  0x9c   :  { %27 = vadd.xlane.f32.xlu0 %v26_v10 }
 0x129   :  { %v28_v11 = vpop.xlane.xlu0 %27 }
 0x12a   :  { %v29_v12 = vmul.f32 0.00390625, %v28_v11 }
 0x12c   :  { %v30_v14 = vadd.f32 1e-05, %v29_v12 }
 0x12e   :  { %68 = vrsqrt.f32 %v30_v14 }
 0x138   :  { %v69_v22 = vpop.eup %68 }
 0x139   :  { %v32_v25 = vmul.f32 %v69_v22, %v22_v6  ;;  %v33_v26 = vmul.f32 %v69_v22, %v23_v7 }
 0x13b   :  { %v46_v27 = vmul.f32 %v39_v20, %v32_v25  ;;  %v47_v28 = vmul.f32 %v43_v21, %v33_v26 }
 0x13d   :  { %v60_v29 = vadd.f32 %v53_v23, %v46_v27  ;;  %v61_v30 = vadd.f32 %v57_v24, %v47_v28 }
 0x13f   :  { %62 = vst [vmem:[%s108_s3] sm:$0xff] %v60_v29  ;;  %63 = vst [vmem:[%s108_s3 + $0x8] sm:$0xff] %v61_v30 }

// kernel: viedoswin_forward.121
= control target key start
LH: loop header
LB: loop body
LE: loop exit
PB: predicated region body
PF: predicated region fallthrough
CT: control target
= control target key end

     0   :  { %s1174_s12 = smov 0   ;;  %s1176_s13 = smov 0   ;;  %s1289_s0 = inlined_call_operand.vmem [shape: bf16[8,1024], index: 0, kind: input, shape index: {}]   ;;  %s1290_s1 = inlined_call_operand.vmem [shape: bf16[1024,256], index: 1, kind: input, shape index: {}]   ;;  %s1291_s2 = inlined_call_operand.vmem [shape: f32[1,256], index: 2, kind: input, shape index: {}]   ;;  %s1292_s3 = inlined_call_operand.vmem [shape: bf16[8,256], index: 3, kind: output, shape index: {}]  }
   0x1   :  { %s1178_s14 = smov 0  }
   0x2 LB: > { %s25_s15 = sadd.s32 1, %s1147_s13  ;;  %p921_p0 = scmp.ge.s32.totalorder %s1151_s14, 1  ;;  %s1151_s14 = sphi %s1178_s14, %s13_s14   ;;  %s1147_s13 = sphi %s1176_s13, %s1294_s13   ;;  %s1143_s12 = sphi %s1174_s12, %s1293_s12  }
   0x3   : > { %p26_p1 = scmp.ge.s32.totalorder %s25_s15, 2  ;;  %p194_p2 = scmp.lt.s32.totalorder %s1151_s14, 3 }
   0x5   : > { %s1296_s15 = smov (%p26_p1, %s25_s15), 0  ;;  %p195_p3 = pnand %p921_p0, %p194_p2 }
   0x6   : > { %s922_s16 = sshll.u32 (!%p195_p3), %s1143_s12, 2  ;;  %s924_s17 = sshll.u32 (!%p195_p3), %s1143_s12, 6 }
   0x7   : > { %198 = sbr.rel (%p195_p3) target bundleno = 320 (0x140), region = 32  ;;  %p243_p4 = scmp.lt.s32.totalorder (!%p195_p3), %s922_s16, 7 }
   0x8   : > { %p252_p5 = scmp.lt.s32.totalorder (!%p195_p3), %s924_s17, 127  ;;  %p927_p6 = scmp.ne.s32.totalorder (!%p195_p3), %s1143_s12, 0 }
   0xe   : > { %s1298_s16 = smov (!%p243_p4, %s922_s16), 7  ;;  %s1300_s17 = smov (!%p252_p5, %s924_s17), 127 }
   0xf   : > { %s923_s18 = sshll.u32 %s1298_s16, 2  ;;  %s1002_s22 = sshll.u32 %s1300_s17, 3  ;;  %v1153_v0 = vmov (!%p927_p6), 0.0  }
  0x10   : > { %s1199_s21 = scalar_lea.vmem %s1289_s0, %s923_s18  ;;  %s1204_s25 = scalar_lea.vmem %s1290_s1, %s1002_s22  ;;  %281 = vst [vmem:[#allocation2] sm:$0xff] (!%p927_p6), %v1153_v0  ;;  %282 = vst [vmem:[#allocation2 + $0x8] sm:$0xff] (!%p927_p6), %v1153_v0 }
  0x11   : > { %280 = sbr.rel (%p927_p6) target bundleno = 24 (0x18), region = 36 }
  0x18 PF: > { %v1029_v1 = vld [vmem:[%s1204_s25 + $0x4] ss:$8 sps:$4 sm:$0xff]   ;;  %v1033_v3 = vld [vmem:[%s1204_s25] ss:$8 sps:$4 sm:$0xff]   ;;  %v1035_v5 = vld [vmem:[%s1204_s25 + $0x14] ss:$8 sps:$4 sm:$0xff]  }
  0x19   : > { %v1031_v2 = vld [vmem:[%s1204_s25 + $0x104] ss:$8 sps:$4 sm:$0xff]   ;;  %685 = vmatprep.subr.bf16.mxu0 %v1029_v1  ;;  %v1034_v4 = vld [vmem:[%s1204_s25 + $0x100] ss:$8 sps:$4 sm:$0xff]   ;;  %v1037_v6 = vld [vmem:[%s1204_s25 + $0x114] ss:$8 sps:$4 sm:$0xff]  }
  0x1a   : > { %726 = vmatprep.subr.bf16.mxu1 %v1031_v2  ;;  %686 = vmatpush1.bf16.msra.mxu0 %v1033_v3  ;;  %v1039_v7 = vld [vmem:[%s1204_s25 + $0x10] ss:$8 sps:$4 sm:$0xff]   ;;  %v1041_v9 = vld [vmem:[%s1204_s25 + $0x24] ss:$8 sps:$4 sm:$0xff]   ;;  %v1045_v11 = vld [vmem:[%s1204_s25 + $0x20] ss:$8 sps:$4 sm:$0xff]  }
  0x1b   : > { %727 = vmatpush1.bf16.msra.mxu1 %v1034_v4  ;;  %687 = vmatprep.subr.bf16.mxu0 %v1035_v5  ;;  %v1040_v8 = vld [vmem:[%s1204_s25 + $0x110] ss:$8 sps:$4 sm:$0xff]   ;;  %v1043_v10 = vld [vmem:[%s1204_s25 + $0x124] ss:$8 sps:$4 sm:$0xff]   ;;  %v1046_v12 = vld [vmem:[%s1204_s25 + $0x120] ss:$8 sps:$4 sm:$0xff]  }
  0x1c   : > { %728 = vmatprep.subr.bf16.mxu1 %v1037_v6  ;;  %v1047_v13 = vld [vmem:[%s1204_s25 + $0x34] ss:$8 sps:$4 sm:$0xff]   ;;  %v1051_v15 = vld [vmem:[%s1204_s25 + $0x30] ss:$8 sps:$4 sm:$0xff]   ;;  %v1053_v17 = vld [vmem:[%s1204_s25 + $0x44] ss:$8 sps:$4 sm:$0xff]  }
  0x1d   : > { %v1049_v14 = vld [vmem:[%s1204_s25 + $0x134] ss:$8 sps:$4 sm:$0xff]   ;;  %v1052_v16 = vld [vmem:[%s1204_s25 + $0x130] ss:$8 sps:$4 sm:$0xff]   ;;  %v1055_v18 = vld [vmem:[%s1204_s25 + $0x144] ss:$8 sps:$4 sm:$0xff]  }
  0x1e   : > { %688 = vmatpush1.bf16.msra.mxu0 %v1039_v7  ;;  %v1057_v19 = vld [vmem:[%s1204_s25 + $0x40] ss:$8 sps:$4 sm:$0xff]   ;;  %v1059_v21 = vld [vmem:[%s1204_s25 + $0x54] ss:$8 sps:$4 sm:$0xff]   ;;  %v1063_v23 = vld [vmem:[%s1204_s25 + $0x50] ss:$8 sps:$4 sm:$0xff]  }
  0x1f   : > { %729 = vmatpush1.bf16.msra.mxu1 %v1040_v8  ;;  %689 = vmatprep.subr.bf16.mxu0 %v1041_v9  ;;  %v1058_v20 = vld [vmem:[%s1204_s25 + $0x140] ss:$8 sps:$4 sm:$0xff]   ;;  %v1061_v22 = vld [vmem:[%s1204_s25 + $0x154] ss:$8 sps:$4 sm:$0xff]   ;;  %v1064_v24 = vld [vmem:[%s1204_s25 + $0x150] ss:$8 sps:$4 sm:$0xff]  }
  0x20   : > { %730 = vmatprep.subr.bf16.mxu1 %v1043_v10  ;;  %v1065_v25 = vld [vmem:[%s1204_s25 + $0x64] ss:$8 sps:$4 sm:$0xff]   ;;  %v1069_v27 = vld [vmem:[%s1204_s25 + $0x60] ss:$8 sps:$4 sm:$0xff]   ;;  %v1071_v29 = vld [vmem:[%s1204_s25 + $0x74] ss:$8 sps:$4 sm:$0xff]  }
  0x21   : > { %v1067_v26 = vld [vmem:[%s1204_s25 + $0x164] ss:$8 sps:$4 sm:$0xff]   ;;  %v1070_v28 = vld [vmem:[%s1204_s25 + $0x160] ss:$8 sps:$4 sm:$0xff]   ;;  %v1073_v30 = vld [vmem:[%s1204_s25 + $0x174] ss:$8 sps:$4 sm:$0xff]  }
  0x22   : > { %690 = vmatpush1.bf16.msra.mxu0 %v1045_v11  ;;  %v1075_v31 = vld [vmem:[%s1204_s25 + $0x70] ss:$8 sps:$4 sm:$0xff]   ;;  %v1077_v33 = vld [vmem:[%s1204_s25 + $0x84] ss:$8 sps:$4 sm:$0xff]   ;;  %v1081_v35 = vld [vmem:[%s1204_s25 + $0x80] ss:$8 sps:$4 sm:$0xff]  }
  0x23   : > { %731 = vmatpush1.bf16.msra.mxu1 %v1046_v12  ;;  %691 = vmatprep.subr.bf16.mxu0 %v1047_v13  ;;  %v1076_v32 = vld [vmem:[%s1204_s25 + $0x170] ss:$8 sps:$4 sm:$0xff]   ;;  %v1079_v34 = vld [vmem:[%s1204_s25 + $0x184] ss:$8 sps:$4 sm:$0xff]   ;;  %v1082_v36 = vld [vmem:[%s1204_s25 + $0x180] ss:$8 sps:$4 sm:$0xff]  }
  0x24   : > { %732 = vmatprep.subr.bf16.mxu1 %v1049_v14  ;;  %v1083_v37 = vld [vmem:[%s1204_s25 + $0x94] ss:$8 sps:$4 sm:$0xff]   ;;  %v1087_v39 = vld [vmem:[%s1204_s25 + $0x90] ss:$8 sps:$4 sm:$0xff]   ;;  %v1089_v41 = vld [vmem:[%s1204_s25 + $0xa4] ss:$8 sps:$4 sm:$0xff]  }
  0x25   : > { %v1085_v38 = vld [vmem:[%s1204_s25 + $0x194] ss:$8 sps:$4 sm:$0xff]   ;;  %v1088_v40 = vld [vmem:[%s1204_s25 + $0x190] ss:$8 sps:$4 sm:$0xff]   ;;  %v1091_v42 = vld [vmem:[%s1204_s25 + $0x1a4] ss:$8 sps:$4 sm:$0xff]  }
  0x26   : > { %692 = vmatpush1.bf16.msra.mxu0 %v1051_v15  ;;  %v1093_v43 = vld [vmem:[%s1204_s25 + $0xa0] ss:$8 sps:$4 sm:$0xff]   ;;  %v1095_v45 = vld [vmem:[%s1204_s25 + $0xb4] ss:$8 sps:$4 sm:$0xff]   ;;  %v1099_v50 = vld [vmem:[%s1204_s25 + $0xb0] ss:$8 sps:$4 sm:$0xff]  }
  0x27   : > { %733 = vmatpush1.bf16.msra.mxu1 %v1052_v16  ;;  %693 = vmatprep.subr.bf16.mxu0 %v1053_v17  ;;  %v1094_v44 = vld [vmem:[%s1204_s25 + $0x1a0] ss:$8 sps:$4 sm:$0xff]   ;;  %v1097_v46 = vld [vmem:[%s1204_s25 + $0x1b4] ss:$8 sps:$4 sm:$0xff]   ;;  %v1100_v51 = vld [vmem:[%s1204_s25 + $0x1b0] ss:$8 sps:$4 sm:$0xff]  }
  0x28   : > { %734 = vmatprep.subr.bf16.mxu1 %v1055_v18  ;;  %v285_v47 = vld [vmem:[%s1199_s21] sm:$0xff]  ;;  %v286_v49 = vld [vmem:[%s1199_s21 + $0x8] sm:$0xff]  ;;  %v1107_v57 = vld [vmem:[%s1204_s25 + $0xd4] ss:$8 sps:$4 sm:$0xff]   ;;  %p996_p7 = scmp.ne.s32.totalorder %s1143_s12, 1 }
  0x29   : > { %v929_v48 = vcombine.high %v285_v47, %v285_v47  ;;  %v931_v52 = vcombine.high %v286_v49, %v286_v49  ;;  %v1101_v53 = vld [vmem:[%s1204_s25 + $0xc4] ss:$8 sps:$4 sm:$0xff]   ;;  %v1105_v55 = vld [vmem:[%s1204_s25 + $0xc0] ss:$8 sps:$4 sm:$0xff]   ;;  %v1109_v58 = vld [vmem:[%s1204_s25 + $0x1d4] ss:$8 sps:$4 sm:$0xff]   ;;  %v928_v5 = vcombine.low %v285_v47, %v285_v47  ;;  %v930_v6 = vcombine.low %v286_v49, %v286_v49 }
  0x2a   : > { %694 = vmatpush1.bf16.msra.mxu0 %v1057_v19  ;;  %v1103_v54 = vld [vmem:[%s1204_s25 + $0x1c4] ss:$8 sps:$4 sm:$0xff]   ;;  %v1106_v56 = vld [vmem:[%s1204_s25 + $0x1c0] ss:$8 sps:$4 sm:$0xff]   ;;  %v1111_v59 = vld [vmem:[%s1204_s25 + $0xd0] ss:$8 sps:$4 sm:$0xff]  }
  0x2b   : > { %735 = vmatpush1.bf16.msra.mxu1 %v1058_v20  ;;  %695 = vmatprep.subr.bf16.mxu0 %v1059_v21  ;;  %v1112_v60 = vld [vmem:[%s1204_s25 + $0x1d0] ss:$8 sps:$4 sm:$0xff]   ;;  %v1113_v61 = vld [vmem:[%s1204_s25 + $0xe4] ss:$8 sps:$4 sm:$0xff]   ;;  %v1117_v63 = vld [vmem:[%s1204_s25 + $0xe0] ss:$8 sps:$4 sm:$0xff]   ;;  %v779_v21 = vlaneseq (!%p996_p7) }
  0x2c   : > { %736 = vmatprep.subr.bf16.mxu1 %v1061_v22  ;;  %717 = vmatprep.mubr.bf16.mxu0 %v929_v48  ;;  %v1115_v62 = vld [vmem:[%s1204_s25 + $0x1e4] ss:$8 sps:$4 sm:$0xff]   ;;  %v1118_v0 = vld [vmem:[%s1204_s25 + $0x1e0] ss:$8 sps:$4 sm:$0xff]   ;;  %v1119_v1 = vld [vmem:[%s1204_s25 + $0xf4] ss:$8 sps:$4 sm:$0xff]  }
  0x2d   : > { %758 = vmatprep.mubr.bf16.mxu1 %v931_v52  ;;  %v1121_v2 = vld [vmem:[%s1204_s25 + $0x1f4] ss:$8 sps:$4 sm:$0xff]   ;;  %v1123_v3 = vld [vmem:[%s1204_s25 + $0xf0] ss:$8 sps:$4 sm:$0xff]   ;;  %v283_v8 = vld [vmem:[#allocation2] sm:$0xff]  ;;  %v780_v22 = vshrl.u32 (!%p996_p7), %v779_v21, 7 }
  0x2e   : > { %696 = vmatpush1.bf16.msra.mxu0 %v1063_v23  ;;  %v1124_v4 = vld [vmem:[%s1204_s25 + $0x1f0] ss:$8 sps:$4 sm:$0xff]   ;;  %v284_v12 = vld [vmem:[#allocation2 + $0x8] sm:$0xff]  ;;  %v777_v23 = vld [vmem:[%s1291_s2] sm:$0x3] (!%p996_p7) }
  0x2f   : > { %737 = vmatpush1.bf16.msra.mxu1 %v1064_v24  ;;  %697 = vmatprep.subr.bf16.mxu0 %v1065_v25  ;;  %v781_v24 = vsub.s32 (!%p996_p7), 0, %v780_v22  ;;  %v785_v25 = vsub.s32 (!%p996_p7), 1, %v780_v22 }
  0x30   : > { %738 = vmatprep.subr.bf16.mxu1 %v1067_v26 }
  0x32   : > { %698 = vmatpush1.bf16.msra.mxu0 %v1069_v27 }
  0x33   : > { %739 = vmatpush1.bf16.msra.mxu1 %v1070_v28  ;;  %699 = vmatprep.subr.bf16.mxu0 %v1071_v29  ;;  %v782_v28 = vrot.slane (!%p996_p7), %v777_v23, %v781_v24  ;;  %v786_v29 = vrot.slane (!%p996_p7), %v777_v23, %v785_v25 }
  0x34   : > { %740 = vmatprep.subr.bf16.mxu1 %v1073_v30 }
  0x36   : > { %700 = vmatpush1.bf16.msra.mxu0 %v1075_v31 }
  0x37   : > { %741 = vmatpush1.bf16.msra.mxu1 %v1076_v32  ;;  %701 = vmatprep.subr.bf16.mxu0 %v1077_v33 }
  0x38   : > { %742 = vmatprep.subr.bf16.mxu1 %v1079_v34 }
  0x3a   : > { %702 = vmatpush1.bf16.msra.mxu0 %v1081_v35 }
  0x3b   : > { %743 = vmatpush1.bf16.msra.mxu1 %v1082_v36  ;;  %703 = vmatprep.subr.bf16.mxu0 %v1083_v37 }
  0x3c   : > { %744 = vmatprep.subr.bf16.mxu1 %v1085_v38 }
  0x3e   : > { %704 = vmatpush1.bf16.msra.mxu0 %v1087_v39 }
  0x3f   : > { %745 = vmatpush1.bf16.msra.mxu1 %v1088_v40  ;;  %705 = vmatprep.subr.bf16.mxu0 %v1089_v41 }
  0x40   : > { %746 = vmatprep.subr.bf16.mxu1 %v1091_v42 }
  0x42   : > { %706 = vmatpush1.bf16.msra.mxu0 %v1093_v43 }
  0x43   : > { %747 = vmatpush1.bf16.msra.mxu1 %v1094_v44  ;;  %707 = vmatprep.subr.bf16.mxu0 %v1095_v45 }
  0x44   : > { %748 = vmatprep.subr.bf16.mxu1 %v1097_v46 }
  0x46   : > { %708 = vmatpush1.bf16.msra.mxu0 %v1099_v50 }
  0x47   : > { %749 = vmatpush1.bf16.msra.mxu1 %v1100_v51  ;;  %709 = vmatprep.subr.bf16.mxu0 %v1101_v53 }
  0x48   : > { %750 = vmatprep.subr.bf16.mxu1 %v1103_v54 }
  0x4a   : > { %710 = vmatpush1.bf16.msra.mxu0 %v1105_v55 }
  0x4b   : > { %751 = vmatpush1.bf16.msra.mxu1 %v1106_v56  ;;  %711 = vmatprep.subr.bf16.mxu0 %v1107_v57 }
  0x4c   : > { %752 = vmatprep.subr.bf16.mxu1 %v1109_v58 }
  0x4e   : > { %712 = vmatpush1.bf16.msra.mxu0 %v1111_v59 }
  0x4f   : > { %753 = vmatpush1.bf16.msra.mxu1 %v1112_v60  ;;  %713 = vmatprep.subr.bf16.mxu0 %v1113_v61 }
  0x50   : > { %754 = vmatprep.subr.bf16.mxu1 %v1115_v62 }
  0x52   : > { %714 = vmatpush1.bf16.msra.mxu0 %v1117_v63 }
  0x53   : > { %755 = vmatpush1.bf16.msra.mxu1 %v1118_v0  ;;  %715 = vmatprep.subr.bf16.mxu0 %v1119_v1 }
  0x54   : > { %756 = vmatprep.subr.bf16.mxu1 %v1121_v2 }
  0x56   : > { %716 = vmatpush1.bf16.msra.mxu0 %v1123_v3 }
  0x57   : > { %757 = vmatpush1.bf16.msra.mxu1 %v1124_v4 }
  0x59   : > { %718 = vmatmul.mubr.bf16.vlgmr.msra.gmra.mrb[0].mxu0 %v928_v5 }
  0x5a   : > { %759 = vmatmul.mubr.bf16.vlgmr.msra.gmra.mrb[0].mxu1 %v930_v6 }
 0x12c   : > { %v719_v7 = vpop.f32.mrb[0].mxu0 }
 0x12d   : > { %v760_v9 = vpop.f32.mrb[0].mxu1  ;;  %v721_v11 = vpop.f32.mrb[1].mxu0  ;;  %774 = sbr.rel (%p996_p7) target bundleno = 320 (0x140), region = 40 }
 0x12e   : > { %v761_v10 = vadd.f32 %v760_v9, %v719_v7  ;;  %v762_v13 = vpop.f32.mrb[1].mxu1  ;;  %v723_v15 = vpop.f32.mrb[2].mxu0 }
 0x12f   : > { %v763_v14 = vadd.f32 %v762_v13, %v721_v11  ;;  %v764_v16 = vpop.f32.mrb[2].mxu1  ;;  %v724_v18 = vpop.f32.mrb[3].mxu0 }
 0x130   : > { %v767_v17 = vadd.f32 %v761_v10, %v283_v8  ;;  %v765_v19 = vpop.f32.mrb[3].mxu1 }
 0x131   : > { %v768_v20 = vadd.f32 %v763_v14, %v284_v12 }
 0x132   : > { %769 = vst [vmem:[#allocation2] sm:$0xff] %v767_v17 }
 0x133   : > { %770 = vst [vmem:[#allocation2 + $0x8] sm:$0xff] %v768_v20 }
 0x139   : > { %v775_v26 = vld [vmem:[#allocation2] sm:$0xff] }
 0x13a   : > { %v776_v27 = vld [vmem:[#allocation2 + $0x8] sm:$0xff]  ;;  %v789_v30 = vadd.f32 %v782_v28, %v775_v26 }
 0x13b   : > { %v790_v31 = vadd.f32 %v786_v29, %v776_v27 }
 0x13d   : > { %v1003_v32 = vpack.c.bf16 %v790_v31, %v789_v30 }
 0x13f   : > { %799 = vst [vmem:[%s1292_s3] sm:$0xff] %v1003_v32 }
 0x140 PF: > { %s13_s14 = sadd.s32 1, %s1151_s14   ;;  %s1293_s12 = smov %s1147_s13 }
 0x141   : > { %p10_p8 = scmp.ge.s32.totalorder %s13_s14, 4   ;;  %s1294_s13 = smov %s1296_s15 }
 0x143   :  { %12 = sbr.rel (!%p10_p8) target bundleno = 2 (0x2), region = 76 }

// kernel: viedoswin_forward.120
= control target key start
LH: loop header
LB: loop body
LE: loop exit
PB: predicated region body
PF: predicated region fallthrough
CT: control target
= control target key end

     0   :  { %s1405_s12 = smov 0   ;;  %s1407_s13 = smov 0   ;;  %s1684_s0 = inlined_call_operand.vmem [shape: bf16[8,256], index: 0, kind: input, shape index: {}]   ;;  %s1685_s1 = inlined_call_operand.vmem [shape: bf16[256,1024], index: 1, kind: input, shape index: {}]   ;;  %s1686_s2 = inlined_call_operand.vmem [shape: f32[1,1024], index: 2, kind: input, shape index: {}]   ;;  %s1687_s3 = inlined_call_operand.vmem [shape: bf16[8,1024], index: 3, kind: output, shape index: {}]  }
   0x1   :  { %s1409_s14 = smov 0   ;;  %s1411_s15 = smov 0  }
   0x2   :  { %s1413_s16 = smov 0  }
   0x3 LB: > { %s28_s17 = sadd.s32 1, %s1379_s15  ;;  %p76_p1 = scmp.ne.s32.totalorder %s1371_s13, %s1367_s12  ;;  %s1383_s16 = sphi %s1413_s16, %s13_s16   ;;  %s1379_s15 = sphi %s1411_s15, %s1691_s15   ;;  %s1375_s14 = sphi %s1409_s14, %s1690_s14   ;;  %s1371_s13 = sphi %s1407_s13, %s1689_s13   ;;  %s1367_s12 = sphi %s1405_s12, %s1688_s12  }
   0x4   : > { %p30_p0 = scmp.ge.s32.totalorder %s28_s17, 2  ;;  %p77_p2 = scmp.eq.s32.totalorder %s1383_s16, 0 }
   0x5   : > { %s69_s19 = sadd.s32 1, %s1371_s13  ;;  %p1117_p5 = scmp.ge.s32.totalorder %s1383_s16, 2 }
   0x6   : > { %s1693_s17 = smov (%p30_p0, %s28_s17), 0  ;;  %p78_p3 = por %p77_p2, %p76_p1 }
   0x7   : > { %s65_s18 = ssub.s32 %s1379_s15, %s1693_s17  ;;  %169 = sbr.rel (%p1117_p5) target bundleno = 50 (0x32), region = 20 }
   0x8   : > { %p67_p4 = scmp.eq.s32.totalorder %s65_s18, 0 }
   0xa   : > { %s1440_s20 = scalar_select %p67_p4, %s1371_s13, %s69_s19  }
   0xe   : > { %172 = sbr.rel (!%p78_p3) target bundleno = 50 (0x32), region = 24  ;;  %s174_s21 = sand.u32 (%p78_p3), 1, %s1371_s13  }
   0xf   : > { %s1196_s22 = sshll.u32 (%p78_p3), %s1379_s15, 4  ;;  %s1118_s23 = sshll.u32 (%p78_p3), %s174_s21, 9 }
  0x10   : > { %s1448_s26 = scalar_lea.vmem (%p78_p3), %s1685_s1, %s1196_s22  ;;  %s1453_s27 = scalar_lea.vmem (%p78_p3), [#allocation3], %s1118_s23 }
  0x11   : > { %v195_v0 = vld [vmem:[%s1448_s26] sm:$0xff] (%p78_p3)  ;;  %v197_v1 = vld [vmem:[%s1448_s26 + $0x8] sm:$0xff] (%p78_p3) }
  0x12   : > { %v199_v2 = vld [vmem:[%s1448_s26 + $0x20] sm:$0xff] (%p78_p3)  ;;  %196 = vst [vmem:[%s1453_s27] sm:$0xff] (%p78_p3), %v195_v0  ;;  %198 = vst [vmem:[%s1453_s27 + $0x8] sm:$0xff] (%p78_p3), %v197_v1  ;;  %v201_v3 = vld [vmem:[%s1448_s26 + $0x28] sm:$0xff] (%p78_p3) }
  0x13   : > { %200 = vst [vmem:[%s1453_s27 + $0x10] sm:$0xff] (%p78_p3), %v199_v2  ;;  %v203_v4 = vld [vmem:[%s1448_s26 + $0x40] sm:$0xff] (%p78_p3)  ;;  %v205_v5 = vld [vmem:[%s1448_s26 + $0x48] sm:$0xff] (%p78_p3)  ;;  %202 = vst [vmem:[%s1453_s27 + $0x18] sm:$0xff] (%p78_p3), %v201_v3 }
  0x14   : > { %204 = vst [vmem:[%s1453_s27 + $0x20] sm:$0xff] (%p78_p3), %v203_v4  ;;  %206 = vst [vmem:[%s1453_s27 + $0x28] sm:$0xff] (%p78_p3), %v205_v5  ;;  %v207_v6 = vld [vmem:[%s1448_s26 + $0x60] sm:$0xff] (%p78_p3)  ;;  %v209_v7 = vld [vmem:[%s1448_s26 + $0x68] sm:$0xff] (%p78_p3) }
  0x15   : > { %v211_v8 = vld [vmem:[%s1448_s26 + $0x80] sm:$0xff]  ;;  %208 = vst [vmem:[%s1453_s27 + $0x30] sm:$0xff] %v207_v6  ;;  %210 = vst [vmem:[%s1453_s27 + $0x38] sm:$0xff] %v209_v7  ;;  %v213_v9 = vld [vmem:[%s1448_s26 + $0x88] sm:$0xff] }
  0x16   : > { %212 = vst [vmem:[%s1453_s27 + $0x40] sm:$0xff] %v211_v8  ;;  %v215_v10 = vld [vmem:[%s1448_s26 + $0xa0] sm:$0xff]  ;;  %v217_v11 = vld [vmem:[%s1448_s26 + $0xa8] sm:$0xff]  ;;  %214 = vst [vmem:[%s1453_s27 + $0x48] sm:$0xff] %v213_v9 }
  0x17   : > { %216 = vst [vmem:[%s1453_s27 + $0x50] sm:$0xff] %v215_v10  ;;  %218 = vst [vmem:[%s1453_s27 + $0x58] sm:$0xff] %v217_v11  ;;  %v219_v12 = vld [vmem:[%s1448_s26 + $0xc0] sm:$0xff]  ;;  %v221_v13 = vld [vmem:[%s1448_s26 + $0xc8] sm:$0xff] }
  0x18   : > { %v223_v14 = vld [vmem:[%s1448_s26 + $0xe0] sm:$0xff]  ;;  %220 = vst [vmem:[%s1453_s27 + $0x60] sm:$0xff] %v219_v12  ;;  %222 = vst [vmem:[%s1453_s27 + $0x68] sm:$0xff] %v221_v13  ;;  %v225_v15 = vld [vmem:[%s1448_s26 + $0xe8] sm:$0xff] }
  0x19   : > { %224 = vst [vmem:[%s1453_s27 + $0x70] sm:$0xff] %v223_v14  ;;  %v227_v16 = vld [vmem:[%s1448_s26 + $0x100] sm:$0xff]  ;;  %v229_v17 = vld [vmem:[%s1448_s26 + $0x108] sm:$0xff]  ;;  %226 = vst [vmem:[%s1453_s27 + $0x78] sm:$0xff] %v225_v15 }
  0x1a   : > { %228 = vst [vmem:[%s1453_s27 + $0x80] sm:$0xff] %v227_v16  ;;  %230 = vst [vmem:[%s1453_s27 + $0x88] sm:$0xff] %v229_v17  ;;  %v231_v18 = vld [vmem:[%s1448_s26 + $0x120] sm:$0xff]  ;;  %v233_v19 = vld [vmem:[%s1448_s26 + $0x128] sm:$0xff] }
  0x1b   : > { %v235_v20 = vld [vmem:[%s1448_s26 + $0x140] sm:$0xff]  ;;  %232 = vst [vmem:[%s1453_s27 + $0x90] sm:$0xff] %v231_v18  ;;  %234 = vst [vmem:[%s1453_s27 + $0x98] sm:$0xff] %v233_v19  ;;  %v237_v21 = vld [vmem:[%s1448_s26 + $0x148] sm:$0xff] }
  0x1c   : > { %236 = vst [vmem:[%s1453_s27 + $0xa0] sm:$0xff] %v235_v20  ;;  %v239_v22 = vld [vmem:[%s1448_s26 + $0x160] sm:$0xff]  ;;  %v241_v23 = vld [vmem:[%s1448_s26 + $0x168] sm:$0xff]  ;;  %238 = vst [vmem:[%s1453_s27 + $0xa8] sm:$0xff] %v237_v21 }
  0x1d   : > { %240 = vst [vmem:[%s1453_s27 + $0xb0] sm:$0xff] %v239_v22  ;;  %242 = vst [vmem:[%s1453_s27 + $0xb8] sm:$0xff] %v241_v23  ;;  %v243_v24 = vld [vmem:[%s1448_s26 + $0x180] sm:$0xff]  ;;  %v245_v25 = vld [vmem:[%s1448_s26 + $0x188] sm:$0xff] }
  0x1e   : > { %v247_v26 = vld [vmem:[%s1448_s26 + $0x1a0] sm:$0xff]  ;;  %244 = vst [vmem:[%s1453_s27 + $0xc0] sm:$0xff] %v243_v24  ;;  %246 = vst [vmem:[%s1453_s27 + $0xc8] sm:$0xff] %v245_v25  ;;  %v249_v27 = vld [vmem:[%s1448_s26 + $0x1a8] sm:$0xff] }
  0x1f   : > { %248 = vst [vmem:[%s1453_s27 + $0xd0] sm:$0xff] %v247_v26  ;;  %v251_v28 = vld [vmem:[%s1448_s26 + $0x1c0] sm:$0xff]  ;;  %v253_v29 = vld [vmem:[%s1448_s26 + $0x1c8] sm:$0xff]  ;;  %250 = vst [vmem:[%s1453_s27 + $0xd8] sm:$0xff] %v249_v27 }
  0x20   : > { %252 = vst [vmem:[%s1453_s27 + $0xe0] sm:$0xff] %v251_v28  ;;  %254 = vst [vmem:[%s1453_s27 + $0xe8] sm:$0xff] %v253_v29  ;;  %v255_v30 = vld [vmem:[%s1448_s26 + $0x1e0] sm:$0xff]  ;;  %v257_v31 = vld [vmem:[%s1448_s26 + $0x1e8] sm:$0xff] }
  0x21   : > { %v259_v32 = vld [vmem:[%s1448_s26 + $0x200] sm:$0xff]  ;;  %256 = vst [vmem:[%s1453_s27 + $0xf0] sm:$0xff] %v255_v30  ;;  %258 = vst [vmem:[%s1453_s27 + $0xf8] sm:$0xff] %v257_v31  ;;  %v261_v33 = vld [vmem:[%s1448_s26 + $0x208] sm:$0xff] }
  0x22   : > { %260 = vst [vmem:[%s1453_s27 + $0x100] sm:$0xff] %v259_v32  ;;  %v263_v34 = vld [vmem:[%s1448_s26 + $0x220] sm:$0xff]  ;;  %v265_v35 = vld [vmem:[%s1448_s26 + $0x228] sm:$0xff]  ;;  %262 = vst [vmem:[%s1453_s27 + $0x108] sm:$0xff] %v261_v33 }
  0x23   : > { %264 = vst [vmem:[%s1453_s27 + $0x110] sm:$0xff] %v263_v34  ;;  %266 = vst [vmem:[%s1453_s27 + $0x118] sm:$0xff] %v265_v35  ;;  %v267_v36 = vld [vmem:[%s1448_s26 + $0x240] sm:$0xff]  ;;  %v269_v37 = vld [vmem:[%s1448_s26 + $0x248] sm:$0xff] }
  0x24   : > { %v271_v38 = vld [vmem:[%s1448_s26 + $0x260] sm:$0xff]  ;;  %268 = vst [vmem:[%s1453_s27 + $0x120] sm:$0xff] %v267_v36  ;;  %270 = vst [vmem:[%s1453_s27 + $0x128] sm:$0xff] %v269_v37  ;;  %v273_v39 = vld [vmem:[%s1448_s26 + $0x268] sm:$0xff] }
  0x25   : > { %272 = vst [vmem:[%s1453_s27 + $0x130] sm:$0xff] %v271_v38  ;;  %v275_v40 = vld [vmem:[%s1448_s26 + $0x280] sm:$0xff]  ;;  %v277_v41 = vld [vmem:[%s1448_s26 + $0x288] sm:$0xff]  ;;  %274 = vst [vmem:[%s1453_s27 + $0x138] sm:$0xff] %v273_v39 }
  0x26   : > { %276 = vst [vmem:[%s1453_s27 + $0x140] sm:$0xff] %v275_v40  ;;  %278 = vst [vmem:[%s1453_s27 + $0x148] sm:$0xff] %v277_v41  ;;  %v279_v42 = vld [vmem:[%s1448_s26 + $0x2a0] sm:$0xff]  ;;  %v281_v43 = vld [vmem:[%s1448_s26 + $0x2a8] sm:$0xff] }
  0x27   : > { %v283_v44 = vld [vmem:[%s1448_s26 + $0x2c0] sm:$0xff]  ;;  %280 = vst [vmem:[%s1453_s27 + $0x150] sm:$0xff] %v279_v42  ;;  %282 = vst [vmem:[%s1453_s27 + $0x158] sm:$0xff] %v281_v43  ;;  %v285_v45 = vld [vmem:[%s1448_s26 + $0x2c8] sm:$0xff] }
  0x28   : > { %284 = vst [vmem:[%s1453_s27 + $0x160] sm:$0xff] %v283_v44  ;;  %v287_v46 = vld [vmem:[%s1448_s26 + $0x2e0] sm:$0xff]  ;;  %v289_v47 = vld [vmem:[%s1448_s26 + $0x2e8] sm:$0xff]  ;;  %286 = vst [vmem:[%s1453_s27 + $0x168] sm:$0xff] %v285_v45 }
  0x29   : > { %288 = vst [vmem:[%s1453_s27 + $0x170] sm:$0xff] %v287_v46  ;;  %290 = vst [vmem:[%s1453_s27 + $0x178] sm:$0xff] %v289_v47  ;;  %v291_v48 = vld [vmem:[%s1448_s26 + $0x300] sm:$0xff]  ;;  %v293_v49 = vld [vmem:[%s1448_s26 + $0x308] sm:$0xff] }
  0x2a   : > { %v295_v50 = vld [vmem:[%s1448_s26 + $0x320] sm:$0xff]  ;;  %292 = vst [vmem:[%s1453_s27 + $0x180] sm:$0xff] %v291_v48  ;;  %294 = vst [vmem:[%s1453_s27 + $0x188] sm:$0xff] %v293_v49  ;;  %v297_v51 = vld [vmem:[%s1448_s26 + $0x328] sm:$0xff] }
  0x2b   : > { %296 = vst [vmem:[%s1453_s27 + $0x190] sm:$0xff] %v295_v50  ;;  %v299_v52 = vld [vmem:[%s1448_s26 + $0x340] sm:$0xff]  ;;  %v301_v53 = vld [vmem:[%s1448_s26 + $0x348] sm:$0xff]  ;;  %298 = vst [vmem:[%s1453_s27 + $0x198] sm:$0xff] %v297_v51 }
  0x2c   : > { %300 = vst [vmem:[%s1453_s27 + $0x1a0] sm:$0xff] %v299_v52  ;;  %302 = vst [vmem:[%s1453_s27 + $0x1a8] sm:$0xff] %v301_v53  ;;  %v303_v54 = vld [vmem:[%s1448_s26 + $0x360] sm:$0xff]  ;;  %v305_v55 = vld [vmem:[%s1448_s26 + $0x368] sm:$0xff] }
  0x2d   : > { %v307_v56 = vld [vmem:[%s1448_s26 + $0x380] sm:$0xff]  ;;  %304 = vst [vmem:[%s1453_s27 + $0x1b0] sm:$0xff] %v303_v54  ;;  %306 = vst [vmem:[%s1453_s27 + $0x1b8] sm:$0xff] %v305_v55  ;;  %v309_v57 = vld [vmem:[%s1448_s26 + $0x388] sm:$0xff] }
  0x2e   : > { %308 = vst [vmem:[%s1453_s27 + $0x1c0] sm:$0xff] %v307_v56  ;;  %v311_v58 = vld [vmem:[%s1448_s26 + $0x3a0] sm:$0xff]  ;;  %v313_v59 = vld [vmem:[%s1448_s26 + $0x3a8] sm:$0xff]  ;;  %310 = vst [vmem:[%s1453_s27 + $0x1c8] sm:$0xff] %v309_v57 }
  0x2f   : > { %312 = vst [vmem:[%s1453_s27 + $0x1d0] sm:$0xff] %v311_v58  ;;  %314 = vst [vmem:[%s1453_s27 + $0x1d8] sm:$0xff] %v313_v59  ;;  %v315_v60 = vld [vmem:[%s1448_s26 + $0x3c0] sm:$0xff]  ;;  %v317_v61 = vld [vmem:[%s1448_s26 + $0x3c8] sm:$0xff] }
  0x30   : > { %v319_v62 = vld [vmem:[%s1448_s26 + $0x3e0] sm:$0xff]  ;;  %316 = vst [vmem:[%s1453_s27 + $0x1e0] sm:$0xff] %v315_v60  ;;  %318 = vst [vmem:[%s1453_s27 + $0x1e8] sm:$0xff] %v317_v61  ;;  %v321_v63 = vld [vmem:[%s1448_s26 + $0x3e8] sm:$0xff] }
  0x31   : > { %320 = vst [vmem:[%s1453_s27 + $0x1f0] sm:$0xff] %v319_v62  ;;  %322 = vst [vmem:[%s1453_s27 + $0x1f8] sm:$0xff] %v321_v63 }
  0x32 PF: > { %p1121_p6 = scmp.ge.s32.totalorder %s1383_s16, 1  ;;  %p335_p7 = scmp.lt.s32.totalorder %s1383_s16, 3 }
  0x34   : > { %p336_p8 = pnand %p1121_p6, %p335_p7 }
  0x35   : > { %s342_s28 = sand.u32 (!%p336_p8), 1, %s1367_s12   ;;  %v1586_v0 = vld [vmem:[%s1684_s0] sm:$0xff] (!%p336_p8)  ;;  %s1123_s6 = sshll.u32 (!%p336_p8), %s1375_s14, 2 }
  0x36   : > { %339 = sbr.rel (%p336_p8) target bundleno = 366 (0x16e), region = 51  ;;  %s1122_s4 = sshll.u32 (!%p336_p8), %s342_s28, 9  ;;  %v1127_v1 = vcombine.high (!%p336_p8), %v1586_v0, %v1586_v0 }
  0x37   : > { %s1590_s5 = scalar_lea.vmem (!%p336_p8), [#allocation3], %s1122_s4  ;;  %p395_p9 = scmp.lt.s32.totalorder (!%p336_p8), %s1123_s6, 7 }
  0x38   : > { %v1239_v2 = vld [vmem:[%s1590_s5 + $0x4] ss:$16 sps:$4 sm:$0xff] (!%p336_p8)   ;;  %845 = vmatprep.mubr.bf16.mxu0 (!%p336_p8), %v1127_v1  ;;  %886 = vmatprep.mubr.bf16.mxu1 (!%p336_p8), %v1127_v1  ;;  %v1241_v3 = vld [vmem:[%s1590_s5 + $0xc] ss:$16 sps:$4 sm:$0xff] (!%p336_p8)   ;;  %v1243_v4 = vld [vmem:[%s1590_s5] ss:$16 sps:$4 sm:$0xff] (!%p336_p8)  }
  0x39   : > { %813 = vmatprep.subr.bf16.mxu0 (!%p336_p8), %v1239_v2  ;;  %v1244_v5 = vld [vmem:[%s1590_s5 + $0x8] ss:$16 sps:$4 sm:$0xff] (!%p336_p8)   ;;  %854 = vmatprep.subr.bf16.mxu1 (!%p336_p8), %v1241_v3  ;;  %v1245_v6 = vld [vmem:[%s1590_s5 + $0x24] ss:$16 sps:$4 sm:$0xff] (!%p336_p8)   ;;  %v1247_v7 = vld [vmem:[%s1590_s5 + $0x2c] ss:$16 sps:$4 sm:$0xff] (!%p336_p8)   ;;  %v1126_v3 = vcombine.low (!%p336_p8), %v1586_v0, %v1586_v0 }
  0x3a   : > { %814 = vmatpush1.bf16.msra.mxu0 (!%p336_p8), %v1243_v4  ;;  %855 = vmatpush1.bf16.msra.mxu1 (!%p336_p8), %v1244_v5  ;;  %v1249_v8 = vld [vmem:[%s1590_s5 + $0x20] ss:$16 sps:$4 sm:$0xff] (!%p336_p8)   ;;  %v1250_v9 = vld [vmem:[%s1590_s5 + $0x28] ss:$16 sps:$4 sm:$0xff] (!%p336_p8)   ;;  %v1251_v10 = vld [vmem:[%s1590_s5 + $0x44] ss:$16 sps:$4 sm:$0xff] (!%p336_p8)   ;;  %v912_v4 = vlaneseq (!%p336_p8) }
  0x3b   : > { %815 = vmatprep.subr.bf16.mxu0 (!%p336_p8), %v1245_v6  ;;  %856 = vmatprep.subr.bf16.mxu1 (!%p336_p8), %v1247_v7  ;;  %v1253_v11 = vld [vmem:[%s1590_s5 + $0x4c] ss:$16 sps:$4 sm:$0xff] (!%p336_p8)   ;;  %v1255_v12 = vld [vmem:[%s1590_s5 + $0x40] ss:$16 sps:$4 sm:$0xff] (!%p336_p8)   ;;  %v1256_v13 = vld [vmem:[%s1590_s5 + $0x48] ss:$16 sps:$4 sm:$0xff] (!%p336_p8)  }
  0x3c   : > { %v1257_v14 = vld [vmem:[%s1590_s5 + $0x64] ss:$16 sps:$4 sm:$0xff] (!%p336_p8)   ;;  %v1259_v15 = vld [vmem:[%s1590_s5 + $0x6c] ss:$16 sps:$4 sm:$0xff] (!%p336_p8)   ;;  %v1261_v16 = vld [vmem:[%s1590_s5 + $0x60] ss:$16 sps:$4 sm:$0xff] (!%p336_p8)  }
  0x3d   : > { %v1262_v17 = vld [vmem:[%s1590_s5 + $0x68] ss:$16 sps:$4 sm:$0xff]   ;;  %v1263_v18 = vld [vmem:[%s1590_s5 + $0x84] ss:$16 sps:$4 sm:$0xff]   ;;  %v1265_v19 = vld [vmem:[%s1590_s5 + $0x8c] ss:$16 sps:$4 sm:$0xff]  }
  0x3e   : > { %816 = vmatpush1.bf16.msra.mxu0 %v1249_v8  ;;  %857 = vmatpush1.bf16.msra.mxu1 %v1250_v9  ;;  %v1267_v20 = vld [vmem:[%s1590_s5 + $0x80] ss:$16 sps:$4 sm:$0xff]   ;;  %v1268_v21 = vld [vmem:[%s1590_s5 + $0x88] ss:$16 sps:$4 sm:$0xff]   ;;  %v1269_v22 = vld [vmem:[%s1590_s5 + $0xa4] ss:$16 sps:$4 sm:$0xff]  }
  0x3f   : > { %817 = vmatprep.subr.bf16.mxu0 %v1251_v10  ;;  %858 = vmatprep.subr.bf16.mxu1 %v1253_v11  ;;  %v1271_v23 = vld [vmem:[%s1590_s5 + $0xac] ss:$16 sps:$4 sm:$0xff]   ;;  %v1273_v24 = vld [vmem:[%s1590_s5 + $0xa0] ss:$16 sps:$4 sm:$0xff]   ;;  %v1274_v25 = vld [vmem:[%s1590_s5 + $0xa8] ss:$16 sps:$4 sm:$0xff]  }
  0x40   : > { %v1275_v26 = vld [vmem:[%s1590_s5 + $0xc4] ss:$16 sps:$4 sm:$0xff]   ;;  %v1277_v27 = vld [vmem:[%s1590_s5 + $0xcc] ss:$16 sps:$4 sm:$0xff]   ;;  %v1279_v28 = vld [vmem:[%s1590_s5 + $0xc0] ss:$16 sps:$4 sm:$0xff]  }
  0x41   : > { %v1280_v29 = vld [vmem:[%s1590_s5 + $0xc8] ss:$16 sps:$4 sm:$0xff]   ;;  %v1281_v30 = vld [vmem:[%s1590_s5 + $0xe4] ss:$16 sps:$4 sm:$0xff]   ;;  %v1283_v31 = vld [vmem:[%s1590_s5 + $0xec] ss:$16 sps:$4 sm:$0xff]  }
  0x42   : > { %818 = vmatpush1.bf16.msra.mxu0 %v1255_v12  ;;  %859 = vmatpush1.bf16.msra.mxu1 %v1256_v13  ;;  %v1285_v32 = vld [vmem:[%s1590_s5 + $0xe0] ss:$16 sps:$4 sm:$0xff]   ;;  %v1286_v33 = vld [vmem:[%s1590_s5 + $0xe8] ss:$16 sps:$4 sm:$0xff]   ;;  %v1287_v34 = vld [vmem:[%s1590_s5 + $0x104] ss:$16 sps:$4 sm:$0xff]  }
  0x43   : > { %819 = vmatprep.subr.bf16.mxu0 %v1257_v14  ;;  %860 = vmatprep.subr.bf16.mxu1 %v1259_v15  ;;  %v1289_v35 = vld [vmem:[%s1590_s5 + $0x10c] ss:$16 sps:$4 sm:$0xff]   ;;  %v1291_v36 = vld [vmem:[%s1590_s5 + $0x100] ss:$16 sps:$4 sm:$0xff]   ;;  %v1292_v37 = vld [vmem:[%s1590_s5 + $0x108] ss:$16 sps:$4 sm:$0xff]  }
  0x44   : > { %v1293_v38 = vld [vmem:[%s1590_s5 + $0x124] ss:$16 sps:$4 sm:$0xff]   ;;  %v1295_v39 = vld [vmem:[%s1590_s5 + $0x12c] ss:$16 sps:$4 sm:$0xff]   ;;  %v1297_v40 = vld [vmem:[%s1590_s5 + $0x120] ss:$16 sps:$4 sm:$0xff]  }
  0x45   : > { %v1298_v41 = vld [vmem:[%s1590_s5 + $0x128] ss:$16 sps:$4 sm:$0xff]   ;;  %v1299_v42 = vld [vmem:[%s1590_s5 + $0x144] ss:$16 sps:$4 sm:$0xff]   ;;  %v1301_v43 = vld [vmem:[%s1590_s5 + $0x14c] ss:$16 sps:$4 sm:$0xff]  }
  0x46   : > { %820 = vmatpush1.bf16.msra.mxu0 %v1261_v16  ;;  %861 = vmatpush1.bf16.msra.mxu1 %v1262_v17  ;;  %v1303_v44 = vld [vmem:[%s1590_s5 + $0x140] ss:$16 sps:$4 sm:$0xff]   ;;  %v1304_v45 = vld [vmem:[%s1590_s5 + $0x148] ss:$16 sps:$4 sm:$0xff]   ;;  %v1305_v46 = vld [vmem:[%s1590_s5 + $0x164] ss:$16 sps:$4 sm:$0xff]  }
  0x47   : > { %821 = vmatprep.subr.bf16.mxu0 %v1263_v18  ;;  %862 = vmatprep.subr.bf16.mxu1 %v1265_v19  ;;  %v1307_v47 = vld [vmem:[%s1590_s5 + $0x16c] ss:$16 sps:$4 sm:$0xff]   ;;  %v1309_v48 = vld [vmem:[%s1590_s5 + $0x160] ss:$16 sps:$4 sm:$0xff]   ;;  %v1310_v49 = vld [vmem:[%s1590_s5 + $0x168] ss:$16 sps:$4 sm:$0xff]  }
  0x48   : > { %v1311_v50 = vld [vmem:[%s1590_s5 + $0x184] ss:$16 sps:$4 sm:$0xff]   ;;  %v1313_v51 = vld [vmem:[%s1590_s5 + $0x18c] ss:$16 sps:$4 sm:$0xff]   ;;  %v1315_v52 = vld [vmem:[%s1590_s5 + $0x180] ss:$16 sps:$4 sm:$0xff]  }
  0x49   : > { %v1316_v53 = vld [vmem:[%s1590_s5 + $0x188] ss:$16 sps:$4 sm:$0xff]   ;;  %v1317_v54 = vld [vmem:[%s1590_s5 + $0x1a4] ss:$16 sps:$4 sm:$0xff]   ;;  %v1319_v55 = vld [vmem:[%s1590_s5 + $0x1ac] ss:$16 sps:$4 sm:$0xff]  }
  0x4a   : > { %822 = vmatpush1.bf16.msra.mxu0 %v1267_v20  ;;  %863 = vmatpush1.bf16.msra.mxu1 %v1268_v21  ;;  %v1321_v56 = vld [vmem:[%s1590_s5 + $0x1a0] ss:$16 sps:$4 sm:$0xff]   ;;  %v1322_v57 = vld [vmem:[%s1590_s5 + $0x1a8] ss:$16 sps:$4 sm:$0xff]   ;;  %v1323_v58 = vld [vmem:[%s1590_s5 + $0x1c4] ss:$16 sps:$4 sm:$0xff]  }
  0x4b   : > { %823 = vmatprep.subr.bf16.mxu0 %v1269_v22  ;;  %864 = vmatprep.subr.bf16.mxu1 %v1271_v23  ;;  %v1325_v59 = vld [vmem:[%s1590_s5 + $0x1cc] ss:$16 sps:$4 sm:$0xff]   ;;  %v1327_v60 = vld [vmem:[%s1590_s5 + $0x1c0] ss:$16 sps:$4 sm:$0xff]   ;;  %v1328_v61 = vld [vmem:[%s1590_s5 + $0x1c8] ss:$16 sps:$4 sm:$0xff]  }
  0x4c   : > { %v1329_v62 = vld [vmem:[%s1590_s5 + $0x1e4] ss:$16 sps:$4 sm:$0xff]   ;;  %v1331_v63 = vld [vmem:[%s1590_s5 + $0x1ec] ss:$16 sps:$4 sm:$0xff]   ;;  %v1333_v1 = vld [vmem:[%s1590_s5 + $0x1e0] ss:$16 sps:$4 sm:$0xff]  }
  0x4d   : > { %v1334_v2 = vld [vmem:[%s1590_s5 + $0x1e8] ss:$16 sps:$4 sm:$0xff]   ;;  %s1695_s6 = smov (!%p395_p9, %s1123_s6), 7  ;;  %v913_v5 = vshrl.u32 %v912_v4, 7 }
  0x4e   : > { %824 = vmatpush1.bf16.msra.mxu0 %v1273_v24  ;;  %865 = vmatpush1.bf16.msra.mxu1 %v1274_v25  ;;  %s397_s9 = scalar_lea.vmem %s1686_s2, %s1695_s6  ;;  %s1125_s10 = sshll.u32 %s1695_s6, 2 }
  0x4f   : > { %825 = vmatprep.subr.bf16.mxu0 %v1275_v26  ;;  %866 = vmatprep.subr.bf16.mxu1 %v1277_v27  ;;  %v914_v6 = vsub.s32 0, %v913_v5  ;;  %v922_v7 = vsub.s32 2, %v913_v5  ;;  %v910_v8 = vld [vmem:[%s397_s9] sm:$0xf]  ;;  %v918_v9 = vsub.s32 1, %v913_v5  ;;  %v926_v0 = vsub.s32 3, %v913_v5  ;;  %s407_s14 = scalar_lea.vmem %s1687_s3, %s1125_s10 }
  0x51   : > { %v915_v10 = vrot.slane %v910_v8, %v914_v6  ;;  %v923_v11 = vrot.slane %v910_v8, %v922_v7  ;;  %v919_v12 = vrot.slane %v910_v8, %v918_v9  ;;  %v927_v13 = vrot.slane %v910_v8, %v926_v0 }
  0x52   : > { %826 = vmatpush1.bf16.msra.mxu0 %v1279_v28  ;;  %867 = vmatpush1.bf16.msra.mxu1 %v1280_v29 }
  0x53   : > { %827 = vmatprep.subr.bf16.mxu0 %v1281_v30  ;;  %868 = vmatprep.subr.bf16.mxu1 %v1283_v31 }
  0x56   : > { %828 = vmatpush1.bf16.msra.mxu0 %v1285_v32  ;;  %869 = vmatpush1.bf16.msra.mxu1 %v1286_v33 }
  0x57   : > { %829 = vmatprep.subr.bf16.mxu0 %v1287_v34  ;;  %870 = vmatprep.subr.bf16.mxu1 %v1289_v35 }
  0x5a   : > { %830 = vmatpush1.bf16.msra.mxu0 %v1291_v36  ;;  %871 = vmatpush1.bf16.msra.mxu1 %v1292_v37 }
  0x5b   : > { %831 = vmatprep.subr.bf16.mxu0 %v1293_v38  ;;  %872 = vmatprep.subr.bf16.mxu1 %v1295_v39 }
  0x5e   : > { %832 = vmatpush1.bf16.msra.mxu0 %v1297_v40  ;;  %873 = vmatpush1.bf16.msra.mxu1 %v1298_v41 }
  0x5f   : > { %833 = vmatprep.subr.bf16.mxu0 %v1299_v42  ;;  %874 = vmatprep.subr.bf16.mxu1 %v1301_v43 }
  0x62   : > { %834 = vmatpush1.bf16.msra.mxu0 %v1303_v44  ;;  %875 = vmatpush1.bf16.msra.mxu1 %v1304_v45 }
  0x63   : > { %835 = vmatprep.subr.bf16.mxu0 %v1305_v46  ;;  %876 = vmatprep.subr.bf16.mxu1 %v1307_v47 }
  0x66   : > { %836 = vmatpush1.bf16.msra.mxu0 %v1309_v48  ;;  %877 = vmatpush1.bf16.msra.mxu1 %v1310_v49 }
  0x67   : > { %837 = vmatprep.subr.bf16.mxu0 %v1311_v50  ;;  %878 = vmatprep.subr.bf16.mxu1 %v1313_v51 }
  0x6a   : > { %838 = vmatpush1.bf16.msra.mxu0 %v1315_v52  ;;  %879 = vmatpush1.bf16.msra.mxu1 %v1316_v53 }
  0x6b   : > { %839 = vmatprep.subr.bf16.mxu0 %v1317_v54  ;;  %880 = vmatprep.subr.bf16.mxu1 %v1319_v55 }
  0x6e   : > { %840 = vmatpush1.bf16.msra.mxu0 %v1321_v56  ;;  %881 = vmatpush1.bf16.msra.mxu1 %v1322_v57 }
  0x6f   : > { %841 = vmatprep.subr.bf16.mxu0 %v1323_v58  ;;  %882 = vmatprep.subr.bf16.mxu1 %v1325_v59 }
  0x72   : > { %842 = vmatpush1.bf16.msra.mxu0 %v1327_v60  ;;  %883 = vmatpush1.bf16.msra.mxu1 %v1328_v61 }
  0x73   : > { %843 = vmatprep.subr.bf16.mxu0 %v1329_v62  ;;  %884 = vmatprep.subr.bf16.mxu1 %v1331_v63 }
  0x76   : > { %844 = vmatpush1.bf16.msra.mxu0 %v1333_v1  ;;  %885 = vmatpush1.bf16.msra.mxu1 %v1334_v2 }
  0x79   : > { %846 = vmatmul.mubr.bf16.vlgmr.msra.gmra.mrb[0].mxu0 %v1126_v3  ;;  %887 = vmatmul.mubr.bf16.vlgmr.msra.gmra.mrb[0].mxu1 %v1126_v3 }
 0x14c   : > { %v847_v14 = vpop.f32.mrb[0].mxu0  ;;  %v888_v15 = vpop.f32.mrb[0].mxu1 }
 0x14d   : > { %v932_v16 = vadd.f32 %v915_v10, %v847_v14  ;;  %v934_v17 = vadd.f32 %v923_v11, %v888_v15  ;;  %v849_v18 = vpop.f32.mrb[1].mxu0  ;;  %v890_v19 = vpop.f32.mrb[1].mxu1 }
 0x14e   : > { %v933_v20 = vadd.f32 %v919_v12, %v849_v18  ;;  %v935_v21 = vadd.f32 %v927_v13, %v890_v19  ;;  %v851_v22 = vpop.f32.mrb[2].mxu0  ;;  %v892_v23 = vpop.f32.mrb[2].mxu1 }
 0x14f   : > { %v940_v24 = vmul.f32 0.044715, %v932_v16  ;;  %v942_v25 = vmul.f32 0.044715, %v934_v17  ;;  %v852_v30 = vpop.f32.mrb[3].mxu0  ;;  %v893_v31 = vpop.f32.mrb[3].mxu1 }
 0x150   : > { %v941_v26 = vmul.f32 0.044715, %v933_v20  ;;  %v943_v27 = vmul.f32 0.044715, %v935_v21  ;;  %v936_v48 = vmul.f32 0.5, %v932_v16  ;;  %v938_v51 = vmul.f32 0.5, %v934_v17 }
 0x151   : > { %v944_v28 = vmul.f32 %v940_v24, %v932_v16  ;;  %v946_v29 = vmul.f32 %v942_v25, %v934_v17  ;;  %v937_v55 = vmul.f32 0.5, %v933_v20  ;;  %v939_v58 = vmul.f32 0.5, %v935_v21 }
 0x152   : > { %v945_v32 = vmul.f32 %v941_v26, %v933_v20  ;;  %v947_v33 = vmul.f32 %v943_v27, %v935_v21 }
 0x153   : > { %v948_v34 = vmul.f32 %v944_v28, %v932_v16  ;;  %v950_v35 = vmul.f32 %v946_v29, %v934_v17 }
 0x154   : > { %v949_v36 = vmul.f32 %v945_v32, %v933_v20  ;;  %v951_v37 = vmul.f32 %v947_v33, %v935_v21 }
 0x155   : > { %v952_v38 = vadd.f32 %v948_v34, %v932_v16  ;;  %v954_v39 = vadd.f32 %v950_v35, %v934_v17 }
 0x156   : > { %v953_v40 = vadd.f32 %v949_v36, %v933_v20  ;;  %v955_v41 = vadd.f32 %v951_v37, %v935_v21 }
 0x157   : > { %v956_v42 = vmul.f32 0.7978846, %v952_v38  ;;  %v958_v43 = vmul.f32 0.7978846, %v954_v39 }
 0x158   : > { %v957_v44 = vmul.f32 0.7978846, %v953_v40  ;;  %v959_v45 = vmul.f32 0.7978846, %v955_v41 }
 0x159   : > { %1337 = vtanh.f32 %v956_v42 }
 0x15a   : > { %1339 = vtanh.f32 %v958_v43 }
 0x15b   : > { %1341 = vtanh.f32 %v957_v44 }
 0x15c   : > { %1343 = vtanh.f32 %v959_v45 }
 0x163   : > { %v1338_v46 = vpop.eup %1337 }
 0x164   : > { %v1340_v47 = vpop.eup %1339  ;;  %v964_v49 = vadd.f32 1.0, %v1338_v46 }
 0x165   : > { %v1342_v50 = vpop.eup %1341  ;;  %v966_v52 = vadd.f32 1.0, %v1340_v47 }
 0x166   : > { %v1344_v53 = vpop.eup %1343  ;;  %v968_v54 = vmul.f32 %v964_v49, %v936_v48  ;;  %v965_v56 = vadd.f32 1.0, %v1342_v50 }
 0x167   : > { %v970_v57 = vmul.f32 %v966_v52, %v938_v51  ;;  %v967_v59 = vadd.f32 1.0, %v1344_v53 }
 0x168   : > { %v969_v60 = vmul.f32 %v965_v56, %v937_v55 }
 0x169   : > { %v971_v61 = vmul.f32 %v967_v59, %v939_v58 }
 0x16a   : > { %v1197_v62 = vpack.c.bf16 %v969_v60, %v968_v54 }
 0x16b   : > { %v1198_v63 = vpack.c.bf16 %v971_v61, %v970_v57 }
 0x16c   : > { %988 = vst [vmem:[%s407_s14] sm:$0xff] %v1197_v62 }
 0x16d   : > { %989 = vst [vmem:[%s407_s14 + $0x8] sm:$0xff] %v1198_v63 }
 0x16e PF: > { %s13_s16 = sadd.s32 1, %s1383_s16   ;;  %s1688_s12 = smov %s1371_s13 }
 0x16f   : > { %p10_p10 = scmp.ge.s32.totalorder %s13_s16, 4   ;;  %s1689_s13 = smov %s1440_s20 }
 0x170   : > { %s1690_s14 = smov %s1379_s15  ;;  %s1691_s15 = smov %s1693_s17 }
 0x171   :  { %12 = sbr.rel (!%p10_p10) target bundleno = 3 (0x3), region = 104 }

</bundles_post_ra>
